<compile_context>
chip_gen: v6e
topology: v6e:2x2x1
jax: 0.10.0
libtpu: 0.0.40
codegen_flags: <defaults>
</compile_context>

<pallas_src>
import functools

import jax
import jax.numpy as jnp
from jax.experimental import pallas as pl
from jax.experimental.pallas import tpu as pltpu

# (cin, cout, fuse 2x2 maxpool into epilogue) for vgg19.features[:9]
VGG19_BLOCK2_CFG = [(3, 64, False), (64, 64, True), (64, 128, False), (128, 128, False)]


@functools.lru_cache(maxsize=1)
def _vmem_limit_bytes():
    """Generation-aware VMEM limit (v7x has 64 MiB/TC, v5e/v6e have 128 MiB)."""
    cap = 64 * 1024 * 1024
    try:
        cap = int(pltpu.get_tpu_info().vmem_capacity_bytes)
    except Exception:
        pass
    return min(3 * cap // 4, 96 * 1024 * 1024)


def _pick_row_tile(h, row_tile, pool):
    rt = max(1, min(row_tile, h))
    while h % rt != 0 or (pool and rt % 2 != 0):
        rt -= 1
    return rt


def conv3x3_relu(x, w, b, *, pool=False, row_tile=8, cout_tile=128):
    """Fused 3x3 conv (stride 1, pad 1) + bias + ReLU (+ optional fused 2x2/2 maxpool).

    x: (N, H, W, Cin) float, cast to bf16 internally
    w: (3, 3, Cin, Cout)   (== PyTorch (Cout, Cin, 3, 3).transpose(2, 3, 1, 0))
    b: (Cout,)
    returns bf16 (N, H, W, Cout), or (N, H/2, W/2, Cout) when pool=True.
    """
    n, h, wd, cin = x.shape
    cout = w.shape[-1]
    ct = min(cout_tile, cout)
    assert cout % ct == 0
    if pool:
        assert h % 2 == 0 and wd % 2 == 0, "fused maxpool needs even H and W"
    rt = _pick_row_tile(h, row_tile, pool)
    nrow = h // rt
    nco = cout // ct

    xb = x.astype(jnp.bfloat16)
    wr = w.reshape(3, 3 * cin, cout).astype(jnp.bfloat16)   # (dy, dx*cin, cout)
    br = b.reshape(1, cout).astype(jnp.float32)

    # Halo side arrays: top[:, r] = x row (r*rt - 1), bot[:, r] = x row ((r+1)*rt);
    # boundary tiles receive zero rows, so no edge masking is needed in the kernel.
    zrow = jnp.zeros((n, 1, wd, cin), xb.dtype)
    if nrow > 1:
        top = jnp.concatenate([zrow, xb[:, rt - 1:h - 1:rt, :, :]], axis=1)
        bot = jnp.concatenate([xb[:, rt:h:rt, :, :], zrow], axis=1)
    else:
        top, bot = zrow, zrow

    ho, wo = (h // 2, wd // 2) if pool else (h, wd)
    rto = rt // 2 if pool else rt

    def kernel(x_ref, top_ref, bot_ref, w_ref, b_ref, o_ref, acc_ref):
        n_, rt_, w_, cin_ = x_ref.shape
        ct_ = o_ref.shape[-1]
        rows = n_ * rt_ * w_

        xt = x_ref[...]                                   # (n, rt, w, cin) bf16
        zcol = jnp.zeros((n_ * rt_, 1, cin_), xt.dtype)

        def patch(slab):                                  # slab rows already dy-shifted
            s = slab.reshape(n_ * rt_, w_, cin_)
            left = jnp.concatenate([zcol, s[:, :w_ - 1, :]], axis=1)    # dx = 0 (col-1)
            right = jnp.concatenate([s[:, 1:, :], zcol], axis=1)        # dx = 2 (col+1)
            return jnp.concatenate([left, s, right], axis=-1).reshape(rows, 3 * cin_)

        slab_dy0 = jnp.concatenate([top_ref[...], xt[:, :rt_ - 1]], axis=1)   # rows y-1
        slab_dy2 = jnp.concatenate([xt[:, 1:], bot_ref[...]], axis=1)         # rows y+1

        acc_ref[...] = jnp.dot(patch(slab_dy0), w_ref[0],
                               preferred_element_type=jnp.float32)
        acc_ref[...] += jnp.dot(patch(xt), w_ref[1],
                                preferred_element_type=jnp.float32)
        acc_ref[...] += jnp.dot(patch(slab_dy2), w_ref[2],
                                preferred_element_type=jnp.float32)

        if pool:
            # Fused 2x2/stride-2 maxpool: pool the raw accumulator first (exact, since
            # bias-add and ReLU are monotone), then bias + ReLU on 1/4 of the elements.
            # W-pairs are adjacent accumulator rows -> native sublane-strided loads.
            even = acc_ref[pl.ds(0, rows // 2, stride=2), :]
            odd = acc_ref[pl.ds(1, rows // 2, stride=2), :]
            wp = jnp.maximum(even, odd)                          # (n*rt*(w/2), ct)
            wp = wp.reshape(n_, rt_ // 2, 2, w_ // 2, ct_)
            hp = jnp.maximum(wp[:, :, 0], wp[:, :, 1])           # (n, rt/2, w/2, ct)
            y = jnp.maximum(hp + b_ref[...], 0.0)
            o_ref[...] = y.astype(o_ref.dtype)
        else:
            y = jnp.maximum(acc_ref[...] + b_ref[...], 0.0)
            o_ref[...] = y.reshape(n_, rt_, w_, ct_).astype(o_ref.dtype)

    flops = 2 * n * h * wd * 9 * cin * cout
    bytes_accessed = (
        (xb.size + top.size + bot.size) * 2          # bf16 activation + halos
        + wr.size * 2 * nco + br.size * 4            # weights re-fetched per cout tile
        + n * ho * wo * cout * 2                     # bf16 output
    )

    return pl.pallas_call(
        kernel,
        out_shape=jax.ShapeDtypeStruct((n, ho, wo, cout), jnp.bfloat16),
        grid=(nco, nrow),                            # rows innermost
        in_specs=[
            pl.BlockSpec((n, rt, wd, cin), lambda co, r: (0, r, 0, 0)),
            pl.BlockSpec((n, 1, wd, cin), lambda co, r: (0, r, 0, 0)),
            pl.BlockSpec((n, 1, wd, cin), lambda co, r: (0, r, 0, 0)),
            pl.BlockSpec((3, 3 * cin, ct), lambda co, r: (0, 0, co)),   # row-independent
            pl.BlockSpec((1, ct), lambda co, r: (0, co)),
        ],
        out_specs=pl.BlockSpec((n, rto, wo, ct), lambda co, r: (0, r, 0, co)),
        scratch_shapes=[pltpu.VMEM((n * rt * wd, ct), jnp.float32)],
        compiler_params=pltpu.CompilerParams(
            dimension_semantics=("parallel", "parallel"),
            vmem_limit_bytes=_vmem_limit_bytes()),
        cost_estimate=pl.CostEstimate(flops=flops, transcendentals=0,
                                      bytes_accessed=int(bytes_accessed)),
    )(xb, top, bot, wr, br)


def init_vgg19_block2_params(key):
    """Deterministic synthetic weights with the exact VGG19 features[:9] conv shapes."""
    # TODO(synk): the original module loads pretrained VGG19 weights; replaced by He init.
    #             Real torchvision weights would map via w_torch.transpose(2, 3, 1, 0).
    params = []
    for cin, cout, _ in VGG19_BLOCK2_CFG:
        key, wk = jax.random.split(key)
        std = (2.0 / (9 * cin)) ** 0.5
        w = std * jax.random.normal(wk, (3, 3, cin, cout), jnp.float32)
        b = jnp.zeros((cout,), jnp.float32)
        params.append((w, b))
    return params


def block2_forward(x_nchw, params):
    """VGG19 features[:9]: conv+relu, conv+relu, maxpool(2,2), conv+relu, conv+relu."""
    x = jnp.transpose(x_nchw, (0, 2, 3, 1)).astype(jnp.bfloat16)    # NCHW -> NHWC, bf16
    for (w, b), (_, _, pool) in zip(params, VGG19_BLOCK2_CFG):
        x = conv3x3_relu(x, w, b, pool=pool)
    return jnp.transpose(x, (0, 3, 1, 2)).astype(jnp.float32)       # NHWC -> NCHW


if __name__ == "__main__":
    key = jax.random.PRNGKey(0)
    pkey, xkey = jax.random.split(key)
    params = init_vgg19_block2_params(pkey)
    x = jax.random.normal(xkey, (2, 3, 32, 32), jnp.float32)        # NCHW like PyTorch
    y = jax.jit(block2_forward)(x, params)
    y = jax.block_until_ready(y)
    assert y.shape == (2, 128, 16, 16), y.shape                     # one 2x2 pool: 32 -> 16
    assert bool(jnp.all(jnp.isfinite(y)))
    print("KERNEL_OK")
</pallas_src>

<mosaic_0001>
module attributes {stable_mosaic.version = 11 : i64} {
  func.func @kernel(%arg0: i32, %arg1: i32, %arg2: memref<2x8x32x3xbf16, #tpu.memory_space<vmem>>, %arg3: memref<2x1x32x3xbf16, #tpu.memory_space<vmem>>, %arg4: memref<2x1x32x3xbf16, #tpu.memory_space<vmem>>, %arg5: memref<3x9x64xbf16, #tpu.memory_space<vmem>>, %arg6: memref<1x64xf32, #tpu.memory_space<vmem>>, %arg7: memref<2x8x32x64xbf16, #tpu.memory_space<vmem>>, %arg8: memref<512x64xf32, #tpu.memory_space<vmem>>) attributes {dimension_semantics = [#tpu.dimension_semantics<parallel>, #tpu.dimension_semantics<parallel>], iteration_bounds = array<i64: 1, 4>, scalar_prefetch = 0 : i64, scratch_operands = 1 : i64, tpu.core_type = #tpu.core_type<tc>, window_params = [{transform_indices = @transform_0, window_bounds = array<i64: 2, 8, 32, 3>}, {transform_indices = @transform_1, window_bounds = array<i64: 2, 1, 32, 3>}, {transform_indices = @transform_2, window_bounds = array<i64: 2, 1, 32, 3>}, {transform_indices = @transform_3, window_bounds = array<i64: 3, 9, 64>}, {transform_indices = @transform_4, window_bounds = array<i64: 1, 64>}, {transform_indices = @transform_5, window_bounds = array<i64: 2, 8, 32, 64>}]} {
    %c0 = arith.constant 0 : index
    %c0_0 = arith.constant 0 : index
    %c0_1 = arith.constant 0 : index
    %c0_2 = arith.constant 0 : index
    %0 = vector.load %arg2[%c0, %c0_0, %c0_1, %c0_2] : memref<2x8x32x3xbf16, #tpu.memory_space<vmem>>, vector<2x8x32x3xbf16>
    %cst = arith.constant 0.000000e+00 : bf16
    %1 = vector.broadcast %cst : bf16 to vector<16x1x3xbf16>
    %c0_3 = arith.constant 0 : index
    %c0_4 = arith.constant 0 : index
    %c0_5 = arith.constant 0 : index
    %c0_6 = arith.constant 0 : index
    %2 = vector.load %arg3[%c0_3, %c0_4, %c0_5, %c0_6] : memref<2x1x32x3xbf16, #tpu.memory_space<vmem>>, vector<2x1x32x3xbf16>
    %3 = vector.extract_strided_slice %0 {offsets = [0, 0, 0, 0], sizes = [2, 7, 32, 3], strides = [1, 1, 1, 1]} : vector<2x8x32x3xbf16> to vector<2x7x32x3xbf16>
    %4 = tpu.concatenate %2, %3 in 1 : vector<2x1x32x3xbf16>, vector<2x7x32x3xbf16> -> vector<2x8x32x3xbf16>
    %5 = vector.extract_strided_slice %0 {offsets = [0, 1, 0, 0], sizes = [2, 7, 32, 3], strides = [1, 1, 1, 1]} : vector<2x8x32x3xbf16> to vector<2x7x32x3xbf16>
    %c0_7 = arith.constant 0 : index
    %c0_8 = arith.constant 0 : index
    %c0_9 = arith.constant 0 : index
    %c0_10 = arith.constant 0 : index
    %6 = vector.load %arg4[%c0_7, %c0_8, %c0_9, %c0_10] : memref<2x1x32x3xbf16, #tpu.memory_space<vmem>>, vector<2x1x32x3xbf16>
    %7 = tpu.concatenate %5, %6 in 1 : vector<2x7x32x3xbf16>, vector<2x1x32x3xbf16> -> vector<2x8x32x3xbf16>
    %8 = vector.shape_cast %4 : vector<2x8x32x3xbf16> to vector<16x32x3xbf16>
    %9 = vector.extract_strided_slice %8 {offsets = [0, 0, 0], sizes = [16, 31, 3], strides = [1, 1, 1]} : vector<16x32x3xbf16> to vector<16x31x3xbf16>
    %10 = tpu.concatenate %1, %9 in 1 : vector<16x1x3xbf16>, vector<16x31x3xbf16> -> vector<16x32x3xbf16>
    %11 = vector.extract_strided_slice %8 {offsets = [0, 1, 0], sizes = [16, 31, 3], strides = [1, 1, 1]} : vector<16x32x3xbf16> to vector<16x31x3xbf16>
    %12 = tpu.concatenate %11, %1 in 1 : vector<16x31x3xbf16>, vector<16x1x3xbf16> -> vector<16x32x3xbf16>
    %13 = tpu.concatenate %10, %8, %12 in 2 : vector<16x32x3xbf16>, vector<16x32x3xbf16>, vector<16x32x3xbf16> -> vector<16x32x9xbf16>
    %14 = vector.shape_cast %13 : vector<16x32x9xbf16> to vector<512x9xbf16>
    %c0_11 = arith.constant 0 : index
    %c0_12 = arith.constant 0 : index
    %c0_13 = arith.constant 0 : index
    %15 = vector.load %arg5[%c0_11, %c0_12, %c0_13] : memref<3x9x64xbf16, #tpu.memory_space<vmem>>, vector<1x9x64xbf16>
    %16 = vector.shape_cast %15 : vector<1x9x64xbf16> to vector<9x64xbf16>
    %cst_14 = arith.constant dense<0.000000e+00> : vector<512x64xf32>
    %17 = tpu.matmul %14, %16, %cst_14 {dimension_numbers = #tpu.dot_dimension_numbers<[1], [0], [0], [1], [0, 0, 1, 1], [], []>} : vector<512x9xbf16>, vector<9x64xbf16>, vector<512x64xf32> -> vector<512x64xf32>
    %c0_15 = arith.constant 0 : index
    %c0_16 = arith.constant 0 : index
    %18 = vector.load %arg8[%c0_15, %c0_16] : memref<512x64xf32, #tpu.memory_space<vmem>>, vector<512x64xf32>
    tpu.vector_store %arg8[%c0_15, %c0_16], %17 {strides = array<i32>} : memref<512x64xf32, #tpu.memory_space<vmem>>, vector<512x64xf32>,
    %c0_17 = arith.constant 0 : index
    %c0_18 = arith.constant 0 : index
    %19 = vector.load %arg8[%c0_17, %c0_18] : memref<512x64xf32, #tpu.memory_space<vmem>>, vector<512x64xf32>
    %20 = vector.shape_cast %0 : vector<2x8x32x3xbf16> to vector<16x32x3xbf16>
    %21 = vector.extract_strided_slice %20 {offsets = [0, 0, 0], sizes = [16, 31, 3], strides = [1, 1, 1]} : vector<16x32x3xbf16> to vector<16x31x3xbf16>
    %22 = tpu.concatenate %1, %21 in 1 : vector<16x1x3xbf16>, vector<16x31x3xbf16> -> vector<16x32x3xbf16>
    %23 = vector.extract_strided_slice %20 {offsets = [0, 1, 0], sizes = [16, 31, 3], strides = [1, 1, 1]} : vector<16x32x3xbf16> to vector<16x31x3xbf16>
    %24 = tpu.concatenate %23, %1 in 1 : vector<16x31x3xbf16>, vector<16x1x3xbf16> -> vector<16x32x3xbf16>
    %25 = tpu.concatenate %22, %20, %24 in 2 : vector<16x32x3xbf16>, vector<16x32x3xbf16>, vector<16x32x3xbf16> -> vector<16x32x9xbf16>
    %26 = vector.shape_cast %25 : vector<16x32x9xbf16> to vector<512x9xbf16>
    %c1 = arith.constant 1 : index
    %c0_19 = arith.constant 0 : index
    %c0_20 = arith.constant 0 : index
    %27 = vector.load %arg5[%c1, %c0_19, %c0_20] : memref<3x9x64xbf16, #tpu.memory_space<vmem>>, vector<1x9x64xbf16>
    %28 = vector.shape_cast %27 : vector<1x9x64xbf16> to vector<9x64xbf16>
    %cst_21 = arith.constant dense<0.000000e+00> : vector<512x64xf32>
    %29 = tpu.matmul %26, %28, %cst_21 {dimension_numbers = #tpu.dot_dimension_numbers<[1], [0], [0], [1], [0, 0, 1, 1], [], []>} : vector<512x9xbf16>, vector<9x64xbf16>, vector<512x64xf32> -> vector<512x64xf32>
    %30 = arith.addf %19, %29 : vector<512x64xf32>
    %c0_22 = arith.constant 0 : index
    %c0_23 = arith.constant 0 : index
    %31 = vector.load %arg8[%c0_22, %c0_23] : memref<512x64xf32, #tpu.memory_space<vmem>>, vector<512x64xf32>
    tpu.vector_store %arg8[%c0_22, %c0_23], %30 {strides = array<i32>} : memref<512x64xf32, #tpu.memory_space<vmem>>, vector<512x64xf32>,
    %c0_24 = arith.constant 0 : index
    %c0_25 = arith.constant 0 : index
    %32 = vector.load %arg8[%c0_24, %c0_25] : memref<512x64xf32, #tpu.memory_space<vmem>>, vector<512x64xf32>
    %33 = vector.shape_cast %7 : vector<2x8x32x3xbf16> to vector<16x32x3xbf16>
    %34 = vector.extract_strided_slice %33 {offsets = [0, 0, 0], sizes = [16, 31, 3], strides = [1, 1, 1]} : vector<16x32x3xbf16> to vector<16x31x3xbf16>
    %35 = tpu.concatenate %1, %34 in 1 : vector<16x1x3xbf16>, vector<16x31x3xbf16> -> vector<16x32x3xbf16>
    %36 = vector.extract_strided_slice %33 {offsets = [0, 1, 0], sizes = [16, 31, 3], strides = [1, 1, 1]} : vector<16x32x3xbf16> to vector<16x31x3xbf16>
    %37 = tpu.concatenate %36, %1 in 1 : vector<16x31x3xbf16>, vector<16x1x3xbf16> -> vector<16x32x3xbf16>
    %38 = tpu.concatenate %35, %33, %37 in 2 : vector<16x32x3xbf16>, vector<16x32x3xbf16>, vector<16x32x3xbf16> -> vector<16x32x9xbf16>
    %39 = vector.shape_cast %38 : vector<16x32x9xbf16> to vector<512x9xbf16>
    %c2 = arith.constant 2 : index
    %c0_26 = arith.constant 0 : index
    %c0_27 = arith.constant 0 : index
    %40 = vector.load %arg5[%c2, %c0_26, %c0_27] : memref<3x9x64xbf16, #tpu.memory_space<vmem>>, vector<1x9x64xbf16>
    %41 = vector.shape_cast %40 : vector<1x9x64xbf16> to vector<9x64xbf16>
    %cst_28 = arith.constant dense<0.000000e+00> : vector<512x64xf32>
    %42 = tpu.matmul %39, %41, %cst_28 {dimension_numbers = #tpu.dot_dimension_numbers<[1], [0], [0], [1], [0, 0, 1, 1], [], []>} : vector<512x9xbf16>, vector<9x64xbf16>, vector<512x64xf32> -> vector<512x64xf32>
    %43 = arith.addf %32, %42 : vector<512x64xf32>
    %c0_29 = arith.constant 0 : index
    %c0_30 = arith.constant 0 : index
    %44 = vector.load %arg8[%c0_29, %c0_30] : memref<512x64xf32, #tpu.memory_space<vmem>>, vector<512x64xf32>
    tpu.vector_store %arg8[%c0_29, %c0_30], %43 {strides = array<i32>} : memref<512x64xf32, #tpu.memory_space<vmem>>, vector<512x64xf32>,
    %c0_31 = arith.constant 0 : index
    %c0_32 = arith.constant 0 : index
    %45 = vector.load %arg8[%c0_31, %c0_32] : memref<512x64xf32, #tpu.memory_space<vmem>>, vector<512x64xf32>
    %c0_33 = arith.constant 0 : index
    %c0_34 = arith.constant 0 : index
    %46 = vector.load %arg6[%c0_33, %c0_34] : memref<1x64xf32, #tpu.memory_space<vmem>>, vector<1x64xf32>
    %47 = vector.broadcast %46 : vector<1x64xf32> to vector<512x64xf32>
    %48 = arith.addf %45, %47 : vector<512x64xf32>
    %cst_35 = arith.constant 0.000000e+00 : f32
    %49 = vector.broadcast %cst_35 : f32 to vector<512x64xf32>
    %50 = arith.maximumf %48, %49 : vector<512x64xf32>
    %51 = vector.shape_cast %50 : vector<512x64xf32> to vector<2x8x32x64xf32>
    %52 = arith.truncf %51 : vector<2x8x32x64xf32> to vector<2x8x32x64xbf16>
    %c0_36 = arith.constant 0 : index
    %c0_37 = arith.constant 0 : index
    %c0_38 = arith.constant 0 : index
    %c0_39 = arith.constant 0 : index
    %53 = vector.load %arg7[%c0_36, %c0_37, %c0_38, %c0_39] : memref<2x8x32x64xbf16, #tpu.memory_space<vmem>>, vector<2x8x32x64xbf16>
    tpu.vector_store %arg7[%c0_36, %c0_37, %c0_38, %c0_39], %52 {strides = array<i32>} : memref<2x8x32x64xbf16, #tpu.memory_space<vmem>>, vector<2x8x32x64xbf16>,
    return
  }
  func.func @transform_0(%arg0: i32, %arg1: i32) -> (i32, i32, i32, i32) {
    %c0_i32 = arith.constant 0 : i32
    %c0_i32_0 = arith.constant 0 : i32
    %c0_i32_1 = arith.constant 0 : i32
    %c0_i32_2 = arith.constant 0 : i32
    return %c0_i32, %arg1, %c0_i32_0, %c0_i32_1 : i32, i32, i32, i32
  }
  func.func @transform_1(%arg0: i32, %arg1: i32) -> (i32, i32, i32, i32) {
    %c0_i32 = arith.constant 0 : i32
    %c0_i32_0 = arith.constant 0 : i32
    %c0_i32_1 = arith.constant 0 : i32
    %c0_i32_2 = arith.constant 0 : i32
    return %c0_i32, %arg1, %c0_i32_0, %c0_i32_1 : i32, i32, i32, i32
  }
  func.func @transform_2(%arg0: i32, %arg1: i32) -> (i32, i32, i32, i32) {
    %c0_i32 = arith.constant 0 : i32
    %c0_i32_0 = arith.constant 0 : i32
    %c0_i32_1 = arith.constant 0 : i32
    %c0_i32_2 = arith.constant 0 : i32
    return %c0_i32, %arg1, %c0_i32_0, %c0_i32_1 : i32, i32, i32, i32
  }
  func.func @transform_3(%arg0: i32, %arg1: i32) -> (i32, i32, i32) {
    %c0_i32 = arith.constant 0 : i32
    %c0_i32_0 = arith.constant 0 : i32
    %c0_i32_1 = arith.constant 0 : i32
    return %c0_i32, %c0_i32_0, %arg0 : i32, i32, i32
  }
  func.func @transform_4(%arg0: i32, %arg1: i32) -> (i32, i32) {
    %c0_i32 = arith.constant 0 : i32
    %c0_i32_0 = arith.constant 0 : i32
    return %c0_i32, %arg0 : i32, i32
  }
  func.func @transform_5(%arg0: i32, %arg1: i32) -> (i32, i32, i32, i32) {
    %c0_i32 = arith.constant 0 : i32
    %c0_i32_0 = arith.constant 0 : i32
    %c0_i32_1 = arith.constant 0 : i32
    return %c0_i32, %arg1, %c0_i32_0, %arg0 : i32, i32, i32, i32
  }
}

module attributes {stable_mosaic.version = 11 : i64} {
  func.func @kernel(%arg0: i32, %arg1: i32, %arg2: memref<2x8x32x64xbf16, #tpu.memory_space<vmem>>, %arg3: memref<2x1x32x64xbf16, #tpu.memory_space<vmem>>, %arg4: memref<2x1x32x64xbf16, #tpu.memory_space<vmem>>, %arg5: memref<3x192x64xbf16, #tpu.memory_space<vmem>>, %arg6: memref<1x64xf32, #tpu.memory_space<vmem>>, %arg7: memref<2x4x16x64xbf16, #tpu.memory_space<vmem>>, %arg8: memref<512x64xf32, #tpu.memory_space<vmem>>) attributes {dimension_semantics = [#tpu.dimension_semantics<parallel>, #tpu.dimension_semantics<parallel>], iteration_bounds = array<i64: 1, 4>, scalar_prefetch = 0 : i64, scratch_operands = 1 : i64, tpu.core_type = #tpu.core_type<tc>, window_params = [{transform_indices = @transform_0, window_bounds = array<i64: 2, 8, 32, 64>}, {transform_indices = @transform_1, window_bounds = array<i64: 2, 1, 32, 64>}, {transform_indices = @transform_2, window_bounds = array<i64: 2, 1, 32, 64>}, {transform_indices = @transform_3, window_bounds = array<i64: 3, 192, 64>}, {transform_indices = @transform_4, window_bounds = array<i64: 1, 64>}, {transform_indices = @transform_5, window_bounds = array<i64: 2, 4, 16, 64>}]} {
    %c0 = arith.constant 0 : index
    %c0_0 = arith.constant 0 : index
    %c0_1 = arith.constant 0 : index
    %c0_2 = arith.constant 0 : index
    %0 = vector.load %arg2[%c0, %c0_0, %c0_1, %c0_2] : memref<2x8x32x64xbf16, #tpu.memory_space<vmem>>, vector<2x8x32x64xbf16>
    %cst = arith.constant 0.000000e+00 : bf16
    %1 = vector.broadcast %cst : bf16 to vector<16x1x64xbf16>
    %c0_3 = arith.constant 0 : index
    %c0_4 = arith.constant 0 : index
    %c0_5 = arith.constant 0 : index
    %c0_6 = arith.constant 0 : index
    %2 = vector.load %arg3[%c0_3, %c0_4, %c0_5, %c0_6] : memref<2x1x32x64xbf16, #tpu.memory_space<vmem>>, vector<2x1x32x64xbf16>
    %3 = vector.extract_strided_slice %0 {offsets = [0, 0, 0, 0], sizes = [2, 7, 32, 64], strides = [1, 1, 1, 1]} : vector<2x8x32x64xbf16> to vector<2x7x32x64xbf16>
    %4 = tpu.concatenate %2, %3 in 1 : vector<2x1x32x64xbf16>, vector<2x7x32x64xbf16> -> vector<2x8x32x64xbf16>
    %5 = vector.extract_strided_slice %0 {offsets = [0, 1, 0, 0], sizes = [2, 7, 32, 64], strides = [1, 1, 1, 1]} : vector<2x8x32x64xbf16> to vector<2x7x32x64xbf16>
    %c0_7 = arith.constant 0 : index
    %c0_8 = arith.constant 0 : index
    %c0_9 = arith.constant 0 : index
    %c0_10 = arith.constant 0 : index
    %6 = vector.load %arg4[%c0_7, %c0_8, %c0_9, %c0_10] : memref<2x1x32x64xbf16, #tpu.memory_space<vmem>>, vector<2x1x32x64xbf16>
    %7 = tpu.concatenate %5, %6 in 1 : vector<2x7x32x64xbf16>, vector<2x1x32x64xbf16> -> vector<2x8x32x64xbf16>
    %8 = vector.shape_cast %4 : vector<2x8x32x64xbf16> to vector<16x32x64xbf16>
    %9 = vector.extract_strided_slice %8 {offsets = [0, 0, 0], sizes = [16, 31, 64], strides = [1, 1, 1]} : vector<16x32x64xbf16> to vector<16x31x64xbf16>
    %10 = tpu.concatenate %1, %9 in 1 : vector<16x1x64xbf16>, vector<16x31x64xbf16> -> vector<16x32x64xbf16>
    %11 = vector.extract_strided_slice %8 {offsets = [0, 1, 0], sizes = [16, 31, 64], strides = [1, 1, 1]} : vector<16x32x64xbf16> to vector<16x31x64xbf16>
    %12 = tpu.concatenate %11, %1 in 1 : vector<16x31x64xbf16>, vector<16x1x64xbf16> -> vector<16x32x64xbf16>
    %13 = tpu.concatenate %10, %8, %12 in 2 : vector<16x32x64xbf16>, vector<16x32x64xbf16>, vector<16x32x64xbf16> -> vector<16x32x192xbf16>
    %14 = vector.shape_cast %13 : vector<16x32x192xbf16> to vector<512x192xbf16>
    %c0_11 = arith.constant 0 : index
    %c0_12 = arith.constant 0 : index
    %c0_13 = arith.constant 0 : index
    %15 = vector.load %arg5[%c0_11, %c0_12, %c0_13] : memref<3x192x64xbf16, #tpu.memory_space<vmem>>, vector<1x192x64xbf16>
    %16 = vector.shape_cast %15 : vector<1x192x64xbf16> to vector<192x64xbf16>
    %cst_14 = arith.constant dense<0.000000e+00> : vector<512x64xf32>
    %17 = tpu.matmul %14, %16, %cst_14 {dimension_numbers = #tpu.dot_dimension_numbers<[1], [0], [0], [1], [0, 0, 1, 1], [], []>} : vector<512x192xbf16>, vector<192x64xbf16>, vector<512x64xf32> -> vector<512x64xf32>
    %c0_15 = arith.constant 0 : index
    %c0_16 = arith.constant 0 : index
    %18 = vector.load %arg8[%c0_15, %c0_16] : memref<512x64xf32, #tpu.memory_space<vmem>>, vector<512x64xf32>
    tpu.vector_store %arg8[%c0_15, %c0_16], %17 {strides = array<i32>} : memref<512x64xf32, #tpu.memory_space<vmem>>, vector<512x64xf32>,
    %c0_17 = arith.constant 0 : index
    %c0_18 = arith.constant 0 : index
    %19 = vector.load %arg8[%c0_17, %c0_18] : memref<512x64xf32, #tpu.memory_space<vmem>>, vector<512x64xf32>
    %20 = vector.shape_cast %0 : vector<2x8x32x64xbf16> to vector<16x32x64xbf16>
    %21 = vector.extract_strided_slice %20 {offsets = [0, 0, 0], sizes = [16, 31, 64], strides = [1, 1, 1]} : vector<16x32x64xbf16> to vector<16x31x64xbf16>
    %22 = tpu.concatenate %1, %21 in 1 : vector<16x1x64xbf16>, vector<16x31x64xbf16> -> vector<16x32x64xbf16>
    %23 = vector.extract_strided_slice %20 {offsets = [0, 1, 0], sizes = [16, 31, 64], strides = [1, 1, 1]} : vector<16x32x64xbf16> to vector<16x31x64xbf16>
    %24 = tpu.concatenate %23, %1 in 1 : vector<16x31x64xbf16>, vector<16x1x64xbf16> -> vector<16x32x64xbf16>
    %25 = tpu.concatenate %22, %20, %24 in 2 : vector<16x32x64xbf16>, vector<16x32x64xbf16>, vector<16x32x64xbf16> -> vector<16x32x192xbf16>
    %26 = vector.shape_cast %25 : vector<16x32x192xbf16> to vector<512x192xbf16>
    %c1 = arith.constant 1 : index
    %c0_19 = arith.constant 0 : index
    %c0_20 = arith.constant 0 : index
    %27 = vector.load %arg5[%c1, %c0_19, %c0_20] : memref<3x192x64xbf16, #tpu.memory_space<vmem>>, vector<1x192x64xbf16>
    %28 = vector.shape_cast %27 : vector<1x192x64xbf16> to vector<192x64xbf16>
    %cst_21 = arith.constant dense<0.000000e+00> : vector<512x64xf32>
    %29 = tpu.matmul %26, %28, %cst_21 {dimension_numbers = #tpu.dot_dimension_numbers<[1], [0], [0], [1], [0, 0, 1, 1], [], []>} : vector<512x192xbf16>, vector<192x64xbf16>, vector<512x64xf32> -> vector<512x64xf32>
    %30 = arith.addf %19, %29 : vector<512x64xf32>
    %c0_22 = arith.constant 0 : index
    %c0_23 = arith.constant 0 : index
    %31 = vector.load %arg8[%c0_22, %c0_23] : memref<512x64xf32, #tpu.memory_space<vmem>>, vector<512x64xf32>
    tpu.vector_store %arg8[%c0_22, %c0_23], %30 {strides = array<i32>} : memref<512x64xf32, #tpu.memory_space<vmem>>, vector<512x64xf32>,
    %c0_24 = arith.constant 0 : index
    %c0_25 = arith.constant 0 : index
    %32 = vector.load %arg8[%c0_24, %c0_25] : memref<512x64xf32, #tpu.memory_space<vmem>>, vector<512x64xf32>
    %33 = vector.shape_cast %7 : vector<2x8x32x64xbf16> to vector<16x32x64xbf16>
    %34 = vector.extract_strided_slice %33 {offsets = [0, 0, 0], sizes = [16, 31, 64], strides = [1, 1, 1]} : vector<16x32x64xbf16> to vector<16x31x64xbf16>
    %35 = tpu.concatenate %1, %34 in 1 : vector<16x1x64xbf16>, vector<16x31x64xbf16> -> vector<16x32x64xbf16>
    %36 = vector.extract_strided_slice %33 {offsets = [0, 1, 0], sizes = [16, 31, 64], strides = [1, 1, 1]} : vector<16x32x64xbf16> to vector<16x31x64xbf16>
    %37 = tpu.concatenate %36, %1 in 1 : vector<16x31x64xbf16>, vector<16x1x64xbf16> -> vector<16x32x64xbf16>
    %38 = tpu.concatenate %35, %33, %37 in 2 : vector<16x32x64xbf16>, vector<16x32x64xbf16>, vector<16x32x64xbf16> -> vector<16x32x192xbf16>
    %39 = vector.shape_cast %38 : vector<16x32x192xbf16> to vector<512x192xbf16>
    %c2 = arith.constant 2 : index
    %c0_26 = arith.constant 0 : index
    %c0_27 = arith.constant 0 : index
    %40 = vector.load %arg5[%c2, %c0_26, %c0_27] : memref<3x192x64xbf16, #tpu.memory_space<vmem>>, vector<1x192x64xbf16>
    %41 = vector.shape_cast %40 : vector<1x192x64xbf16> to vector<192x64xbf16>
    %cst_28 = arith.constant dense<0.000000e+00> : vector<512x64xf32>
    %42 = tpu.matmul %39, %41, %cst_28 {dimension_numbers = #tpu.dot_dimension_numbers<[1], [0], [0], [1], [0, 0, 1, 1], [], []>} : vector<512x192xbf16>, vector<192x64xbf16>, vector<512x64xf32> -> vector<512x64xf32>
    %43 = arith.addf %32, %42 : vector<512x64xf32>
    %c0_29 = arith.constant 0 : index
    %c0_30 = arith.constant 0 : index
    %44 = vector.load %arg8[%c0_29, %c0_30] : memref<512x64xf32, #tpu.memory_space<vmem>>, vector<512x64xf32>
    tpu.vector_store %arg8[%c0_29, %c0_30], %43 {strides = array<i32>} : memref<512x64xf32, #tpu.memory_space<vmem>>, vector<512x64xf32>,
    %c0_31 = arith.constant 0 : index
    %c0_32 = arith.constant 0 : index
    %45 = tpu.strided_load %arg8[%c0_31, %c0_32] {strides = array<i32: 2, 1>} : memref<512x64xf32, #tpu.memory_space<vmem>>, vector<256x64xf32>
    %c1_33 = arith.constant 1 : index
    %c0_34 = arith.constant 0 : index
    %46 = tpu.strided_load %arg8[%c1_33, %c0_34] {strides = array<i32: 2, 1>} : memref<512x64xf32, #tpu.memory_space<vmem>>, vector<256x64xf32>
    %47 = arith.maximumf %45, %46 : vector<256x64xf32>
    %48 = vector.shape_cast %47 : vector<256x64xf32> to vector<2x4x2x16x64xf32>
    %49 = vector.extract_strided_slice %48 {offsets = [0, 0, 0, 0, 0], sizes = [2, 4, 1, 16, 64], strides = [1, 1, 1, 1, 1]} : vector<2x4x2x16x64xf32> to vector<2x4x1x16x64xf32>
    %50 = vector.shape_cast %49 : vector<2x4x1x16x64xf32> to vector<2x4x16x64xf32>
    %51 = vector.extract_strided_slice %48 {offsets = [0, 0, 1, 0, 0], sizes = [2, 4, 1, 16, 64], strides = [1, 1, 1, 1, 1]} : vector<2x4x2x16x64xf32> to vector<2x4x1x16x64xf32>
    %52 = vector.shape_cast %51 : vector<2x4x1x16x64xf32> to vector<2x4x16x64xf32>
    %53 = arith.maximumf %50, %52 : vector<2x4x16x64xf32>
    %c0_35 = arith.constant 0 : index
    %c0_36 = arith.constant 0 : index
    %54 = vector.load %arg6[%c0_35, %c0_36] : memref<1x64xf32, #tpu.memory_space<vmem>>, vector<1x64xf32>
    %55 = vector.shape_cast %54 : vector<1x64xf32> to vector<1x1x1x64xf32>
    %56 = vector.broadcast %55 : vector<1x1x1x64xf32> to vector<2x4x16x64xf32>
    %57 = arith.addf %53, %56 : vector<2x4x16x64xf32>
    %cst_37 = arith.constant 0.000000e+00 : f32
    %58 = vector.broadcast %cst_37 : f32 to vector<2x4x16x64xf32>
    %59 = arith.maximumf %57, %58 : vector<2x4x16x64xf32>
    %60 = arith.truncf %59 : vector<2x4x16x64xf32> to vector<2x4x16x64xbf16>
    %c0_38 = arith.constant 0 : index
    %c0_39 = arith.constant 0 : index
    %c0_40 = arith.constant 0 : index
    %c0_41 = arith.constant 0 : index
    %61 = vector.load %arg7[%c0_38, %c0_39, %c0_40, %c0_41] : memref<2x4x16x64xbf16, #tpu.memory_space<vmem>>, vector<2x4x16x64xbf16>
    tpu.vector_store %arg7[%c0_38, %c0_39, %c0_40, %c0_41], %60 {strides = array<i32>} : memref<2x4x16x64xbf16, #tpu.memory_space<vmem>>, vector<2x4x16x64xbf16>,
    return
  }
  func.func @transform_0(%arg0: i32, %arg1: i32) -> (i32, i32, i32, i32) {
    %c0_i32 = arith.constant 0 : i32
    %c0_i32_0 = arith.constant 0 : i32
    %c0_i32_1 = arith.constant 0 : i32
    %c0_i32_2 = arith.constant 0 : i32
    return %c0_i32, %arg1, %c0_i32_0, %c0_i32_1 : i32, i32, i32, i32
  }
  func.func @transform_1(%arg0: i32, %arg1: i32) -> (i32, i32, i32, i32) {
    %c0_i32 = arith.constant 0 : i32
    %c0_i32_0 = arith.constant 0 : i32
    %c0_i32_1 = arith.constant 0 : i32
    %c0_i32_2 = arith.constant 0 : i32
    return %c0_i32, %arg1, %c0_i32_0, %c0_i32_1 : i32, i32, i32, i32
  }
  func.func @transform_2(%arg0: i32, %arg1: i32) -> (i32, i32, i32, i32) {
    %c0_i32 = arith.constant 0 : i32
    %c0_i32_0 = arith.constant 0 : i32
    %c0_i32_1 = arith.constant 0 : i32
    %c0_i32_2 = arith.constant 0 : i32
    return %c0_i32, %arg1, %c0_i32_0, %c0_i32_1 : i32, i32, i32, i32
  }
  func.func @transform_3(%arg0: i32, %arg1: i32) -> (i32, i32, i32) {
    %c0_i32 = arith.constant 0 : i32
    %c0_i32_0 = arith.constant 0 : i32
    %c0_i32_1 = arith.constant 0 : i32
    return %c0_i32, %c0_i32_0, %arg0 : i32, i32, i32
  }
  func.func @transform_4(%arg0: i32, %arg1: i32) -> (i32, i32) {
    %c0_i32 = arith.constant 0 : i32
    %c0_i32_0 = arith.constant 0 : i32
    return %c0_i32, %arg0 : i32, i32
  }
  func.func @transform_5(%arg0: i32, %arg1: i32) -> (i32, i32, i32, i32) {
    %c0_i32 = arith.constant 0 : i32
    %c0_i32_0 = arith.constant 0 : i32
    %c0_i32_1 = arith.constant 0 : i32
    return %c0_i32, %arg1, %c0_i32_0, %arg0 : i32, i32, i32, i32
  }
}

module attributes {stable_mosaic.version = 11 : i64} {
  func.func @kernel(%arg0: i32, %arg1: i32, %arg2: memref<2x8x16x64xbf16, #tpu.memory_space<vmem>>, %arg3: memref<2x1x16x64xbf16, #tpu.memory_space<vmem>>, %arg4: memref<2x1x16x64xbf16, #tpu.memory_space<vmem>>, %arg5: memref<3x192x128xbf16, #tpu.memory_space<vmem>>, %arg6: memref<1x128xf32, #tpu.memory_space<vmem>>, %arg7: memref<2x8x16x128xbf16, #tpu.memory_space<vmem>>, %arg8: memref<256x128xf32, #tpu.memory_space<vmem>>) attributes {dimension_semantics = [#tpu.dimension_semantics<parallel>, #tpu.dimension_semantics<parallel>], iteration_bounds = array<i64: 1, 2>, scalar_prefetch = 0 : i64, scratch_operands = 1 : i64, tpu.core_type = #tpu.core_type<tc>, window_params = [{transform_indices = @transform_0, window_bounds = array<i64: 2, 8, 16, 64>}, {transform_indices = @transform_1, window_bounds = array<i64: 2, 1, 16, 64>}, {transform_indices = @transform_2, window_bounds = array<i64: 2, 1, 16, 64>}, {transform_indices = @transform_3, window_bounds = array<i64: 3, 192, 128>}, {transform_indices = @transform_4, window_bounds = array<i64: 1, 128>}, {transform_indices = @transform_5, window_bounds = array<i64: 2, 8, 16, 128>}]} {
    %c0 = arith.constant 0 : index
    %c0_0 = arith.constant 0 : index
    %c0_1 = arith.constant 0 : index
    %c0_2 = arith.constant 0 : index
    %0 = vector.load %arg2[%c0, %c0_0, %c0_1, %c0_2] : memref<2x8x16x64xbf16, #tpu.memory_space<vmem>>, vector<2x8x16x64xbf16>
    %cst = arith.constant 0.000000e+00 : bf16
    %1 = vector.broadcast %cst : bf16 to vector<16x1x64xbf16>
    %c0_3 = arith.constant 0 : index
    %c0_4 = arith.constant 0 : index
    %c0_5 = arith.constant 0 : index
    %c0_6 = arith.constant 0 : index
    %2 = vector.load %arg3[%c0_3, %c0_4, %c0_5, %c0_6] : memref<2x1x16x64xbf16, #tpu.memory_space<vmem>>, vector<2x1x16x64xbf16>
    %3 = vector.extract_strided_slice %0 {offsets = [0, 0, 0, 0], sizes = [2, 7, 16, 64], strides = [1, 1, 1, 1]} : vector<2x8x16x64xbf16> to vector<2x7x16x64xbf16>
    %4 = tpu.concatenate %2, %3 in 1 : vector<2x1x16x64xbf16>, vector<2x7x16x64xbf16> -> vector<2x8x16x64xbf16>
    %5 = vector.extract_strided_slice %0 {offsets = [0, 1, 0, 0], sizes = [2, 7, 16, 64], strides = [1, 1, 1, 1]} : vector<2x8x16x64xbf16> to vector<2x7x16x64xbf16>
    %c0_7 = arith.constant 0 : index
    %c0_8 = arith.constant 0 : index
    %c0_9 = arith.constant 0 : index
    %c0_10 = arith.constant 0 : index
    %6 = vector.load %arg4[%c0_7, %c0_8, %c0_9, %c0_10] : memref<2x1x16x64xbf16, #tpu.memory_space<vmem>>, vector<2x1x16x64xbf16>
    %7 = tpu.concatenate %5, %6 in 1 : vector<2x7x16x64xbf16>, vector<2x1x16x64xbf16> -> vector<2x8x16x64xbf16>
    %8 = vector.shape_cast %4 : vector<2x8x16x64xbf16> to vector<16x16x64xbf16>
    %9 = vector.extract_strided_slice %8 {offsets = [0, 0, 0], sizes = [16, 15, 64], strides = [1, 1, 1]} : vector<16x16x64xbf16> to vector<16x15x64xbf16>
    %10 = tpu.concatenate %1, %9 in 1 : vector<16x1x64xbf16>, vector<16x15x64xbf16> -> vector<16x16x64xbf16>
    %11 = vector.extract_strided_slice %8 {offsets = [0, 1, 0], sizes = [16, 15, 64], strides = [1, 1, 1]} : vector<16x16x64xbf16> to vector<16x15x64xbf16>
    %12 = tpu.concatenate %11, %1 in 1 : vector<16x15x64xbf16>, vector<16x1x64xbf16> -> vector<16x16x64xbf16>
    %13 = tpu.concatenate %10, %8, %12 in 2 : vector<16x16x64xbf16>, vector<16x16x64xbf16>, vector<16x16x64xbf16> -> vector<16x16x192xbf16>
    %14 = vector.shape_cast %13 : vector<16x16x192xbf16> to vector<256x192xbf16>
    %c0_11 = arith.constant 0 : index
    %c0_12 = arith.constant 0 : index
    %c0_13 = arith.constant 0 : index
    %15 = vector.load %arg5[%c0_11, %c0_12, %c0_13] : memref<3x192x128xbf16, #tpu.memory_space<vmem>>, vector<1x192x128xbf16>
    %16 = vector.shape_cast %15 : vector<1x192x128xbf16> to vector<192x128xbf16>
    %cst_14 = arith.constant dense<0.000000e+00> : vector<256x128xf32>
    %17 = tpu.matmul %14, %16, %cst_14 {dimension_numbers = #tpu.dot_dimension_numbers<[1], [0], [0], [1], [0, 0, 1, 1], [], []>} : vector<256x192xbf16>, vector<192x128xbf16>, vector<256x128xf32> -> vector<256x128xf32>
    %c0_15 = arith.constant 0 : index
    %c0_16 = arith.constant 0 : index
    %18 = vector.load %arg8[%c0_15, %c0_16] : memref<256x128xf32, #tpu.memory_space<vmem>>, vector<256x128xf32>
    tpu.vector_store %arg8[%c0_15, %c0_16], %17 {strides = array<i32>} : memref<256x128xf32, #tpu.memory_space<vmem>>, vector<256x128xf32>,
    %c0_17 = arith.constant 0 : index
    %c0_18 = arith.constant 0 : index
    %19 = vector.load %arg8[%c0_17, %c0_18] : memref<256x128xf32, #tpu.memory_space<vmem>>, vector<256x128xf32>
    %20 = vector.shape_cast %0 : vector<2x8x16x64xbf16> to vector<16x16x64xbf16>
    %21 = vector.extract_strided_slice %20 {offsets = [0, 0, 0], sizes = [16, 15, 64], strides = [1, 1, 1]} : vector<16x16x64xbf16> to vector<16x15x64xbf16>
    %22 = tpu.concatenate %1, %21 in 1 : vector<16x1x64xbf16>, vector<16x15x64xbf16> -> vector<16x16x64xbf16>
    %23 = vector.extract_strided_slice %20 {offsets = [0, 1, 0], sizes = [16, 15, 64], strides = [1, 1, 1]} : vector<16x16x64xbf16> to vector<16x15x64xbf16>
    %24 = tpu.concatenate %23, %1 in 1 : vector<16x15x64xbf16>, vector<16x1x64xbf16> -> vector<16x16x64xbf16>
    %25 = tpu.concatenate %22, %20, %24 in 2 : vector<16x16x64xbf16>, vector<16x16x64xbf16>, vector<16x16x64xbf16> -> vector<16x16x192xbf16>
    %26 = vector.shape_cast %25 : vector<16x16x192xbf16> to vector<256x192xbf16>
    %c1 = arith.constant 1 : index
    %c0_19 = arith.constant 0 : index
    %c0_20 = arith.constant 0 : index
    %27 = vector.load %arg5[%c1, %c0_19, %c0_20] : memref<3x192x128xbf16, #tpu.memory_space<vmem>>, vector<1x192x128xbf16>
    %28 = vector.shape_cast %27 : vector<1x192x128xbf16> to vector<192x128xbf16>
    %cst_21 = arith.constant dense<0.000000e+00> : vector<256x128xf32>
    %29 = tpu.matmul %26, %28, %cst_21 {dimension_numbers = #tpu.dot_dimension_numbers<[1], [0], [0], [1], [0, 0, 1, 1], [], []>} : vector<256x192xbf16>, vector<192x128xbf16>, vector<256x128xf32> -> vector<256x128xf32>
    %30 = arith.addf %19, %29 : vector<256x128xf32>
    %c0_22 = arith.constant 0 : index
    %c0_23 = arith.constant 0 : index
    %31 = vector.load %arg8[%c0_22, %c0_23] : memref<256x128xf32, #tpu.memory_space<vmem>>, vector<256x128xf32>
    tpu.vector_store %arg8[%c0_22, %c0_23], %30 {strides = array<i32>} : memref<256x128xf32, #tpu.memory_space<vmem>>, vector<256x128xf32>,
    %c0_24 = arith.constant 0 : index
    %c0_25 = arith.constant 0 : index
    %32 = vector.load %arg8[%c0_24, %c0_25] : memref<256x128xf32, #tpu.memory_space<vmem>>, vector<256x128xf32>
    %33 = vector.shape_cast %7 : vector<2x8x16x64xbf16> to vector<16x16x64xbf16>
    %34 = vector.extract_strided_slice %33 {offsets = [0, 0, 0], sizes = [16, 15, 64], strides = [1, 1, 1]} : vector<16x16x64xbf16> to vector<16x15x64xbf16>
    %35 = tpu.concatenate %1, %34 in 1 : vector<16x1x64xbf16>, vector<16x15x64xbf16> -> vector<16x16x64xbf16>
    %36 = vector.extract_strided_slice %33 {offsets = [0, 1, 0], sizes = [16, 15, 64], strides = [1, 1, 1]} : vector<16x16x64xbf16> to vector<16x15x64xbf16>
    %37 = tpu.concatenate %36, %1 in 1 : vector<16x15x64xbf16>, vector<16x1x64xbf16> -> vector<16x16x64xbf16>
    %38 = tpu.concatenate %35, %33, %37 in 2 : vector<16x16x64xbf16>, vector<16x16x64xbf16>, vector<16x16x64xbf16> -> vector<16x16x192xbf16>
    %39 = vector.shape_cast %38 : vector<16x16x192xbf16> to vector<256x192xbf16>
    %c2 = arith.constant 2 : index
    %c0_26 = arith.constant 0 : index
    %c0_27 = arith.constant 0 : index
    %40 = vector.load %arg5[%c2, %c0_26, %c0_27] : memref<3x192x128xbf16, #tpu.memory_space<vmem>>, vector<1x192x128xbf16>
    %41 = vector.shape_cast %40 : vector<1x192x128xbf16> to vector<192x128xbf16>
    %cst_28 = arith.constant dense<0.000000e+00> : vector<256x128xf32>
    %42 = tpu.matmul %39, %41, %cst_28 {dimension_numbers = #tpu.dot_dimension_numbers<[1], [0], [0], [1], [0, 0, 1, 1], [], []>} : vector<256x192xbf16>, vector<192x128xbf16>, vector<256x128xf32> -> vector<256x128xf32>
    %43 = arith.addf %32, %42 : vector<256x128xf32>
    %c0_29 = arith.constant 0 : index
    %c0_30 = arith.constant 0 : index
    %44 = vector.load %arg8[%c0_29, %c0_30] : memref<256x128xf32, #tpu.memory_space<vmem>>, vector<256x128xf32>
    tpu.vector_store %arg8[%c0_29, %c0_30], %43 {strides = array<i32>} : memref<256x128xf32, #tpu.memory_space<vmem>>, vector<256x128xf32>,
    %c0_31 = arith.constant 0 : index
    %c0_32 = arith.constant 0 : index
    %45 = vector.load %arg8[%c0_31, %c0_32] : memref<256x128xf32, #tpu.memory_space<vmem>>, vector<256x128xf32>
    %c0_33 = arith.constant 0 : index
    %c0_34 = arith.constant 0 : index
    %46 = vector.load %arg6[%c0_33, %c0_34] : memref<1x128xf32, #tpu.memory_space<vmem>>, vector<1x128xf32>
    %47 = vector.broadcast %46 : vector<1x128xf32> to vector<256x128xf32>
    %48 = arith.addf %45, %47 : vector<256x128xf32>
    %cst_35 = arith.constant 0.000000e+00 : f32
    %49 = vector.broadcast %cst_35 : f32 to vector<256x128xf32>
    %50 = arith.maximumf %48, %49 : vector<256x128xf32>
    %51 = vector.shape_cast %50 : vector<256x128xf32> to vector<2x8x16x128xf32>
    %52 = arith.truncf %51 : vector<2x8x16x128xf32> to vector<2x8x16x128xbf16>
    %c0_36 = arith.constant 0 : index
    %c0_37 = arith.constant 0 : index
    %c0_38 = arith.constant 0 : index
    %c0_39 = arith.constant 0 : index
    %53 = vector.load %arg7[%c0_36, %c0_37, %c0_38, %c0_39] : memref<2x8x16x128xbf16, #tpu.memory_space<vmem>>, vector<2x8x16x128xbf16>
    tpu.vector_store %arg7[%c0_36, %c0_37, %c0_38, %c0_39], %52 {strides = array<i32>} : memref<2x8x16x128xbf16, #tpu.memory_space<vmem>>, vector<2x8x16x128xbf16>,
    return
  }
  func.func @transform_0(%arg0: i32, %arg1: i32) -> (i32, i32, i32, i32) {
    %c0_i32 = arith.constant 0 : i32
    %c0_i32_0 = arith.constant 0 : i32
    %c0_i32_1 = arith.constant 0 : i32
    %c0_i32_2 = arith.constant 0 : i32
    return %c0_i32, %arg1, %c0_i32_0, %c0_i32_1 : i32, i32, i32, i32
  }
  func.func @transform_1(%arg0: i32, %arg1: i32) -> (i32, i32, i32, i32) {
    %c0_i32 = arith.constant 0 : i32
    %c0_i32_0 = arith.constant 0 : i32
    %c0_i32_1 = arith.constant 0 : i32
    %c0_i32_2 = arith.constant 0 : i32
    return %c0_i32, %arg1, %c0_i32_0, %c0_i32_1 : i32, i32, i32, i32
  }
  func.func @transform_2(%arg0: i32, %arg1: i32) -> (i32, i32, i32, i32) {
    %c0_i32 = arith.constant 0 : i32
    %c0_i32_0 = arith.constant 0 : i32
    %c0_i32_1 = arith.constant 0 : i32
    %c0_i32_2 = arith.constant 0 : i32
    return %c0_i32, %arg1, %c0_i32_0, %c0_i32_1 : i32, i32, i32, i32
  }
  func.func @transform_3(%arg0: i32, %arg1: i32) -> (i32, i32, i32) {
    %c0_i32 = arith.constant 0 : i32
    %c0_i32_0 = arith.constant 0 : i32
    %c0_i32_1 = arith.constant 0 : i32
    return %c0_i32, %c0_i32_0, %arg0 : i32, i32, i32
  }
  func.func @transform_4(%arg0: i32, %arg1: i32) -> (i32, i32) {
    %c0_i32 = arith.constant 0 : i32
    %c0_i32_0 = arith.constant 0 : i32
    return %c0_i32, %arg0 : i32, i32
  }
  func.func @transform_5(%arg0: i32, %arg1: i32) -> (i32, i32, i32, i32) {
    %c0_i32 = arith.constant 0 : i32
    %c0_i32_0 = arith.constant 0 : i32
    %c0_i32_1 = arith.constant 0 : i32
    return %c0_i32, %arg1, %c0_i32_0, %arg0 : i32, i32, i32, i32
  }
}

module attributes {stable_mosaic.version = 11 : i64} {
  func.func @kernel(%arg0: i32, %arg1: i32, %arg2: memref<2x8x16x128xbf16, #tpu.memory_space<vmem>>, %arg3: memref<2x1x16x128xbf16, #tpu.memory_space<vmem>>, %arg4: memref<2x1x16x128xbf16, #tpu.memory_space<vmem>>, %arg5: memref<3x384x128xbf16, #tpu.memory_space<vmem>>, %arg6: memref<1x128xf32, #tpu.memory_space<vmem>>, %arg7: memref<2x8x16x128xbf16, #tpu.memory_space<vmem>>, %arg8: memref<256x128xf32, #tpu.memory_space<vmem>>) attributes {dimension_semantics = [#tpu.dimension_semantics<parallel>, #tpu.dimension_semantics<parallel>], iteration_bounds = array<i64: 1, 2>, scalar_prefetch = 0 : i64, scratch_operands = 1 : i64, tpu.core_type = #tpu.core_type<tc>, window_params = [{transform_indices = @transform_0, window_bounds = array<i64: 2, 8, 16, 128>}, {transform_indices = @transform_1, window_bounds = array<i64: 2, 1, 16, 128>}, {transform_indices = @transform_2, window_bounds = array<i64: 2, 1, 16, 128>}, {transform_indices = @transform_3, window_bounds = array<i64: 3, 384, 128>}, {transform_indices = @transform_4, window_bounds = array<i64: 1, 128>}, {transform_indices = @transform_5, window_bounds = array<i64: 2, 8, 16, 128>}]} {
    %c0 = arith.constant 0 : index
    %c0_0 = arith.constant 0 : index
    %c0_1 = arith.constant 0 : index
    %c0_2 = arith.constant 0 : index
    %0 = vector.load %arg2[%c0, %c0_0, %c0_1, %c0_2] : memref<2x8x16x128xbf16, #tpu.memory_space<vmem>>, vector<2x8x16x128xbf16>
    %cst = arith.constant 0.000000e+00 : bf16
    %1 = vector.broadcast %cst : bf16 to vector<16x1x128xbf16>
    %c0_3 = arith.constant 0 : index
    %c0_4 = arith.constant 0 : index
    %c0_5 = arith.constant 0 : index
    %c0_6 = arith.constant 0 : index
    %2 = vector.load %arg3[%c0_3, %c0_4, %c0_5, %c0_6] : memref<2x1x16x128xbf16, #tpu.memory_space<vmem>>, vector<2x1x16x128xbf16>
    %3 = vector.extract_strided_slice %0 {offsets = [0, 0, 0, 0], sizes = [2, 7, 16, 128], strides = [1, 1, 1, 1]} : vector<2x8x16x128xbf16> to vector<2x7x16x128xbf16>
    %4 = tpu.concatenate %2, %3 in 1 : vector<2x1x16x128xbf16>, vector<2x7x16x128xbf16> -> vector<2x8x16x128xbf16>
    %5 = vector.extract_strided_slice %0 {offsets = [0, 1, 0, 0], sizes = [2, 7, 16, 128], strides = [1, 1, 1, 1]} : vector<2x8x16x128xbf16> to vector<2x7x16x128xbf16>
    %c0_7 = arith.constant 0 : index
    %c0_8 = arith.constant 0 : index
    %c0_9 = arith.constant 0 : index
    %c0_10 = arith.constant 0 : index
    %6 = vector.load %arg4[%c0_7, %c0_8, %c0_9, %c0_10] : memref<2x1x16x128xbf16, #tpu.memory_space<vmem>>, vector<2x1x16x128xbf16>
    %7 = tpu.concatenate %5, %6 in 1 : vector<2x7x16x128xbf16>, vector<2x1x16x128xbf16> -> vector<2x8x16x128xbf16>
    %8 = vector.shape_cast %4 : vector<2x8x16x128xbf16> to vector<16x16x128xbf16>
    %9 = vector.extract_strided_slice %8 {offsets = [0, 0, 0], sizes = [16, 15, 128], strides = [1, 1, 1]} : vector<16x16x128xbf16> to vector<16x15x128xbf16>
    %10 = tpu.concatenate %1, %9 in 1 : vector<16x1x128xbf16>, vector<16x15x128xbf16> -> vector<16x16x128xbf16>
    %11 = vector.extract_strided_slice %8 {offsets = [0, 1, 0], sizes = [16, 15, 128], strides = [1, 1, 1]} : vector<16x16x128xbf16> to vector<16x15x128xbf16>
    %12 = tpu.concatenate %11, %1 in 1 : vector<16x15x128xbf16>, vector<16x1x128xbf16> -> vector<16x16x128xbf16>
    %13 = tpu.concatenate %10, %8, %12 in 2 : vector<16x16x128xbf16>, vector<16x16x128xbf16>, vector<16x16x128xbf16> -> vector<16x16x384xbf16>
    %14 = vector.shape_cast %13 : vector<16x16x384xbf16> to vector<256x384xbf16>
    %c0_11 = arith.constant 0 : index
    %c0_12 = arith.constant 0 : index
    %c0_13 = arith.constant 0 : index
    %15 = vector.load %arg5[%c0_11, %c0_12, %c0_13] : memref<3x384x128xbf16, #tpu.memory_space<vmem>>, vector<1x384x128xbf16>
    %16 = vector.shape_cast %15 : vector<1x384x128xbf16> to vector<384x128xbf16>
    %cst_14 = arith.constant dense<0.000000e+00> : vector<256x128xf32>
    %17 = tpu.matmul %14, %16, %cst_14 {dimension_numbers = #tpu.dot_dimension_numbers<[1], [0], [0], [1], [0, 0, 1, 1], [], []>} : vector<256x384xbf16>, vector<384x128xbf16>, vector<256x128xf32> -> vector<256x128xf32>
    %c0_15 = arith.constant 0 : index
    %c0_16 = arith.constant 0 : index
    %18 = vector.load %arg8[%c0_15, %c0_16] : memref<256x128xf32, #tpu.memory_space<vmem>>, vector<256x128xf32>
    tpu.vector_store %arg8[%c0_15, %c0_16], %17 {strides = array<i32>} : memref<256x128xf32, #tpu.memory_space<vmem>>, vector<256x128xf32>,
    %c0_17 = arith.constant 0 : index
    %c0_18 = arith.constant 0 : index
    %19 = vector.load %arg8[%c0_17, %c0_18] : memref<256x128xf32, #tpu.memory_space<vmem>>, vector<256x128xf32>
    %20 = vector.shape_cast %0 : vector<2x8x16x128xbf16> to vector<16x16x128xbf16>
    %21 = vector.extract_strided_slice %20 {offsets = [0, 0, 0], sizes = [16, 15, 128], strides = [1, 1, 1]} : vector<16x16x128xbf16> to vector<16x15x128xbf16>
    %22 = tpu.concatenate %1, %21 in 1 : vector<16x1x128xbf16>, vector<16x15x128xbf16> -> vector<16x16x128xbf16>
    %23 = vector.extract_strided_slice %20 {offsets = [0, 1, 0], sizes = [16, 15, 128], strides = [1, 1, 1]} : vector<16x16x128xbf16> to vector<16x15x128xbf16>
    %24 = tpu.concatenate %23, %1 in 1 : vector<16x15x128xbf16>, vector<16x1x128xbf16> -> vector<16x16x128xbf16>
    %25 = tpu.concatenate %22, %20, %24 in 2 : vector<16x16x128xbf16>, vector<16x16x128xbf16>, vector<16x16x128xbf16> -> vector<16x16x384xbf16>
    %26 = vector.shape_cast %25 : vector<16x16x384xbf16> to vector<256x384xbf16>
    %c1 = arith.constant 1 : index
    %c0_19 = arith.constant 0 : index
    %c0_20 = arith.constant 0 : index
    %27 = vector.load %arg5[%c1, %c0_19, %c0_20] : memref<3x384x128xbf16, #tpu.memory_space<vmem>>, vector<1x384x128xbf16>
    %28 = vector.shape_cast %27 : vector<1x384x128xbf16> to vector<384x128xbf16>
    %cst_21 = arith.constant dense<0.000000e+00> : vector<256x128xf32>
    %29 = tpu.matmul %26, %28, %cst_21 {dimension_numbers = #tpu.dot_dimension_numbers<[1], [0], [0], [1], [0, 0, 1, 1], [], []>} : vector<256x384xbf16>, vector<384x128xbf16>, vector<256x128xf32> -> vector<256x128xf32>
    %30 = arith.addf %19, %29 : vector<256x128xf32>
    %c0_22 = arith.constant 0 : index
    %c0_23 = arith.constant 0 : index
    %31 = vector.load %arg8[%c0_22, %c0_23] : memref<256x128xf32, #tpu.memory_space<vmem>>, vector<256x128xf32>
    tpu.vector_store %arg8[%c0_22, %c0_23], %30 {strides = array<i32>} : memref<256x128xf32, #tpu.memory_space<vmem>>, vector<256x128xf32>,
    %c0_24 = arith.constant 0 : index
    %c0_25 = arith.constant 0 : index
    %32 = vector.load %arg8[%c0_24, %c0_25] : memref<256x128xf32, #tpu.memory_space<vmem>>, vector<256x128xf32>
    %33 = vector.shape_cast %7 : vector<2x8x16x128xbf16> to vector<16x16x128xbf16>
    %34 = vector.extract_strided_slice %33 {offsets = [0, 0, 0], sizes = [16, 15, 128], strides = [1, 1, 1]} : vector<16x16x128xbf16> to vector<16x15x128xbf16>
    %35 = tpu.concatenate %1, %34 in 1 : vector<16x1x128xbf16>, vector<16x15x128xbf16> -> vector<16x16x128xbf16>
    %36 = vector.extract_strided_slice %33 {offsets = [0, 1, 0], sizes = [16, 15, 128], strides = [1, 1, 1]} : vector<16x16x128xbf16> to vector<16x15x128xbf16>
    %37 = tpu.concatenate %36, %1 in 1 : vector<16x15x128xbf16>, vector<16x1x128xbf16> -> vector<16x16x128xbf16>
    %38 = tpu.concatenate %35, %33, %37 in 2 : vector<16x16x128xbf16>, vector<16x16x128xbf16>, vector<16x16x128xbf16> -> vector<16x16x384xbf16>
    %39 = vector.shape_cast %38 : vector<16x16x384xbf16> to vector<256x384xbf16>
    %c2 = arith.constant 2 : index
    %c0_26 = arith.constant 0 : index
    %c0_27 = arith.constant 0 : index
    %40 = vector.load %arg5[%c2, %c0_26, %c0_27] : memref<3x384x128xbf16, #tpu.memory_space<vmem>>, vector<1x384x128xbf16>
    %41 = vector.shape_cast %40 : vector<1x384x128xbf16> to vector<384x128xbf16>
    %cst_28 = arith.constant dense<0.000000e+00> : vector<256x128xf32>
    %42 = tpu.matmul %39, %41, %cst_28 {dimension_numbers = #tpu.dot_dimension_numbers<[1], [0], [0], [1], [0, 0, 1, 1], [], []>} : vector<256x384xbf16>, vector<384x128xbf16>, vector<256x128xf32> -> vector<256x128xf32>
    %43 = arith.addf %32, %42 : vector<256x128xf32>
    %c0_29 = arith.constant 0 : index
    %c0_30 = arith.constant 0 : index
    %44 = vector.load %arg8[%c0_29, %c0_30] : memref<256x128xf32, #tpu.memory_space<vmem>>, vector<256x128xf32>
    tpu.vector_store %arg8[%c0_29, %c0_30], %43 {strides = array<i32>} : memref<256x128xf32, #tpu.memory_space<vmem>>, vector<256x128xf32>,
    %c0_31 = arith.constant 0 : index
    %c0_32 = arith.constant 0 : index
    %45 = vector.load %arg8[%c0_31, %c0_32] : memref<256x128xf32, #tpu.memory_space<vmem>>, vector<256x128xf32>
    %c0_33 = arith.constant 0 : index
    %c0_34 = arith.constant 0 : index
    %46 = vector.load %arg6[%c0_33, %c0_34] : memref<1x128xf32, #tpu.memory_space<vmem>>, vector<1x128xf32>
    %47 = vector.broadcast %46 : vector<1x128xf32> to vector<256x128xf32>
    %48 = arith.addf %45, %47 : vector<256x128xf32>
    %cst_35 = arith.constant 0.000000e+00 : f32
    %49 = vector.broadcast %cst_35 : f32 to vector<256x128xf32>
    %50 = arith.maximumf %48, %49 : vector<256x128xf32>
    %51 = vector.shape_cast %50 : vector<256x128xf32> to vector<2x8x16x128xf32>
    %52 = arith.truncf %51 : vector<2x8x16x128xf32> to vector<2x8x16x128xbf16>
    %c0_36 = arith.constant 0 : index
    %c0_37 = arith.constant 0 : index
    %c0_38 = arith.constant 0 : index
    %c0_39 = arith.constant 0 : index
    %53 = vector.load %arg7[%c0_36, %c0_37, %c0_38, %c0_39] : memref<2x8x16x128xbf16, #tpu.memory_space<vmem>>, vector<2x8x16x128xbf16>
    tpu.vector_store %arg7[%c0_36, %c0_37, %c0_38, %c0_39], %52 {strides = array<i32>} : memref<2x8x16x128xbf16, #tpu.memory_space<vmem>>, vector<2x8x16x128xbf16>,
    return
  }
  func.func @transform_0(%arg0: i32, %arg1: i32) -> (i32, i32, i32, i32) {
    %c0_i32 = arith.constant 0 : i32
    %c0_i32_0 = arith.constant 0 : i32
    %c0_i32_1 = arith.constant 0 : i32
    %c0_i32_2 = arith.constant 0 : i32
    return %c0_i32, %arg1, %c0_i32_0, %c0_i32_1 : i32, i32, i32, i32
  }
  func.func @transform_1(%arg0: i32, %arg1: i32) -> (i32, i32, i32, i32) {
    %c0_i32 = arith.constant 0 : i32
    %c0_i32_0 = arith.constant 0 : i32
    %c0_i32_1 = arith.constant 0 : i32
    %c0_i32_2 = arith.constant 0 : i32
    return %c0_i32, %arg1, %c0_i32_0, %c0_i32_1 : i32, i32, i32, i32
  }
  func.func @transform_2(%arg0: i32, %arg1: i32) -> (i32, i32, i32, i32) {
    %c0_i32 = arith.constant 0 : i32
    %c0_i32_0 = arith.constant 0 : i32
    %c0_i32_1 = arith.constant 0 : i32
    %c0_i32_2 = arith.constant 0 : i32
    return %c0_i32, %arg1, %c0_i32_0, %c0_i32_1 : i32, i32, i32, i32
  }
  func.func @transform_3(%arg0: i32, %arg1: i32) -> (i32, i32, i32) {
    %c0_i32 = arith.constant 0 : i32
    %c0_i32_0 = arith.constant 0 : i32
    %c0_i32_1 = arith.constant 0 : i32
    return %c0_i32, %c0_i32_0, %arg0 : i32, i32, i32
  }
  func.func @transform_4(%arg0: i32, %arg1: i32) -> (i32, i32) {
    %c0_i32 = arith.constant 0 : i32
    %c0_i32_0 = arith.constant 0 : i32
    return %c0_i32, %arg0 : i32, i32
  }
  func.func @transform_5(%arg0: i32, %arg1: i32) -> (i32, i32, i32, i32) {
    %c0_i32 = arith.constant 0 : i32
    %c0_i32_0 = arith.constant 0 : i32
    %c0_i32_1 = arith.constant 0 : i32
    return %c0_i32, %arg1, %c0_i32_0, %arg0 : i32, i32, i32, i32
  }
}

</mosaic_0001>

<bundles_post_ra>
// kernel: block2_forward.6
= control target key start
LH: loop header
LB: loop body
LE: loop exit
PB: predicated region body
PF: predicated region fallthrough
CT: control target
= control target key end

     0   :  { %s3281_s18 = smov 0   ;;  %s3283_s19 = smov 0   ;;  %s4141_s0 = inlined_call_operand.vmem [shape: bf16[2,16,16,64], index: 0, kind: input, shape index: {}]   ;;  %s4142_s1 = inlined_call_operand.vmem [shape: bf16[2,2,16,64], index: 1, kind: input, shape index: {}]   ;;  %s4143_s2 = inlined_call_operand.vmem [shape: bf16[2,2,16,64], index: 2, kind: input, shape index: {}]   ;;  %s4144_s3 = inlined_call_operand.vmem [shape: bf16[3,192,128], index: 3, kind: input, shape index: {}]   ;;  %s4145_s4 = inlined_call_operand.vmem [shape: f32[1,128], index: 4, kind: input, shape index: {}]   ;;  %s4146_s5 = inlined_call_operand.vmem [shape: bf16[2,16,16,128], index: 5, kind: output, shape index: {}]  }
   0x1   :  { %s3285_s20 = smov 0   ;;  %s3287_s21 = smov 0  }
   0x2   :  { %s3289_s22 = smov 0  }
   0x3 LB: > { %s24_s23 = sadd.s32 1, %s3243_s21  ;;  %s2742_s24 = sadd.s32 4294967295, %s3247_s22   ;;  %s3247_s22 = sphi %s3289_s22, %s15_s22   ;;  %s3243_s21 = sphi %s3287_s21, %s4156_s21   ;;  %s3239_s20 = sphi %s3285_s20, %s4155_s20   ;;  %s3235_s19 = sphi %s3283_s19, %s4154_s19   ;;  %s3231_s18 = sphi %s3281_s18, %s4153_s18  }
   0x4   : > { %p25_p0 = scmp.ge.s32.totalorder %s24_s23, 2  ;;  %p41_p1 = scmp.ne.s32.totalorder %s3235_s19, %s3231_s18 }
   0x5   : > { %p42_p2 = scmp.eq.s32.totalorder %s3247_s22, 0  ;;  %p177_p4 = scmp.eq.s32.totalorder %s2742_s24, 1 }
   0x6   : > { %s4158_s23 = smov (%p25_p0, %s24_s23), 0  ;;  %s34_s27 = sadd.s32 1, %s3235_s19 }
   0x7   : > { %p3313_p3 = por %p42_p2, %p41_p1  ;;  %s31_s26 = ssub.s32 %s3243_s21, %s4158_s23 }
   0x8   : > { %p32_p5 = scmp.eq.s32.totalorder %s31_s26, 0  ;;  %p3320_p6 = por %p177_p4, %p41_p1 }
   0x9   : > { %p2747_p7 = scmp.ge.s32.totalorder %s3247_s22, 2 }
   0xa   : > { %s3325_s29 = scalar_select %p32_p5, %s3235_s19, %s34_s27  }
   0xb   : > { %212 = sbr.rel (%p2747_p7) target bundleno = 38 (0x26), region = 24 }
  0x10   : > { %215 = sbr.rel (!%p3313_p3) target bundleno = 28 (0x1c), region = 28  ;;  %s217_s30 = sand.u32 (%p3313_p3), 1, %s3235_s19  }
  0x11   : > { %s2955_s6 = sshll.u32 (%p3313_p3), %s3243_s21, 6  ;;  %s2748_s7 = sshll.u32 (%p3313_p3), %s217_s30, 7 }
  0x12   : > { %s3335_s10 = scalar_lea.vmem (%p3313_p3), %s4141_s0, %s2955_s6  ;;  %s219_s11 = scalar_lea.vmem (%p3313_p3), [#allocation3], %s2748_s7 }
  0x13   : > { %v240_v0 = vld [vmem:[%s3335_s10] sm:$0xff] (%p3313_p3)   ;;  %v244_v1 = vld [vmem:[%s3335_s10 + $0x8] sm:$0xff] (%p3313_p3)   ;;  %v248_v2 = vld [vmem:[%s3335_s10 + $0x10] sm:$0xff] (%p3313_p3)  }
  0x14   : > { %241 = vst [vmem:[%s219_s11] sm:$0xff] (%p3313_p3), %v240_v0   ;;  %245 = vst [vmem:[%s219_s11 + $0x8] sm:$0xff] (%p3313_p3), %v244_v1   ;;  %v252_v3 = vld [vmem:[%s3335_s10 + $0x18] sm:$0xff] (%p3313_p3)   ;;  %v256_v4 = vld [vmem:[%s3335_s10 + $0x20] sm:$0xff] (%p3313_p3)  }
  0x15   : > { %249 = vst [vmem:[%s219_s11 + $0x10] sm:$0xff] %v248_v2   ;;  %v260_v5 = vld [vmem:[%s3335_s10 + $0x28] sm:$0xff]   ;;  %253 = vst [vmem:[%s219_s11 + $0x18] sm:$0xff] %v252_v3   ;;  %v264_v6 = vld [vmem:[%s3335_s10 + $0x30] sm:$0xff]  }
  0x16   : > { %257 = vst [vmem:[%s219_s11 + $0x20] sm:$0xff] %v256_v4   ;;  %261 = vst [vmem:[%s219_s11 + $0x28] sm:$0xff] %v260_v5   ;;  %v268_v7 = vld [vmem:[%s3335_s10 + $0x38] sm:$0xff]   ;;  %v272_v8 = vld [vmem:[%s3335_s10 + $0x80] sm:$0xff]  }
  0x17   : > { %265 = vst [vmem:[%s219_s11 + $0x30] sm:$0xff] %v264_v6   ;;  %269 = vst [vmem:[%s219_s11 + $0x38] sm:$0xff] %v268_v7   ;;  %v276_v9 = vld [vmem:[%s3335_s10 + $0x88] sm:$0xff]   ;;  %v280_v10 = vld [vmem:[%s3335_s10 + $0x90] sm:$0xff]  }
  0x18   : > { %273 = vst [vmem:[%s219_s11 + $0x40] sm:$0xff] %v272_v8   ;;  %v284_v11 = vld [vmem:[%s3335_s10 + $0x98] sm:$0xff]   ;;  %277 = vst [vmem:[%s219_s11 + $0x48] sm:$0xff] %v276_v9   ;;  %v288_v12 = vld [vmem:[%s3335_s10 + $0xa0] sm:$0xff]  }
  0x19   : > { %281 = vst [vmem:[%s219_s11 + $0x50] sm:$0xff] %v280_v10   ;;  %285 = vst [vmem:[%s219_s11 + $0x58] sm:$0xff] %v284_v11   ;;  %v292_v13 = vld [vmem:[%s3335_s10 + $0xa8] sm:$0xff]   ;;  %v296_v14 = vld [vmem:[%s3335_s10 + $0xb0] sm:$0xff]  }
  0x1a   : > { %289 = vst [vmem:[%s219_s11 + $0x60] sm:$0xff] %v288_v12   ;;  %293 = vst [vmem:[%s219_s11 + $0x68] sm:$0xff] %v292_v13   ;;  %v300_v15 = vld [vmem:[%s3335_s10 + $0xb8] sm:$0xff]  }
  0x1b   : > { %297 = vst [vmem:[%s219_s11 + $0x70] sm:$0xff] %v296_v14   ;;  %301 = vst [vmem:[%s219_s11 + $0x78] sm:$0xff] %v300_v15  }
  0x1c PF: > { %391 = sbr.rel (!%p3313_p3) target bundleno = 33 (0x21), region = 69  ;;  %s393_s12 = sand.u32 (%p3313_p3), 1, %s3235_s19  }
  0x1d   : > { %s2956_s13 = sshll.u32 (%p3313_p3), %s3243_s21, 3  ;;  %s2752_s14 = sshll.u32 (%p3313_p3), %s393_s12, 4 }
  0x1e   : > { %s398_s17 = scalar_lea.vmem (%p3313_p3), %s4142_s1, %s2956_s13  ;;  %s395_s24 = scalar_lea.vmem (%p3313_p3), [#allocation4], %s2752_s14 }
  0x1f   : > { %v415_v16 = vld [vmem:[%s398_s17] sm:$0xff] (%p3313_p3)   ;;  %v419_v17 = vld [vmem:[%s398_s17 + $0x10] sm:$0xff] (%p3313_p3)  }
  0x20   : > { %416 = vst [vmem:[%s395_s24] sm:$0xff] (%p3313_p3), %v415_v16   ;;  %420 = vst [vmem:[%s395_s24 + $0x8] sm:$0xff] (%p3313_p3), %v419_v17  }
  0x21 PF: > { %454 = sbr.rel (!%p3313_p3) target bundleno = 38 (0x26), region = 110  ;;  %s456_s26 = sand.u32 (%p3313_p3), 1, %s3235_s19  }
  0x22   : > { %s2957_s27 = sshll.u32 (%p3313_p3), %s3243_s21, 3  ;;  %s2755_s30 = sshll.u32 (%p3313_p3), %s456_s26, 4 }
  0x23   : > { %s461_s8 = scalar_lea.vmem (%p3313_p3), %s4143_s2, %s2957_s27  ;;  %s458_s9 = scalar_lea.vmem (%p3313_p3), [#allocation5], %s2755_s30 }
  0x24   : > { %v478_v18 = vld [vmem:[%s461_s8] sm:$0xff] (%p3313_p3)   ;;  %v482_v19 = vld [vmem:[%s461_s8 + $0x10] sm:$0xff] (%p3313_p3)  }
  0x25   : > { %479 = vst [vmem:[%s458_s9] sm:$0xff] (%p3313_p3), %v478_v18   ;;  %483 = vst [vmem:[%s458_s9 + $0x8] sm:$0xff] (%p3313_p3), %v482_v19  }
  0x26 PF: > { %p2758_p8 = scmp.ge.s32.totalorder %s3247_s22, 1  ;;  %p516_p9 = scmp.lt.s32.totalorder %s3247_s22, 3 }
  0x28   : > { %p517_p10 = pnand %p2758_p8, %p516_p9 }
  0x29   : > { %s523_s25 = sand.u32 (!%p517_p10), 1, %s3231_s18   ;;  %s3250_s16 = smov (!%p517_p10), 64  }
  0x2a   : > { %520 = sbr.rel (%p517_p10) target bundleno = 569 (0x239), region = 151  ;;  %s3373_s12 = sshll.u32 (!%p517_p10), %s523_s25, 4 }
  0x2b   : > { %s3375_s13 = sshll.u32 (!%p517_p10), %s523_s25, 7  ;;  %s532_s18 = scalar_lea.vmem (!%p517_p10), [#allocation4], %s3373_s12 }
  0x2c   : > { %s3389_s17 = scalar_lea.vmem (!%p517_p10), [#allocation3], %s3375_s13  ;;  %s539_s15 = scalar_lea.vmem (!%p517_p10), [#allocation5], %s3373_s12 }
  0x2d   : > { %s4028_s8 = scalar_lea.vmem (!%p517_p10), [#allocation6], %s3375_s13 }
  0x2f   : > { %v3169_v20 = vld [vmem:[%s4144_s3 + $0x38] sm:$0xff]   ;;  %v3249_v21 = vmov 0   ;;  %v3170_v22 = vld [vmem:[%s4144_s3 + $0x30] sm:$0xff]   ;;  %v3392_v25 = vld [vmem:[%s3389_s17 + $0x40] sm:$0xff]   ;;  %vm903_vm0 = vcmask 1047552   ;;  %vm954_vm3 = vcmask 523264  }
  0x30   : > { %3087 = vmatprep.subr.bf16.mxu1 %v3249_v21  ;;  %1163 = vmatprep.subr.bf16.mxu0 %v3249_v21  ;;  %v3153_v23 = vld [vmem:[%s532_s18 + $0x8] sm:$0xff]   ;;  %v3385_v24 = vld [vmem:[%s532_s18] sm:$0xff]   ;;  %vm904_vm1 = vsmask.f32 7424  ;;  %v775_v4 = vshll.u32 %v3392_v25, 16  ;;  %vm836_vm4 = vcmask 1040384  }
  0x31   : > { %3099 = vmatpush1.bf16.msra.mxu1 %v3169_v20  ;;  %1164 = vmatpush1.bf16.msra.mxu0 %v3169_v20  ;;  %v3171_v26 = vld [vmem:[%s4144_s3 + $0x28] sm:$0xff]   ;;  %v3400_v27 = vld [vmem:[%s3389_s17] sm:$0xff]   ;;  %v3419_v30 = vld [vmem:[%s3389_s17 + $0x50] sm:$0xff]   ;;  %v765_v34 = vshrl.u32 %v3153_v23, 16  ;;  %v768_v37 = vshll.u32 %v3153_v23, 16  ;;  %v709_v47 = vshrl.u32 %v3385_v24, 16 }
  0x32   : > { %3088 = vmatprep.subr.bf16.mxu1 %v3249_v21  ;;  %1165 = vmatprep.subr.bf16.mxu0 %v3249_v21  ;;  %v3407_v28 = vld [vmem:[%s3389_s17 + $0x48] sm:$0xff]   ;;  %v3424_v31 = vld [vmem:[%s3389_s17 + $0x10] sm:$0xff]   ;;  %v3429_v32 = vld [vmem:[%s3389_s17 + $0x58] sm:$0xff]   ;;  %v712_v48 = vshll.u32 %v3385_v24, 16  ;;  %vm837_vm5 = vsmask.f32 256 }
  0x33   : > { %938 = vrot.lane.b32.xlu0 %v3153_v23, %s3250_s16  ;;  %940 = vrot.lane.b32.xlu1 %v3392_v25, %s3250_s16  ;;  %v3412_v29 = vld [vmem:[%s3389_s17 + $0x8] sm:$0xff]   ;;  %v3432_v33 = vld [vmem:[%s3389_s17 + $0x18] sm:$0xff]   ;;  %v767_v39 = vrot.slane %v765_v34, 7  ;;  %v871_v41 = vrot.slane %v768_v37, 1  ;;  %vm3481_vm2 = vmand %vm903_vm0, %vm904_vm1  ;;  %v711_v54 = vrot.slane %v709_v47, 7  ;;  %v772_v5 = vshrl.u32 %v3392_v25, 16 }
  0x34   : > { %v3437_v35 = vld [vmem:[%s3389_s17 + $0x60] sm:$0xff]   ;;  %v3173_v38 = vld [vmem:[%s4144_s3 + $0x18] sm:$0xff]   ;;  %v3455_v42 = vld [vmem:[%s3389_s17 + $0x68] sm:$0xff]   ;;  %v855_v55 = vrot.slane %v712_v48, 1  ;;  %v873_v6 = vrot.slane %v775_v4, 1  ;;  %v719_v7 = vshll.u32 %v3400_v27, 16 }
  0x35   : > { %3100 = vmatpush1.bf16.msra.mxu1 %v3170_v22  ;;  %1166 = vmatpush1.bf16.msra.mxu0 %v3170_v22  ;;  %v3172_v36 = vld [vmem:[%s4144_s3 + $0x20] sm:$0xff]   ;;  %v3457_v43 = vor.u32 %v768_v37, %v767_v39  ;;  %v3174_v44 = vld [vmem:[%s4144_s3 + $0x10] sm:$0xff]   ;;  %v3465_v45 = vld [vmem:[%s3389_s17 + $0x28] sm:$0xff]   ;;  %v872_v46 = vor.u32 %v871_v41, %v765_v34  ;;  %v3503_v59 = vor.u32 %v712_v48, %v711_v54  ;;  %v774_v10 = vrot.slane %v772_v5, 7  ;;  %s2991_s13 = sshll.u32 (%p3320_p6), %s3239_s20, 6 }
  0x36   : > { %3089 = vmatprep.subr.bf16.mxu1 %v3249_v21  ;;  %1167 = vmatprep.subr.bf16.mxu0 %v3249_v21  ;;  %v3451_v40 = vld [vmem:[%s3389_s17 + $0x20] sm:$0xff]   ;;  %v3474_v49 = vld [vmem:[%s3389_s17 + $0x70] sm:$0xff]   ;;  %v3175_v50 = vld [vmem:[%s4144_s3 + $0x8] sm:$0xff]   ;;  %v856_v58 = vor.u32 %v855_v55, %v709_v47  ;;  %v874_v9 = vor.u32 %v873_v6, %v772_v5  ;;  %v716_v11 = vshrl.u32 %v3400_v27, 16  ;;  %v782_v12 = vshll.u32 %v3407_v28, 16 }
  0x37   : > { %922 = vrot.lane.b32.xlu0 %v3385_v24, %s3250_s16  ;;  %924 = vrot.lane.b32.xlu1 %v3400_v27, %s3250_s16  ;;  %v914_v52 = vsel %vm3481_vm2, %v872_v46, 0  ;;  %v3491_v53 = vld [vmem:[%s3389_s17 + $0x30] sm:$0xff]   ;;  %v3176_v56 = vld [vmem:[%s4144_s3] sm:$0xff]   ;;  %vm3557_vm6 = vmand %vm836_vm4, %vm837_vm5  ;;  %v857_v13 = vrot.slane %v719_v7, 1  ;;  %v779_v16 = vshrl.u32 %v3407_v28, 16  ;;  %v777_v19 = vor.u32 %v775_v4, %v774_v10 }
  0x38   : > { %2799 = vmatprep.mubr.msk.bf16.mxu1 %vm954_vm3, %v914_v52  ;;  %v3501_v57 = vld [vmem:[%s3389_s17 + $0x38] sm:$0xff]   ;;  %v906_v60 = vsel %vm3481_vm2, %v856_v58, 0  ;;  %v3514_v61 = vld [vmem:[%s539_s15] sm:$0xff]   ;;  %v3179_v0 = vld [vmem:[%s4144_s3 + $0x48] sm:$0xff]   ;;  %v847_v14 = vsel %vm3557_vm6, 0, %v3457_v43  ;;  %v3572_v18 = vsel %vm3481_vm2, %v874_v9, 0 }
  0x39   : > { %3101 = vmatpush1.bf16.msra.mxu1 %v3171_v26  ;;  %1168 = vmatpush1.bf16.msra.mxu0 %v3171_v26  ;;  %v3177_v62 = vld [vmem:[%s4144_s3 + $0x58] sm:$0xff]   ;;  %v3178_v63 = vld [vmem:[%s4144_s3 + $0x50] sm:$0xff]   ;;  %v3180_v1 = vld [vmem:[%s4144_s3 + $0x40] sm:$0xff]   ;;  %v718_v20 = vrot.slane %v716_v11, 7  ;;  %v726_v22 = vshll.u32 %v3412_v29, 16  ;;  %v858_v24 = vor.u32 %v857_v13, %v716_v11  ;;  %v875_v25 = vrot.slane %v782_v12, 1 }
  0x3a   : > { %3090 = vmatprep.subr.bf16.mxu1 %v3249_v21  ;;  %1169 = vmatprep.subr.bf16.mxu0 %v3249_v21  ;;  %v3544_v2 = vld [vmem:[%s3389_s17 + $0x78] sm:$0xff]   ;;  %v839_v26 = vsel %vm3557_vm6, 0, %v3503_v59  ;;  %v3184_v34 = vld [vmem:[%s4144_s3 + $0x90] sm:$0xff]   ;;  %v789_v37 = vshll.u32 %v3419_v30, 16  ;;  %v848_v39 = vsel %vm3557_vm6, 0, %v777_v19  ;;  %v723_v43 = vshrl.u32 %v3412_v29, 16  ;;  %s2446_s17 = scalar_lea.vmem (%p3320_p6), %s4146_s5, %s2991_s13 }
  0x3b   : > { %942 = vrot.lane.b32.xlu0 %v3407_v28, %s3250_s16  ;;  %926 = vrot.lane.b32.xlu1 %v3412_v29, %s3250_s16  ;;  %v3550_v3 = vld [vmem:[%s539_s15 + $0x8] sm:$0xff]   ;;  %v721_v41 = vor.u32 %v719_v7, %v718_v20  ;;  %v3595_v46 = vsel %vm3481_vm2, %v858_v24, 0  ;;  %v876_v47 = vor.u32 %v875_v25, %v779_v16  ;;  %v859_v48 = vrot.slane %v726_v22, 1  ;;  %v3186_v52 = vld [vmem:[%s4144_s3 + $0xf0] sm:$0xff]  }
  0x3c   : > { %2791 = vmatprep.mubr.msk.bf16.mxu0 %vm954_vm3, %v906_v60  ;;  %v3182_v15 = vld [vmem:[%s4144_s3 + $0x98] sm:$0xff]   ;;  %v3187_v29 = vld [vmem:[%s4144_s3 + $0x88] sm:$0xff]   ;;  %v786_v55 = vshrl.u32 %v3419_v30, 16  ;;  %v725_v60 = vrot.slane %v723_v43, 7  ;;  %v3189_v6 = vld [vmem:[%s4144_s3 + $0x80] sm:$0xff]   ;;  %v793_v19 = vshrl.u32 %v3429_v32, 16 }
  0x3d   : > { %3102 = vmatpush1.bf16.msra.mxu1 %v3172_v36  ;;  %1170 = vmatpush1.bf16.msra.mxu0 %v3172_v36  ;;  %v3183_v28 = vld [vmem:[%s4144_s3 + $0xf8] sm:$0xff]   ;;  %v781_v36 = vrot.slane %v779_v16, 7  ;;  %v840_v59 = vsel %vm3557_vm6, 0, %v721_v41  ;;  %v3188_v4 = vld [vmem:[%s4144_s3 + $0xe8] sm:$0xff]  }
  0x3e   : > { %3091 = vmatprep.subr.bf16.mxu1 %v3249_v21  ;;  %1171 = vmatprep.subr.bf16.mxu0 %v3249_v21  ;;  %v788_v7 = vrot.slane %v786_v55, 7  ;;  %v728_v10 = vor.u32 %v726_v22, %v725_v60  ;;  %v3191_v25 = vld [vmem:[%s4144_s3 + $0x78] sm:$0xff]  }
  0x3f   : > { %944 = vrot.lane.b32.xlu0 %v3419_v30, %s3250_s16  ;;  %928 = vrot.lane.b32.xlu1 %v3424_v31, %s3250_s16  ;;  %v784_v54 = vor.u32 %v782_v12, %v781_v36  ;;  %v860_v30 = vor.u32 %v859_v48, %v723_v43  ;;  %v730_v12 = vshrl.u32 %v3424_v31, 16  ;;  %v3192_v36 = vld [vmem:[%s4144_s3 + $0xd8] sm:$0xff]  }
  0x41   : > { %3103 = vmatpush1.bf16.msra.mxu1 %v3173_v38  ;;  %1172 = vmatpush1.bf16.msra.mxu0 %v3173_v38  ;;  %v849_v5 = vsel %vm3557_vm6, 0, %v784_v54 }
  0x42   : > { %3092 = vmatprep.subr.bf16.mxu1 %v3249_v21  ;;  %1173 = vmatprep.subr.bf16.mxu0 %v3249_v21 }
  0x43   : > { %946 = vrot.lane.b32.xlu0 %v3429_v32, %s3250_s16  ;;  %930 = vrot.lane.b32.xlu1 %v3432_v33, %s3250_s16 }
  0x45   : > { %3104 = vmatpush1.bf16.msra.mxu1 %v3174_v44  ;;  %1174 = vmatpush1.bf16.msra.mxu0 %v3174_v44 }
  0x46   : > { %3093 = vmatprep.subr.bf16.mxu1 %v3249_v21  ;;  %1175 = vmatprep.subr.bf16.mxu0 %v3249_v21 }
  0x47   : > { %948 = vrot.lane.b32.xlu0 %v3437_v35, %s3250_s16  ;;  %932 = vrot.lane.b32.xlu1 %v3451_v40, %s3250_s16 }
  0x49   : > { %3105 = vmatpush1.bf16.msra.mxu1 %v3175_v50  ;;  %1176 = vmatpush1.bf16.msra.mxu0 %v3175_v50 }
  0x4a   : > { %3094 = vmatprep.subr.bf16.mxu1 %v3249_v21  ;;  %1177 = vmatprep.subr.bf16.mxu0 %v3249_v21 }
  0x4b   : > { %950 = vrot.lane.b32.xlu0 %v3455_v42, %s3250_s16  ;;  %934 = vrot.lane.b32.xlu1 %v3465_v45, %s3250_s16 }
  0x4d   : > { %3106 = vmatpush1.bf16.msra.mxu1 %v3176_v56  ;;  %1178 = vmatpush1.bf16.msra.mxu0 %v3176_v56  ;;  %v733_v56 = vshll.u32 %v3424_v31, 16  ;;  %v3190_v31 = vld [vmem:[%s4144_s3 + $0xe0] sm:$0xff]  }
  0x4e   : > { %3095 = vmatprep.subr.bf16.mxu1 %v3249_v21  ;;  %1187 = vmatprep.subr.bf16.mxu0 %v3249_v21 }
  0x4f   : > { %952 = vrot.lane.b32.xlu0 %v3474_v49, %s3250_s16  ;;  %936 = vrot.lane.b32.xlu1 %v3491_v53, %s3250_s16  ;;  %v861_v13 = vrot.slane %v733_v56, 1 }
  0x51   : > { %3107 = vmatpush2.bf16.msra.mxu1 %v3177_v62  ;;  %1188 = vmatpush2.bf16.msra.mxu0 %v3177_v62  ;;  %v877_v62 = vrot.slane %v789_v37, 1 }
  0x52   : > { %3096 = vmatprep.subr.bf16.mxu1 %v3249_v21  ;;  %1189 = vmatprep.subr.bf16.mxu0 %v3249_v21 }
  0x53   : > { %1424 = vrot.lane.b32.xlu0 %v3501_v57, %s3250_s16  ;;  %1832 = vrot.lane.b32.xlu1 %v3514_v61, %s3250_s16  ;;  %v878_v11 = vor.u32 %v877_v62, %v786_v55  ;;  %v3195_v62 = vld [vmem:[%s4144_s3 + $0x68] sm:$0xff]  }
  0x55   : > { %3108 = vmatpush2.bf16.msra.mxu1 %v3178_v63  ;;  %1190 = vmatpush2.bf16.msra.mxu0 %v3178_v63  ;;  %v3616_v63 = vsel %vm3481_vm2, %v876_v47, 0  ;;  %v3656_v24 = vsel %vm3481_vm2, %v878_v11, 0 }
  0x56   : > { %3097 = vmatprep.subr.bf16.mxu1 %v3249_v21  ;;  %1191 = vmatprep.subr.bf16.mxu0 %v3249_v21 }
  0x57   : > { %1426 = vrot.lane.b32.xlu0 %v3544_v2, %s3250_s16  ;;  %1834 = vrot.lane.b32.xlu1 %v3550_v3, %s3250_s16 }
  0x59   : > { %3109 = vmatpush2.bf16.msra.mxu1 %v3179_v0  ;;  %1192 = vmatpush2.bf16.msra.mxu0 %v3179_v0  ;;  %v796_v0 = vshll.u32 %v3429_v32, 16  ;;  %v732_v32 = vrot.slane %v730_v12, 7 }
  0x5a   : > { %3098 = vmatprep.subr.bf16.mxu1 %v3249_v21  ;;  %1193 = vmatprep.subr.bf16.mxu0 %v3249_v21 }
  0x5b   : > { %v879_v20 = vrot.slane %v796_v0, 1  ;;  %v735_v43 = vor.u32 %v733_v56, %v732_v32  ;;  %v800_v56 = vshrl.u32 %v3437_v35, 16 }
  0x5d   : > { %3110 = vmatpush2.bf16.msra.mxu1 %v3180_v1  ;;  %1194 = vmatpush2.bf16.msra.mxu0 %v3180_v1  ;;  %v880_v47 = vor.u32 %v879_v20, %v793_v19 }
  0x5e   : > { %1539 = vmatprep.subr.bf16.mxu1 %v3249_v21  ;;  %1947 = vmatprep.subr.bf16.mxu0 %v3249_v21 }
  0x5f   : > { %v3700_v60 = vsel %vm3481_vm2, %v880_v47, 0 }
  0xa5   : > { %v939_v17 = vpop.permute.xlu0 %938  ;;  %v941_v27 = vpop.permute.xlu1 %940 }
  0xa6   : > { %v989_v23 = vsel %vm954_vm3, %v847_v14, %v939_v17  ;;  %v3598_v50 = vsel %vm954_vm3, %v848_v39, %v941_v27  ;;  %v3638_v14 = vsel %vm3481_vm2, %v860_v30, 0  ;;  %v791_v17 = vor.u32 %v789_v37, %v788_v7  ;;  %v3196_v7 = vld [vmem:[%s4144_s3 + $0xc8] sm:$0xff]  }
  0xa7   : > { %1260 = vmatmul.mubr.bf16.vlgmr.msra.gmra.mxu1 %v989_v23  ;;  %v841_v23 = vsel %vm3557_vm6, 0, %v728_v10  ;;  %v803_v27 = vshll.u32 %v3437_v35, 16  ;;  %v795_v37 = vrot.slane %v793_v19, 7  ;;  %v810_v35 = vshll.u32 %v3455_v42, 16 }
  0xa8   : > { %1540 = vmatpush1.bf16.msra.mxu1 %v3182_v15  ;;  %2800 = vmatprep.mubr.msk.bf16.mxu1 %vm954_vm3, %v3572_v18  ;;  %v740_v15 = vshll.u32 %v3432_v33, 16 }
  0xa9   : > { %v923_v38 = vpop.permute.xlu0 %922  ;;  %1541 = vmatprep.subr.bf16.mxu1 %v3249_v21  ;;  %v925_v58 = vpop.permute.xlu1 %924  ;;  %v798_v54 = vor.u32 %v796_v0, %v795_v37  ;;  %v881_v0 = vrot.slane %v803_v27, 1  ;;  %v883_v37 = vrot.slane %v810_v35, 1 }
  0xaa   : > { %v957_v44 = vsel %vm954_vm3, %v839_v26, %v923_v38  ;;  %v3621_v1 = vsel %vm954_vm3, %v840_v59, %v925_v58  ;;  %v862_v26 = vor.u32 %v861_v13, %v730_v12  ;;  %v737_v38 = vshrl.u32 %v3432_v33, 16  ;;  %v3197_v13 = vld [vmem:[%s4144_s3 + $0x60] sm:$0xff]  }
  0xab   : > { %1196 = vmatmul.mubr.bf16.vlgmr.msra.gmra.mxu0 %v957_v44  ;;  %v3193_v44 = vld [vmem:[%s4144_s3 + $0x70] sm:$0xff]   ;;  %v863_v48 = vrot.slane %v740_v15, 1  ;;  %v842_v59 = vsel %vm3557_vm6, 0, %v735_v43  ;;  %v882_v12 = vor.u32 %v881_v0, %v800_v56 }
  0xac   : > { %1948 = vmatpush1.bf16.msra.mxu0 %v3183_v28  ;;  %1542 = vmatpush1.bf16.msra.mxu1 %v3184_v34  ;;  %v850_v34 = vsel %vm3557_vm6, 0, %v791_v17  ;;  %v3678_v41 = vsel %vm3481_vm2, %v862_v26, 0  ;;  %v739_v55 = vrot.slane %v737_v38, 7  ;;  %v754_v17 = vshll.u32 %v3465_v45, 16 }
  0xad   : > { %1949 = vmatprep.subr.bf16.mxu0 %v3249_v21  ;;  %2792 = vmatprep.mubr.msk.bf16.mxu0 %vm954_vm3, %v3595_v46  ;;  %v943_v9 = vpop.permute.xlu0 %942  ;;  %v927_v22 = vpop.permute.xlu1 %926  ;;  %v864_v30 = vor.u32 %v863_v48, %v737_v38  ;;  %v3745_v32 = vsel %vm3481_vm2, %v882_v12, 0  ;;  %v817_v38 = vshll.u32 %v3474_v49, 16 }
  0xae   : > { %1543 = vmatprep.subr.bf16.mxu1 %v3249_v21  ;;  %v3643_v16 = vsel %vm954_vm3, %v849_v5, %v943_v9  ;;  %v3665_v28 = vsel %vm954_vm3, %v841_v23, %v927_v22  ;;  %v851_v5 = vsel %vm3557_vm6, 0, %v798_v54  ;;  %v802_v9 = vrot.slane %v800_v56, 7  ;;  %v3198_v23 = vld [vmem:[%s4144_s3 + $0xc0] sm:$0xff]  }
  0xaf   : > { %1268 = vmatmul.mubr.bf16.gmra.mxu1 %v3598_v50  ;;  %v3720_v11 = vsel %vm3481_vm2, %v864_v30, 0  ;;  %v867_v47 = vrot.slane %v754_v17, 1  ;;  %v3202_v30 = vld [vmem:[%s4144_s3 + $0x110] sm:$0xff]  }
  0xb0   : > { %1950 = vmatpush1.bf16.msra.mxu0 %v3186_v52  ;;  %1544 = vmatpush1.bf16.msra.mxu1 %v3187_v29  ;;  %v747_v52 = vshll.u32 %v3451_v40, 16  ;;  %v3194_v29 = vld [vmem:[%s4144_s3 + $0xd0] sm:$0xff]   ;;  %v805_v22 = vor.u32 %v803_v27, %v802_v9  ;;  %v3199_v27 = vld [vmem:[%s4144_s3 + $0xb8] sm:$0xff]   ;;  %v3203_v9 = vld [vmem:[%s4144_s3 + $0xa8] sm:$0xff]  }
  0xb1   : > { %1951 = vmatprep.subr.bf16.mxu0 %v3249_v21  ;;  %2801 = vmatprep.mubr.msk.bf16.mxu1 %vm954_vm3, %v3616_v63  ;;  %v945_v39 = vpop.permute.xlu0 %944  ;;  %v929_v58 = vpop.permute.xlu1 %928 }
  0xb2   : > { %1545 = vmatprep.subr.bf16.mxu1 %v3249_v21  ;;  %v3687_v33 = vsel %vm954_vm3, %v850_v34, %v945_v39  ;;  %v3200_v39 = vld [vmem:[%s4144_s3 + $0x118] sm:$0xff]  }
  0xb3   : > { %1204 = vmatmul.mubr.bf16.gmra.mxu0 %v3621_v1 }
  0xb4   : > { %1952 = vmatpush1.bf16.msra.mxu0 %v3188_v4  ;;  %1546 = vmatpush1.bf16.msra.mxu1 %v3189_v6  ;;  %v3709_v4 = vsel %vm954_vm3, %v842_v59, %v929_v58  ;;  %v742_v6 = vor.u32 %v740_v15, %v739_v55  ;;  %v744_v15 = vshrl.u32 %v3451_v40, 16  ;;  %v761_v58 = vshll.u32 %v3491_v53, 16 }
  0xb5   : > { %2793 = vmatprep.mubr.msk.bf16.mxu0 %vm954_vm3, %v3638_v14  ;;  %1953 = vmatprep.subr.bf16.mxu0 %v3249_v21  ;;  %v947_v10 = vpop.permute.xlu0 %946  ;;  %v931_v26 = vpop.permute.xlu1 %930 }
  0xb6   : > { %1547 = vmatprep.subr.bf16.mxu1 %v3249_v21  ;;  %v3733_v19 = vsel %vm954_vm3, %v851_v5, %v947_v10  ;;  %v843_v20 = vsel %vm3557_vm6, 0, %v742_v6 }
  0xb7   : > { %1276 = vmatmul.mubr.bf16.gmra.mxu1 %v3643_v16 }
  0xb8   : > { %1954 = vmatpush1.bf16.msra.mxu0 %v3190_v31  ;;  %2802 = vmatprep.mubr.msk.bf16.mxu1 %vm954_vm3, %v3656_v24  ;;  %v865_v31 = vrot.slane %v747_v52, 1 }
  0xb9   : > { %1548 = vmatpush1.bf16.msra.mxu1 %v3191_v25  ;;  %1955 = vmatprep.subr.bf16.mxu0 %v3249_v21  ;;  %v807_v25 = vshrl.u32 %v3455_v42, 16  ;;  %v3755_v42 = vsel %vm954_vm3, %v843_v20, %v931_v26  ;;  %v949_v48 = vpop.permute.xlu0 %948  ;;  %v933_v0 = vpop.permute.xlu1 %932  ;;  %v3205_v26 = vld [vmem:[%s4144_s3 + $0xa0] sm:$0xff]  }
  0xba   : > { %1549 = vmatprep.subr.bf16.mxu1 %v3249_v21  ;;  %v866_v34 = vor.u32 %v865_v31, %v744_v15 }
  0xbb   : > { %1212 = vmatmul.mubr.bf16.gmra.mxu0 %v3665_v28  ;;  %v809_v43 = vrot.slane %v807_v25, 7  ;;  %v884_v56 = vor.u32 %v883_v37, %v807_v25  ;;  %v869_v25 = vrot.slane %v761_v58, 1 }
  0xbc   : > { %1956 = vmatpush1.bf16.msra.mxu0 %v3192_v36  ;;  %2794 = vmatprep.mubr.msk.bf16.mxu0 %vm954_vm3, %v3678_v41  ;;  %v746_v36 = vrot.slane %v744_v15, 7  ;;  %v3767_v54 = vsel %vm3481_vm2, %v866_v34, 0  ;;  %v3204_v15 = vld [vmem:[%s4144_s3 + $0x108] sm:$0xff]  }
  0xbd   : > { %1550 = vmatpush1.bf16.msra.mxu1 %v3193_v44  ;;  %1957 = vmatprep.subr.bf16.mxu0 %v3249_v21  ;;  %v751_v44 = vshrl.u32 %v3465_v45, 16  ;;  %v3201_v45 = vld [vmem:[%s4144_s3 + $0xb0] sm:$0xff]   ;;  %v812_v40 = vor.u32 %v810_v35, %v809_v43  ;;  %v3790_v6 = vsel %vm3481_vm2, %v884_v56, 0  ;;  %v885_v35 = vrot.slane %v817_v38, 1  ;;  %v951_v31 = vpop.permute.xlu0 %950 }
  0xbe   : > { %1551 = vmatprep.subr.bf16.mxu1 %v3249_v21  ;;  %v749_v55 = vor.u32 %v747_v52, %v746_v36  ;;  %v935_v36 = vpop.permute.xlu1 %934 }
  0xbf   : > { %1284 = vmatmul.mubr.bf16.gmra.mxu1 %v3687_v33  ;;  %v868_v52 = vor.u32 %v867_v47, %v751_v44  ;;  %v853_v12 = vsel %vm3557_vm6, 0, %v812_v40 }
  0xc0   : > { %2803 = vmatprep.mubr.msk.bf16.mxu1 %vm954_vm3, %v3700_v60  ;;  %1958 = vmatpush1.bf16.msra.mxu0 %v3194_v29  ;;  %v852_v29 = vsel %vm3557_vm6, 0, %v805_v22  ;;  %v844_v5 = vsel %vm3557_vm6, 0, %v749_v55 }
  0xc1   : > { %1552 = vmatpush1.bf16.msra.mxu1 %v3195_v62  ;;  %1959 = vmatprep.subr.bf16.mxu0 %v3249_v21  ;;  %v3779_v59 = vsel %vm954_vm3, %v852_v29, %v949_v48  ;;  %v753_v62 = vrot.slane %v751_v44, 7  ;;  %v3800_v10 = vsel %vm954_vm3, %v844_v5, %v933_v0  ;;  %v953_v47 = vpop.permute.xlu0 %952 }
  0xc2   : > { %1553 = vmatprep.subr.bf16.mxu1 %v3249_v21 }
  0xc3   : > { %1220 = vmatmul.mubr.bf16.gmra.mxu0 %v3709_v4 }
  0xc4   : > { %2795 = vmatprep.mubr.msk.bf16.mxu0 %vm954_vm3, %v3720_v11  ;;  %1960 = vmatpush1.bf16.msra.mxu0 %v3196_v7  ;;  %v814_v7 = vshrl.u32 %v3474_v49, 16  ;;  %v912_v49 = vsel %vm3481_vm2, %v868_v52, 0 }
  0xc5   : > { %1554 = vmatpush1.bf16.msra.mxu1 %v3197_v13  ;;  %1961 = vmatprep.subr.bf16.mxu0 %v3249_v21  ;;  %v756_v13 = vor.u32 %v754_v17, %v753_v62  ;;  %v3819_v17 = vsel %vm954_vm3, %v853_v12, %v951_v31 }
  0xc6   : > { %1563 = vmatprep.subr.bf16.mxu1 %v3249_v21  ;;  %v886_v20 = vor.u32 %v885_v35, %v814_v7  ;;  %v816_v22 = vrot.slane %v814_v7, 7 }
  0xc7   : > { %1292 = vmatmul.mubr.bf16.gmra.mxu1 %v3733_v19  ;;  %v845_v34 = vsel %vm3557_vm6, 0, %v756_v13 }
  0xc8   : > { %2804 = vmatprep.mubr.msk.bf16.mxu1 %vm954_vm3, %v3745_v32  ;;  %1962 = vmatpush1.bf16.msra.mxu0 %v3198_v23  ;;  %v758_v23 = vshrl.u32 %v3491_v53, 16  ;;  %v3206_v53 = vld [vmem:[%s4144_s3 + $0x100] sm:$0xff]   ;;  %v819_v37 = vor.u32 %v817_v38, %v816_v22  ;;  %v981_v44 = vsel %vm954_vm3, %v845_v34, %v935_v36 }
  0xc9   : > { %1564 = vmatpush2.bf16.msra.mxu1 %v3199_v27  ;;  %1971 = vmatprep.subr.bf16.mxu0 %v3249_v21  ;;  %v3829_v27 = vsel %vm3481_vm2, %v886_v20, 0 }
  0xca   : > { %1565 = vmatprep.subr.bf16.mxu1 %v3249_v21  ;;  %v760_v43 = vrot.slane %v758_v23, 7  ;;  %v854_v48 = vsel %vm3557_vm6, 0, %v819_v37 }
  0xcb   : > { %1228 = vmatmul.mubr.bf16.gmra.mxu0 %v3755_v42  ;;  %v3841_v55 = vsel %vm954_vm3, %v854_v48, %v953_v47 }
  0xcc   : > { %2796 = vmatprep.mubr.msk.bf16.mxu0 %vm954_vm3, %v3767_v54  ;;  %1972 = vmatpush2.bf16.msra.mxu0 %v3200_v39  ;;  %v870_v39 = vor.u32 %v869_v25, %v758_v23  ;;  %v763_v29 = vor.u32 %v761_v58, %v760_v43 }
  0xcd   : > { %1566 = vmatpush2.bf16.msra.mxu1 %v3201_v45  ;;  %1973 = vmatprep.subr.bf16.mxu0 %v3249_v21 }
  0xce   : > { %1567 = vmatprep.subr.bf16.mxu1 %v3249_v21  ;;  %v913_v38 = vsel %vm3481_vm2, %v870_v39, 0  ;;  %v846_v56 = vsel %vm3557_vm6, 0, %v763_v29 }
  0xcf   : > { %1300 = vmatmul.mubr.bf16.gmra.mxu1 %v3779_v59 }
  0xd0   : > { %2805 = vmatprep.mubr.msk.bf16.mxu1 %vm954_vm3, %v3790_v6  ;;  %1974 = vmatpush2.bf16.msra.mxu0 %v3202_v30 }
  0xd1   : > { %1568 = vmatpush2.bf16.msra.mxu1 %v3203_v9  ;;  %1975 = vmatprep.subr.bf16.mxu0 %v3249_v21 }
  0xd2   : > { %1569 = vmatprep.subr.bf16.mxu1 %v3249_v21 }
  0xd3   : > { %1236 = vmatmul.mubr.bf16.gmra.mxu0 %v3800_v10 }
  0xd4   : > { %2797 = vmatprep.mubr.msk.bf16.mxu0 %vm954_vm3, %v912_v49  ;;  %1976 = vmatpush2.bf16.msra.mxu0 %v3204_v15 }
  0xd5   : > { %1570 = vmatpush2.bf16.msra.mxu1 %v3205_v26  ;;  %1977 = vmatprep.subr.bf16.mxu0 %v3249_v21  ;;  %v937_v21 = vpop.permute.xlu1 %936 }
  0xd6   : > { %v985_v45 = vsel %vm954_vm3, %v846_v56, %v937_v21 }
  0xd7   : > { %1308 = vmatmul.mubr.bf16.gmra.mxu1 %v3819_v17 }
  0xd8   : > { %2806 = vmatprep.mubr.msk.bf16.mxu1 %vm954_vm3, %v3829_v27  ;;  %1978 = vmatpush2.bf16.msra.mxu0 %v3206_v53 }
  0xdb   : > { %1244 = vmatmul.mubr.bf16.gmra.mxu0 %v981_v44 }
  0xdc   : > { %2798 = vmatprep.mubr.msk.bf16.mxu0 %vm954_vm3, %v913_v38 }
  0xdf   : > { %1316 = vmatmul.mubr.bf16.gmra.mxu1 %v3841_v55 }
  0xe0   : > { %2845 = vmatprep.mubr.msk.bf16.mxu1 %vm954_vm3, %v3595_v46  ;;  %v1402_v46 = vshll.u32 %v3501_v57, 16 }
  0xe3   : > { %1252 = vmatmul.mubr.bf16.gmra.mxu0 %v985_v45 }
  0xe4   : > { %2899 = vmatprep.mubr.msk.bf16.mxu0 %vm954_vm3, %v3638_v14 }
  0xe7   : > { %1572 = vmatmul.mubr.bf16.vlgmr.msra.gmra.mxu1 %v3621_v1  ;;  %v1399_v1 = vshrl.u32 %v3501_v57, 16  ;;  %v1425_v57 = vpop.permute.xlu0 %1424 }
  0xe8   : > { %2846 = vmatprep.mubr.msk.bf16.mxu1 %vm954_vm3, %v3638_v14  ;;  %v1416_v14 = vrot.slane %v1402_v46, 1 }
  0xeb   : > { %1980 = vmatmul.mubr.bf16.vlgmr.msra.gmra.mxu0 %v3665_v28 }
  0xec   : > { %2900 = vmatprep.mubr.msk.bf16.mxu0 %vm954_vm3, %v3678_v41 }
  0xef   : > { %1580 = vmatmul.mubr.bf16.gmra.mxu1 %v3665_v28  ;;  %v1810_v28 = vshll.u32 %v3514_v61, 16 }
  0xf0   : > { %2847 = vmatprep.mubr.msk.bf16.mxu1 %vm954_vm3, %v3678_v41  ;;  %v1417_v41 = vor.u32 %v1416_v14, %v1399_v1 }
  0xf1   : > { %v1824_v58 = vrot.slane %v1810_v28, 1 }
  0xf3   : > { %1988 = vmatmul.mubr.bf16.gmra.mxu0 %v3709_v4 }
  0xf4   : > { %2901 = vmatprep.mubr.msk.bf16.mxu0 %vm954_vm3, %v3720_v11 }
  0xf7   : > { %1588 = vmatmul.mubr.bf16.gmra.mxu1 %v3709_v4  ;;  %v1401_v4 = vrot.slane %v1399_v1, 7 }
  0xf8   : > { %2848 = vmatprep.mubr.msk.bf16.mxu1 %vm954_vm3, %v3720_v11  ;;  %v1422_v11 = vsel %vm3481_vm2, %v1417_v41, 0 }
  0xfb   : > { %1996 = vmatmul.mubr.bf16.gmra.mxu0 %v3755_v42 }
  0xfc   : > { %2902 = vmatprep.mubr.msk.bf16.mxu0 %vm954_vm3, %v3767_v54 }
  0xff   : > { %1596 = vmatmul.mubr.bf16.gmra.mxu1 %v3755_v42  ;;  %v1404_v42 = vor.u32 %v1402_v46, %v1401_v4 }
 0x100   : > { %2849 = vmatprep.mubr.msk.bf16.mxu1 %vm954_vm3, %v3767_v54  ;;  %v1807_v54 = vshrl.u32 %v3514_v61, 16  ;;  %v1833_v61 = vpop.permute.xlu1 %1832 }
 0x101   : > { %v1414_v40 = vsel %vm3557_vm6, 0, %v1404_v42 }
 0x102   : > { %v1825_v52 = vor.u32 %v1824_v58, %v1807_v54  ;;  %v1809_v62 = vrot.slane %v1807_v54, 7  ;;  %v1430_v30 = vsel %vm954_vm3, %v1414_v40, %v1425_v57 }
 0x103   : > { %2004 = vmatmul.mubr.bf16.gmra.mxu0 %v3800_v10 }
 0x104   : > { %2903 = vmatprep.mubr.msk.bf16.mxu0 %vm954_vm3, %v912_v49  ;;  %v1830_v0 = vsel %vm3481_vm2, %v1825_v52, 0  ;;  %v1812_v5 = vor.u32 %v1810_v28, %v1809_v62  ;;  %v1835_v13 = vpop.permute.xlu1 %1834 }
 0x106   : > { %v1822_v7 = vsel %vm3557_vm6, 0, %v1812_v5 }
 0x107   : > { %1604 = vmatmul.mubr.bf16.gmra.mxu1 %v3800_v10  ;;  %v1838_v35 = vsel %vm954_vm3, %v1822_v7, %v1833_v61 }
 0x108   : > { %2850 = vmatprep.mubr.msk.bf16.mxu1 %vm954_vm3, %v912_v49 }
 0x10b   : > { %2012 = vmatmul.mubr.bf16.gmra.mxu0 %v981_v44 }
 0x10c   : > { %2904 = vmatprep.mubr.msk.bf16.mxu0 %vm954_vm3, %v913_v38 }
 0x10f   : > { %1612 = vmatmul.mubr.bf16.gmra.mxu1 %v981_v44 }
 0x110   : > { %2851 = vmatprep.mubr.msk.bf16.mxu1 %vm954_vm3, %v913_v38 }
 0x113   : > { %2020 = vmatmul.mubr.bf16.gmra.mxu0 %v985_v45 }
 0x114   : > { %2905 = vmatprep.mubr.msk.bf16.mxu0 %vm954_vm3, %v1422_v11 }
 0x117   : > { %1620 = vmatmul.mubr.bf16.gmra.mxu1 %v985_v45 }
 0x118   : > { %2852 = vmatprep.mubr.msk.bf16.mxu1 %vm954_vm3, %v1422_v11 }
 0x11b   : > { %2028 = vmatmul.mubr.bf16.gmra.mxu0 %v1430_v30 }
 0x11c   : > { %2906 = vmatprep.mubr.msk.bf16.mxu0 %vm954_vm3, %v1830_v0 }
 0x11f   : > { %1628 = vmatmul.mubr.bf16.gmra.mxu1 %v1430_v30 }
 0x120   : > { %2853 = vmatprep.mubr.msk.bf16.mxu1 %vm954_vm3, %v3572_v18  ;;  %v1409_v18 = vshll.u32 %v3544_v2, 16 }
 0x123   : > { %2036 = vmatmul.mubr.bf16.gmra.mxu0 %v1838_v35 }
 0x124   : > { %2907 = vmatprep.mubr.msk.bf16.mxu0 %vm954_vm3, %v3616_v63 }
 0x127   : > { %1636 = vmatmul.mubr.bf16.gmra.mxu1 %v3598_v50  ;;  %v1406_v50 = vshrl.u32 %v3544_v2, 16  ;;  %v1814_v2 = vshrl.u32 %v3550_v3, 16 }
 0x128   : > { %2854 = vmatprep.mubr.msk.bf16.mxu1 %vm954_vm3, %v3616_v63  ;;  %v1418_v63 = vrot.slane %v1409_v18, 1 }
 0x129   : > { %v1816_v10 = vrot.slane %v1814_v2, 7 }
 0x12b   : > { %2044 = vmatmul.mubr.bf16.gmra.mxu0 %v3643_v16 }
 0x12c   : > { %2908 = vmatprep.mubr.msk.bf16.mxu0 %vm954_vm3, %v3656_v24 }
 0x12f   : > { %1644 = vmatmul.mubr.bf16.gmra.mxu1 %v3643_v16  ;;  %v1817_v16 = vshll.u32 %v3550_v3, 16 }
 0x130   : > { %2855 = vmatprep.mubr.msk.bf16.mxu1 %vm954_vm3, %v3656_v24  ;;  %v1419_v24 = vor.u32 %v1418_v63, %v1406_v50 }
 0x131   : > { %v1819_v49 = vor.u32 %v1817_v16, %v1816_v10 }
 0x133   : > { %2052 = vmatmul.mubr.bf16.gmra.mxu0 %v3687_v33  ;;  %v1823_v15 = vsel %vm3557_vm6, 0, %v1819_v49 }
 0x134   : > { %2909 = vmatprep.mubr.msk.bf16.mxu0 %vm954_vm3, %v3700_v60  ;;  %v1842_v31 = vsel %vm954_vm3, %v1823_v15, %v1835_v13 }
 0x137   : > { %1652 = vmatmul.mubr.bf16.gmra.mxu1 %v3687_v33  ;;  %v1408_v33 = vrot.slane %v1406_v50, 7 }
 0x138   : > { %2856 = vmatprep.mubr.msk.bf16.mxu1 %vm954_vm3, %v3700_v60  ;;  %v1423_v60 = vsel %vm3481_vm2, %v1419_v24, 0 }
 0x13b   : > { %2060 = vmatmul.mubr.bf16.gmra.mxu0 %v3733_v19 }
 0x13c   : > { %2910 = vmatprep.mubr.msk.bf16.mxu0 %vm954_vm3, %v3745_v32 }
 0x13f   : > { %1660 = vmatmul.mubr.bf16.gmra.mxu1 %v3733_v19  ;;  %v1411_v19 = vor.u32 %v1409_v18, %v1408_v33 }
 0x140   : > { %2857 = vmatprep.mubr.msk.bf16.mxu1 %vm954_vm3, %v3745_v32  ;;  %v1826_v32 = vrot.slane %v1817_v16, 1 }
 0x142   : > { %v1827_v9 = vor.u32 %v1826_v32, %v1814_v2 }
 0x143   : > { %2068 = vmatmul.mubr.bf16.gmra.mxu0 %v3779_v59 }
 0x144   : > { %2911 = vmatprep.mubr.msk.bf16.mxu0 %vm954_vm3, %v3790_v6  ;;  %v1831_v3 = vsel %vm3481_vm2, %v1827_v9, 0 }
 0x147   : > { %1668 = vmatmul.mubr.bf16.gmra.mxu1 %v3779_v59  ;;  %v1427_v59 = vpop.permute.xlu0 %1426 }
 0x148   : > { %2858 = vmatprep.mubr.msk.bf16.mxu1 %vm954_vm3, %v3790_v6  ;;  %v1415_v6 = vsel %vm3557_vm6, 0, %v1411_v19 }
 0x149   : > { %v1434_v12 = vsel %vm954_vm3, %v1415_v6, %v1427_v59 }
 0x14b   : > { %2076 = vmatmul.mubr.bf16.gmra.mxu0 %v3819_v17 }
 0x14c   : > { %2912 = vmatprep.mubr.msk.bf16.mxu0 %vm954_vm3, %v3829_v27 }
 0x14f   : > { %1676 = vmatmul.mubr.bf16.gmra.mxu1 %v3819_v17 }
 0x150   : > { %2859 = vmatprep.mubr.msk.bf16.mxu1 %vm954_vm3, %v3829_v27 }
 0x153   : > { %2084 = vmatmul.mubr.bf16.gmra.mxu0 %v3841_v55 }
 0x154   : > { %2913 = vmatprep.mubr.msk.bf16.mxu0 %vm954_vm3, %v1423_v60 }
 0x157   : > { %1684 = vmatmul.mubr.bf16.gmra.mxu1 %v3841_v55 }
 0x158   : > { %2860 = vmatprep.mubr.msk.bf16.mxu1 %vm954_vm3, %v1423_v60 }
 0x15b   : > { %2092 = vmatmul.mubr.bf16.gmra.mxu0 %v1434_v12 }
 0x15c   : > { %2914 = vmatprep.mubr.msk.bf16.mxu0 %vm954_vm3, %v1831_v3 }
 0x15f   : > { %1692 = vmatmul.mubr.bf16.gmra.mxu1 %v1434_v12 }
 0x163   : > { %2100 = vmatmul.mubr.bf16.gmra.mxu0 %v1842_v31 }
 0x167   : > { %v3952_v20 = vpop.f32.mrf.mxu1 }
 0x169   : > { %v1263_v22 = vpop.f32.mrf.mxu1 }
 0x16b   : > { %v3954_v23 = vpop.f32.mrf.mxu0  ;;  %v3956_v25 = vpop.f32.mrf.mxu1 }
 0x16d   : > { %v1199_v51 = vpop.f32.mrf.mxu0  ;;  %v1266_v26 = vpop.f32.mrf.mxu1 }
 0x16f   : > { %v3958_v17 = vpop.f32.mrf.mxu0  ;;  %v3960_v34 = vpop.f32.mrf.mxu1 }
 0x171   : > { %v1202_v53 = vpop.f32.mrf.mxu0  ;;  %v1271_v8 = vpop.f32.mrf.mxu1 }
 0x173   : > { %v3962_v36 = vpop.f32.mrf.mxu0  ;;  %v3964_v27 = vpop.f32.mrf.mxu1 }
 0x175   : > { %v1207_v37 = vpop.f32.mrf.mxu0  ;;  %v1274_v39 = vpop.f32.mrf.mxu1 }
 0x176   : > { %v4020_v39 = vld [vmem:[%s4145_s4] ss:$0 sm:$0xff] }
 0x177   : > { %v3966_v43 = vpop.f32.mrf.mxu0  ;;  %v3968_v44 = vpop.f32.mrf.mxu1 }
 0x179   : > { %v1210_v47 = vpop.f32.mrf.mxu0  ;;  %v1279_v48 = vpop.f32.mrf.mxu1 }
 0x17b   : > { %v3970_v38 = vpop.f32.mrf.mxu0  ;;  %v3972_v29 = vpop.f32.mrf.mxu1 }
 0x17d   : > { %v1215_v55 = vpop.f32.mrf.mxu0  ;;  %v1282_v21 = vpop.f32.mrf.mxu1 }
 0x17f   : > { %v3974_v56 = vpop.f32.mrf.mxu0  ;;  %v3976_v45 = vpop.f32.mrf.mxu1 }
 0x181   : > { %v1218_v46 = vpop.f32.mrf.mxu0  ;;  %v1287_v1 = vpop.f32.mrf.mxu1 }
 0x183   : > { %v3978_v14 = vpop.f32.mrf.mxu0  ;;  %v3980_v28 = vpop.f32.mrf.mxu1 }
 0x185   : > { %v1223_v41 = vpop.f32.mrf.mxu0  ;;  %v1290_v4 = vpop.f32.mrf.mxu1 }
 0x187   : > { %v3982_v11 = vpop.f32.mrf.mxu0  ;;  %v3984_v42 = vpop.f32.mrf.mxu1 }
 0x189   : > { %v1226_v54 = vpop.f32.mrf.mxu0  ;;  %v1295_v58 = vpop.f32.mrf.mxu1 }
 0x18b   : > { %v3986_v57 = vpop.f32.mrf.mxu0  ;;  %v3988_v40 = vpop.f32.mrf.mxu1 }
 0x18d   : > { %v1231_v52 = vpop.f32.mrf.mxu0  ;;  %v1298_v62 = vpop.f32.mrf.mxu1 }
 0x18f   : > { %v3990_v30 = vpop.f32.mrf.mxu0  ;;  %v3992_v0 = vpop.f32.mrf.mxu1 }
 0x191   : > { %v1234_v5 = vpop.f32.mrf.mxu0  ;;  %v1303_v61 = vpop.f32.mrf.mxu1 }
 0x193   : > { %v3994_v7 = vpop.f32.mrf.mxu0  ;;  %v3996_v35 = vpop.f32.mrf.mxu1 }
 0x195   : > { %v1239_v18 = vpop.f32.mrf.mxu0  ;;  %v1306_v50 = vpop.f32.mrf.mxu1 }
 0x197   : > { %v3998_v63 = vpop.f32.mrf.mxu0  ;;  %v4000_v16 = vpop.f32.mrf.mxu1 }
 0x199   : > { %v1242_v24 = vpop.f32.mrf.mxu0  ;;  %v1311_v33 = vpop.f32.mrf.mxu1 }
 0x19b   : > { %v4002_v60 = vpop.f32.mrf.mxu0  ;;  %v4004_v19 = vpop.f32.mrf.mxu1 }
 0x19d   : > { %v1247_v2 = vpop.f32.mrf.mxu0  ;;  %v1314_v32 = vpop.f32.mrf.mxu1 }
 0x19f   : > { %v4006_v59 = vpop.f32.mrf.mxu0  ;;  %v4008_v6 = vpop.f32.mrf.mxu1 }
 0x1a1   : > { %v1250_v9 = vpop.f32.mrf.mxu0  ;;  %v1319_v10 = vpop.f32.mrf.mxu1 }
 0x1a3   : > { %v4010_v12 = vpop.f32.mrf.mxu0  ;;  %v4012_v3 = vpop.f32.mrf.mxu1 }
 0x1a5   : > { %v1255_v49 = vpop.f32.mrf.mxu0  ;;  %v1322_v13 = vpop.f32.mrf.mxu1 }
 0x1a7   : > { %v4014_v15 = vpop.f32.mrf.mxu0  ;;  %v1573_v31 = vpop.f32.mrf.mxu1 }
 0x1a8   : > { %v1700_v26 = vadd.f32 %v1573_v31, %v3954_v23 }
 0x1a9   : > { %v1258_v22 = vpop.f32.mrf.mxu0  ;;  %v1575_v51 = vpop.f32.mrf.mxu1 }
 0x1ab   : > { %v1576_v53 = vpop.f32.mrf.mxu1  ;;  %v1981_v8 = vpop.f32.mrf.mxu0 }
 0x1ac   : > { %v2108_v37 = vadd.f32 %v1981_v8, %v1700_v26  ;;  %v1701_v55 = vadd.f32 %v1576_v53, %v3958_v17 }
 0x1ad   : > { %v1578_v47 = vpop.f32.mrf.mxu1  ;;  %v1983_v48 = vpop.f32.mrf.mxu0 }
 0x1ae   : > { %v2211_v1 = vadd.f32 %v4020_v39, %v2108_v37 }
 0x1af   : > { %v1581_v21 = vpop.f32.mrf.mxu1  ;;  %v1984_v46 = vpop.f32.mrf.mxu0 }
 0x1b0   : > { %v2109_v41 = vadd.f32 %v1984_v46, %v1701_v55  ;;  %v1702_v54 = vadd.f32 %v1581_v21, %v3962_v36  ;;  %v2243_v5 = vmax.f32 %v2211_v1, 0.0 }
 0x1b1   : > { %v1583_v4 = vpop.f32.mrf.mxu1  ;;  %v1986_v23 = vpop.f32.mrf.mxu0 }
 0x1b2   : > { %v2212_v58 = vadd.f32 %v4020_v39, %v2109_v41 }
 0x1b3   : > { %v1584_v52 = vpop.f32.mrf.mxu1  ;;  %v1989_v62 = vpop.f32.mrf.mxu0 }
 0x1b4   : > { %v2244_v61 = vmax.f32 %v2212_v58, 0.0  ;;  %v2110_v18 = vadd.f32 %v1989_v62, %v1702_v54  ;;  %v1703_v33 = vadd.f32 %v1584_v52, %v3966_v43 }
 0x1b5   : > { %v1586_v50 = vpop.f32.mrf.mxu1  ;;  %v1991_v24 = vpop.f32.mrf.mxu0 }
 0x1b6   : > { %v2995_v17 = vpack.c.bf16 %v2244_v61, %v2243_v5  ;;  %v2213_v36 = vadd.f32 %v4020_v39, %v2110_v18 }
 0x1b7   : > { %v1589_v2 = vpop.f32.mrf.mxu1  ;;  %v1992_v32 = vpop.f32.mrf.mxu0 }
 0x1b8   : > { %2996 = vst [vmem:[%s4028_s8] sm:$0xff] %v2995_v17   ;;  %v2111_v9 = vadd.f32 %v1992_v32, %v1703_v33  ;;  %v1704_v13 = vadd.f32 %v1589_v2, %v3970_v38  ;;  %v2245_v26 = vmax.f32 %v2213_v36, 0.0 }
 0x1b9   : > { %v1591_v10 = vpop.f32.mrf.mxu1  ;;  %v1994_v49 = vpop.f32.mrf.mxu0 }
 0x1ba   : > { %v2214_v31 = vadd.f32 %v4020_v39, %v2111_v9 }
 0x1bb   : > { %v1592_v22 = vpop.f32.mrf.mxu1  ;;  %v1997_v51 = vpop.f32.mrf.mxu0 }
 0x1bc   : > { %v2246_v43 = vmax.f32 %v2214_v31, 0.0  ;;  %v2112_v53 = vadd.f32 %v1997_v51, %v1704_v13  ;;  %v1705_v48 = vadd.f32 %v1592_v22, %v3974_v56 }
 0x1bd   : > { %v1594_v8 = vpop.f32.mrf.mxu1  ;;  %v1999_v37 = vpop.f32.mrf.mxu0 }
 0x1be   : > { %v3000_v47 = vpack.c.bf16 %v2246_v43, %v2245_v26  ;;  %v2215_v46 = vadd.f32 %v4020_v39, %v2112_v53 }
 0x1bf   : > { %v1597_v55 = vpop.f32.mrf.mxu1  ;;  %v2000_v21 = vpop.f32.mrf.mxu0 }
 0x1c0   : > { %3072 = vst [vmem:[%s4028_s8 + $0x8] sm:$0xff] %v3000_v47   ;;  %v2113_v1 = vadd.f32 %v2000_v21, %v1705_v48  ;;  %v1706_v4 = vadd.f32 %v1597_v55, %v3978_v14  ;;  %v2247_v52 = vmax.f32 %v2215_v46, 0.0 }
 0x1c1   : > { %v1599_v38 = vpop.f32.mrf.mxu1  ;;  %v2002_v41 = vpop.f32.mrf.mxu0 }
 0x1c2   : > { %v2216_v23 = vadd.f32 %v4020_v39, %v2113_v1 }
 0x1c3   : > { %v1600_v54 = vpop.f32.mrf.mxu1  ;;  %v2005_v58 = vpop.f32.mrf.mxu0 }
 0x1c4   : > { %v2248_v62 = vmax.f32 %v2216_v23, 0.0  ;;  %v2114_v5 = vadd.f32 %v2005_v58, %v1706_v4  ;;  %v1707_v50 = vadd.f32 %v1600_v54, %v3982_v11 }
 0x1c5   : > { %v1602_v61 = vpop.f32.mrf.mxu1  ;;  %v2007_v56 = vpop.f32.mrf.mxu0 }
 0x1c6   : > { %v3005_v18 = vpack.c.bf16 %v2248_v62, %v2247_v52  ;;  %v2217_v33 = vadd.f32 %v4020_v39, %v2114_v5 }
 0x1c7   : > { %v1605_v24 = vpop.f32.mrf.mxu1  ;;  %v2008_v17 = vpop.f32.mrf.mxu0 }
 0x1c8   : > { %3073 = vst [vmem:[%s4028_s8 + $0x10] sm:$0xff] %v3005_v18   ;;  %v2115_v2 = vadd.f32 %v2008_v17, %v1707_v50  ;;  %v1708_v36 = vadd.f32 %v1605_v24, %v3986_v57  ;;  %v2249_v13 = vmax.f32 %v2217_v33, 0.0 }
 0x1c9   : > { %v1607_v14 = vpop.f32.mrf.mxu1  ;;  %v2010_v32 = vpop.f32.mrf.mxu0 }
 0x1ca   : > { %v2218_v9 = vadd.f32 %v4020_v39, %v2115_v2 }
 0x1cb   : > { %v1608_v10 = vpop.f32.mrf.mxu1  ;;  %v2013_v49 = vpop.f32.mrf.mxu0 }
 0x1cc   : > { %v2250_v31 = vmax.f32 %v2218_v9, 0.0  ;;  %v2116_v22 = vadd.f32 %v2013_v49, %v1708_v36  ;;  %v1709_v43 = vadd.f32 %v1608_v10, %v3990_v30 }
 0x1cd   : > { %v1610_v51 = vpop.f32.mrf.mxu1  ;;  %v2015_v11 = vpop.f32.mrf.mxu0 }
 0x1ce   : > { %v3010_v26 = vpack.c.bf16 %v2250_v31, %v2249_v13  ;;  %v2219_v37 = vadd.f32 %v4020_v39, %v2116_v22 }
 0x1cf   : > { %v1613_v53 = vpop.f32.mrf.mxu1  ;;  %v2016_v8 = vpop.f32.mrf.mxu0 }
 0x1d0   : > { %3074 = vst [vmem:[%s4028_s8 + $0x18] sm:$0xff] %v3010_v26   ;;  %v2117_v47 = vadd.f32 %v2016_v8, %v1709_v43  ;;  %v1710_v55 = vadd.f32 %v1613_v53, %v3994_v7  ;;  %v2251_v38 = vmax.f32 %v2219_v37, 0.0 }
 0x1d1   : > { %v1615_v57 = vpop.f32.mrf.mxu1  ;;  %v2018_v48 = vpop.f32.mrf.mxu0 }
 0x1d2   : > { %v2220_v21 = vadd.f32 %v4020_v39, %v2117_v47 }
 0x1d3   : > { %v1616_v46 = vpop.f32.mrf.mxu1  ;;  %v2021_v1 = vpop.f32.mrf.mxu0 }
 0x1d4   : > { %v2252_v41 = vmax.f32 %v2220_v21, 0.0  ;;  %v2118_v4 = vadd.f32 %v2021_v1, %v1710_v55  ;;  %v1711_v58 = vadd.f32 %v1616_v46, %v3998_v63 }
 0x1d5   : > { %v1618_v23 = vpop.f32.mrf.mxu1  ;;  %v2023_v30 = vpop.f32.mrf.mxu0 }
 0x1d6   : > { %v3015_v54 = vpack.c.bf16 %v2252_v41, %v2251_v38  ;;  %v2221_v5 = vadd.f32 %v4020_v39, %v2118_v4 }
 0x1d7   : > { %v1621_v52 = vpop.f32.mrf.mxu1  ;;  %v2024_v62 = vpop.f32.mrf.mxu0 }
 0x1d8   : > { %3075 = vst [vmem:[%s4028_s8 + $0x20] sm:$0xff] %v3015_v54   ;;  %v2119_v61 = vadd.f32 %v2024_v62, %v1711_v58  ;;  %v1712_v18 = vadd.f32 %v1621_v52, %v4002_v60  ;;  %v2253_v33 = vmax.f32 %v2221_v5, 0.0 }
 0x1d9   : > { %v1623_v7 = vpop.f32.mrf.mxu1  ;;  %v2026_v56 = vpop.f32.mrf.mxu0 }
 0x1da   : > { %v2222_v50 = vadd.f32 %v4020_v39, %v2119_v61 }
 0x1db   : > { %v1624_v24 = vpop.f32.mrf.mxu1  ;;  %v2029_v17 = vpop.f32.mrf.mxu0 }
 0x1dc   : > { %v2254_v2 = vmax.f32 %v2222_v50, 0.0  ;;  %v2120_v14 = vadd.f32 %v2029_v17, %v1712_v18  ;;  %v1713_v9 = vadd.f32 %v1624_v24, %v4006_v59 }
 0x1dd   : > { %v1626_v32 = vpop.f32.mrf.mxu1  ;;  %v2031_v63 = vpop.f32.mrf.mxu0 }
 0x1de   : > { %v3020_v36 = vpack.c.bf16 %v2254_v2, %v2253_v33  ;;  %v2223_v13 = vadd.f32 %v4020_v39, %v2120_v14 }
 0x1df   : > { %v1629_v10 = vpop.f32.mrf.mxu1  ;;  %v2032_v49 = vpop.f32.mrf.mxu0 }
 0x1e0   : > { %3076 = vst [vmem:[%s4028_s8 + $0x28] sm:$0xff] %v3020_v36   ;;  %v2121_v31 = vadd.f32 %v2032_v49, %v1713_v9  ;;  %v1714_v51 = vadd.f32 %v1629_v10, %v4010_v12  ;;  %v2255_v53 = vmax.f32 %v2223_v13, 0.0 }
 0x1e1   : > { %v1631_v60 = vpop.f32.mrf.mxu1  ;;  %v2034_v22 = vpop.f32.mrf.mxu0 }
 0x1e2   : > { %v2224_v11 = vadd.f32 %v4020_v39, %v2121_v31 }
 0x1e3   : > { %v1632_v26 = vpop.f32.mrf.mxu1  ;;  %v2037_v43 = vpop.f32.mrf.mxu0 }
 0x1e4   : > { %v2256_v8 = vmax.f32 %v2224_v11, 0.0  ;;  %v2122_v37 = vadd.f32 %v2037_v43, %v1714_v51  ;;  %v1715_v48 = vadd.f32 %v1632_v26, %v4014_v15 }
 0x1e5   : > { %v1634_v47 = vpop.f32.mrf.mxu1  ;;  %v2039_v59 = vpop.f32.mrf.mxu0 }
 0x1e6   : > { %v3025_v57 = vpack.c.bf16 %v2256_v8, %v2255_v53  ;;  %v2225_v46 = vadd.f32 %v4020_v39, %v2122_v37 }
 0x1e7   : > { %v1637_v55 = vpop.f32.mrf.mxu1  ;;  %v2040_v21 = vpop.f32.mrf.mxu0 }
 0x1e8   : > { %3077 = vst [vmem:[%s4028_s8 + $0x30] sm:$0xff] %v3025_v57   ;;  %v2123_v1 = vadd.f32 %v2040_v21, %v1715_v48  ;;  %v1716_v41 = vadd.f32 %v1637_v55, %v3952_v20  ;;  %v2257_v54 = vmax.f32 %v2225_v46, 0.0 }
 0x1e9   : > { %v1639_v12 = vpop.f32.mrf.mxu1  ;;  %v2042_v38 = vpop.f32.mrf.mxu0 }
 0x1ea   : > { %v2226_v4 = vadd.f32 %v4020_v39, %v2123_v1 }
 0x1eb   : > { %v1640_v23 = vpop.f32.mrf.mxu1  ;;  %v2045_v30 = vpop.f32.mrf.mxu0 }
 0x1ec   : > { %v2258_v58 = vmax.f32 %v2226_v4, 0.0  ;;  %v2124_v52 = vadd.f32 %v2045_v30, %v1716_v41  ;;  %v1717_v61 = vadd.f32 %v1640_v23, %v3956_v25 }
 0x1ed   : > { %v1642_v62 = vpop.f32.mrf.mxu1  ;;  %v2047_v15 = vpop.f32.mrf.mxu0 }
 0x1ee   : > { %v3030_v5 = vpack.c.bf16 %v2258_v58, %v2257_v54  ;;  %v2227_v18 = vadd.f32 %v4020_v39, %v2124_v52 }
 0x1ef   : > { %v1645_v7 = vpop.f32.mrf.mxu1  ;;  %v2048_v56 = vpop.f32.mrf.mxu0 }
 0x1f0   : > { %3078 = vst [vmem:[%s4028_s8 + $0x38] sm:$0xff] %v3030_v5   ;;  %v2125_v50 = vadd.f32 %v2048_v56, %v1717_v61  ;;  %v1718_v17 = vadd.f32 %v1645_v7, %v3960_v34  ;;  %v2259_v32 = vmax.f32 %v2227_v18, 0.0 }
 0x1f1   : > { %v1647_v20 = vpop.f32.mrf.mxu1  ;;  %v2050_v24 = vpop.f32.mrf.mxu0 }
 0x1f2   : > { %v2228_v33 = vadd.f32 %v4020_v39, %v2125_v50 }
 0x1f3   : > { %v1648_v2 = vpop.f32.mrf.mxu1  ;;  %v2053_v14 = vpop.f32.mrf.mxu0 }
 0x1f4   : > { %v2260_v63 = vmax.f32 %v2228_v33, 0.0  ;;  %v2126_v36 = vadd.f32 %v2053_v14, %v1718_v17  ;;  %v1719_v49 = vadd.f32 %v1648_v2, %v3964_v27 }
 0x1f5   : > { %v1650_v9 = vpop.f32.mrf.mxu1  ;;  %v2055_v25 = vpop.f32.mrf.mxu0 }
 0x1f6   : > { %v3035_v10 = vpack.c.bf16 %v2260_v63, %v2259_v32  ;;  %v2229_v60 = vadd.f32 %v4020_v39, %v2126_v36 }
 0x1f7   : > { %v1653_v13 = vpop.f32.mrf.mxu1  ;;  %v2056_v31 = vpop.f32.mrf.mxu0 }
 0x1f8   : > { %3079 = vst [vmem:[%s4028_s8 + $0x40] sm:$0xff] %v3035_v10   ;;  %v2127_v22 = vadd.f32 %v2056_v31, %v1719_v49  ;;  %v1720_v11 = vadd.f32 %v1653_v13, %v3968_v44  ;;  %v2261_v8 = vmax.f32 %v2229_v60, 0.0 }
 0x1f9   : > { %v1655_v34 = vpop.f32.mrf.mxu1  ;;  %v2058_v51 = vpop.f32.mrf.mxu0 }
 0x1fa   : > { %v2230_v26 = vadd.f32 %v4020_v39, %v2127_v22 }
 0x1fb   : > { %v1656_v43 = vpop.f32.mrf.mxu1  ;;  %v2061_v53 = vpop.f32.mrf.mxu0 }
 0x1fc   : > { %v2262_v37 = vmax.f32 %v2230_v26, 0.0  ;;  %v2128_v47 = vadd.f32 %v2061_v53, %v1720_v11  ;;  %v1721_v48 = vadd.f32 %v1656_v43, %v3972_v29 }
 0x1fd   : > { %v1658_v59 = vpop.f32.mrf.mxu1  ;;  %v2063_v27 = vpop.f32.mrf.mxu0 }
 0x1fe   : > { %v3040_v57 = vpack.c.bf16 %v2262_v37, %v2261_v8  ;;  %v2231_v46 = vadd.f32 %v4020_v39, %v2128_v47 }
 0x1ff   : > { %v1661_v55 = vpop.f32.mrf.mxu1  ;;  %v2064_v21 = vpop.f32.mrf.mxu0 }
 0x200   : > { %3080 = vst [vmem:[%s4028_s8 + $0x48] sm:$0xff] %v3040_v57   ;;  %v2129_v1 = vadd.f32 %v2064_v21, %v1721_v48  ;;  %v1722_v38 = vadd.f32 %v1661_v55, %v3976_v45  ;;  %v2263_v30 = vmax.f32 %v2231_v46, 0.0 }
 0x201   : > { %v1663_v44 = vpop.f32.mrf.mxu1  ;;  %v2066_v12 = vpop.f32.mrf.mxu0 }
 0x202   : > { %v2232_v41 = vadd.f32 %v4020_v39, %v2129_v1 }
 0x203   : > { %v1664_v4 = vpop.f32.mrf.mxu1  ;;  %v2069_v23 = vpop.f32.mrf.mxu0 }
 0x204   : > { %v2264_v54 = vmax.f32 %v2232_v41, 0.0  ;;  %v2130_v58 = vadd.f32 %v2069_v23, %v1722_v38  ;;  %v1723_v15 = vadd.f32 %v1664_v4, %v3980_v28 }
 0x205   : > { %v1666_v52 = vpop.f32.mrf.mxu1  ;;  %v2071_v29 = vpop.f32.mrf.mxu0 }
 0x206   : > { %v3045_v62 = vpack.c.bf16 %v2264_v54, %v2263_v30  ;;  %v2233_v7 = vadd.f32 %v4020_v39, %v2130_v58 }
 0x207   : > { %v1669_v5 = vpop.f32.mrf.mxu1  ;;  %v2072_v61 = vpop.f32.mrf.mxu0 }
 0x208   : > { %3081 = vst [vmem:[%s4028_s8 + $0x50] sm:$0xff] %v3045_v62   ;;  %v2131_v56 = vadd.f32 %v2072_v61, %v1723_v15  ;;  %v1724_v50 = vadd.f32 %v1669_v5, %v3984_v42  ;;  %v2265_v33 = vmax.f32 %v2233_v7, 0.0 }
 0x209   : > { %v1671_v45 = vpop.f32.mrf.mxu1  ;;  %v2074_v18 = vpop.f32.mrf.mxu0 }
 0x20a   : > { %v2234_v20 = vadd.f32 %v4020_v39, %v2131_v56 }
 0x20b   : > { %v1672_v24 = vpop.f32.mrf.mxu1  ;;  %v2077_v17 = vpop.f32.mrf.mxu0 }
 0x20c   : > { %v2266_v2 = vmax.f32 %v2234_v20, 0.0  ;;  %v2132_v14 = vadd.f32 %v2077_v17, %v1724_v50  ;;  %v1725_v36 = vadd.f32 %v1672_v24, %v3988_v40 }
 0x20d   : > { %v1674_v32 = vpop.f32.mrf.mxu1  ;;  %v2079_v28 = vpop.f32.mrf.mxu0 }
 0x20e   : > { %v3050_v63 = vpack.c.bf16 %v2266_v2, %v2265_v33  ;;  %v2235_v10 = vadd.f32 %v4020_v39, %v2132_v14  ;;  %v2471_v28 = vld [vmem:[%s4028_s8 + $0x10] sm:$0xff] (%p3320_p6)  }
 0x20f   : > { %v1677_v9 = vpop.f32.mrf.mxu1  ;;  %v2080_v25 = vpop.f32.mrf.mxu0  ;;  %2472 = vst [vmem:[%s2446_s17 + $0x10] sm:$0xff] (%p3320_p6), %v2471_v28  }
 0x210   : > { %3082 = vst [vmem:[%s4028_s8 + $0x58] sm:$0xff] %v3050_v63   ;;  %v2133_v49 = vadd.f32 %v2080_v25, %v1725_v36  ;;  %v1726_v31 = vadd.f32 %v1677_v9, %v3992_v0  ;;  %v2267_v51 = vmax.f32 %v2235_v10, 0.0  ;;  %v2475_v63 = vld [vmem:[%s4028_s8 + $0x18] sm:$0xff] (%p3320_p6)   ;;  %v2479_v36 = vld [vmem:[%s4028_s8 + $0x20] sm:$0xff] (%p3320_p6)   ;;  %v2483_v9 = vld [vmem:[%s4028_s8 + $0x28] sm:$0xff] (%p3320_p6)  }
 0x211   : > { %v1679_v42 = vpop.f32.mrf.mxu1  ;;  %v2082_v13 = vpop.f32.mrf.mxu0  ;;  %2476 = vst [vmem:[%s2446_s17 + $0x18] sm:$0xff] (%p3320_p6), %v2475_v63   ;;  %2480 = vst [vmem:[%s2446_s17 + $0x20] sm:$0xff] (%p3320_p6), %v2479_v36   ;;  %v2487_v25 = vld [vmem:[%s4028_s8 + $0x30] sm:$0xff] (%p3320_p6)   ;;  %v2491_v10 = vld [vmem:[%s4028_s8 + $0x38] sm:$0xff] (%p3320_p6)  }
 0x212   : > { %v2236_v60 = vadd.f32 %v4020_v39, %v2133_v49  ;;  %2484 = vst [vmem:[%s2446_s17 + $0x28] sm:$0xff] (%p3320_p6), %v2483_v9   ;;  %v2495_v49 = vld [vmem:[%s4028_s8 + $0x40] sm:$0xff] (%p3320_p6)   ;;  %2488 = vst [vmem:[%s2446_s17 + $0x30] sm:$0xff] (%p3320_p6), %v2487_v25   ;;  %v2499_v42 = vld [vmem:[%s4028_s8 + $0x48] sm:$0xff] (%p3320_p6)  }
 0x213   : > { %v1680_v22 = vpop.f32.mrf.mxu1  ;;  %v2085_v34 = vpop.f32.mrf.mxu0  ;;  %2492 = vst [vmem:[%s2446_s17 + $0x38] sm:$0xff] (%p3320_p6), %v2491_v10   ;;  %2496 = vst [vmem:[%s2446_s17 + $0x80] sm:$0xff] (%p3320_p6), %v2495_v49   ;;  %v2503_v13 = vld [vmem:[%s4028_s8 + $0x50] sm:$0xff] (%p3320_p6)  }
 0x214   : > { %v2268_v11 = vmax.f32 %v2236_v60, 0.0  ;;  %v2134_v26 = vadd.f32 %v2085_v34, %v1726_v31  ;;  %v1727_v8 = vadd.f32 %v1680_v22, %v3996_v35  ;;  %2500 = vst [vmem:[%s2446_s17 + $0x88] sm:$0xff] (%p3320_p6), %v2499_v42   ;;  %2504 = vst [vmem:[%s2446_s17 + $0x90] sm:$0xff] (%p3320_p6), %v2503_v13  }
 0x215   : > { %v1682_v43 = vpop.f32.mrf.mxu1  ;;  %v2087_v40 = vpop.f32.mrf.mxu0 }
 0x216   : > { %v3055_v53 = vpack.c.bf16 %v2268_v11, %v2267_v51  ;;  %v2237_v59 = vadd.f32 %v4020_v39, %v2134_v26 }
 0x217   : > { %v1685_v37 = vpop.f32.mrf.mxu1  ;;  %v2088_v47 = vpop.f32.mrf.mxu0  ;;  %v2507_v31 = vld [vmem:[%s4028_s8 + $0x58] sm:$0xff] (%p3320_p6)  }
 0x218   : > { %3083 = vst [vmem:[%s4028_s8 + $0x60] sm:$0xff] %v3055_v53   ;;  %v2135_v27 = vadd.f32 %v2088_v47, %v1727_v8  ;;  %v1728_v48 = vadd.f32 %v1685_v37, %v4000_v16  ;;  %v2269_v1 = vmax.f32 %v2237_v59, 0.0  ;;  %2508 = vst [vmem:[%s2446_s17 + $0x98] sm:$0xff] (%p3320_p6), %v2507_v31  }
 0x219   : > { %v1687_v0 = vpop.f32.mrf.mxu1  ;;  %v2090_v57 = vpop.f32.mrf.mxu0 }
 0x21a   : > { %v2238_v55 = vadd.f32 %v4020_v39, %v2135_v27 }
 0x21b   : > { %v1688_v21 = vpop.f32.mrf.mxu1  ;;  %v2093_v46 = vpop.f32.mrf.mxu0 }
 0x21c   : > { %v2270_v44 = vmax.f32 %v2238_v55, 0.0  ;;  %v2136_v12 = vadd.f32 %v2093_v46, %v1728_v48  ;;  %v1729_v4 = vadd.f32 %v1688_v21, %v4004_v19 }
 0x21d   : > { %v1690_v38 = vpop.f32.mrf.mxu1  ;;  %v2095_v35 = vpop.f32.mrf.mxu0 }
 0x21e   : > { %v3060_v41 = vpack.c.bf16 %v2270_v44, %v2269_v1  ;;  %v2239_v54 = vadd.f32 %v4020_v39, %v2136_v12 }
 0x21f   : > { %v1693_v23 = vpop.f32.mrf.mxu1  ;;  %v2096_v30 = vpop.f32.mrf.mxu0  ;;  %v2511_v60 = vld [vmem:[%s4028_s8 + $0x60] sm:$0xff] (%p3320_p6)  }
 0x220   : > { %3084 = vst [vmem:[%s4028_s8 + $0x68] sm:$0xff] %v3060_v41   ;;  %v2137_v58 = vadd.f32 %v2096_v30, %v1729_v4  ;;  %v1730_v29 = vadd.f32 %v1693_v23, %v4008_v6  ;;  %v2271_v61 = vmax.f32 %v2239_v54, 0.0  ;;  %2512 = vst [vmem:[%s2446_s17 + $0xa0] sm:$0xff] (%p3320_p6), %v2511_v60  }
 0x221   : > { %v1695_v16 = vpop.f32.mrf.mxu1  ;;  %v2098_v52 = vpop.f32.mrf.mxu0 }
 0x222   : > { %v2240_v62 = vadd.f32 %v4020_v39, %v2137_v58 }
 0x223   : > { %v1696_v15 = vpop.f32.mrf.mxu1  ;;  %v2101_v5 = vpop.f32.mrf.mxu0 }
 0x224   : > { %v2272_v7 = vmax.f32 %v2240_v62, 0.0  ;;  %v2138_v56 = vadd.f32 %v2101_v5, %v1730_v29  ;;  %v1731_v50 = vadd.f32 %v1696_v15, %v4012_v3  ;;  %v2463_v3 = vld [vmem:[%s4028_s8] sm:$0xff] (%p3320_p6)  }
 0x225   : > { %v1698_v19 = vpop.f32.mrf.mxu1  ;;  %v2103_v45 = vpop.f32.mrf.mxu0  ;;  %2464 = vst [vmem:[%s2446_s17] sm:$0xff] (%p3320_p6), %v2463_v3  }
 0x226   : > { %v3065_v18 = vpack.c.bf16 %v2272_v7, %v2271_v61  ;;  %v2241_v24 = vadd.f32 %v4020_v39, %v2138_v56 }
 0x227   : > { %v2104_v20 = vpop.f32.mrf.mxu0  ;;  %v2515_v22 = vld [vmem:[%s4028_s8 + $0x68] sm:$0xff] (%p3320_p6)  }
 0x228   : > { %3085 = vst [vmem:[%s4028_s8 + $0x70] sm:$0xff] %v3065_v18   ;;  %v2139_v17 = vadd.f32 %v2104_v20, %v1731_v50  ;;  %v2273_v2 = vmax.f32 %v2241_v24, 0.0  ;;  %2516 = vst [vmem:[%s2446_s17 + $0xa8] sm:$0xff] (%p3320_p6), %v2515_v22  }
 0x229   : > { %v2106_v33 = vpop.f32.mrf.mxu0 }
 0x22a   : > { %v2242_v6 = vadd.f32 %v4020_v39, %v2139_v17  ;;  %v2467_v39 = vld [vmem:[%s4028_s8 + $0x8] sm:$0xff] (%p3320_p6)  }
 0x22b   : > { %2468 = vst [vmem:[%s2446_s17 + $0x8] sm:$0xff] (%p3320_p6), %v2467_v39  }
 0x22c   : > { %v2274_v14 = vmax.f32 %v2242_v6, 0.0  ;;  %2441 = sbr.rel (!%p3320_p6) target bundleno = 569 (0x239), region = 167 }
 0x22e   : > { %v3070_v32 = vpack.c.bf16 %v2274_v14, %v2273_v2 }
 0x22f   : > { %v2519_v34 = vld [vmem:[%s4028_s8 + $0x70] sm:$0xff] (%p3320_p6)  }
 0x230   : > { %3086 = vst [vmem:[%s4028_s8 + $0x78] sm:$0xff] %v3070_v32   ;;  %2520 = vst [vmem:[%s2446_s17 + $0xb0] sm:$0xff] (%p3320_p6), %v2519_v34  }
 0x237   : > { %v2523_v51 = vld [vmem:[%s4028_s8 + $0x78] sm:$0xff]  }
 0x238   : > { %2524 = vst [vmem:[%s2446_s17 + $0xb8] sm:$0xff] %v2523_v51  }
 0x239 PF: > { %s15_s22 = sadd.s32 1, %s3247_s22   ;;  %s4153_s18 = smov %s3235_s19 }
 0x23a   : > { %p12_p11 = scmp.ge.s32.totalorder %s15_s22, 4   ;;  %s4154_s19 = smov %s3325_s29 }
 0x23b   : > { %s4155_s20 = smov %s3243_s21  ;;  %s4156_s21 = smov %s4158_s23 }
 0x23c   :  { %14 = sbr.rel (!%p12_p11) target bundleno = 3 (0x3), region = 263 }

// kernel: block2_forward.7
= control target key start
LH: loop header
LB: loop body
LE: loop exit
PB: predicated region body
PF: predicated region fallthrough
CT: control target
= control target key end

     0   :  { %s4507_s18 = smov 0   ;;  %s4509_s19 = smov 0   ;;  %s5765_s0 = inlined_call_operand.vmem [shape: bf16[2,16,16,128], index: 0, kind: input, shape index: {}]   ;;  %s5766_s1 = inlined_call_operand.vmem [shape: bf16[2,2,16,128], index: 1, kind: input, shape index: {}]   ;;  %s5767_s2 = inlined_call_operand.vmem [shape: bf16[2,2,16,128], index: 2, kind: input, shape index: {}]   ;;  %s5768_s3 = inlined_call_operand.vmem [shape: bf16[3,384,128], index: 3, kind: input, shape index: {}]   ;;  %s5769_s4 = inlined_call_operand.vmem [shape: f32[1,128], index: 4, kind: input, shape index: {}]   ;;  %s5770_s5 = inlined_call_operand.vmem [shape: bf16[2,16,16,128], index: 5, kind: output, shape index: {}]  }
   0x1   :  { %s4511_s20 = smov 0   ;;  %s4513_s21 = smov 0  }
   0x2   :  { %s4515_s22 = smov 0  }
   0x3 LB: > { %s24_s23 = sadd.s32 1, %s4471_s21  ;;  %s3352_s24 = sadd.s32 4294967295, %s4475_s22   ;;  %s4475_s22 = sphi %s4515_s22, %s15_s22   ;;  %s4471_s21 = sphi %s4513_s21, %s5808_s21   ;;  %s4467_s20 = sphi %s4511_s20, %s5807_s20   ;;  %s4463_s19 = sphi %s4509_s19, %s5806_s19   ;;  %s4459_s18 = sphi %s4507_s18, %s5805_s18  }
   0x4   : > { %p25_p0 = scmp.ge.s32.totalorder %s24_s23, 2  ;;  %p41_p1 = scmp.ne.s32.totalorder %s4463_s19, %s4459_s18 }
   0x5   : > { %p42_p2 = scmp.eq.s32.totalorder %s4475_s22, 0  ;;  %p177_p4 = scmp.eq.s32.totalorder %s3352_s24, 1 }
   0x6   : > { %s5810_s23 = smov (%p25_p0, %s24_s23), 0  ;;  %s34_s27 = sadd.s32 1, %s4463_s19 }
   0x7   : > { %p4539_p3 = por %p42_p2, %p41_p1  ;;  %s31_s26 = ssub.s32 %s4471_s21, %s5810_s23 }
   0x8   : > { %p32_p5 = scmp.eq.s32.totalorder %s31_s26, 0  ;;  %p4546_p6 = por %p177_p4, %p41_p1 }
   0x9   : > { %p3357_p7 = scmp.ge.s32.totalorder %s4475_s22, 2 }
   0xa   : > { %s4551_s29 = scalar_select %p32_p5, %s4463_s19, %s34_s27  }
   0xb   : > { %212 = sbr.rel (%p3357_p7) target bundleno = 38 (0x26), region = 24 }
  0x10   : > { %215 = sbr.rel (!%p4539_p3) target bundleno = 28 (0x1c), region = 28  ;;  %s217_s30 = sand.u32 (%p4539_p3), 1, %s4463_s19  }
  0x11   : > { %s3601_s6 = sshll.u32 (%p4539_p3), %s4471_s21, 6  ;;  %s3358_s7 = sshll.u32 (%p4539_p3), %s217_s30, 7 }
  0x12   : > { %s4561_s10 = scalar_lea.vmem (%p4539_p3), %s5765_s0, %s3601_s6  ;;  %s219_s11 = scalar_lea.vmem (%p4539_p3), [#allocation3], %s3358_s7 }
  0x13   : > { %v240_v0 = vld [vmem:[%s4561_s10] sm:$0xff] (%p4539_p3)   ;;  %v244_v1 = vld [vmem:[%s4561_s10 + $0x8] sm:$0xff] (%p4539_p3)   ;;  %v248_v2 = vld [vmem:[%s4561_s10 + $0x10] sm:$0xff] (%p4539_p3)  }
  0x14   : > { %241 = vst [vmem:[%s219_s11] sm:$0xff] (%p4539_p3), %v240_v0   ;;  %245 = vst [vmem:[%s219_s11 + $0x8] sm:$0xff] (%p4539_p3), %v244_v1   ;;  %v252_v3 = vld [vmem:[%s4561_s10 + $0x18] sm:$0xff] (%p4539_p3)   ;;  %v256_v4 = vld [vmem:[%s4561_s10 + $0x20] sm:$0xff] (%p4539_p3)  }
  0x15   : > { %249 = vst [vmem:[%s219_s11 + $0x10] sm:$0xff] %v248_v2   ;;  %v260_v5 = vld [vmem:[%s4561_s10 + $0x28] sm:$0xff]   ;;  %253 = vst [vmem:[%s219_s11 + $0x18] sm:$0xff] %v252_v3   ;;  %v264_v6 = vld [vmem:[%s4561_s10 + $0x30] sm:$0xff]  }
  0x16   : > { %257 = vst [vmem:[%s219_s11 + $0x20] sm:$0xff] %v256_v4   ;;  %261 = vst [vmem:[%s219_s11 + $0x28] sm:$0xff] %v260_v5   ;;  %v268_v7 = vld [vmem:[%s4561_s10 + $0x38] sm:$0xff]   ;;  %v272_v8 = vld [vmem:[%s4561_s10 + $0x80] sm:$0xff]  }
  0x17   : > { %265 = vst [vmem:[%s219_s11 + $0x30] sm:$0xff] %v264_v6   ;;  %269 = vst [vmem:[%s219_s11 + $0x38] sm:$0xff] %v268_v7   ;;  %v276_v9 = vld [vmem:[%s4561_s10 + $0x88] sm:$0xff]   ;;  %v280_v10 = vld [vmem:[%s4561_s10 + $0x90] sm:$0xff]  }
  0x18   : > { %273 = vst [vmem:[%s219_s11 + $0x40] sm:$0xff] %v272_v8   ;;  %v284_v11 = vld [vmem:[%s4561_s10 + $0x98] sm:$0xff]   ;;  %277 = vst [vmem:[%s219_s11 + $0x48] sm:$0xff] %v276_v9   ;;  %v288_v12 = vld [vmem:[%s4561_s10 + $0xa0] sm:$0xff]  }
  0x19   : > { %281 = vst [vmem:[%s219_s11 + $0x50] sm:$0xff] %v280_v10   ;;  %285 = vst [vmem:[%s219_s11 + $0x58] sm:$0xff] %v284_v11   ;;  %v292_v13 = vld [vmem:[%s4561_s10 + $0xa8] sm:$0xff]   ;;  %v296_v14 = vld [vmem:[%s4561_s10 + $0xb0] sm:$0xff]  }
  0x1a   : > { %289 = vst [vmem:[%s219_s11 + $0x60] sm:$0xff] %v288_v12   ;;  %293 = vst [vmem:[%s219_s11 + $0x68] sm:$0xff] %v292_v13   ;;  %v300_v15 = vld [vmem:[%s4561_s10 + $0xb8] sm:$0xff]  }
  0x1b   : > { %297 = vst [vmem:[%s219_s11 + $0x70] sm:$0xff] %v296_v14   ;;  %301 = vst [vmem:[%s219_s11 + $0x78] sm:$0xff] %v300_v15  }
  0x1c PF: > { %391 = sbr.rel (!%p4539_p3) target bundleno = 33 (0x21), region = 69  ;;  %s393_s12 = sand.u32 (%p4539_p3), 1, %s4463_s19  }
  0x1d   : > { %s3602_s13 = sshll.u32 (%p4539_p3), %s4471_s21, 3  ;;  %s3362_s14 = sshll.u32 (%p4539_p3), %s393_s12, 4 }
  0x1e   : > { %s398_s17 = scalar_lea.vmem (%p4539_p3), %s5766_s1, %s3602_s13  ;;  %s395_s24 = scalar_lea.vmem (%p4539_p3), [#allocation4], %s3362_s14 }
  0x1f   : > { %v415_v16 = vld [vmem:[%s398_s17] sm:$0xff] (%p4539_p3)   ;;  %v419_v17 = vld [vmem:[%s398_s17 + $0x10] sm:$0xff] (%p4539_p3)  }
  0x20   : > { %416 = vst [vmem:[%s395_s24] sm:$0xff] (%p4539_p3), %v415_v16   ;;  %420 = vst [vmem:[%s395_s24 + $0x8] sm:$0xff] (%p4539_p3), %v419_v17  }
  0x21 PF: > { %454 = sbr.rel (!%p4539_p3) target bundleno = 38 (0x26), region = 110  ;;  %s456_s26 = sand.u32 (%p4539_p3), 1, %s4463_s19  }
  0x22   : > { %s3603_s27 = sshll.u32 (%p4539_p3), %s4471_s21, 3  ;;  %s3365_s30 = sshll.u32 (%p4539_p3), %s456_s26, 4 }
  0x23   : > { %s461_s8 = scalar_lea.vmem (%p4539_p3), %s5767_s2, %s3603_s27  ;;  %s458_s9 = scalar_lea.vmem (%p4539_p3), [#allocation5], %s3365_s30 }
  0x24   : > { %v478_v18 = vld [vmem:[%s461_s8] sm:$0xff] (%p4539_p3)   ;;  %v482_v19 = vld [vmem:[%s461_s8 + $0x10] sm:$0xff] (%p4539_p3)  }
  0x25   : > { %479 = vst [vmem:[%s458_s9] sm:$0xff] (%p4539_p3), %v478_v18   ;;  %483 = vst [vmem:[%s458_s9 + $0x8] sm:$0xff] (%p4539_p3), %v482_v19  }
  0x26 PF: > { %p3368_p8 = scmp.ge.s32.totalorder %s4475_s22, 1  ;;  %p516_p9 = scmp.lt.s32.totalorder %s4475_s22, 3 }
  0x28   : > { %p517_p10 = pnand %p3368_p8, %p516_p9 }
  0x2a   : > { %520 = sbr.rel (%p517_p10) target bundleno = 580 (0x244), region = 151 }
  0x2f   : > { %v4341_v20 = vld [vmem:[%s5768_s3 + $0x78] sm:$0xff]   ;;  %v4343_v22 = vld [vmem:[%s5768_s3 + $0x70] sm:$0xff]   ;;  %v4345_v24 = vld [vmem:[%s5768_s3 + $0x68] sm:$0xff]   ;;  %s523_s30 = sand.u32 1, %s4459_s18   ;;  %vm836_vm0 = vcmask 1040384   ;;  %vm903_vm4 = vcmask 1047552  }
  0x30   : > { %v4342_v21 = vld [vmem:[%s5768_s3 + $0x38] sm:$0xff]   ;;  %3733 = vmatprep.subr.bf16.mxu0 %v4341_v20  ;;  %4285 = vmatprep.subr.bf16.mxu1 %v4341_v20  ;;  %v4344_v23 = vld [vmem:[%s5768_s3 + $0x30] sm:$0xff]   ;;  %v4346_v25 = vld [vmem:[%s5768_s3 + $0x28] sm:$0xff]   ;;  %s4617_s8 = sshll.u32 %s523_s30, 4  ;;  %s4622_s10 = sshll.u32 %s523_s30, 7 }
  0x31   : > { %3734 = vmatpush3.bf16.msra.mxu0 %v4342_v21  ;;  %4293 = vmatpush3.bf16.msra.mxu1 %v4342_v21  ;;  %v4347_v26 = vld [vmem:[%s5768_s3 + $0x60] sm:$0xff]   ;;  %v4349_v28 = vld [vmem:[%s5768_s3 + $0x58] sm:$0xff]   ;;  %v4351_v30 = vld [vmem:[%s5768_s3 + $0x50] sm:$0xff]   ;;  %s532_s16 = scalar_lea.vmem [#allocation4], %s4617_s8  ;;  %s4639_s17 = scalar_lea.vmem [#allocation3], %s4622_s10 }
  0x32   : > { %3735 = vmatprep.subr.bf16.mxu0 %v4343_v22  ;;  %4286 = vmatprep.subr.bf16.mxu1 %v4343_v22  ;;  %v4348_v27 = vld [vmem:[%s5768_s3 + $0x20] sm:$0xff]   ;;  %v4350_v29 = vld [vmem:[%s5768_s3 + $0x18] sm:$0xff]   ;;  %v4352_v34 = vld [vmem:[%s5768_s3 + $0x10] sm:$0xff]   ;;  %vm837_vm1 = vsmask.f32 256  ;;  %s539_s9 = scalar_lea.vmem [#allocation5], %s4617_s8 }
  0x33   : > { %v4636_v31 = vld [vmem:[%s532_s16] sm:$0xff]   ;;  %v4358_v32 = vld [vmem:[%s4639_s17 + $0x58] sm:$0xff]   ;;  %v4353_v35 = vld [vmem:[%s5768_s3 + $0x48] sm:$0xff]   ;;  %vm904_vm3 = vsmask.f32 7424 }
  0x34   : > { %1162 = vmatprep.mubr.bf16.mxu0 %v4636_v31  ;;  %v709_v33 = vshrl.u32 %v4636_v31, 16  ;;  %v712_v36 = vshll.u32 %v4636_v31, 16  ;;  %v793_v37 = vshrl.u32 %v4358_v32, 16  ;;  %v4354_v38 = vld [vmem:[%s5768_s3 + $0x8] sm:$0xff]   ;;  %1258 = vmatprep.mubr.bf16.mxu1 %v4358_v32  ;;  %v796_v40 = vshll.u32 %v4358_v32, 16  ;;  %v4657_v42 = vld [vmem:[%s4639_s17] sm:$0xff]   ;;  %vm4673_vm2 = vmand %vm836_vm0, %vm837_vm1 }
  0x35   : > { %3736 = vmatpush3.bf16.msra.mxu0 %v4344_v23  ;;  %4294 = vmatpush3.bf16.msra.mxu1 %v4344_v23  ;;  %v4363_v43 = vld [vmem:[%s4639_s17 + $0x60] sm:$0xff]   ;;  %v716_v47 = vshrl.u32 %v4657_v42, 16  ;;  %v4359_v53 = vld [vmem:[%s5768_s3 + $0xb8] sm:$0xff]   ;;  %v719_v58 = vshll.u32 %v4657_v42, 16  ;;  %v4695_v63 = vld [vmem:[%s4639_s17 + $0x8] sm:$0xff]  }
  0x36   : > { %3737 = vmatprep.subr.bf16.mxu0 %v4345_v24  ;;  %4287 = vmatprep.subr.bf16.mxu1 %v4345_v24  ;;  %v711_v39 = vrot.slane %v709_v33, 7  ;;  %v795_v41 = vrot.slane %v793_v37, 7  ;;  %v879_v44 = vrot.slane %v796_v40, 1  ;;  %v4355_v45 = vld [vmem:[%s5768_s3 + $0x40] sm:$0xff]   ;;  %v803_v51 = vshll.u32 %v4363_v43, 16  ;;  %v4360_v55 = vld [vmem:[%s5768_s3 + $0x178] sm:$0xff]   ;;  %vm4799_vm5 = vmand %vm903_vm4, %vm904_vm3 }
  0x37   : > { %v4356_v46 = vld [vmem:[%s5768_s3] sm:$0xff]   ;;  %v800_v54 = vshrl.u32 %v4363_v43, 16  ;;  %v718_v57 = vrot.slane %v716_v47, 7  ;;  %v4698_v0 = vld [vmem:[%s4639_s17 + $0x68] sm:$0xff]   ;;  %v4361_v1 = vld [vmem:[%s5768_s3 + $0xb0] sm:$0xff]   ;;  %v723_v6 = vshrl.u32 %v4695_v63, 16 }
  0x38   : > { %v4667_v48 = vor.u32 %v879_v44, %v793_v37  ;;  %v714_v49 = vor.u32 %v712_v36, %v711_v39  ;;  %v798_v52 = vor.u32 %v796_v40, %v795_v41  ;;  %v881_v56 = vrot.slane %v803_v51, 1  ;;  %v4366_v3 = vld [vmem:[%s5768_s3 + $0x170] sm:$0xff]   ;;  %v4364_v4 = vld [vmem:[%s5768_s3 + $0xa8] sm:$0xff]   ;;  %v4365_v17 = vld [vmem:[%s5768_s3 + $0xa0] sm:$0xff]  }
  0x39   : > { %3738 = vmatpush3.bf16.msra.mxu0 %v4346_v25  ;;  %4295 = vmatpush3.bf16.msra.mxu1 %v4346_v25  ;;  %v802_v62 = vrot.slane %v800_v54, 7  ;;  %v721_v2 = vor.u32 %v719_v58, %v718_v57  ;;  %v807_v7 = vshrl.u32 %v4698_v0, 16  ;;  %v4716_v8 = vld [vmem:[%s4639_s17 + $0x10] sm:$0xff]   ;;  %v4374_v9 = vld [vmem:[%s5768_s3 + $0x168] sm:$0xff]   ;;  %v726_v11 = vshll.u32 %v4695_v63, 16  ;;  %v4379_v22 = vld [vmem:[%s5768_s3 + $0x160] sm:$0xff]  }
  0x3a   : > { %3739 = vmatprep.subr.bf16.mxu0 %v4347_v26  ;;  %4288 = vmatprep.subr.bf16.mxu1 %v4347_v26  ;;  %v839_v59 = vsel %vm4673_vm2, 0, %v714_v49  ;;  %v4688_v60 = vor.u32 %v881_v56, %v800_v54  ;;  %v4692_v61 = vsel %vm4673_vm2, 0, %v798_v52  ;;  %v4727_v12 = vld [vmem:[%s4639_s17 + $0x70] sm:$0xff]   ;;  %v725_v14 = vrot.slane %v723_v6, 7  ;;  %v4369_v23 = vld [vmem:[%s5768_s3 + $0x98] sm:$0xff]   ;;  %v4375_v49 = vld [vmem:[%s5768_s3 + $0x80] sm:$0xff]  }
  0x3b   : > { %v805_v5 = vor.u32 %v803_v51, %v802_v62  ;;  %v4723_v10 = vsel %vm4673_vm2, 0, %v721_v2  ;;  %v809_v15 = vrot.slane %v807_v7, 7  ;;  %v810_v16 = vshll.u32 %v4698_v0, 16  ;;  %v4370_v32 = vld [vmem:[%s5768_s3 + $0x90] sm:$0xff]   ;;  %v4384_v37 = vld [vmem:[%s5768_s3 + $0x158] sm:$0xff]   ;;  %v4835_v62 = vld [vmem:[%s4639_s17 + $0x28] sm:$0xff]  }
  0x3c   : > { %v730_v18 = vshrl.u32 %v4716_v8, 16  ;;  %v814_v19 = vshrl.u32 %v4727_v12, 16  ;;  %v728_v20 = vor.u32 %v726_v11, %v725_v14  ;;  %v733_v25 = vshll.u32 %v4716_v8, 16  ;;  %v4390_v54 = vld [vmem:[%s5768_s3 + $0x150] sm:$0xff]  }
  0x3d   : > { %3740 = vmatpush3.bf16.msra.mxu0 %v4348_v27  ;;  %4296 = vmatpush3.bf16.msra.mxu1 %v4348_v27  ;;  %v4731_v13 = vsel %vm4673_vm2, 0, %v805_v5  ;;  %v812_v21 = vor.u32 %v810_v16, %v809_v15  ;;  %v817_v27 = vshll.u32 %v4727_v12, 16  ;;  %v857_v41 = vrot.slane %v719_v58, 1  ;;  %v4378_v5 = vld [vmem:[%s5768_s3 + $0xf8] sm:$0xff]  }
  0x3e   : > { %3741 = vmatprep.subr.bf16.mxu0 %v4349_v28  ;;  %4289 = vmatprep.subr.bf16.mxu1 %v4349_v28  ;;  %v732_v24 = vrot.slane %v730_v18, 7  ;;  %v816_v26 = vrot.slane %v814_v19, 7  ;;  %v4762_v28 = vld [vmem:[%s4639_s17 + $0x18] sm:$0xff]   ;;  %v859_v52 = vrot.slane %v726_v11, 1  ;;  %v861_v58 = vrot.slane %v733_v25, 1 }
  0x3f   : > { %v737_v39 = vshrl.u32 %v4762_v28, 16  ;;  %v740_v31 = vshll.u32 %v4762_v28, 16  ;;  %v751_v14 = vshrl.u32 %v4835_v62, 16 }
  0x40   : > { %v860_v2 = vor.u32 %v859_v52, %v723_v6  ;;  %v862_v11 = vor.u32 %v861_v58, %v730_v18  ;;  %v4381_v6 = vld [vmem:[%s5768_s3 + $0x130] sm:$0xff]   ;;  %v4405_v52 = vld [vmem:[%s5768_s3 + $0x1f8] sm:$0xff]  }
  0x41   : > { %3742 = vmatpush3.bf16.msra.mxu0 %v4350_v29  ;;  %4297 = vmatpush3.bf16.msra.mxu1 %v4350_v29  ;;  %v4766_v29 = vsel %vm4673_vm2, 0, %v728_v20  ;;  %v4382_v20 = vld [vmem:[%s5768_s3 + $0xf0] sm:$0xff]   ;;  %v4393_v58 = vld [vmem:[%s5768_s3 + $0x118] sm:$0xff]  }
  0x42   : > { %3743 = vmatprep.subr.bf16.mxu0 %v4351_v30  ;;  %4290 = vmatprep.subr.bf16.mxu1 %v4351_v30  ;;  %v4770_v30 = vsel %vm4673_vm2, 0, %v812_v21  ;;  %v4859_v15 = vsel %vm4799_vm5, %v860_v2, 0  ;;  %v4868_v18 = vsel %vm4799_vm5, %v862_v11, 0  ;;  %v4874_v21 = vld [vmem:[%s4639_s17 + $0x30] sm:$0xff]  }
  0x45   : > { %3744 = vmatpush3.bf16.msra.mxu0 %v4352_v34  ;;  %4298 = vmatpush3.bf16.msra.mxu1 %v4352_v34  ;;  %v855_v34 = vrot.slane %v712_v36, 1  ;;  %v4373_v36 = vld [vmem:[%s5768_s3 + $0x88] sm:$0xff]  }
  0x46   : > { %3745 = vmatprep.subr.bf16.mxu0 %v4353_v35  ;;  %4291 = vmatprep.subr.bf16.mxu1 %v4353_v35  ;;  %v735_v35 = vor.u32 %v733_v25, %v732_v24  ;;  %v753_v25 = vrot.slane %v751_v14, 7 }
  0x47   : > { %v856_v40 = vor.u32 %v855_v34, %v709_v33  ;;  %v4809_v33 = vld [vmem:[%s4639_s17 + $0x20] sm:$0xff]  }
  0x48   : > { %v744_v57 = vshrl.u32 %v4809_v33, 16 }
  0x49   : > { %3746 = vmatpush3.bf16.msra.mxu0 %v4354_v38  ;;  %4299 = vmatpush3.bf16.msra.mxu1 %v4354_v38  ;;  %v819_v38 = vor.u32 %v817_v27, %v816_v26  ;;  %v906_v51 = vsel %vm4799_vm5, %v856_v40, 0  ;;  %v4385_v26 = vld [vmem:[%s5768_s3 + $0x128] sm:$0xff]   ;;  %v761_v40 = vshll.u32 %v4874_v21, 16 }
  0x4a   : > { %3747 = vmatprep.subr.bf16.mxu0 %v4355_v45  ;;  %4292 = vmatprep.subr.bf16.mxu1 %v4355_v45 }
  0x4b   : > { %v4805_v45 = vsel %vm4673_vm2, 0, %v819_v38 }
  0x4d   : > { %3748 = vmatpush3.bf16.msra.mxu0 %v4356_v46  ;;  %4300 = vmatpush3.bf16.msra.mxu1 %v4356_v46  ;;  %v739_v46 = vrot.slane %v737_v39, 7 }
  0x4e   : > { %4141 = vmatprep.subr.bf16.mxu1 %v4359_v53  ;;  %4189 = vmatprep.subr.bf16.mxu0 %v4360_v55 }
  0x4f   : > { %v742_v56 = vor.u32 %v740_v31, %v739_v46 }
  0x50   : > { %1163 = vmatmul.mubr.bf16.vlgmr.msra.gmra.mxu0 %v839_v59  ;;  %1259 = vmatmul.mubr.bf16.vlgmr.msra.gmra.mxu1 %v4692_v61 }
  0x51   : > { %4142 = vmatpush3.bf16.msra.mxu1 %v4359_v53  ;;  %4190 = vmatpush3.bf16.msra.mxu0 %v4360_v55  ;;  %v858_v53 = vor.u32 %v857_v41, %v716_v47  ;;  %v883_v55 = vrot.slane %v810_v16, 1  ;;  %v4377_v47 = vld [vmem:[%s5768_s3 + $0x138] sm:$0xff]  }
  0x52   : > { %4143 = vmatprep.subr.bf16.mxu1 %v4361_v1  ;;  %1170 = vmatprep.mubr.bf16.mxu0 %v4657_v42  ;;  %v4391_v41 = vld [vmem:[%s532_s16 + $0x8] sm:$0xff]  }
  0x53   : > { %1266 = vmatprep.mubr.bf16.mxu1 %v4363_v43  ;;  %4191 = vmatprep.subr.bf16.mxu0 %v4366_v3  ;;  %v4796_v43 = vsel %vm4673_vm2, 0, %v735_v35  ;;  %v4829_v59 = vor.u32 %v883_v55, %v807_v7  ;;  %v746_v7 = vrot.slane %v744_v57, 7  ;;  %v758_v35 = vshrl.u32 %v4874_v21, 16  ;;  %v4389_v55 = vld [vmem:[%s5768_s3 + $0xe0] sm:$0xff]  }
  0x55   : > { %4144 = vmatpush3.bf16.msra.mxu1 %v4361_v1  ;;  %4192 = vmatpush3.bf16.msra.mxu0 %v4366_v3  ;;  %v4839_v1 = vsel %vm4799_vm5, %v858_v53, 0  ;;  %v863_v3 = vrot.slane %v740_v31, 1  ;;  %v4388_v31 = vld [vmem:[%s5768_s3 + $0x120] sm:$0xff]  }
  0x56   : > { %4145 = vmatprep.subr.bf16.mxu1 %v4364_v4  ;;  %4193 = vmatprep.subr.bf16.mxu0 %v4374_v9 }
  0x57   : > { %v864_v16 = vor.u32 %v863_v3, %v737_v39  ;;  %v4929_v3 = vld [vmem:[%s4639_s17 + $0x40] sm:$0xff]  }
  0x58   : > { %1171 = vmatmul.mubr.bf16.gmra.mxu0 %v4723_v10  ;;  %1267 = vmatmul.mubr.bf16.gmra.mxu1 %v4731_v13 }
  0x59   : > { %4146 = vmatpush3.bf16.msra.mxu1 %v4364_v4  ;;  %1178 = vmatprep.mubr.bf16.mxu0 %v4695_v63  ;;  %v4845_v4 = vsel %vm4673_vm2, 0, %v742_v56  ;;  %v768_v56 = vshll.u32 %v4391_v41, 16 }
  0x5a   : > { %4147 = vmatprep.subr.bf16.mxu1 %v4365_v17  ;;  %1274 = vmatprep.mubr.bf16.mxu1 %v4698_v0 }
  0x5b   : > { %4194 = vmatpush3.bf16.msra.mxu0 %v4374_v9  ;;  %v747_v9 = vshll.u32 %v4809_v33, 16  ;;  %v871_v11 = vrot.slane %v768_v56, 1 }
  0x5c   : > { %4195 = vmatprep.subr.bf16.mxu0 %v4379_v22 }
  0x5d   : > { %4148 = vmatpush3.bf16.msra.mxu1 %v4365_v17  ;;  %v4397_v17 = vld [vmem:[%s5768_s3 + $0x148] sm:$0xff]   ;;  %v865_v24 = vrot.slane %v747_v9, 1 }
  0x5e   : > { %4149 = vmatprep.subr.bf16.mxu1 %v4369_v23 }
  0x5f   : > { %4196 = vmatpush3.bf16.msra.mxu0 %v4379_v22  ;;  %v749_v22 = vor.u32 %v747_v9, %v746_v7  ;;  %v866_v39 = vor.u32 %v865_v24, %v744_v57  ;;  %v765_v7 = vshrl.u32 %v4391_v41, 16  ;;  %v4932_v9 = vld [vmem:[%s4639_s17 + $0x48] sm:$0xff]  }
  0x60   : > { %1179 = vmatmul.mubr.bf16.gmra.mxu0 %v4766_v29  ;;  %1275 = vmatmul.mubr.bf16.gmra.mxu1 %v4770_v30 }
  0x61   : > { %4150 = vmatpush3.bf16.msra.mxu1 %v4369_v23  ;;  %1186 = vmatprep.mubr.bf16.mxu0 %v4716_v8  ;;  %v754_v23 = vshll.u32 %v4835_v62, 16  ;;  %v4892_v38 = vsel %vm4673_vm2, 0, %v749_v22  ;;  %v4912_v53 = vsel %vm4799_vm5, %v866_v39, 0  ;;  %v782_v22 = vshll.u32 %v4932_v9, 16 }
  0x62   : > { %4151 = vmatprep.subr.bf16.mxu1 %v4370_v32  ;;  %1282 = vmatprep.mubr.bf16.mxu1 %v4727_v12  ;;  %v767_v24 = vrot.slane %v765_v7, 7  ;;  %v779_v39 = vshrl.u32 %v4932_v9, 16 }
  0x63   : > { %4197 = vmatprep.subr.bf16.mxu0 %v4384_v37  ;;  %v867_v34 = vrot.slane %v754_v23, 1  ;;  %v756_v46 = vor.u32 %v754_v23, %v753_v25  ;;  %v872_v23 = vor.u32 %v871_v11, %v765_v7  ;;  %v772_v25 = vshrl.u32 %v4929_v3, 16 }
  0x64   : > { %4198 = vmatpush3.bf16.msra.mxu0 %v4384_v37  ;;  %v4402_v37 = vld [vmem:[%s5768_s3 + $0x140] sm:$0xff]  }
  0x65   : > { %4152 = vmatpush3.bf16.msra.mxu1 %v4370_v32  ;;  %4199 = vmatprep.subr.bf16.mxu0 %v4390_v54  ;;  %v4884_v32 = vsel %vm4799_vm5, %v864_v16, 0  ;;  %v4919_v57 = vsel %vm4673_vm2, 0, %v756_v46  ;;  %v4401_v46 = vld [vmem:[%s5768_s3 + $0xc8] sm:$0xff]  }
  0x66   : > { %4153 = vmatprep.subr.bf16.mxu1 %v4373_v36 }
  0x68   : > { %1187 = vmatmul.mubr.bf16.gmra.mxu0 %v4796_v43  ;;  %1283 = vmatmul.mubr.bf16.gmra.mxu1 %v4805_v45 }
  0x69   : > { %4154 = vmatpush3.bf16.msra.mxu1 %v4373_v36  ;;  %1194 = vmatprep.mubr.bf16.mxu0 %v4762_v28  ;;  %v4386_v36 = vld [vmem:[%s5768_s3 + $0xe8] sm:$0xff]  }
  0x6a   : > { %4155 = vmatprep.subr.bf16.mxu1 %v4375_v49  ;;  %4157 = vmatprep.mubr.bf16.mxu1 %v906_v51  ;;  %v760_v51 = vrot.slane %v758_v35, 7 }
  0x6b   : > { %4200 = vmatpush3.bf16.msra.mxu0 %v4390_v54  ;;  %v869_v54 = vrot.slane %v761_v40, 1 }
  0x6c   : > { %4201 = vmatprep.subr.bf16.mxu0 %v4397_v17  ;;  %v763_v2 = vor.u32 %v761_v40, %v760_v51  ;;  %v914_v40 = vsel %vm4799_vm5, %v872_v23, 0 }
  0x6d   : > { %4156 = vmatpush3.bf16.msra.mxu1 %v4375_v49  ;;  %v868_v49 = vor.u32 %v867_v34, %v751_v14  ;;  %v4398_v14 = vld [vmem:[%s5768_s3 + $0x110] sm:$0xff]   ;;  %v4400_v34 = vld [vmem:[%s5768_s3 + $0x108] sm:$0xff]  }
  0x6e   : > { %3869 = vmatprep.subr.bf16.mxu1 %v4377_v47  ;;  %v4944_v16 = vsel %vm4673_vm2, 0, %v763_v2 }
  0x6f   : > { %4202 = vmatpush3.bf16.msra.mxu0 %v4397_v17  ;;  %v4926_v47 = vsel %vm4799_vm5, %v868_v49, 0  ;;  %v775_v17 = vshll.u32 %v4929_v3, 16  ;;  %v770_v49 = vor.u32 %v768_v56, %v767_v24  ;;  %v774_v56 = vrot.slane %v772_v25, 7 }
  0x70   : > { %1195 = vmatmul.mubr.bf16.gmra.mxu0 %v4845_v4  ;;  %4158 = vmatmul.mubr.bf16.vlgmr.msra.gmra.mxu1 %v4839_v1 }
  0x71   : > { %3870 = vmatpush3.bf16.msra.mxu1 %v4378_v5  ;;  %1202 = vmatprep.mubr.bf16.mxu0 %v4809_v33  ;;  %v870_v5 = vor.u32 %v869_v54, %v758_v35  ;;  %v873_v35 = vrot.slane %v775_v17, 1  ;;  %v847_v2 = vsel %vm4673_vm2, 0, %v770_v49  ;;  %v4411_v49 = vld [vmem:[%s5768_s3 + $0x1a8] sm:$0xff]  }
  0x72   : > { %4161 = vmatprep.mubr.bf16.mxu1 %v4859_v15  ;;  %3871 = vmatprep.subr.bf16.mxu1 %v4381_v6  ;;  %v4394_v6 = vld [vmem:[%s5768_s3 + $0xd8] sm:$0xff]  }
  0x73   : > { %4203 = vmatprep.subr.bf16.mxu0 %v4402_v37  ;;  %v874_v51 = vor.u32 %v873_v35, %v772_v25  ;;  %v781_v25 = vrot.slane %v779_v39, 7  ;;  %v5020_v35 = vsel %vm4799_vm5, %v4688_v60, 0 }
  0x74   : > { %4204 = vmatpush3.bf16.msra.mxu0 %v4402_v37  ;;  %v4962_v37 = vld [vmem:[%s4639_s17 + $0x50] sm:$0xff]  }
  0x75   : > { %3872 = vmatpush3.bf16.msra.mxu1 %v4382_v20  ;;  %4005 = vmatprep.subr.bf16.mxu0 %v4405_v52  ;;  %v4951_v20 = vsel %vm4799_vm5, %v870_v5, 0  ;;  %v789_v54 = vshll.u32 %v4962_v37, 16  ;;  %v786_v7 = vshrl.u32 %v4962_v37, 16 }
  0x76   : > { %3873 = vmatprep.subr.bf16.mxu1 %v4385_v26  ;;  %v4399_v26 = vld [vmem:[%s5768_s3 + $0xd0] sm:$0xff]  }
  0x77   : > { %v877_v11 = vrot.slane %v789_v54, 1 }
  0x78   : > { %1203 = vmatmul.mubr.bf16.gmra.mxu0 %v4892_v38  ;;  %4162 = vmatmul.mubr.bf16.gmra.mxu1 %v4868_v18 }
  0x79   : > { %1210 = vmatprep.mubr.bf16.mxu0 %v4835_v62  ;;  %4165 = vmatprep.mubr.bf16.mxu1 %v4884_v32 }
  0x7a   : > { %3874 = vmatpush3.bf16.msra.mxu1 %v4386_v36  ;;  %v875_v36 = vrot.slane %v782_v22, 1 }
  0x7b   : > { %3875 = vmatprep.subr.bf16.mxu1 %v4388_v31  ;;  %v4403_v31 = vld [vmem:[%s5768_s3 + $0x100] sm:$0xff]  }
  0x7c   : > { %v876_v52 = vor.u32 %v875_v36, %v779_v39  ;;  %v885_v39 = vrot.slane %v817_v27, 1  ;;  %v5027_v36 = vsel %vm4799_vm5, %v4829_v59, 0 }
  0x7e   : > { %3876 = vmatpush3.bf16.msra.mxu1 %v4389_v55  ;;  %v4404_v55 = vld [vmem:[%s5768_s3 + $0xc0] sm:$0xff]   ;;  %v4990_v5 = vsel %vm4799_vm5, %v876_v52, 0 }
  0x7f   : > { %3877 = vmatprep.subr.bf16.mxu1 %v4393_v58  ;;  %v4407_v58 = vld [vmem:[%s5768_s3 + $0x238] sm:$0xff]   ;;  %v4423_v52 = vld [vmem:[%s5768_s3 + $0x220] sm:$0xff]  }
  0x80   : > { %1211 = vmatmul.mubr.bf16.gmra.mxu0 %v4919_v57  ;;  %4166 = vmatmul.mubr.bf16.gmra.mxu1 %v4912_v53 }
  0x81   : > { %1218 = vmatprep.mubr.bf16.mxu0 %v4874_v21  ;;  %4169 = vmatprep.mubr.bf16.mxu1 %v4926_v47 }
  0x82   : > { %3878 = vmatpush3.bf16.msra.mxu1 %v4394_v6  ;;  %v777_v6 = vor.u32 %v775_v17, %v774_v56  ;;  %v784_v17 = vor.u32 %v782_v22, %v781_v25  ;;  %v886_v22 = vor.u32 %v885_v39, %v814_v19  ;;  %v4406_v19 = vld [vmem:[%s5768_s3 + $0x1b8] sm:$0xff]   ;;  %v4429_v39 = vld [vmem:[%s5768_s3 + $0x208] sm:$0xff]  }
  0x83   : > { %3879 = vmatprep.subr.bf16.mxu1 %v4398_v14  ;;  %v878_v14 = vor.u32 %v877_v11, %v786_v7  ;;  %v4417_v11 = vld [vmem:[%s5768_s3 + $0x198] sm:$0xff]  }
  0x84   : > { %v4998_v23 = vsel %vm4673_vm2, 0, %v777_v6  ;;  %v5042_v59 = vsel %vm4799_vm5, %v886_v22, 0  ;;  %v4419_v6 = vld [vmem:[%s5768_s3 + $0x1d0] sm:$0xff]   ;;  %v4422_v22 = vld [vmem:[%s5768_s3 + $0x188] sm:$0xff]  }
  0x85   : > { %v5002_v24 = vsel %vm4799_vm5, %v878_v14, 0  ;;  %v4428_v14 = vld [vmem:[%s5768_s3 + $0x210] sm:$0xff]  }
  0x86   : > { %3880 = vmatpush3.bf16.msra.mxu1 %v4399_v26  ;;  %v5007_v26 = vsel %vm4799_vm5, %v4667_v48, 0  ;;  %v788_v48 = vrot.slane %v786_v7, 7 }
  0x87   : > { %3881 = vmatprep.subr.bf16.mxu1 %v4400_v34  ;;  %v5015_v34 = vsel %vm4673_vm2, 0, %v784_v17  ;;  %v4420_v17 = vld [vmem:[%s5768_s3 + $0x190] sm:$0xff]  }
  0x88   : > { %1219 = vmatmul.mubr.bf16.gmra.mxu0 %v4944_v16  ;;  %4170 = vmatmul.mubr.bf16.gmra.mxu1 %v4951_v20  ;;  %v791_v60 = vor.u32 %v789_v54, %v788_v48  ;;  %v4421_v48 = vld [vmem:[%s5768_s3 + $0x1c8] sm:$0xff]  }
  0x89   : > { %1226 = vmatprep.mubr.bf16.mxu0 %v4391_v41  ;;  %4173 = vmatprep.mubr.bf16.mxu1 %v914_v40  ;;  %v4986_v41 = vsel %vm4799_vm5, %v874_v51, 0  ;;  %v4408_v40 = vld [vmem:[%s5768_s3 + $0x1f0] sm:$0xff]   ;;  %v4414_v51 = vld [vmem:[%s5768_s3 + $0x1e0] sm:$0xff]  }
  0x8a   : > { %3882 = vmatpush3.bf16.msra.mxu1 %v4401_v46  ;;  %v5038_v27 = vsel %vm4673_vm2, 0, %v791_v60  ;;  %v4412_v46 = vld [vmem:[%s5768_s3 + $0x230] sm:$0xff]  }
  0x8b   : > { %3883 = vmatprep.subr.bf16.mxu1 %v4403_v31  ;;  %v5071_v31 = vld [vmem:[%s4639_s17 + $0x38] sm:$0xff]  }
  0x8c   : > { %v1530_v54 = vshll.u32 %v5071_v31, 16  ;;  %v1527_v56 = vshrl.u32 %v5071_v31, 16 }
  0x8e   : > { %3884 = vmatpush3.bf16.msra.mxu1 %v4404_v55  ;;  %v4415_v55 = vld [vmem:[%s5768_s3 + $0x1a0] sm:$0xff]   ;;  %v1544_v7 = vrot.slane %v1530_v54, 1 }
  0x8f   : > { %4237 = vmatprep.subr.bf16.mxu1 %v4407_v58 }
  0x90   : > { %1227 = vmatmul.mubr.bf16.gmra.mxu0 %v847_v2  ;;  %4174 = vmatmul.mubr.bf16.gmra.mxu1 %v4986_v41  ;;  %v4427_v2 = vld [vmem:[%s5768_s3 + $0x218] sm:$0xff]   ;;  %v1545_v25 = vor.u32 %v1544_v7, %v1527_v56 }
  0x91   : > { %1234 = vmatprep.mubr.bf16.mxu0 %v4929_v3  ;;  %4177 = vmatprep.mubr.bf16.mxu1 %v4990_v5 }
  0x92   : > { %v5123_v60 = vsel %vm4799_vm5, %v1545_v25, 0 }
  0x98   : > { %1235 = vmatmul.mubr.bf16.gmra.mxu0 %v4998_v23  ;;  %4178 = vmatmul.mubr.bf16.gmra.mxu1 %v5002_v24 }
  0x99   : > { %1242 = vmatprep.mubr.bf16.mxu0 %v4932_v9  ;;  %4181 = vmatprep.mubr.bf16.mxu1 %v5007_v26 }
  0xa0   : > { %1243 = vmatmul.mubr.bf16.gmra.mxu0 %v5015_v34  ;;  %4182 = vmatmul.mubr.bf16.gmra.mxu1 %v5020_v35 }
  0xa1   : > { %1250 = vmatprep.mubr.bf16.mxu0 %v4962_v37  ;;  %4185 = vmatprep.mubr.bf16.mxu1 %v5027_v36 }
  0xa8   : > { %1251 = vmatmul.mubr.bf16.gmra.mxu0 %v5038_v27  ;;  %4186 = vmatmul.mubr.bf16.gmra.mxu1 %v5042_v59 }
  0xa9   : > { %1779 = vmatprep.mubr.bf16.mxu1 %v4657_v42  ;;  %4205 = vmatprep.mubr.bf16.mxu0 %v4839_v1  ;;  %v4409_v42 = vld [vmem:[%s5768_s3 + $0x1b0] sm:$0xff]   ;;  %v4410_v1 = vld [vmem:[%s5768_s3 + $0x1e8] sm:$0xff]  }
  0xb0   : > { %1780 = vmatmul.mubr.bf16.vlgmr.msra.gmra.mxu1 %v4723_v10  ;;  %4206 = vmatmul.mubr.bf16.vlgmr.msra.gmra.mxu0 %v4859_v15  ;;  %v4418_v10 = vld [vmem:[%s5768_s3 + $0x228] sm:$0xff]  }
  0xb1   : > { %4006 = vmatpush3.bf16.msra.mxu0 %v4406_v19  ;;  %4238 = vmatpush3.bf16.msra.mxu1 %v4407_v58  ;;  %v4416_v58 = vld [vmem:[%s5768_s3 + $0x1d8] sm:$0xff]   ;;  %v4425_v19 = vld [vmem:[%s5768_s3 + $0x1c0] sm:$0xff]  }
  0xb2   : > { %1787 = vmatprep.mubr.bf16.mxu1 %v4695_v63  ;;  %4209 = vmatprep.mubr.bf16.mxu0 %v4868_v18 }
  0xb3   : > { %4007 = vmatprep.subr.bf16.mxu0 %v4408_v40  ;;  %4239 = vmatprep.subr.bf16.mxu1 %v4412_v46  ;;  %v4430_v40 = vld [vmem:[%s5768_s3 + $0x200] sm:$0xff]  }
  0xb5   : > { %4008 = vmatpush3.bf16.msra.mxu0 %v4409_v42  ;;  %4240 = vmatpush3.bf16.msra.mxu1 %v4412_v46  ;;  %v4426_v46 = vld [vmem:[%s5768_s3 + $0x180] sm:$0xff]   ;;  %v5146_v42 = vld [vmem:[%s4639_s17 + $0x78] sm:$0xff]  }
  0xb6   : > { %4009 = vmatprep.subr.bf16.mxu0 %v4410_v1  ;;  %4241 = vmatprep.subr.bf16.mxu1 %v4418_v10  ;;  %v1529_v1 = vrot.slane %v1527_v56, 7 }
  0xb8   : > { %1788 = vmatmul.mubr.bf16.gmra.mxu1 %v4766_v29  ;;  %4210 = vmatmul.mubr.bf16.gmra.mxu0 %v4884_v32 }
  0xb9   : > { %1795 = vmatprep.mubr.bf16.mxu1 %v4716_v8  ;;  %4213 = vmatprep.mubr.bf16.mxu0 %v4912_v53 }
  0xba   : > { %4010 = vmatpush3.bf16.msra.mxu0 %v4411_v49  ;;  %4242 = vmatpush3.bf16.msra.mxu1 %v4418_v10  ;;  %v1534_v10 = vshrl.u32 %v5146_v42, 16 }
  0xbb   : > { %4011 = vmatprep.subr.bf16.mxu0 %v4414_v51  ;;  %4243 = vmatprep.subr.bf16.mxu1 %v4423_v52  ;;  %v1532_v51 = vor.u32 %v1530_v54, %v1529_v1 }
  0xbe   : > { %4012 = vmatpush3.bf16.msra.mxu0 %v4415_v55  ;;  %4244 = vmatpush3.bf16.msra.mxu1 %v4423_v52  ;;  %v5164_v55 = vsel %vm4673_vm2, 0, %v1532_v51 }
  0xbf   : > { %4013 = vmatprep.subr.bf16.mxu0 %v4416_v58  ;;  %4245 = vmatprep.subr.bf16.mxu1 %v4427_v2 }
  0xc0   : > { %1796 = vmatmul.mubr.bf16.gmra.mxu1 %v4796_v43  ;;  %4214 = vmatmul.mubr.bf16.gmra.mxu0 %v4926_v47 }
  0xc1   : > { %1803 = vmatprep.mubr.bf16.mxu1 %v4762_v28  ;;  %4217 = vmatprep.mubr.bf16.mxu0 %v4951_v20 }
  0xc2   : > { %4014 = vmatpush3.bf16.msra.mxu0 %v4417_v11  ;;  %4246 = vmatpush3.bf16.msra.mxu1 %v4427_v2 }
  0xc3   : > { %4015 = vmatprep.subr.bf16.mxu0 %v4419_v6  ;;  %4247 = vmatprep.subr.bf16.mxu1 %v4428_v14 }
  0xc6   : > { %4016 = vmatpush3.bf16.msra.mxu0 %v4420_v17  ;;  %4248 = vmatpush3.bf16.msra.mxu1 %v4428_v14 }
  0xc7   : > { %4017 = vmatprep.subr.bf16.mxu0 %v4421_v48  ;;  %4249 = vmatprep.subr.bf16.mxu1 %v4429_v39 }
  0xc8   : > { %1804 = vmatmul.mubr.bf16.gmra.mxu1 %v4845_v4  ;;  %4218 = vmatmul.mubr.bf16.gmra.mxu0 %v5123_v60 }
  0xc9   : > { %1811 = vmatprep.mubr.bf16.mxu1 %v4809_v33  ;;  %4221 = vmatprep.mubr.bf16.mxu0 %v4986_v41  ;;  %v1537_v41 = vshll.u32 %v5146_v42, 16 }
  0xca   : > { %4018 = vmatpush3.bf16.msra.mxu0 %v4422_v22  ;;  %4250 = vmatpush3.bf16.msra.mxu1 %v4429_v39  ;;  %v1536_v39 = vrot.slane %v1534_v10, 7 }
  0xcb   : > { %4019 = vmatprep.subr.bf16.mxu0 %v4425_v19  ;;  %4251 = vmatprep.subr.bf16.mxu1 %v4430_v40  ;;  %v1546_v49 = vrot.slane %v1537_v41, 1 }
  0xcd   : > { %v1547_v52 = vor.u32 %v1546_v49, %v1534_v10  ;;  %v1539_v10 = vor.u32 %v1537_v41, %v1536_v39 }
  0xce   : > { %4020 = vmatpush3.bf16.msra.mxu0 %v4426_v46  ;;  %4252 = vmatpush3.bf16.msra.mxu1 %v4430_v40 }
  0xcf   : > { %v5168_v58 = vsel %vm4799_vm5, %v1547_v52, 0 }
  0xd0   : > { %1812 = vmatmul.mubr.bf16.gmra.mxu1 %v4892_v38  ;;  %4222 = vmatmul.mubr.bf16.gmra.mxu0 %v4990_v5 }
  0xd1   : > { %1819 = vmatprep.mubr.bf16.mxu1 %v4835_v62  ;;  %4225 = vmatprep.mubr.bf16.mxu0 %v5002_v24 }
  0xd8   : > { %1820 = vmatmul.mubr.bf16.gmra.mxu1 %v4919_v57  ;;  %4226 = vmatmul.mubr.bf16.gmra.mxu0 %v5007_v26 }
  0xd9   : > { %1827 = vmatprep.mubr.bf16.mxu1 %v4874_v21  ;;  %4229 = vmatprep.mubr.bf16.mxu0 %v5020_v35 }
  0xe0   : > { %1828 = vmatmul.mubr.bf16.gmra.mxu1 %v4944_v16  ;;  %4230 = vmatmul.mubr.bf16.gmra.mxu0 %v5027_v36 }
  0xe1   : > { %1835 = vmatprep.mubr.bf16.mxu1 %v5071_v31  ;;  %4233 = vmatprep.mubr.bf16.mxu0 %v5042_v59 }
  0xe8   : > { %1836 = vmatmul.mubr.bf16.gmra.mxu1 %v5164_v55  ;;  %4234 = vmatmul.mubr.bf16.gmra.mxu0 %v5168_v58 }
  0xe9   : > { %1843 = vmatprep.mubr.bf16.mxu1 %v4929_v3  ;;  %2428 = vmatprep.mubr.bf16.mxu0 %v4695_v63  ;;  %v5185_v63 = vld [vmem:[%s4639_s17 + $0x58] sm:$0xff]  }
  0xf0   : > { %1844 = vmatmul.mubr.bf16.gmra.mxu1 %v4998_v23  ;;  %2429 = vmatmul.mubr.bf16.vlgmr.msra.gmra.mxu0 %v4766_v29 }
  0xf1   : > { %1851 = vmatprep.mubr.bf16.mxu1 %v4932_v9  ;;  %2436 = vmatprep.mubr.bf16.mxu0 %v4716_v8  ;;  %v5192_v8 = vld [vmem:[%s4639_s17 + $0x60] sm:$0xff]  }
  0xf8   : > { %1852 = vmatmul.mubr.bf16.gmra.mxu1 %v5015_v34  ;;  %2437 = vmatmul.mubr.bf16.gmra.mxu0 %v4796_v43 }
  0xf9   : > { %1859 = vmatprep.mubr.bf16.mxu1 %v4962_v37  ;;  %2444 = vmatprep.mubr.bf16.mxu0 %v4762_v28 }
 0x100   : > { %1860 = vmatmul.mubr.bf16.gmra.mxu1 %v5038_v27  ;;  %2445 = vmatmul.mubr.bf16.gmra.mxu0 %v4845_v4 }
 0x101   : > { %1867 = vmatprep.mubr.bf16.mxu1 %v5185_v63  ;;  %2452 = vmatprep.mubr.bf16.mxu0 %v4809_v33 }
 0x108   : > { %1868 = vmatmul.mubr.bf16.gmra.mxu1 %v4692_v61  ;;  %2453 = vmatmul.mubr.bf16.gmra.mxu0 %v4892_v38 }
 0x109   : > { %1875 = vmatprep.mubr.bf16.mxu1 %v5192_v8  ;;  %2460 = vmatprep.mubr.bf16.mxu0 %v4835_v62  ;;  %v5206_v62 = vld [vmem:[%s539_s9] sm:$0xff]  }
 0x10a   : > { %v2179_v19 = vshll.u32 %v5206_v62, 16 }
 0x110   : > { %v3749_v28 = vpop.f32.mrf.mxu0  ;;  %v3821_v29 = vpop.f32.mrf.mxu1  ;;  %1876 = vmatmul.mubr.bf16.gmra.mxu1 %v4731_v13  ;;  %2461 = vmatmul.mubr.bf16.gmra.mxu0 %v4919_v57 }
 0x111   : > { %1883 = vmatprep.mubr.bf16.mxu1 %v4698_v0  ;;  %2468 = vmatprep.mubr.bf16.mxu0 %v4874_v21  ;;  %v2176_v21 = vshrl.u32 %v5206_v62, 16 }
 0x112   : > { %v3750_v43 = vpop.f32.mrf.mxu0  ;;  %v3822_v33 = vpop.f32.mrf.mxu1 }
 0x113   : > { %v5200_v4 = vadd.f32 %v3750_v43, %v3749_v28  ;;  %v5202_v38 = vadd.f32 %v3822_v33, %v3821_v29  ;;  %v2178_v22 = vrot.slane %v2176_v21, 7 }
 0x114   : > { %v3752_v3 = vpop.f32.mrf.mxu0  ;;  %v3824_v23 = vpop.f32.mrf.mxu1 }
 0x115   : > { %v2181_v49 = vor.u32 %v2179_v19, %v2178_v22 }
 0x116   : > { %v3753_v54 = vpop.f32.mrf.mxu0  ;;  %v3825_v2 = vpop.f32.mrf.mxu1 }
 0x117   : > { %v5208_v56 = vadd.f32 %v3753_v54, %v3752_v3  ;;  %v5210_v57 = vadd.f32 %v3825_v2, %v3824_v23  ;;  %v2191_v3 = vsel %vm4673_vm2, 0, %v2181_v49 }
 0x118   : > { %v3755_v0 = vpop.f32.mrf.mxu0  ;;  %v3827_v7 = vpop.f32.mrf.mxu1  ;;  %1884 = vmatmul.mubr.bf16.gmra.mxu1 %v4770_v30  ;;  %2469 = vmatmul.mubr.bf16.gmra.mxu0 %v4944_v16 }
 0x119   : > { %1891 = vmatprep.mubr.bf16.mxu1 %v4727_v12  ;;  %2476 = vmatprep.mubr.bf16.mxu0 %v5071_v31 }
 0x11a   : > { %v3756_v11 = vpop.f32.mrf.mxu0  ;;  %v3828_v6 = vpop.f32.mrf.mxu1 }
 0x11b   : > { %v3757_v14 = vadd.f32 %v3756_v11, %v3755_v0  ;;  %v5217_v25 = vadd.f32 %v3828_v6, %v3827_v7 }
 0x11c   : > { %v3758_v17 = vpop.f32.mrf.mxu0  ;;  %v3830_v48 = vpop.f32.mrf.mxu1 }
 0x11e   : > { %v3759_v16 = vpop.f32.mrf.mxu0  ;;  %v3831_v40 = vpop.f32.mrf.mxu1 }
 0x11f   : > { %v3760_v12 = vadd.f32 %v3759_v16, %v3758_v17  ;;  %v5222_v46 = vadd.f32 %v3831_v40, %v3830_v48 }
 0x120   : > { %v3761_v31 = vpop.f32.mrf.mxu0  ;;  %v3833_v1 = vpop.f32.mrf.mxu1  ;;  %1892 = vmatmul.mubr.bf16.gmra.mxu1 %v4805_v45  ;;  %2477 = vmatmul.mubr.bf16.gmra.mxu0 %v5164_v55  ;;  %v5236_v55 = vsel %vm4673_vm2, 0, %v1539_v10 }
 0x121   : > { %1899 = vmatprep.mubr.bf16.mxu1 %v5146_v42  ;;  %2484 = vmatprep.mubr.bf16.mxu0 %v5206_v62 }
 0x122   : > { %v3762_v51 = vpop.f32.mrf.mxu0  ;;  %v3834_v52 = vpop.f32.mrf.mxu1 }
 0x123   : > { %v3763_v28 = vadd.f32 %v3762_v51, %v3761_v31  ;;  %v5232_v29 = vadd.f32 %v3834_v52, %v3833_v1 }
 0x124   : > { %v3764_v43 = vpop.f32.mrf.mxu0  ;;  %v3836_v33 = vpop.f32.mrf.mxu1 }
 0x126   : > { %v3765_v23 = vpop.f32.mrf.mxu0  ;;  %v3837_v54 = vpop.f32.mrf.mxu1 }
 0x127   : > { %v3766_v41 = vadd.f32 %v3765_v23, %v3764_v43  ;;  %v5240_v2 = vadd.f32 %v3837_v54, %v3836_v33 }
 0x128   : > { %v3767_v0 = vpop.f32.mrf.mxu0  ;;  %v3839_v7 = vpop.f32.mrf.mxu1  ;;  %1900 = vmatmul.mubr.bf16.gmra.mxu1 %v5236_v55  ;;  %2485 = vmatmul.mubr.bf16.gmra.mxu0 %v2191_v3 }
 0x129   : > { %2492 = vmatprep.mubr.bf16.mxu0 %v4932_v9  ;;  %4253 = vmatprep.mubr.bf16.mxu1 %v4859_v15 }
 0x12a   : > { %v3768_v11 = vpop.f32.mrf.mxu0  ;;  %v3840_v6 = vpop.f32.mrf.mxu1 }
 0x12b   : > { %v3769_v17 = vadd.f32 %v3768_v11, %v3767_v0  ;;  %v5245_v48 = vadd.f32 %v3840_v6, %v3839_v7 }
 0x12c   : > { %v3770_v39 = vpop.f32.mrf.mxu0  ;;  %v3842_v22 = vpop.f32.mrf.mxu1 }
 0x12e   : > { %v3771_v16 = vpop.f32.mrf.mxu0  ;;  %v3843_v40 = vpop.f32.mrf.mxu1 }
 0x12f   : > { %v3772_v31 = vadd.f32 %v3771_v16, %v3770_v39  ;;  %v5247_v1 = vadd.f32 %v3843_v40, %v3842_v22 }
 0x130   : > { %v3773_v10 = vpop.f32.mrf.mxu0  ;;  %v4159_v49 = vpop.f32.mrf.mxu1  ;;  %2493 = vmatmul.mubr.bf16.gmra.mxu0 %v5015_v34  ;;  %4254 = vmatmul.mubr.bf16.vlgmr.msra.gmra.mxu1 %v4868_v18 }
 0x131   : > { %v5251_v9 = vadd.f32 %v4159_v49, %v3757_v14  ;;  %2500 = vmatprep.mubr.bf16.mxu0 %v4962_v37  ;;  %4257 = vmatprep.mubr.bf16.mxu1 %v4884_v32 }
 0x132   : > { %v3774_v15 = vpop.f32.mrf.mxu0  ;;  %v1325_v51 = vpop.f32.mrf.mxu1 }
 0x133   : > { %v3775_v52 = vadd.f32 %v3774_v15, %v3773_v10  ;;  %v5256_v43 = vadd.f32 %v5200_v4, %v1325_v51 }
 0x134   : > { %v3776_v33 = vpop.f32.mrf.mxu0  ;;  %v4160_v3 = vpop.f32.mrf.mxu1 }
 0x135   : > { %v5258_v23 = vadd.f32 %v4160_v3, %v3760_v12  ;;  %v4435_v3 = vld [vmem:[%s4639_s17 + $0x68] sm:$0xff]  }
 0x136   : > { %v3777_v54 = vpop.f32.mrf.mxu0  ;;  %v1328_v34 = vpop.f32.mrf.mxu1 }
 0x137   : > { %v3778_v0 = vadd.f32 %v3777_v54, %v3776_v33  ;;  %v5261_v18 = vadd.f32 %v5208_v56, %v1328_v34 }
 0x138   : > { %v3779_v14 = vpop.f32.mrf.mxu0  ;;  %v4163_v37 = vpop.f32.mrf.mxu1  ;;  %2501 = vmatmul.mubr.bf16.gmra.mxu0 %v5038_v27  ;;  %4258 = vmatmul.mubr.bf16.gmra.mxu1 %v4912_v53  ;;  %v2193_v27 = vrot.slane %v2179_v19, 1 }
 0x139   : > { %v5265_v32 = vadd.f32 %v4163_v37, %v3769_v17  ;;  %2508 = vmatprep.mubr.bf16.mxu0 %v5185_v63  ;;  %4261 = vmatprep.mubr.bf16.mxu1 %v4926_v47 }
 0x13a   : > { %v3780_v4 = vpop.f32.mrf.mxu0  ;;  %v1341_v12 = vpop.f32.mrf.mxu1  ;;  %v2194_v19 = vor.u32 %v2193_v27, %v2176_v21 }
 0x13b   : > { %v3781_v7 = vadd.f32 %v3780_v4, %v3779_v14  ;;  %v5269_v11 = vadd.f32 %v3763_v28, %v1341_v12 }
 0x13c   : > { %v3782_v6 = vpop.f32.mrf.mxu0  ;;  %v4164_v56 = vpop.f32.mrf.mxu1 }
 0x13d   : > { %v5271_v39 = vadd.f32 %v4164_v56, %v3772_v31 }
 0x13e   : > { %v3783_v22 = vpop.f32.mrf.mxu0  ;;  %v1344_v53 = vpop.f32.mrf.mxu1 }
 0x13f   : > { %v3784_v17 = vadd.f32 %v3783_v22, %v3782_v6  ;;  %v5275_v16 = vadd.f32 %v3766_v41, %v1344_v53  ;;  %v4436_v22 = vld [vmem:[%s4639_s17 + $0x70] sm:$0xff]  }
 0x140   : > { %v3785_v63 = vpop.f32.mrf.mxu0  ;;  %v4167_v40 = vpop.f32.mrf.mxu1  ;;  %2509 = vmatmul.mubr.bf16.gmra.mxu0 %v4692_v61  ;;  %4262 = vmatmul.mubr.bf16.gmra.mxu1 %v4951_v20  ;;  %v2199_v20 = vsel %vm4799_vm5, %v2194_v19, 0 }
 0x141   : > { %v5279_v47 = vadd.f32 %v4167_v40, %v3781_v7  ;;  %2516 = vmatprep.mubr.bf16.mxu0 %v5192_v8  ;;  %4265 = vmatprep.mubr.bf16.mxu1 %v5123_v60 }
 0x142   : > { %v3786_v28 = vpop.f32.mrf.mxu0  ;;  %v1357_v31 = vpop.f32.mrf.mxu1 }
 0x143   : > { %v3787_v41 = vadd.f32 %v3786_v28, %v3785_v63  ;;  %v5285_v10 = vadd.f32 %v3775_v52, %v1357_v31  ;;  %v4432_v28 = vld [vmem:[%s539_s9 + $0x8] sm:$0xff]   ;;  %s5616_s9 = scalar_lea.vmem [#allocation6], %s4622_s10  ;;  %s3637_s10 = sshll.u32 (%p4546_p6), %s4467_s20, 6 }
 0x144   : > { %v3788_v49 = vpop.f32.mrf.mxu0  ;;  %v4168_v15 = vpop.f32.mrf.mxu1  ;;  %s3056_s13 = scalar_lea.vmem (%p4546_p6), %s5770_s5, %s3637_s10 }
 0x145   : > { %v5287_v61 = vadd.f32 %v4168_v15, %v3784_v17 }
 0x146   : > { %v3789_v51 = vpop.f32.mrf.mxu0  ;;  %v1360_v8 = vpop.f32.mrf.mxu1 }
 0x147   : > { %v3790_v33 = vadd.f32 %v3789_v51, %v3788_v49  ;;  %v5291_v60 = vadd.f32 %v3778_v0, %v1360_v8  ;;  %v2186_v51 = vshll.u32 %v4432_v28, 16 }
 0x148   : > { %v3791_v62 = vpop.f32.mrf.mxu0  ;;  %v4171_v21 = vpop.f32.mrf.mxu1  ;;  %2517 = vmatmul.mubr.bf16.gmra.mxu0 %v4731_v13  ;;  %4266 = vmatmul.mubr.bf16.gmra.mxu1 %v2199_v20  ;;  %v2183_v20 = vshrl.u32 %v4432_v28, 16 }
 0x149   : > { %2524 = vmatprep.mubr.bf16.mxu0 %v4435_v3  ;;  %4269 = vmatprep.mubr.bf16.mxu1 %v4990_v5 }
 0x14a   : > { %v3792_v52 = vpop.f32.mrf.mxu0  ;;  %v1373_v54 = vpop.f32.mrf.mxu1 }
 0x14b   : > { %v3793_v34 = vadd.f32 %v3792_v52, %v3791_v62  ;;  %v5296_v14 = vadd.f32 %v3787_v41, %v1373_v54  ;;  %v2185_v52 = vrot.slane %v2183_v20, 7 }
 0x14c   : > { %v3794_v37 = vpop.f32.mrf.mxu0  ;;  %v4172_v4 = vpop.f32.mrf.mxu1 }
 0x14d   : > { %v5298_v12 = vadd.f32 %v4171_v21, %v3793_v34  ;;  %v2195_v34 = vrot.slane %v2186_v51, 1 }
 0x14e   : > { %v3795_v0 = vpop.f32.mrf.mxu0  ;;  %v1376_v7 = vpop.f32.mrf.mxu1 }
 0x14f   : > { %v3796_v6 = vadd.f32 %v3795_v0, %v3794_v37  ;;  %v5300_v13 = vadd.f32 %v3790_v33, %v1376_v7 }
 0x150   : > { %v3797_v56 = vpop.f32.mrf.mxu0  ;;  %v4175_v27 = vpop.f32.mrf.mxu1  ;;  %2525 = vmatmul.mubr.bf16.gmra.mxu0 %v4770_v30  ;;  %4270 = vmatmul.mubr.bf16.gmra.mxu1 %v5002_v24 }
 0x151   : > { %v5304_v5 = vadd.f32 %v4172_v4, %v3796_v6  ;;  %2532 = vmatprep.mubr.bf16.mxu0 %v4436_v22  ;;  %4273 = vmatprep.mubr.bf16.mxu1 %v5007_v26  ;;  %v2196_v6 = vor.u32 %v2195_v34, %v2183_v20 }
 0x152   : > { %v3798_v53 = vpop.f32.mrf.mxu0  ;;  %v1389_v17 = vpop.f32.mrf.mxu1 }
 0x153   : > { %v3799_v63 = vadd.f32 %v3798_v53, %v3797_v56 }
 0x154   : > { %v3800_v40 = vpop.f32.mrf.mxu0  ;;  %v4176_v19 = vpop.f32.mrf.mxu1 }
 0x155   : > { %v5310_v31 = vadd.f32 %v3799_v63, %v1389_v17 }
 0x156   : > { %v3801_v41 = vpop.f32.mrf.mxu0  ;;  %v1392_v49 = vpop.f32.mrf.mxu1 }
 0x157   : > { %v3802_v30 = vadd.f32 %v3801_v41, %v3800_v40 }
 0x158   : > { %v3803_v15 = vpop.f32.mrf.mxu0  ;;  %v4179_v24 = vpop.f32.mrf.mxu1  ;;  %2533 = vmatmul.mubr.bf16.gmra.mxu0 %v4805_v45  ;;  %4274 = vmatmul.mubr.bf16.gmra.mxu1 %v5020_v35 }
 0x159   : > { %v5314_v26 = vadd.f32 %v3802_v30, %v1392_v49  ;;  %2540 = vmatprep.mubr.bf16.mxu0 %v5146_v42  ;;  %4277 = vmatprep.mubr.bf16.mxu1 %v5027_v36  ;;  %v2188_v36 = vor.u32 %v2186_v51, %v2185_v52 }
 0x15a   : > { %v3804_v8 = vpop.f32.mrf.mxu0  ;;  %v1405_v33 = vpop.f32.mrf.mxu1 }
 0x15b   : > { %v3805_v62 = vadd.f32 %v3804_v8, %v3803_v15 }
 0x15c   : > { %v3806_v21 = vpop.f32.mrf.mxu0  ;;  %v4180_v3 = vpop.f32.mrf.mxu1 }
 0x15d   : > { %v5318_v54 = vadd.f32 %v4175_v27, %v3805_v62 }
 0x15e   : > { %v3807_v45 = vpop.f32.mrf.mxu0  ;;  %v1408_v37 = vpop.f32.mrf.mxu1 }
 0x15f   : > { %v3808_v35 = vadd.f32 %v3807_v45, %v3806_v21 }
 0x160   : > { %v3809_v4 = vpop.f32.mrf.mxu0  ;;  %v4183_v0 = vpop.f32.mrf.mxu1  ;;  %2541 = vmatmul.mubr.bf16.gmra.mxu0 %v5236_v55  ;;  %4278 = vmatmul.mubr.bf16.gmra.mxu1 %v5042_v59 }
 0x161   : > { %v5322_v42 = vadd.f32 %v4176_v19, %v3808_v35  ;;  %v5325_v7 = vadd.f32 %v4183_v0, %v5217_v25  ;;  %2548 = vmatprep.mubr.bf16.mxu0 %v4432_v28  ;;  %4281 = vmatprep.mubr.bf16.mxu1 %v5168_v58  ;;  %v2192_v25 = vsel %vm4673_vm2, 0, %v2188_v36  ;;  %v2200_v58 = vsel %vm4799_vm5, %v2196_v6, 0 }
 0x162   : > { %v3810_v56 = vpop.f32.mrf.mxu0  ;;  %v1421_v27 = vpop.f32.mrf.mxu1 }
 0x163   : > { %v3811_v22 = vadd.f32 %v3810_v56, %v3809_v4  ;;  %v5329_v53 = vadd.f32 %v5202_v38, %v1421_v27 }
 0x164   : > { %v3812_v17 = vpop.f32.mrf.mxu0  ;;  %v4184_v55 = vpop.f32.mrf.mxu1 }
 0x165   : > { %v5331_v63 = vadd.f32 %v3811_v22, %v1405_v33  ;;  %v5334_v59 = vadd.f32 %v4184_v55, %v5222_v46 }
 0x166   : > { %v3813_v40 = vpop.f32.mrf.mxu0  ;;  %v1424_v19 = vpop.f32.mrf.mxu1 }
 0x167   : > { %v3814_v28 = vadd.f32 %v3813_v40, %v3812_v17  ;;  %v5341_v41 = vadd.f32 %v5210_v57, %v1424_v19 }
 0x168   : > { %v3815_v38 = vpop.f32.mrf.mxu0  ;;  %v4187_v49 = vpop.f32.mrf.mxu1  ;;  %2549 = vmatmul.mubr.bf16.gmra.mxu0 %v2192_v25  ;;  %4282 = vmatmul.mubr.bf16.gmra.mxu1 %v2200_v58 }
 0x169   : > { %v5343_v30 = vadd.f32 %v3814_v28, %v1408_v37  ;;  %v5346_v46 = vadd.f32 %v4187_v49, %v5245_v48 }
 0x16a   : > { %v3816_v50 = vpop.f32.mrf.mxu0  ;;  %v1437_v15 = vpop.f32.mrf.mxu1 }
 0x16b   : > { %v3817_v20 = vadd.f32 %v3816_v50, %v3815_v38  ;;  %v5349_v44 = vadd.f32 %v5232_v29, %v1437_v15 }
 0x16c   : > { %v3818_v51 = vpop.f32.mrf.mxu0  ;;  %v4188_v8 = vpop.f32.mrf.mxu1 }
 0x16d   : > { %v5351_v33 = vadd.f32 %v4179_v24, %v3817_v20  ;;  %v5354_v57 = vadd.f32 %v4188_v8, %v5247_v1 }
 0x16e   : > { %v3819_v62 = vpop.f32.mrf.mxu0  ;;  %v1440_v21 = vpop.f32.mrf.mxu1 }
 0x16f   : > { %v3820_v52 = vadd.f32 %v3819_v62, %v3818_v51  ;;  %v5357_v34 = vadd.f32 %v5240_v2, %v1440_v21 }
 0x170   : > { %v3885_v48 = vpop.f32.mrf.mxu1  ;;  %v4207_v45 = vpop.f32.mrf.mxu0 }
 0x171   : > { %v5359_v37 = vadd.f32 %v4180_v3, %v3820_v52 }
 0x172   : > { %v3886_v35 = vpop.f32.mrf.mxu1  ;;  %v1942_v29 = vpop.f32.mrf.mxu0 }
 0x173   : > { %v3887_v4 = vadd.f32 %v3886_v35, %v3885_v48 }
 0x174   : > { %v3888_v0 = vpop.f32.mrf.mxu1  ;;  %v4208_v36 = vpop.f32.mrf.mxu0 }
 0x175   : > { %v1943_v24 = vadd.f32 %v3887_v4, %v1942_v29 }
 0x176   : > { %v3889_v6 = vpop.f32.mrf.mxu1  ;;  %v1945_v56 = vpop.f32.mrf.mxu0 }
 0x177   : > { %v5362_v1 = vadd.f32 %v1943_v24, %v5256_v43  ;;  %v3890_v27 = vadd.f32 %v3889_v6, %v3888_v0 }
 0x178   : > { %v3891_v22 = vpop.f32.mrf.mxu1  ;;  %v4211_v17 = vpop.f32.mrf.mxu0 }
 0x179   : > { %v1946_v2 = vadd.f32 %v3890_v27, %v1945_v56 }
 0x17a   : > { %v3892_v55 = vpop.f32.mrf.mxu1  ;;  %v1958_v25 = vpop.f32.mrf.mxu0 }
 0x17b   : > { %v5365_v3 = vadd.f32 %v1946_v2, %v5261_v18  ;;  %v3893_v58 = vadd.f32 %v3892_v55, %v3891_v22 }
 0x17c   : > { %v3894_v40 = vpop.f32.mrf.mxu1  ;;  %v4212_v19 = vpop.f32.mrf.mxu0 }
 0x17d   : > { %v1951_v28 = vadd.f32 %v4207_v45, %v3893_v58 }
 0x17e   : > { %v3895_v38 = vpop.f32.mrf.mxu1  ;;  %v1961_v49 = vpop.f32.mrf.mxu0 }
 0x17f   : > { %v3896_v50 = vadd.f32 %v3895_v38, %v3894_v40  ;;  %v5368_v15 = vadd.f32 %v1951_v28, %v5251_v9 }
 0x180   : > { %v3897_v43 = vpop.f32.mrf.mxu1  ;;  %v4215_v20 = vpop.f32.mrf.mxu0 }
 0x181   : > { %v1954_v51 = vadd.f32 %v4208_v36, %v3896_v50 }
 0x182   : > { %v3898_v8 = vpop.f32.mrf.mxu1  ;;  %v1974_v62 = vpop.f32.mrf.mxu0 }
 0x183   : > { %v3899_v21 = vadd.f32 %v3898_v8, %v3897_v43  ;;  %v5371_v52 = vadd.f32 %v1954_v51, %v5258_v23 }
 0x184   : > { %v3900_v18 = vpop.f32.mrf.mxu1  ;;  %v4216_v48 = vpop.f32.mrf.mxu0 }
 0x185   : > { %v1959_v35 = vadd.f32 %v3899_v21, %v1958_v25 }
 0x186   : > { %v3901_v29 = vpop.f32.mrf.mxu1  ;;  %v1977_v45 = vpop.f32.mrf.mxu0 }
 0x187   : > { %v3902_v4 = vadd.f32 %v3901_v29, %v3900_v18  ;;  %v5374_v0 = vadd.f32 %v1959_v35, %v5269_v11 }
 0x188   : > { %v3903_v9 = vpop.f32.mrf.mxu1  ;;  %v5376_v24 = vpop.f32.mrf.mxu0 }
 0x189   : > { %v1962_v6 = vadd.f32 %v3902_v4, %v1961_v49 }
 0x18a   : > { %v3904_v36 = vpop.f32.mrf.mxu1  ;;  %v1990_v56 = vpop.f32.mrf.mxu0 }
 0x18b   : > { %v3905_v27 = vadd.f32 %v3904_v36, %v3903_v9  ;;  %v5379_v22 = vadd.f32 %v1962_v6, %v5275_v16 }
 0x18c   : > { %v3906_v23 = vpop.f32.mrf.mxu1  ;;  %v5381_v2 = vpop.f32.mrf.mxu0 }
 0x18d   : > { %v1967_v55 = vadd.f32 %v4211_v17, %v3905_v27 }
 0x18e   : > { %v3907_v25 = vpop.f32.mrf.mxu1  ;;  %v1993_v58 = vpop.f32.mrf.mxu0 }
 0x18f   : > { %v3908_v40 = vadd.f32 %v3907_v25, %v3906_v23  ;;  %v5384_v11 = vadd.f32 %v1967_v55, %v5265_v32 }
 0x190   : > { %v3909_v28 = vpop.f32.mrf.mxu1  ;;  %v5386_v38 = vpop.f32.mrf.mxu0 }
 0x191   : > { %v1970_v49 = vadd.f32 %v4212_v19, %v3908_v40 }
 0x192   : > { %v3910_v50 = vpop.f32.mrf.mxu1  ;;  %v2006_v43 = vpop.f32.mrf.mxu0 }
 0x193   : > { %v3911_v51 = vadd.f32 %v3910_v50, %v3909_v28  ;;  %v5389_v16 = vadd.f32 %v1970_v49, %v5271_v39 }
 0x194   : > { %v3912_v8 = vpop.f32.mrf.mxu1  ;;  %v5391_v21 = vpop.f32.mrf.mxu0 }
 0x195   : > { %v1975_v17 = vadd.f32 %v3911_v51, %v1974_v62 }
 0x196   : > { %v3913_v18 = vpop.f32.mrf.mxu1  ;;  %v2009_v35 = vpop.f32.mrf.mxu0 }
 0x197   : > { %v3914_v29 = vadd.f32 %v3913_v18, %v3912_v8  ;;  %v5394_v32 = vadd.f32 %v1975_v17, %v5285_v10 }
 0x198   : > { %v3915_v4 = vpop.f32.mrf.mxu1  ;;  %v5396_v9 = vpop.f32.mrf.mxu0 }
 0x199   : > { %v1978_v19 = vadd.f32 %v3914_v29, %v1977_v45 }
 0x19a   : > { %v3916_v6 = vpop.f32.mrf.mxu1  ;;  %v5398_v36 = vpop.f32.mrf.mxu0 }
 0x19b   : > { %v3917_v27 = vadd.f32 %v3916_v6, %v3915_v4  ;;  %v5401_v39 = vadd.f32 %v1978_v19, %v5291_v60 }
 0x19c   : > { %v3918_v23 = vpop.f32.mrf.mxu1  ;;  %v5403_v55 = vpop.f32.mrf.mxu0 }
 0x19d   : > { %v1983_v62 = vadd.f32 %v4215_v20, %v3917_v27 }
 0x19e   : > { %v3919_v25 = vpop.f32.mrf.mxu1  ;;  %v5405_v40 = vpop.f32.mrf.mxu0 }
 0x19f   : > { %v3920_v10 = vadd.f32 %v3919_v25, %v3918_v23  ;;  %v5408_v28 = vadd.f32 %v1983_v62, %v5279_v47 }
 0x1a0   : > { %v3921_v49 = vpop.f32.mrf.mxu1  ;;  %v5410_v45 = vpop.f32.mrf.mxu0 }
 0x1a1   : > { %v1986_v50 = vadd.f32 %v4216_v48, %v3920_v10 }
 0x1a2   : > { %v3922_v51 = vpop.f32.mrf.mxu1  ;;  %v5412_v8 = vpop.f32.mrf.mxu0 }
 0x1a3   : > { %v3923_v60 = vadd.f32 %v3922_v51, %v3921_v49  ;;  %v5415_v17 = vadd.f32 %v1986_v50, %v5287_v61 }
 0x1a4   : > { %v3924_v18 = vpop.f32.mrf.mxu1  ;;  %v5417_v20 = vpop.f32.mrf.mxu0 }
 0x1a5   : > { %v1991_v29 = vadd.f32 %v3923_v60, %v1990_v56 }
 0x1a6   : > { %v3925_v4 = vpop.f32.mrf.mxu1  ;;  %v5419_v19 = vpop.f32.mrf.mxu0 }
 0x1a7   : > { %v3926_v47 = vadd.f32 %v3925_v4, %v3924_v18  ;;  %v5422_v6 = vadd.f32 %v1991_v29, %v5296_v14 }
 0x1a8   : > { %v3927_v27 = vpop.f32.mrf.mxu1  ;;  %v5424_v48 = vpop.f32.mrf.mxu0 }
 0x1a9   : > { %v1994_v23 = vadd.f32 %v3926_v47, %v1993_v58 }
 0x1aa   : > { %v3928_v62 = vpop.f32.mrf.mxu1  ;;  %v5426_v25 = vpop.f32.mrf.mxu0 }
 0x1ab   : > { %v3929_v61 = vadd.f32 %v3928_v62, %v3927_v27  ;;  %v5429_v10 = vadd.f32 %v1994_v23, %v5300_v13 }
 0x1ac   : > { %v3930_v49 = vpop.f32.mrf.mxu1  ;;  %v5431_v56 = vpop.f32.mrf.mxu0 }
 0x1ad   : > { %5777 = vst [vmem:[#allocation7_spill] sm:$0xff] %v5429_v10  ;;  %v1999_v50 = vadd.f32 %v5376_v24, %v3929_v61 }
 0x1ae   : > { %v3931_v51 = vpop.f32.mrf.mxu1  ;;  %v5434_v60 = vpop.f32.mrf.mxu0 }
 0x1af   : > { %v3932_v14 = vadd.f32 %v3931_v51, %v3930_v49  ;;  %v5437_v18 = vadd.f32 %v1999_v50, %v5298_v12 }
 0x1b0   : > { %v3933_v58 = vpop.f32.mrf.mxu1  ;;  %v4021_v29 = vpop.f32.mrf.mxu0 }
 0x1b1   : > { %v2002_v4 = vadd.f32 %v5381_v2, %v3932_v14 }
 0x1b2   : > { %v3934_v47 = vpop.f32.mrf.mxu1  ;;  %v4022_v27 = vpop.f32.mrf.mxu0 }
 0x1b3   : > { %v3935_v13 = vadd.f32 %v3934_v47, %v3933_v58  ;;  %v5440_v23 = vadd.f32 %v4022_v27, %v4021_v29  ;;  %v5443_v62 = vadd.f32 %v2002_v4, %v5304_v5 }
 0x1b4   : > { %v3936_v24 = vpop.f32.mrf.mxu1  ;;  %v5445_v61 = vpop.f32.mrf.mxu0 }
 0x1b5   : > { %v2007_v10 = vadd.f32 %v3935_v13, %v2006_v43 }
 0x1b6   : > { %v3937_v49 = vpop.f32.mrf.mxu1  ;;  %v5447_v51 = vpop.f32.mrf.mxu0 }
 0x1b7   : > { %v3938_v12 = vadd.f32 %v3937_v49, %v3936_v24  ;;  %v5450_v50 = vadd.f32 %v2007_v10, %v5310_v31 }
 0x1b8   : > { %v3939_v2 = vpop.f32.mrf.mxu1  ;;  %v5452_v14 = vpop.f32.mrf.mxu0 }
 0x1b9   : > { %5778 = vst [vmem:[#allocation8_spill] sm:$0xff] %v5450_v50  ;;  %v2010_v58 = vadd.f32 %v3938_v12, %v2009_v35 }
 0x1ba   : > { %v3940_v29 = vpop.f32.mrf.mxu1  ;;  %v5454_v47 = vpop.f32.mrf.mxu0 }
 0x1bb   : > { %v3941_v5 = vadd.f32 %v3940_v29, %v3939_v2  ;;  %v5457_v4 = vadd.f32 %v2010_v58, %v5314_v26 }
 0x1bc   : > { %v3942_v27 = vpop.f32.mrf.mxu1  ;;  %v5459_v43 = vpop.f32.mrf.mxu0 }
 0x1bd   : > { %5779 = vst [vmem:[#allocation9_spill] sm:$0xff] %v5457_v4  ;;  %v2015_v13 = vadd.f32 %v5386_v38, %v3941_v5 }
 0x1be   : > { %v3943_v24 = vpop.f32.mrf.mxu1  ;;  %v5462_v49 = vpop.f32.mrf.mxu0 }
 0x1bf   : > { %v3944_v31 = vadd.f32 %v3943_v24, %v3942_v27  ;;  %v5465_v10 = vadd.f32 %v2015_v13, %v5318_v54 }
 0x1c0   : > { %v3945_v35 = vpop.f32.mrf.mxu1  ;;  %v5467_v12 = vpop.f32.mrf.mxu0 }
 0x1c1   : > { %v2018_v2 = vadd.f32 %v5391_v21, %v3944_v31 }
 0x1c2   : > { %v3946_v29 = vpop.f32.mrf.mxu1  ;;  %v5470_v26 = vpop.f32.mrf.mxu0 }
 0x1c3   : > { %v3947_v58 = vadd.f32 %v3946_v29, %v3945_v35  ;;  %v5473_v4 = vadd.f32 %v2018_v2, %v5322_v42 }
 0x1c4   : > { %v3948_v38 = vpop.f32.mrf.mxu1  ;;  %v5475_v5 = vpop.f32.mrf.mxu0 }
 0x1c5   : > { %5780 = vst [vmem:[#allocation10_spill] sm:$0xff] %v5473_v4  ;;  %v2023_v27 = vadd.f32 %v3947_v58, %v5398_v36 }
 0x1c6   : > { %v3949_v24 = vpop.f32.mrf.mxu1  ;;  %v5478_v54 = vpop.f32.mrf.mxu0 }
 0x1c7   : > { %v3950_v13 = vadd.f32 %v3949_v24, %v3948_v38  ;;  %v5481_v50 = vadd.f32 %v2023_v27, %v5331_v63 }
 0x1c8   : > { %v3951_v21 = vpop.f32.mrf.mxu1  ;;  %v5483_v31 = vpop.f32.mrf.mxu0 }
 0x1c9   : > { %5781 = vst [vmem:[#allocation11_spill] sm:$0xff] %v5481_v50  ;;  %v2026_v35 = vadd.f32 %v3950_v13, %v5405_v40 }
 0x1ca   : > { %v3952_v29 = vpop.f32.mrf.mxu1  ;;  %v5486_v42 = vpop.f32.mrf.mxu0 }
 0x1cb   : > { %v3953_v2 = vadd.f32 %v3952_v29, %v3951_v21  ;;  %v5489_v4 = vadd.f32 %v2026_v35, %v5343_v30 }
 0x1cc   : > { %v3954_v36 = vpop.f32.mrf.mxu1  ;;  %v5491_v58 = vpop.f32.mrf.mxu0 }
 0x1cd   : > { %5782 = vst [vmem:[#allocation12_spill] sm:$0xff] %v5489_v4  ;;  %v2031_v38 = vadd.f32 %v5396_v9, %v3953_v2 }
 0x1ce   : > { %v3955_v24 = vpop.f32.mrf.mxu1  ;;  %v5494_v63 = vpop.f32.mrf.mxu0 }
 0x1cf   : > { %v3956_v27 = vadd.f32 %v3955_v24, %v3954_v36  ;;  %v5497_v50 = vadd.f32 %v2031_v38, %v5351_v33 }
 0x1d0   : > { %v3957_v40 = vpop.f32.mrf.mxu1  ;;  %v5499_v13 = vpop.f32.mrf.mxu0 }
 0x1d1   : > { %5783 = vst [vmem:[#allocation13_spill] sm:$0xff] %v5497_v50  ;;  %v2034_v21 = vadd.f32 %v5403_v55, %v3956_v27 }
 0x1d2   : > { %v3958_v29 = vpop.f32.mrf.mxu1  ;;  %v5502_v30 = vpop.f32.mrf.mxu0 }
 0x1d3   : > { %v3959_v35 = vadd.f32 %v3958_v29, %v3957_v40  ;;  %v5505_v4 = vadd.f32 %v2034_v21, %v5359_v37 }
 0x1d4   : > { %v3960_v9 = vpop.f32.mrf.mxu1  ;;  %v5507_v2 = vpop.f32.mrf.mxu0 }
 0x1d5   : > { %5784 = vst [vmem:[#allocation14_spill] sm:$0xff] %v5505_v4  ;;  %v2039_v36 = vadd.f32 %v3959_v35, %v5412_v8 }
 0x1d6   : > { %v3961_v24 = vpop.f32.mrf.mxu1  ;;  %v5510_v33 = vpop.f32.mrf.mxu0 }
 0x1d7   : > { %v3962_v38 = vadd.f32 %v3961_v24, %v3960_v9  ;;  %v5513_v50 = vadd.f32 %v2039_v36, %v5329_v53 }
 0x1d8   : > { %v3963_v55 = vpop.f32.mrf.mxu1  ;;  %v5515_v27 = vpop.f32.mrf.mxu0 }
 0x1d9   : > { %5785 = vst [vmem:[#allocation15_spill] sm:$0xff] %v5513_v50  ;;  %v2042_v40 = vadd.f32 %v3962_v38, %v5419_v19 }
 0x1da   : > { %v3964_v29 = vpop.f32.mrf.mxu1  ;;  %v5518_v37 = vpop.f32.mrf.mxu0 }
 0x1db   : > { %v3965_v21 = vadd.f32 %v3964_v29, %v3963_v55  ;;  %v5521_v4 = vadd.f32 %v2042_v40, %v5341_v41 }
 0x1dc   : > { %v3966_v8 = vpop.f32.mrf.mxu1  ;;  %v5523_v35 = vpop.f32.mrf.mxu0 }
 0x1dd   : > { %5786 = vst [vmem:[#allocation16_spill] sm:$0xff] %v5521_v4  ;;  %v2047_v9 = vadd.f32 %v5410_v45, %v3965_v21 }
 0x1de   : > { %v3967_v24 = vpop.f32.mrf.mxu1  ;;  %v5526_v53 = vpop.f32.mrf.mxu0 }
 0x1df   : > { %v3968_v36 = vadd.f32 %v3967_v24, %v3966_v8  ;;  %v5529_v50 = vadd.f32 %v2047_v9, %v5325_v7 }
 0x1e0   : > { %v3969_v19 = vpop.f32.mrf.mxu1  ;;  %v5531_v38 = vpop.f32.mrf.mxu0 }
 0x1e1   : > { %5787 = vst [vmem:[#allocation17_spill] sm:$0xff] %v5529_v50  ;;  %v2050_v55 = vadd.f32 %v5417_v20, %v3968_v36 }
 0x1e2   : > { %v3970_v29 = vpop.f32.mrf.mxu1  ;;  %v5534_v41 = vpop.f32.mrf.mxu0 }
 0x1e3   : > { %v3971_v40 = vadd.f32 %v3970_v29, %v3969_v19  ;;  %v5537_v4 = vadd.f32 %v2050_v55, %v5334_v59 }
 0x1e4   : > { %v3972_v45 = vpop.f32.mrf.mxu1  ;;  %v5539_v21 = vpop.f32.mrf.mxu0 }
 0x1e5   : > { %5788 = vst [vmem:[#allocation18_spill] sm:$0xff] %v5537_v4  ;;  %v2055_v8 = vadd.f32 %v3971_v40, %v5426_v25 }
 0x1e6   : > { %v3973_v24 = vpop.f32.mrf.mxu1  ;;  %v5542_v7 = vpop.f32.mrf.mxu0 }
 0x1e7   : > { %v3974_v9 = vadd.f32 %v3973_v24, %v3972_v45  ;;  %v5545_v50 = vadd.f32 %v2055_v8, %v5349_v44  ;;  %v4029_v8 = vadd.f32 %v5454_v47, %v5452_v14  ;;  %v5580_v47 = vld [vmem:[%s5769_s4] ss:$0 sm:$0xff] }
 0x1e8   : > { %v3975_v20 = vpop.f32.mrf.mxu1  ;;  %v5547_v36 = vpop.f32.mrf.mxu0 }
 0x1e9   : > { %5789 = vst [vmem:[#allocation19_spill] sm:$0xff] %v5545_v50  ;;  %v2058_v19 = vadd.f32 %v3974_v9, %v5434_v60 }
 0x1ea   : > { %v3976_v29 = vpop.f32.mrf.mxu1  ;;  %v5550_v59 = vpop.f32.mrf.mxu0 }
 0x1eb   : > { %v3977_v55 = vadd.f32 %v3976_v29, %v3975_v20  ;;  %v5553_v4 = vadd.f32 %v2058_v19, %v5357_v34 }
 0x1ec   : > { %v3978_v25 = vpop.f32.mrf.mxu1  ;;  %v5555_v40 = vpop.f32.mrf.mxu0 }
 0x1ed   : > { %5790 = vst [vmem:[#allocation20_spill] sm:$0xff] %v5553_v4  ;;  %v2063_v45 = vadd.f32 %v5424_v48, %v3977_v55  ;;  %v4032_v48 = vadd.f32 %v5462_v49, %v5459_v43  ;;  %v4026_v43 = vadd.f32 %v5447_v51, %v5445_v61  ;;  %v4044_v51 = vadd.f32 %v5494_v63, %v5491_v58 }
 0x1ee   : > { %v3979_v24 = vpop.f32.mrf.mxu1  ;;  %v5558_v44 = vpop.f32.mrf.mxu0  ;;  %v4038_v63 = vadd.f32 %v5478_v54, %v5475_v5 }
 0x1ef   : > { %v5563_v60 = vadd.f32 %v2063_v45, %v5346_v46  ;;  %v3980_v9 = vadd.f32 %v3979_v24, %v3978_v25 }
 0x1f0   : > { %v5565_v50 = vpop.f32.mrf.mxu0  ;;  %v4255_v20 = vpop.f32.mrf.mxu1 }
 0x1f1   : > { %v2066_v34 = vadd.f32 %v5431_v56, %v3980_v9  ;;  %v2600_v19 = vadd.f32 %v4255_v20, %v4029_v8 }
 0x1f2   : > { %v5568_v29 = vpop.f32.mrf.mxu0  ;;  %v2591_v4 = vpop.f32.mrf.mxu1 }
 0x1f3   : > { %v5573_v55 = vadd.f32 %v2066_v34, %v5354_v57  ;;  %v2720_v14 = vadd.f32 %v2600_v19, %v5368_v15  ;;  %v2592_v46 = vadd.f32 %v5440_v23, %v2591_v4  ;;  %v4041_v15 = vadd.f32 %v5486_v42, %v5483_v31 }
 0x1f4   : > { %v5582_v56 = vpop.f32.mrf.mxu0  ;;  %v4256_v25 = vpop.f32.mrf.mxu1 }
 0x1f5   : > { %v2718_v45 = vadd.f32 %v2592_v46, %v5362_v1  ;;  %v2603_v24 = vadd.f32 %v4256_v25, %v4032_v48  ;;  %v2823_v23 = vadd.f32 %v5580_v47, %v2720_v14  ;;  %v4035_v1 = vadd.f32 %v5470_v26, %v5467_v12 }
 0x1f6   : > { %v5587_v57 = vpop.f32.mrf.mxu0  ;;  %v2594_v49 = vpop.f32.mrf.mxu1 }
 0x1f7   : > { %v2721_v4 = vadd.f32 %v2603_v24, %v5371_v52  ;;  %v2595_v8 = vadd.f32 %v4026_v43, %v2594_v49  ;;  %v2821_v19 = vadd.f32 %v5580_v47, %v2718_v45  ;;  %v2855_v48 = vmax.f32 %v2823_v23, 0.0 }
 0x1f8   : > { %v5593_v9 = vpop.f32.mrf.mxu0  ;;  %v4259_v20 = vpop.f32.mrf.mxu1 }
 0x1f9   : > { %v2824_v34 = vadd.f32 %v5580_v47, %v2721_v4  ;;  %v2616_v61 = vadd.f32 %v4259_v20, %v4041_v15  ;;  %v2719_v31 = vadd.f32 %v2595_v8, %v5365_v3  ;;  %v2853_v3 = vmax.f32 %v2821_v19, 0.0 }
 0x1fa   : > { %v5602_v42 = vpop.f32.mrf.mxu0  ;;  %v2607_v52 = vpop.f32.mrf.mxu1 }
 0x1fb   : > { %v2856_v14 = vmax.f32 %v2824_v34, 0.0  ;;  %v2724_v46 = vadd.f32 %v2616_v61, %v5384_v11  ;;  %v2608_v25 = vadd.f32 %v4035_v1, %v2607_v52  ;;  %v2822_v12 = vadd.f32 %v5580_v47, %v2719_v31 }
 0x1fc   : > { %v5606_v26 = vpop.f32.mrf.mxu0  ;;  %v4260_v24 = vpop.f32.mrf.mxu1  ;;  %v4053_v11 = vadd.f32 %v5518_v37, %v5515_v27  ;;  %v4047_v1 = vadd.f32 %v5502_v30, %v5499_v13  ;;  %v4056_v37 = vadd.f32 %v5526_v53, %v5523_v35 }
 0x1fd   : > { %v3646_v43 = vpack.c.bf16 %v2856_v14, %v2855_v48  ;;  %v2619_v58 = vadd.f32 %v4260_v24, %v4044_v51  ;;  %v2854_v45 = vmax.f32 %v2822_v12, 0.0  ;;  %v2722_v49 = vadd.f32 %v2608_v25, %v5374_v0 }
 0x1fe   : > { %v5611_v15 = vpop.f32.mrf.mxu0  ;;  %v2610_v23 = vpop.f32.mrf.mxu1  ;;  %v2827_v4 = vadd.f32 %v5580_v47, %v2724_v46  ;;  %v4050_v25 = vadd.f32 %v5510_v33, %v5507_v2  ;;  %v4059_v33 = vadd.f32 %v5534_v41, %v5531_v38 }
 0x1ff   : > { %3718 = vst [vmem:[%s5616_s9 + $0x8] sm:$0xff] %v3646_v43   ;;  %v2725_v8 = vadd.f32 %v2619_v58, %v5389_v16  ;;  %v3641_v5 = vpack.c.bf16 %v2854_v45, %v2853_v3  ;;  %v2611_v54 = vadd.f32 %v4038_v63, %v2610_v23  ;;  %v2825_v61 = vadd.f32 %v5580_v47, %v2722_v49 }
 0x200   : > { %v5621_v20 = vpop.f32.mrf.mxu0  ;;  %v4263_v0 = vpop.f32.mrf.mxu1  ;;  %v2859_v31 = vmax.f32 %v2827_v4, 0.0  ;;  %v4068_v4 = vadd.f32 %v5558_v44, %v5555_v40  ;;  %v4062_v40 = vadd.f32 %v5542_v7, %v5539_v21  ;;  %v4071_v7 = vadd.f32 %v5568_v29, %v5565_v50 }
 0x201   : > { %v2828_v34 = vadd.f32 %v5580_v47, %v2725_v8  ;;  %v2632_v27 = vadd.f32 %v4263_v0, %v4053_v11  ;;  %3642 = vst [vmem:[%s5616_s9] sm:$0xff] %v3641_v5   ;;  %v2723_v51 = vadd.f32 %v2611_v54, %v5379_v22  ;;  %v2857_v22 = vmax.f32 %v2825_v61, 0.0 }
 0x202   : > { %v5631_v16 = vpop.f32.mrf.mxu0  ;;  %v2623_v19 = vpop.f32.mrf.mxu1 }
 0x203   : > { %v2860_v52 = vmax.f32 %v2828_v34, 0.0  ;;  %v2728_v48 = vadd.f32 %v2632_v27, %v5408_v28  ;;  %v2624_v13 = vadd.f32 %v4047_v1, %v2623_v19  ;;  %v2826_v30 = vadd.f32 %v5580_v47, %v2723_v51 }
 0x204   : > { %v5635_v14 = vpop.f32.mrf.mxu0  ;;  %v4264_v46 = vpop.f32.mrf.mxu1  ;;  %v4065_v28 = vadd.f32 %v5550_v59, %v5547_v36 }
 0x205   : > { %v3656_v35 = vpack.c.bf16 %v2860_v52, %v2859_v31  ;;  %v2635_v53 = vadd.f32 %v4264_v46, %v4056_v37  ;;  %v2858_v12 = vmax.f32 %v2826_v30, 0.0  ;;  %v2726_v24 = vadd.f32 %v2624_v13, %v5394_v32 }
 0x206   : > { %v5640_v43 = vpop.f32.mrf.mxu0  ;;  %v2626_v58 = vpop.f32.mrf.mxu1  ;;  %v2831_v63 = vadd.f32 %v5580_v47, %v2728_v48 }
 0x207   : > { %3720 = vst [vmem:[%s5616_s9 + $0x18] sm:$0xff] %v3656_v35   ;;  %v2729_v3 = vadd.f32 %v2635_v53, %v5415_v17  ;;  %v3651_v45 = vpack.c.bf16 %v2858_v12, %v2857_v22  ;;  %v2627_v49 = vadd.f32 %v4050_v25, %v2626_v58  ;;  %v2829_v36 = vadd.f32 %v5580_v47, %v2726_v24 }
 0x208   : > { %v4087_v23 = vpop.f32.mrf.mxu0  ;;  %v4267_v2 = vpop.f32.mrf.mxu1  ;;  %v2863_v5 = vmax.f32 %v2831_v63, 0.0  ;;  %v4080_v35 = vadd.f32 %v5611_v15, %v5606_v26  ;;  %v4074_v15 = vadd.f32 %v5587_v57, %v5582_v56  ;;  %v4083_v56 = vadd.f32 %v5631_v16, %v5621_v20 }
 0x209   : > { %v2832_v32 = vadd.f32 %v5580_v47, %v2729_v3  ;;  %v2648_v11 = vadd.f32 %v4267_v2, %v4065_v28  ;;  %3719 = vst [vmem:[%s5616_s9 + $0x10] sm:$0xff] %v3651_v45   ;;  %v2727_v59 = vadd.f32 %v2627_v49, %v5401_v39  ;;  %v2861_v44 = vmax.f32 %v2829_v36, 0.0  ;;  %v5792_v49 = vld [vmem:[#allocation8_spill] sm:$0xff] }
 0x20a   : > { %v4088_v8 = vpop.f32.mrf.mxu0  ;;  %v2639_v17 = vpop.f32.mrf.mxu1 }
 0x20b   : > { %v2864_v54 = vmax.f32 %v2832_v32, 0.0  ;;  %v2732_v0 = vadd.f32 %v2648_v11, %v5437_v18  ;;  %v2640_v1 = vadd.f32 %v4059_v33, %v2639_v17  ;;  %v2830_v38 = vadd.f32 %v5580_v47, %v2727_v59 }
 0x20c   : > { %v4090_v41 = vpop.f32.mrf.mxu0  ;;  %v4268_v34 = vpop.f32.mrf.mxu1  ;;  %v4077_v18 = vadd.f32 %v5602_v42, %v5593_v9  ;;  %v5791_v42 = vld [vmem:[#allocation7_spill] sm:$0xff]  ;;  %v4089_v11 = vadd.f32 %v4088_v8, %v4087_v23  ;;  %v5794_v23 = vld [vmem:[#allocation9_spill] sm:$0xff] }
 0x20d   : > { %v3666_v27 = vpack.c.bf16 %v2864_v54, %v2863_v5  ;;  %v2651_v37 = vadd.f32 %v4268_v34, %v4068_v4  ;;  %v2862_v61 = vmax.f32 %v2830_v38, 0.0  ;;  %v2730_v39 = vadd.f32 %v2640_v1, %v5422_v6  ;;  %v5793_v4 = vld [vmem:[#allocation10_spill] sm:$0xff] }
 0x20e   : > { %v4091_v51 = vpop.f32.mrf.mxu0  ;;  %v2642_v19 = vpop.f32.mrf.mxu1  ;;  %v2835_v31 = vadd.f32 %v5580_v47, %v2732_v0 }
 0x20f   : > { %3722 = vst [vmem:[%s5616_s9 + $0x28] sm:$0xff] %v3666_v27   ;;  %v2733_v52 = vadd.f32 %v2651_v37, %v5443_v62  ;;  %v3661_v48 = vpack.c.bf16 %v2862_v61, %v2861_v44  ;;  %v2643_v13 = vadd.f32 %v4062_v40, %v2642_v19  ;;  %v2833_v9 = vadd.f32 %v5580_v47, %v2730_v39  ;;  %v5795_v44 = vld [vmem:[#allocation13_spill] sm:$0xff] }
 0x210   : > { %v5665_v30 = vpop.f32.mrf.mxu0  ;;  %v4271_v21 = vpop.f32.mrf.mxu1  ;;  %v2867_v22 = vmax.f32 %v2835_v31, 0.0  ;;  %v4092_v1 = vadd.f32 %v4091_v51, %v4090_v41  ;;  %v4086_v41 = vadd.f32 %v5640_v43, %v5635_v14 }
 0x211   : > { %v2836_v6 = vadd.f32 %v5580_v47, %v2733_v52  ;;  %v2664_v46 = vadd.f32 %v4271_v21, %v4077_v18  ;;  %3721 = vst [vmem:[%s5616_s9 + $0x20] sm:$0xff] %v3661_v48   ;;  %v2731_v53 = vadd.f32 %v2643_v13, %v5791_v42  ;;  %v2865_v3 = vmax.f32 %v2833_v9, 0.0  ;;  %v5796_v13 = vld [vmem:[#allocation11_spill] sm:$0xff] }
 0x212   : > { %v4094_v62 = vpop.f32.mrf.mxu0  ;;  %v2655_v25 = vpop.f32.mrf.mxu1 }
 0x213   : > { %v2868_v12 = vmax.f32 %v2836_v6, 0.0  ;;  %v2736_v24 = vadd.f32 %v2664_v46, %v5465_v10  ;;  %v2656_v58 = vadd.f32 %v4071_v7, %v2655_v25  ;;  %v2834_v50 = vadd.f32 %v5580_v47, %v2731_v53 }
 0x214   : > { %v5677_v29 = vpop.f32.mrf.mxu0  ;;  %v4272_v28 = vpop.f32.mrf.mxu1  ;;  %v4095_v14 = vadd.f32 %v4094_v62, %v5665_v30 }
 0x215   : > { %v3676_v63 = vpack.c.bf16 %v2868_v12, %v2867_v22  ;;  %v2667_v26 = vadd.f32 %v4272_v28, %v4080_v35  ;;  %v2866_v45 = vmax.f32 %v2834_v50, 0.0  ;;  %v2734_v2 = vadd.f32 %v2656_v58, %v5792_v49  ;;  %v5797_v35 = vld [vmem:[#allocation14_spill] sm:$0xff]  ;;  %v5798_v50 = vld [vmem:[#allocation12_spill] sm:$0xff] }
 0x216   : > { %v4097_v33 = vpop.f32.mrf.mxu0  ;;  %v2658_v32 = vpop.f32.mrf.mxu1  ;;  %v2839_v10 = vadd.f32 %v5580_v47, %v2736_v24 }
 0x217   : > { %3724 = vst [vmem:[%s5616_s9 + $0x38] sm:$0xff] %v3676_v63   ;;  %v2737_v36 = vadd.f32 %v2667_v26, %v5793_v4  ;;  %v3671_v59 = vpack.c.bf16 %v2866_v45, %v2865_v3  ;;  %v2659_v17 = vadd.f32 %v4074_v15, %v2658_v32  ;;  %v2837_v38 = vadd.f32 %v5580_v47, %v2734_v2  ;;  %v5799_v45 = vld [vmem:[#allocation17_spill] sm:$0xff] }
 0x218   : > { %v4099_v5 = vpop.f32.mrf.mxu0  ;;  %v4275_v54 = vpop.f32.mrf.mxu1  ;;  %v2871_v37 = vmax.f32 %v2839_v10, 0.0  ;;  %v4098_v4 = vadd.f32 %v4097_v33, %v5677_v29  ;;  %v5802_v33 = vld [vmem:[#allocation16_spill] sm:$0xff] }
 0x219   : > { %v2840_v57 = vadd.f32 %v5580_v47, %v2737_v36  ;;  %v2680_v0 = vadd.f32 %v4275_v54, %v4089_v11  ;;  %3723 = vst [vmem:[%s5616_s9 + $0x30] sm:$0xff] %v3671_v59   ;;  %v2735_v8 = vadd.f32 %v2659_v17, %v5794_v23  ;;  %v2869_v31 = vmax.f32 %v2837_v38, 0.0  ;;  %v5800_v17 = vld [vmem:[#allocation15_spill] sm:$0xff] }
 0x21a   : > { %v4100_v34 = vpop.f32.mrf.mxu0  ;;  %v2671_v27 = vpop.f32.mrf.mxu1 }
 0x21b   : > { %v2872_v40 = vmax.f32 %v2840_v57, 0.0  ;;  %v2740_v61 = vadd.f32 %v2680_v0, %v5795_v44  ;;  %v2672_v39 = vadd.f32 %v4083_v56, %v2671_v27  ;;  %v2838_v19 = vadd.f32 %v5580_v47, %v2735_v8  ;;  %v5801_v0 = vld [vmem:[#allocation18_spill] sm:$0xff] }
 0x21c   : > { %v4102_v20 = vpop.f32.mrf.mxu0  ;;  %v4276_v16 = vpop.f32.mrf.mxu1  ;;  %v4101_v46 = vadd.f32 %v4100_v34, %v4099_v5 }
 0x21d   : > { %v3686_v51 = vpack.c.bf16 %v2872_v40, %v2871_v37  ;;  %v2683_v18 = vadd.f32 %v4276_v16, %v4092_v1  ;;  %v2870_v52 = vmax.f32 %v2838_v19, 0.0  ;;  %v2843_v48 = vadd.f32 %v5580_v47, %v2740_v61 }
 0x21e   : > { %v2738_v21 = vadd.f32 %v2672_v39, %v5796_v13  ;;  %v4103_v7 = vpop.f32.mrf.mxu0  ;;  %v2674_v6 = vpop.f32.mrf.mxu1  ;;  %v5803_v13 = vld [vmem:[#allocation19_spill] sm:$0xff] }
 0x21f   : > { %3726 = vst [vmem:[%s5616_s9 + $0x48] sm:$0xff] %v3686_v51   ;;  %v2741_v9 = vadd.f32 %v2683_v18, %v5797_v35  ;;  %v3681_v42 = vpack.c.bf16 %v2870_v52, %v2869_v31  ;;  %v2675_v53 = vadd.f32 %v4086_v41, %v2674_v6  ;;  %v2875_v24 = vmax.f32 %v2843_v48, 0.0 }
 0x220   : > { %v4105_v25 = vpop.f32.mrf.mxu0  ;;  %v4279_v22 = vpop.f32.mrf.mxu1  ;;  %v2841_v58 = vadd.f32 %v5580_v47, %v2738_v21  ;;  %v4104_v3 = vadd.f32 %v4103_v7, %v4102_v20 }
 0x221   : > { %v2844_v43 = vadd.f32 %v5580_v47, %v2741_v9  ;;  %v2696_v12 = vadd.f32 %v4279_v22, %v4101_v46  ;;  %3725 = vst [vmem:[%s5616_s9 + $0x40] sm:$0xff] %v3681_v42   ;;  %v2739_v28 = vadd.f32 %v2675_v53, %v5798_v50 }
 0x222   : > { %v4106_v63 = vpop.f32.mrf.mxu0  ;;  %v2687_v26 = vpop.f32.mrf.mxu1  ;;  %v2873_v36 = vmax.f32 %v2841_v58, 0.0 }
 0x223   : > { %v2876_v15 = vmax.f32 %v2844_v43, 0.0  ;;  %v2744_v49 = vadd.f32 %v2696_v12, %v5799_v45  ;;  %v2688_v2 = vadd.f32 %v4095_v14, %v2687_v26  ;;  %v2842_v32 = vadd.f32 %v5580_v47, %v2739_v28  ;;  %v5804_v43 = vld [vmem:[#allocation20_spill] sm:$0xff] }
 0x224   : > { %v4108_v30 = vpop.f32.mrf.mxu0  ;;  %v4280_v62 = vpop.f32.mrf.mxu1  ;;  %v4107_v27 = vadd.f32 %v4106_v63, %v4105_v25 }
 0x225   : > { %v3696_v11 = vpack.c.bf16 %v2876_v15, %v2875_v24  ;;  %v2699_v10 = vadd.f32 %v4280_v62, %v4104_v3  ;;  %v2874_v59 = vmax.f32 %v2842_v32, 0.0  ;;  %v2742_v5 = vadd.f32 %v2688_v2, %v5800_v17  ;;  %v3085_v2 = vld [vmem:[%s5616_s9 + $0x18] sm:$0xff] (%p4546_p6)   ;;  %v3089_v32 = vld [vmem:[%s5616_s9 + $0x20] sm:$0xff] (%p4546_p6)   ;;  %v3097_v62 = vld [vmem:[%s5616_s9 + $0x30] sm:$0xff] (%p4546_p6)  }
 0x226   : > { %v4109_v54 = vpop.f32.mrf.mxu0  ;;  %v2690_v56 = vpop.f32.mrf.mxu1  ;;  %v2847_v57 = vadd.f32 %v5580_v47, %v2744_v49  ;;  %v3081_v49 = vld [vmem:[%s5616_s9 + $0x10] sm:$0xff] (%p4546_p6)   ;;  %3086 = vst [vmem:[%s3056_s13 + $0x18] sm:$0xff] (%p4546_p6), %v3085_v2   ;;  %3090 = vst [vmem:[%s3056_s13 + $0x20] sm:$0xff] (%p4546_p6), %v3089_v32  }
 0x227   : > { %3728 = vst [vmem:[%s5616_s9 + $0x58] sm:$0xff] %v3696_v11   ;;  %v2745_v1 = vadd.f32 %v2699_v10, %v5801_v0  ;;  %v3691_v38 = vpack.c.bf16 %v2874_v59, %v2873_v36  ;;  %v2691_v23 = vadd.f32 %v4098_v4, %v2690_v56  ;;  %v2845_v29 = vadd.f32 %v5580_v47, %v2742_v5  ;;  %v3101_v11 = vld [vmem:[%s5616_s9 + $0x38] sm:$0xff] (%p4546_p6)   ;;  %v3109_v4 = vld [vmem:[%s5616_s9 + $0x48] sm:$0xff] (%p4546_p6)  }
 0x228   : > { %v4111_v8 = vpop.f32.mrf.mxu0  ;;  %v4283_v34 = vpop.f32.mrf.mxu1  ;;  %v2879_v39 = vmax.f32 %v2847_v57, 0.0  ;;  %v4110_v52 = vadd.f32 %v4109_v54, %v4108_v30  ;;  %v3093_v30 = vld [vmem:[%s5616_s9 + $0x28] sm:$0xff] (%p4546_p6)   ;;  %3082 = vst [vmem:[%s3056_s13 + $0x10] sm:$0xff] (%p4546_p6), %v3081_v49   ;;  %v3105_v10 = vld [vmem:[%s5616_s9 + $0x40] sm:$0xff] (%p4546_p6)   ;;  %3098 = vst [vmem:[%s3056_s13 + $0x30] sm:$0xff] (%p4546_p6), %v3097_v62  }
 0x229   : > { %v2848_v37 = vadd.f32 %v5580_v47, %v2745_v1  ;;  %3727 = vst [vmem:[%s5616_s9 + $0x50] sm:$0xff] %v3691_v38   ;;  %v2743_v40 = vadd.f32 %v2691_v23, %v5802_v33  ;;  %v2877_v7 = vmax.f32 %v2845_v29, 0.0  ;;  %3094 = vst [vmem:[%s3056_s13 + $0x28] sm:$0xff] (%p4546_p6), %v3093_v30  }
 0x22a   : > { %v4112_v44 = vpop.f32.mrf.mxu0  ;;  %v2703_v61 = vpop.f32.mrf.mxu1  ;;  %3102 = vst [vmem:[%s3056_s13 + $0x38] sm:$0xff] (%p4546_p6), %v3101_v11   ;;  %3106 = vst [vmem:[%s3056_s13 + $0x80] sm:$0xff] (%p4546_p6), %v3105_v10  }
 0x22b   : > { %v2880_v19 = vmax.f32 %v2848_v37, 0.0  ;;  %v4113_v20 = vadd.f32 %v4112_v44, %v4111_v8  ;;  %v2704_v16 = vadd.f32 %v4107_v27, %v2703_v61  ;;  %v2846_v41 = vadd.f32 %v5580_v47, %v2743_v40  ;;  %3110 = vst [vmem:[%s3056_s13 + $0x88] sm:$0xff] (%p4546_p6), %v3109_v4  }
 0x22c   : > { %v4114_v51 = vpop.f32.mrf.mxu0  ;;  %v4284_v18 = vpop.f32.mrf.mxu1 }
 0x22d   : > { %v3706_v31 = vpack.c.bf16 %v2880_v19, %v2879_v39  ;;  %v2712_v48 = vadd.f32 %v4283_v34, %v4113_v20  ;;  %v2746_v21 = vadd.f32 %v2704_v16, %v5803_v13  ;;  %v2878_v6 = vmax.f32 %v2846_v41, 0.0 }
 0x22e   : > { %v4115_v46 = vpop.f32.mrf.mxu0  ;;  %v2706_v35 = vpop.f32.mrf.mxu1  ;;  %v3117_v59 = vld [vmem:[%s5616_s9 + $0x58] sm:$0xff] (%p4546_p6)  }
 0x22f   : > { %3730 = vst [vmem:[%s5616_s9 + $0x68] sm:$0xff] %v3706_v31   ;;  %v2748_v9 = vadd.f32 %v2712_v48, %v5563_v60  ;;  %v4116_v42 = vadd.f32 %v4115_v46, %v4114_v51  ;;  %v2707_v53 = vadd.f32 %v4110_v52, %v2706_v35  ;;  %v3701_v25 = vpack.c.bf16 %v2878_v6, %v2877_v7 }
 0x230   : > { %v2849_v22 = vadd.f32 %v5580_v47, %v2746_v21  ;;  %v3113_v36 = vld [vmem:[%s5616_s9 + $0x50] sm:$0xff] (%p4546_p6)   ;;  %3118 = vst [vmem:[%s3056_s13 + $0x98] sm:$0xff] (%p4546_p6), %v3117_v59  }
 0x231   : > { %v2715_v14 = vadd.f32 %v4284_v18, %v4116_v42  ;;  %v2747_v12 = vadd.f32 %v2707_v53, %v5804_v43  ;;  %3729 = vst [vmem:[%s5616_s9 + $0x60] sm:$0xff] %v3701_v25   ;;  %v2851_v24 = vadd.f32 %v5580_v47, %v2748_v9  ;;  %3114 = vst [vmem:[%s3056_s13 + $0x90] sm:$0xff] (%p4546_p6), %v3113_v36  }
 0x232   : > { %v2881_v28 = vmax.f32 %v2849_v22, 0.0 }
 0x233   : > { %v2749_v58 = vadd.f32 %v2715_v14, %v5573_v55  ;;  %v2850_v50 = vadd.f32 %v5580_v47, %v2747_v12  ;;  %v2883_v26 = vmax.f32 %v2851_v24, 0.0  ;;  %v3073_v55 = vld [vmem:[%s5616_s9] sm:$0xff] (%p4546_p6)  }
 0x234   : > { %3074 = vst [vmem:[%s3056_s13] sm:$0xff] (%p4546_p6), %v3073_v55  }
 0x235   : > { %v2852_v60 = vadd.f32 %v5580_v47, %v2749_v58  ;;  %v2882_v63 = vmax.f32 %v2850_v50, 0.0  ;;  %v3077_v47 = vld [vmem:[%s5616_s9 + $0x8] sm:$0xff] (%p4546_p6)  }
 0x236   : > { %3078 = vst [vmem:[%s3056_s13 + $0x8] sm:$0xff] (%p4546_p6), %v3077_v47   ;;  %v3125_v5 = vld [vmem:[%s5616_s9 + $0x68] sm:$0xff] (%p4546_p6)  }
 0x237   : > { %v2884_v15 = vmax.f32 %v2852_v60, 0.0  ;;  %v3711_v3 = vpack.c.bf16 %v2882_v63, %v2881_v28  ;;  %3051 = sbr.rel (!%p4546_p6) target bundleno = 580 (0x244), region = 167  ;;  %3126 = vst [vmem:[%s3056_s13 + $0xa8] sm:$0xff] (%p4546_p6), %v3125_v5  }
 0x238   : > { %v3121_v17 = vld [vmem:[%s5616_s9 + $0x60] sm:$0xff] (%p4546_p6)  }
 0x239   : > { %v3716_v45 = vpack.c.bf16 %v2884_v15, %v2883_v26  ;;  %3731 = vst [vmem:[%s5616_s9 + $0x70] sm:$0xff] %v3711_v3   ;;  %3122 = vst [vmem:[%s3056_s13 + $0xa0] sm:$0xff] (%p4546_p6), %v3121_v17  }
 0x23b   : > { %3732 = vst [vmem:[%s5616_s9 + $0x78] sm:$0xff] %v3716_v45  }
 0x240   : > { %v3129_v54 = vld [vmem:[%s5616_s9 + $0x70] sm:$0xff]  }
 0x241   : > { %3130 = vst [vmem:[%s3056_s13 + $0xb0] sm:$0xff] %v3129_v54  }
 0x242   : > { %v3133_v56 = vld [vmem:[%s5616_s9 + $0x78] sm:$0xff]  }
 0x243   : > { %3134 = vst [vmem:[%s3056_s13 + $0xb8] sm:$0xff] %v3133_v56  }
 0x244 PF: > { %s15_s22 = sadd.s32 1, %s4475_s22   ;;  %s5805_s18 = smov %s4463_s19 }
 0x245   : > { %p12_p11 = scmp.ge.s32.totalorder %s15_s22, 4   ;;  %s5806_s19 = smov %s4551_s29 }
 0x246   : > { %s5807_s20 = smov %s4471_s21  ;;  %s5808_s21 = smov %s5810_s23 }
 0x247   :  { %14 = sbr.rel (!%p12_p11) target bundleno = 3 (0x3), region = 263 }

// kernel: block2_forward.5
= control target key start
LH: loop header
LB: loop body
LE: loop exit
PB: predicated region body
PF: predicated region fallthrough
CT: control target
= control target key end

     0   :  { %s4519_s18 = smov 0   ;;  %s4521_s19 = smov 0   ;;  %s6312_s0 = inlined_call_operand.vmem [shape: bf16[2,32,32,64], index: 0, kind: input, shape index: {}]   ;;  %s6313_s1 = inlined_call_operand.vmem [shape: bf16[2,4,32,64], index: 1, kind: input, shape index: {}]   ;;  %s6314_s2 = inlined_call_operand.vmem [shape: bf16[2,4,32,64], index: 2, kind: input, shape index: {}]   ;;  %s6315_s3 = inlined_call_operand.vmem [shape: bf16[3,192,64], index: 3, kind: input, shape index: {}]   ;;  %s6316_s4 = inlined_call_operand.vmem [shape: f32[1,64], index: 4, kind: input, shape index: {}]   ;;  %s6317_s5 = inlined_call_operand.vmem [shape: bf16[2,16,16,64], index: 5, kind: output, shape index: {}]  }
   0x1   :  { %s4523_s20 = smov 0   ;;  %s4525_s21 = smov 0  }
   0x2   :  { %s4527_s22 = smov 0  }
   0x3 LB: > { %s24_s23 = sadd.s32 1, %s4481_s21  ;;  %s4018_s24 = sadd.s32 4294967295, %s4485_s22   ;;  %s4485_s22 = sphi %s4527_s22, %s15_s22   ;;  %s4481_s21 = sphi %s4525_s21, %s6539_s21   ;;  %s4477_s20 = sphi %s4523_s20, %s6538_s20   ;;  %s4473_s19 = sphi %s4521_s19, %s6537_s19   ;;  %s4469_s18 = sphi %s4519_s18, %s6536_s18  }
   0x4   : > { %p25_p0 = scmp.ge.s32.totalorder %s24_s23, 4  ;;  %p41_p1 = scmp.ne.s32.totalorder %s4473_s19, %s4469_s18 }
   0x5   : > { %p42_p2 = scmp.eq.s32.totalorder %s4485_s22, 0  ;;  %p177_p4 = scmp.eq.s32.totalorder %s4018_s24, 3 }
   0x6   : > { %s6541_s23 = smov (%p25_p0, %s24_s23), 0  ;;  %s34_s27 = sadd.s32 1, %s4473_s19 }
   0x7   : > { %p4551_p3 = por %p42_p2, %p41_p1  ;;  %s31_s26 = ssub.s32 %s4481_s21, %s6541_s23 }
   0x8   : > { %p32_p5 = scmp.eq.s32.totalorder %s31_s26, 0  ;;  %p4558_p6 = por %p177_p4, %p41_p1 }
   0x9   : > { %p4023_p7 = scmp.ge.s32.totalorder %s4485_s22, 4 }
   0xa   : > { %s4563_s29 = scalar_select %p32_p5, %s4473_s19, %s34_s27  }
   0xb   : > { %212 = sbr.rel (%p4023_p7) target bundleno = 48 (0x30), region = 24 }
  0x10   : > { %215 = sbr.rel (!%p4551_p3) target bundleno = 36 (0x24), region = 28  ;;  %s217_s30 = sand.u32 (%p4551_p3), 1, %s4473_s19  }
  0x11   : > { %s4283_s6 = sshll.u32 (%p4551_p3), %s4481_s21, 7  ;;  %s4024_s7 = sshll.u32 (%p4551_p3), %s217_s30, 8 }
  0x12   : > { %s4573_s10 = scalar_lea.vmem (%p4551_p3), %s6312_s0, %s4283_s6  ;;  %s4578_s11 = scalar_lea.vmem (%p4551_p3), [#allocation3], %s4024_s7 }
  0x13   : > { %v240_v0 = vld [vmem:[%s4573_s10] sm:$0xff] (%p4551_p3)   ;;  %v244_v1 = vld [vmem:[%s4573_s10 + $0x8] sm:$0xff] (%p4551_p3)   ;;  %v248_v2 = vld [vmem:[%s4573_s10 + $0x10] sm:$0xff] (%p4551_p3)  }
  0x14   : > { %241 = vst [vmem:[%s4578_s11] sm:$0xff] (%p4551_p3), %v240_v0   ;;  %245 = vst [vmem:[%s4578_s11 + $0x8] sm:$0xff] (%p4551_p3), %v244_v1   ;;  %v252_v3 = vld [vmem:[%s4573_s10 + $0x18] sm:$0xff] (%p4551_p3)   ;;  %v256_v4 = vld [vmem:[%s4573_s10 + $0x20] sm:$0xff] (%p4551_p3)  }
  0x15   : > { %249 = vst [vmem:[%s4578_s11 + $0x10] sm:$0xff] %v248_v2   ;;  %v260_v5 = vld [vmem:[%s4573_s10 + $0x28] sm:$0xff]   ;;  %253 = vst [vmem:[%s4578_s11 + $0x18] sm:$0xff] %v252_v3   ;;  %v264_v6 = vld [vmem:[%s4573_s10 + $0x30] sm:$0xff]  }
  0x16   : > { %257 = vst [vmem:[%s4578_s11 + $0x20] sm:$0xff] %v256_v4   ;;  %261 = vst [vmem:[%s4578_s11 + $0x28] sm:$0xff] %v260_v5   ;;  %v268_v7 = vld [vmem:[%s4573_s10 + $0x38] sm:$0xff]   ;;  %v272_v8 = vld [vmem:[%s4573_s10 + $0x40] sm:$0xff]  }
  0x17   : > { %265 = vst [vmem:[%s4578_s11 + $0x30] sm:$0xff] %v264_v6   ;;  %269 = vst [vmem:[%s4578_s11 + $0x38] sm:$0xff] %v268_v7   ;;  %v276_v9 = vld [vmem:[%s4573_s10 + $0x48] sm:$0xff]   ;;  %v280_v10 = vld [vmem:[%s4573_s10 + $0x50] sm:$0xff]  }
  0x18   : > { %273 = vst [vmem:[%s4578_s11 + $0x40] sm:$0xff] %v272_v8   ;;  %v284_v11 = vld [vmem:[%s4573_s10 + $0x58] sm:$0xff]   ;;  %277 = vst [vmem:[%s4578_s11 + $0x48] sm:$0xff] %v276_v9   ;;  %v288_v12 = vld [vmem:[%s4573_s10 + $0x60] sm:$0xff]  }
  0x19   : > { %281 = vst [vmem:[%s4578_s11 + $0x50] sm:$0xff] %v280_v10   ;;  %285 = vst [vmem:[%s4578_s11 + $0x58] sm:$0xff] %v284_v11   ;;  %v292_v13 = vld [vmem:[%s4573_s10 + $0x68] sm:$0xff]   ;;  %v296_v14 = vld [vmem:[%s4573_s10 + $0x70] sm:$0xff]  }
  0x1a   : > { %289 = vst [vmem:[%s4578_s11 + $0x60] sm:$0xff] %v288_v12   ;;  %293 = vst [vmem:[%s4578_s11 + $0x68] sm:$0xff] %v292_v13   ;;  %v300_v15 = vld [vmem:[%s4573_s10 + $0x78] sm:$0xff]   ;;  %v304_v16 = vld [vmem:[%s4573_s10 + $0x200] sm:$0xff]  }
  0x1b   : > { %297 = vst [vmem:[%s4578_s11 + $0x70] sm:$0xff] %v296_v14   ;;  %v308_v17 = vld [vmem:[%s4573_s10 + $0x208] sm:$0xff]   ;;  %301 = vst [vmem:[%s4578_s11 + $0x78] sm:$0xff] %v300_v15   ;;  %v312_v18 = vld [vmem:[%s4573_s10 + $0x210] sm:$0xff]  }
  0x1c   : > { %305 = vst [vmem:[%s4578_s11 + $0x80] sm:$0xff] %v304_v16   ;;  %309 = vst [vmem:[%s4578_s11 + $0x88] sm:$0xff] %v308_v17   ;;  %v316_v19 = vld [vmem:[%s4573_s10 + $0x218] sm:$0xff]   ;;  %v320_v20 = vld [vmem:[%s4573_s10 + $0x220] sm:$0xff]  }
  0x1d   : > { %313 = vst [vmem:[%s4578_s11 + $0x90] sm:$0xff] %v312_v18   ;;  %317 = vst [vmem:[%s4578_s11 + $0x98] sm:$0xff] %v316_v19   ;;  %v324_v21 = vld [vmem:[%s4573_s10 + $0x228] sm:$0xff]   ;;  %v328_v22 = vld [vmem:[%s4573_s10 + $0x230] sm:$0xff]  }
  0x1e   : > { %321 = vst [vmem:[%s4578_s11 + $0xa0] sm:$0xff] %v320_v20   ;;  %v332_v23 = vld [vmem:[%s4573_s10 + $0x238] sm:$0xff]   ;;  %325 = vst [vmem:[%s4578_s11 + $0xa8] sm:$0xff] %v324_v21   ;;  %v336_v24 = vld [vmem:[%s4573_s10 + $0x240] sm:$0xff]  }
  0x1f   : > { %329 = vst [vmem:[%s4578_s11 + $0xb0] sm:$0xff] %v328_v22   ;;  %333 = vst [vmem:[%s4578_s11 + $0xb8] sm:$0xff] %v332_v23   ;;  %v340_v25 = vld [vmem:[%s4573_s10 + $0x248] sm:$0xff]   ;;  %v344_v26 = vld [vmem:[%s4573_s10 + $0x250] sm:$0xff]  }
  0x20   : > { %337 = vst [vmem:[%s4578_s11 + $0xc0] sm:$0xff] %v336_v24   ;;  %341 = vst [vmem:[%s4578_s11 + $0xc8] sm:$0xff] %v340_v25   ;;  %v348_v27 = vld [vmem:[%s4573_s10 + $0x258] sm:$0xff]   ;;  %v352_v28 = vld [vmem:[%s4573_s10 + $0x260] sm:$0xff]  }
  0x21   : > { %345 = vst [vmem:[%s4578_s11 + $0xd0] sm:$0xff] %v344_v26   ;;  %v356_v29 = vld [vmem:[%s4573_s10 + $0x268] sm:$0xff]   ;;  %349 = vst [vmem:[%s4578_s11 + $0xd8] sm:$0xff] %v348_v27   ;;  %v360_v30 = vld [vmem:[%s4573_s10 + $0x270] sm:$0xff]  }
  0x22   : > { %353 = vst [vmem:[%s4578_s11 + $0xe0] sm:$0xff] %v352_v28   ;;  %357 = vst [vmem:[%s4578_s11 + $0xe8] sm:$0xff] %v356_v29   ;;  %v364_v31 = vld [vmem:[%s4573_s10 + $0x278] sm:$0xff]  }
  0x23   : > { %361 = vst [vmem:[%s4578_s11 + $0xf0] sm:$0xff] %v360_v30   ;;  %365 = vst [vmem:[%s4578_s11 + $0xf8] sm:$0xff] %v364_v31  }
  0x24 PF: > { %519 = sbr.rel (!%p4551_p3) target bundleno = 42 (0x2a), region = 69  ;;  %s521_s12 = sand.u32 (%p4551_p3), 1, %s4473_s19  }
  0x25   : > { %s4284_s13 = sshll.u32 (%p4551_p3), %s4481_s21, 4  ;;  %s4028_s14 = sshll.u32 (%p4551_p3), %s521_s12, 5 }
  0x26   : > { %s526_s17 = scalar_lea.vmem (%p4551_p3), %s6313_s1, %s4284_s13  ;;  %s523_s24 = scalar_lea.vmem (%p4551_p3), [#allocation4], %s4028_s14 }
  0x27   : > { %v543_v32 = vld [vmem:[%s526_s17] sm:$0xff] (%p4551_p3)   ;;  %v547_v33 = vld [vmem:[%s526_s17 + $0x8] sm:$0xff] (%p4551_p3)  }
  0x28   : > { %v551_v34 = vld [vmem:[%s526_s17 + $0x40] sm:$0xff] (%p4551_p3)   ;;  %544 = vst [vmem:[%s523_s24] sm:$0xff] (%p4551_p3), %v543_v32   ;;  %548 = vst [vmem:[%s523_s24 + $0x8] sm:$0xff] (%p4551_p3), %v547_v33   ;;  %v555_v35 = vld [vmem:[%s526_s17 + $0x48] sm:$0xff] (%p4551_p3)  }
  0x29   : > { %552 = vst [vmem:[%s523_s24 + $0x10] sm:$0xff] %v551_v34   ;;  %556 = vst [vmem:[%s523_s24 + $0x18] sm:$0xff] %v555_v35  }
  0x2a PF: > { %598 = sbr.rel (!%p4551_p3) target bundleno = 48 (0x30), region = 110  ;;  %s600_s26 = sand.u32 (%p4551_p3), 1, %s4473_s19  }
  0x2b   : > { %s4285_s27 = sshll.u32 (%p4551_p3), %s4481_s21, 4  ;;  %s4031_s30 = sshll.u32 (%p4551_p3), %s600_s26, 5 }
  0x2c   : > { %s605_s8 = scalar_lea.vmem (%p4551_p3), %s6314_s2, %s4285_s27  ;;  %s602_s9 = scalar_lea.vmem (%p4551_p3), [#allocation5], %s4031_s30 }
  0x2d   : > { %v622_v36 = vld [vmem:[%s605_s8] sm:$0xff] (%p4551_p3)   ;;  %v626_v37 = vld [vmem:[%s605_s8 + $0x8] sm:$0xff] (%p4551_p3)  }
  0x2e   : > { %v630_v38 = vld [vmem:[%s605_s8 + $0x40] sm:$0xff] (%p4551_p3)   ;;  %623 = vst [vmem:[%s602_s9] sm:$0xff] (%p4551_p3), %v622_v36   ;;  %627 = vst [vmem:[%s602_s9 + $0x8] sm:$0xff] (%p4551_p3), %v626_v37   ;;  %v634_v39 = vld [vmem:[%s605_s8 + $0x48] sm:$0xff] (%p4551_p3)  }
  0x2f   : > { %631 = vst [vmem:[%s602_s9 + $0x10] sm:$0xff] %v630_v38   ;;  %635 = vst [vmem:[%s602_s9 + $0x18] sm:$0xff] %v634_v39  }
  0x30 PF: > { %p4034_p8 = scmp.ge.s32.totalorder %s4485_s22, 1  ;;  %p676_p9 = scmp.lt.s32.totalorder %s4485_s22, 5 }
  0x32   : > { %p677_p10 = pnand %p4034_p8, %p676_p9 }
  0x34   : > { %680 = sbr.rel (%p677_p10) target bundleno = 789 (0x315), region = 151 }
  0x39   : > { %s4658_s25 = sand.u32 1, %s4469_s18   ;;  %v4388_v40 = vld [vmem:[%s6315_s3 + $0x38] sm:$0xff]   ;;  %v6325_v41 = vmov 0   ;;  %v4389_v42 = vld [vmem:[%s6315_s3 + $0x30] sm:$0xff]   ;;  %s4488_s16 = smov 64   ;;  %v4392_v46 = vld [vmem:[%s6315_s3 + $0x28] sm:$0xff]  }
  0x3a   : > { %s4036_s12 = sshll.u32 %s4658_s25, 5  ;;  %4304 = vmatprep.subr.bf16.mxu1 %v6325_v41  ;;  %1763 = vmatprep.subr.bf16.mxu0 %v6325_v41  ;;  %s4035_s15 = sshll.u32 %s4658_s25, 8  ;;  %v4393_v58 = vld [vmem:[%s6315_s3 + $0x20] sm:$0xff]   ;;  %v4396_v61 = vld [vmem:[%s6315_s3 + $0x18] sm:$0xff]   ;;  %v4397_v3 = vld [vmem:[%s6315_s3 + $0x10] sm:$0xff]   ;;  %vm1442_vm0 = vcmask 523264  }
  0x3b   : > { %4316 = vmatpush1.bf16.msra.mxu1 %v4388_v40  ;;  %1764 = vmatpush1.bf16.msra.mxu0 %v4388_v40  ;;  %s692_s18 = scalar_lea.vmem [#allocation4], %s4036_s12  ;;  %s4687_s26 = scalar_lea.vmem [#allocation3], %s4035_s15  ;;  %v4400_v10 = vld [vmem:[%s6315_s3 + $0x8] sm:$0xff]   ;;  %v4401_v19 = vld [vmem:[%s6315_s3] sm:$0xff]   ;;  %v4404_v30 = vld [vmem:[%s6315_s3 + $0x58] sm:$0xff]   ;;  %vm1245_vm3 = vcmask 1040384  }
  0x3c   : > { %v4671_v43 = vld [vmem:[%s692_s18 + $0x10] sm:$0xff]   ;;  %4305 = vmatprep.subr.bf16.mxu1 %v6325_v41  ;;  %1765 = vmatprep.subr.bf16.mxu0 %v6325_v41  ;;  %v4676_v44 = vld [vmem:[%s692_s18] sm:$0xff]   ;;  %v4680_v45 = vld [vmem:[%s692_s18 + $0x18] sm:$0xff]   ;;  %vm1263_vm1 = vsmask.f32 7424  ;;  %vm1360_vm5 = vcmask 1047552  }
  0x3d   : > { %1410 = vrot.lane.b32.xlu0 %v4671_v43, %s4488_s16  ;;  %1378 = vrot.lane.b32.xlu1 %v4676_v44, %s4488_s16  ;;  %v4690_v47 = vld [vmem:[%s4687_s26 + $0x80] sm:$0xff]   ;;  %v4696_v48 = vld [vmem:[%s692_s18 + $0x8] sm:$0xff]   ;;  %v1113_v59 = vshll.u32 %v4671_v43, 16  ;;  %v993_v62 = vshll.u32 %v4676_v44, 16  ;;  %v990_v0 = vshrl.u32 %v4676_v44, 16  ;;  %v1110_v11 = vshrl.u32 %v4671_v43, 16  ;;  %vm5288_vm6 = vmand %vm1360_vm5, %vm1263_vm1 }
  0x3e   : > { %v4701_v49 = vld [vmem:[%s4687_s26 + $0x88] sm:$0xff]   ;;  %v4705_v50 = vld [vmem:[%s4687_s26] sm:$0xff]   ;;  %v4713_v51 = vld [vmem:[%s4687_s26 + $0x90] sm:$0xff]   ;;  %v1000_v1 = vshll.u32 %v4696_v48, 16  ;;  %v1125_v2 = vshrl.u32 %v4690_v47, 16  ;;  %v6323_v4 = vshll.u32 %v4690_v47, 16 }
  0x3f   : > { %4317 = vmatpush1.bf16.msra.mxu1 %v4389_v42  ;;  %1766 = vmatpush1.bf16.msra.mxu0 %v4389_v42  ;;  %v4716_v52 = vld [vmem:[%s4687_s26 + $0x8] sm:$0xff]   ;;  %v4723_v53 = vld [vmem:[%s4687_s26 + $0x98] sm:$0xff]   ;;  %v4728_v54 = vld [vmem:[%s4687_s26 + $0x10] sm:$0xff]   ;;  %v1005_v6 = vshrl.u32 %v4705_v50, 16  ;;  %v6321_v8 = vshll.u32 %v4705_v50, 16  ;;  %v4786_v9 = vrot.slane %v990_v0, 7 }
  0x40   : > { %4306 = vmatprep.subr.bf16.mxu1 %v6325_v41  ;;  %1767 = vmatprep.subr.bf16.mxu0 %v6325_v41  ;;  %v4733_v55 = vld [vmem:[%s4687_s26 + $0xa0] sm:$0xff]   ;;  %v4736_v56 = vld [vmem:[%s4687_s26 + $0x18] sm:$0xff]   ;;  %v4741_v57 = vld [vmem:[%s4687_s26 + $0xa8] sm:$0xff]   ;;  %v1264_v13 = vrot.slane %v993_v62, 1  ;;  %v1266_v16 = vrot.slane %v1000_v1, 1  ;;  %v1120_v17 = vshll.u32 %v4680_v45, 16 }
  0x41   : > { %1412 = vrot.lane.b32.xlu0 %v4680_v45, %s4488_s16  ;;  %1414 = vrot.lane.b32.xlu1 %v4690_v47, %s4488_s16  ;;  %6394 = vst [vmem:[#allocation7_spill] sm:$0xff] %v4736_v56  ;;  %6395 = vst [vmem:[#allocation8_spill] sm:$0xff] %v4741_v57  ;;  %v4752_v60 = vld [vmem:[%s4687_s26 + $0x20] sm:$0xff]   ;;  %v4762_v63 = vld [vmem:[%s4687_s26 + $0xb0] sm:$0xff]   ;;  %v4799_v14 = vor.u32 %v993_v62, %v4786_v9  ;;  %v1304_v18 = vrot.slane %v1113_v59, 1  ;;  %v4813_v20 = vrot.slane %v1110_v11, 7 }
  0x42   : > { %6396 = vst [vmem:[#allocation9_spill] sm:$0xff] %v4752_v60  ;;  %v4775_v5 = vld [vmem:[%s4687_s26 + $0x28] sm:$0xff]   ;;  %v4782_v7 = vld [vmem:[%s4687_s26 + $0xb8] sm:$0xff]   ;;  %v4795_v12 = vld [vmem:[%s4687_s26 + $0x30] sm:$0xff]   ;;  %v997_v22 = vshrl.u32 %v4696_v48, 16  ;;  %v1265_v24 = vor.u32 %v1264_v13, %v990_v0  ;;  %v1306_v26 = vrot.slane %v1120_v17, 1 }
  0x43   : > { %4318 = vmatpush1.bf16.msra.mxu1 %v4392_v46  ;;  %1768 = vmatpush1.bf16.msra.mxu0 %v4392_v46  ;;  %6397 = vst [vmem:[#allocation10_spill] sm:$0xff] %v4775_v5  ;;  %v4804_v15 = vld [vmem:[%s4687_s26 + $0xc0] sm:$0xff]   ;;  %v4818_v21 = vld [vmem:[%s4687_s26 + $0x38] sm:$0xff]   ;;  %v4825_v23 = vld [vmem:[%s4687_s26 + $0xc8] sm:$0xff]   ;;  %v1305_v25 = vor.u32 %v1304_v18, %v1110_v11  ;;  %v4831_v27 = vor.u32 %v1113_v59, %v4813_v20  ;;  %v1135_v28 = vshll.u32 %v4701_v49, 16  ;;  %v1015_v32 = vshll.u32 %v4716_v52, 16 }
  0x44   : > { %4307 = vmatprep.subr.bf16.mxu1 %v6325_v41  ;;  %1769 = vmatprep.subr.bf16.mxu0 %v6325_v41  ;;  %6398 = vst [vmem:[#allocation11_spill] sm:$0xff] %v4804_v15  ;;  %6399 = vst [vmem:[#allocation12_spill] sm:$0xff] %v4818_v21  ;;  %v4834_v29 = vor.u32 %v1266_v16, %v997_v22  ;;  %v999_v31 = vrot.slane %v997_v22, 7  ;;  %v1140_v33 = vshrl.u32 %v4713_v51, 16  ;;  %v6322_v34 = vshll.u32 %v4713_v51, 16  ;;  %v4845_v35 = vld [vmem:[%s4687_s26 + $0x40] sm:$0xff]  }
  0x45   : > { %1380 = vrot.lane.b32.xlu0 %v4696_v48, %s4488_s16  ;;  %1416 = vrot.lane.b32.xlu1 %v4701_v49, %s4488_s16  ;;  %6400 = vst [vmem:[#allocation13_spill] sm:$0xff] %v4845_v35  ;;  %v1020_v36 = vshrl.u32 %v4728_v54, 16  ;;  %v4852_v37 = vld [vmem:[%s4687_s26 + $0xd0] sm:$0xff]   ;;  %v1267_v38 = vsel %vm1263_vm1, %v1265_v24, %v1266_v16  ;;  %v1307_v39 = vsel %vm1263_vm1, %v1305_v25, %v1306_v26  ;;  %v6318_v40 = vshll.u32 %v4728_v54, 16  ;;  %v4885_v48 = vld [vmem:[%s4687_s26 + $0xd8] sm:$0xff]   ;;  %s5279_s8 = scalar_lea.vmem [#allocation5], %s4036_s12 }
  0x46   : > { %v1150_v42 = vshll.u32 %v4723_v53, 16  ;;  %v1030_v43 = vshll.u32 %v4736_v56, 16  ;;  %v4405_v44 = vld [vmem:[%s6315_s3 + $0x50] sm:$0xff]   ;;  %4083 = vmatprep.mubr.msk.bf16.mxu0 %vm1442_vm0, %v1267_v38  ;;  %4099 = vmatprep.mubr.msk.bf16.mxu1 %vm1442_vm0, %v1307_v39  ;;  %vm988_vm2 = vsmask.f32 256  ;;  %v1002_v46 = vor.u32 %v1000_v1, %v999_v31  ;;  %v4408_v18 = vld [vmem:[%s6315_s3 + $0x48] sm:$0xff]  }
  0x47   : > { %4319 = vmatpush1.bf16.msra.mxu1 %v4393_v58  ;;  %1770 = vmatpush1.bf16.msra.mxu0 %v4393_v58  ;;  %v4870_v58 = vld [vmem:[%s4687_s26 + $0x48] sm:$0xff]   ;;  %v1117_v59 = vshrl.u32 %v4680_v45, 16  ;;  %v4878_v62 = vrot.slane %v1015_v32, 1  ;;  %v6332_v16 = vshrl.u32 %v4752_v60, 16  ;;  %v6324_v22 = vshll.u32 %v4752_v60, 16  ;;  %v4910_v24 = vld [vmem:[%s4687_s26 + $0x50] sm:$0xff]   ;;  %vm5273_vm4 = vmand %vm1245_vm3, %vm988_vm2 }
  0x48   : > { %4308 = vmatprep.subr.bf16.mxu1 %v6325_v41  ;;  %1771 = vmatprep.subr.bf16.mxu0 %v6325_v41  ;;  %6401 = vst [vmem:[#allocation14_spill] sm:$0xff] %v4870_v58  ;;  %v4889_v1 = vsel %vm988_vm2, %v4786_v9, %v1002_v46  ;;  %v1309_v9 = vrot.slane %v6323_v4, 1  ;;  %v6319_v38 = vshrl.u32 %v4716_v52, 16  ;;  %v1274_v39 = vrot.slane %v6318_v40, 1  ;;  %s4303_s17 = sshll.u32 (%p4558_p6), %s4477_s20, 5 }
  0x49   : > { %1382 = vrot.lane.b32.xlu0 %v4705_v50, %s4488_s16  ;;  %1418 = vrot.lane.b32.xlu1 %v4713_v51, %s4488_s16  ;;  %v4892_v11 = vor.u32 %v1306_v26, %v1117_v59  ;;  %v6330_v46 = vshll.u32 %v4741_v57, 16  ;;  %vm3758_vm7 = vcmask 519168   ;;  %s3786_s30 = scalar_lea.vmem (%p4558_p6), %s6317_s5, %s4303_s17 }
  0x4a   : > { %v1310_v31 = vor.u32 %v1309_v9, %v1125_v2  ;;  %v1275_v9 = vor.u32 %v1274_v39, %v1020_v36  ;;  %v4976_v39 = vrot.slane %v1150_v42, 1 }
  0x4b   : > { %4320 = vmatpush1.bf16.msra.mxu1 %v4396_v61  ;;  %1772 = vmatpush1.bf16.msra.mxu0 %v4396_v61  ;;  %v1269_v61 = vrot.slane %v6321_v8, 1  ;;  %v4981_v8 = vrot.slane %v1125_v2, 7 }
  0x4c   : > { %4309 = vmatprep.subr.bf16.mxu1 %v6325_v41  ;;  %1773 = vmatprep.subr.bf16.mxu0 %v6325_v41  ;;  %6404 = vst [vmem:[#allocation17_spill] sm:$0xff] %v4976_v39 }
  0x4d   : > { %1384 = vrot.lane.b32.xlu0 %v4716_v52, %s4488_s16  ;;  %1420 = vrot.lane.b32.xlu1 %v4723_v53, %s4488_s16  ;;  %v1270_v13 = vor.u32 %v1269_v61, %v1005_v6 }
  0x4f   : > { %4321 = vmatpush1.bf16.msra.mxu1 %v4397_v3  ;;  %1774 = vmatpush1.bf16.msra.mxu0 %v4397_v3  ;;  %v6329_v3 = vshll.u32 %v4733_v55, 16  ;;  %v4917_v26 = vsel %vm1263_vm1, %v1270_v13, %v4878_v62  ;;  %v4953_v13 = vld [vmem:[%s4687_s26 + $0x58] sm:$0xff]  }
  0x50   : > { %4310 = vmatprep.subr.bf16.mxu1 %v6325_v41  ;;  %1775 = vmatprep.subr.bf16.mxu0 %v6325_v41 }
  0x51   : > { %1386 = vrot.lane.b32.xlu0 %v4728_v54, %s4488_s16  ;;  %1422 = vrot.lane.b32.xlu1 %v4733_v55, %s4488_s16 }
  0x53   : > { %4322 = vmatpush1.bf16.msra.mxu1 %v4400_v10  ;;  %1776 = vmatpush1.bf16.msra.mxu0 %v4400_v10  ;;  %v1119_v10 = vrot.slane %v1117_v59, 7  ;;  %v6331_v59 = vshll.u32 %v4775_v5, 16 }
  0x54   : > { %4311 = vmatprep.subr.bf16.mxu1 %v6325_v41  ;;  %1777 = vmatprep.subr.bf16.mxu0 %v6325_v41 }
  0x55   : > { %1388 = vrot.lane.b32.xlu0 %v4736_v56, %s4488_s16  ;;  %1424 = vrot.lane.b32.xlu1 %v4741_v57, %s4488_s16  ;;  %v1122_v25 = vor.u32 %v1120_v17, %v1119_v10  ;;  %v6320_v17 = vshrl.u32 %v4701_v49, 16  ;;  %v1014_v10 = vrot.slane %v6319_v38, 7  ;;  %v1314_v38 = vrot.slane %v6322_v34, 1 }
  0x56   : > { %v1185_v34 = vshrl.u32 %v4804_v15, 16 }
  0x57   : > { %4323 = vmatpush1.bf16.msra.mxu1 %v4401_v19  ;;  %1778 = vmatpush1.bf16.msra.mxu0 %v4401_v19  ;;  %v4904_v19 = vrot.slane %v1135_v28, 1  ;;  %v4930_v45 = vsel %vm988_vm2, %v4813_v20, %v1122_v25  ;;  %v4409_v20 = vld [vmem:[%s6315_s3 + $0x40] sm:$0xff]   ;;  %v4964_v25 = vld [vmem:[%s4687_s26 + $0xe8] sm:$0xff]   ;;  %v1017_v40 = vor.u32 %v1015_v32, %v1014_v10  ;;  %v1315_v2 = vor.u32 %v1314_v38, %v1140_v33 }
  0x58   : > { %4312 = vmatprep.subr.bf16.mxu1 %v6325_v41  ;;  %1787 = vmatprep.subr.bf16.mxu0 %v6325_v41  ;;  %v5014_v38 = vld [vmem:[%s4687_s26 + $0x68] sm:$0xff]  }
  0x59   : > { %1390 = vrot.lane.b32.xlu0 %v4752_v60, %s4488_s16  ;;  %1426 = vrot.lane.b32.xlu1 %v4762_v63, %s4488_s16  ;;  %v4946_v61 = vsel %vm1263_vm1, %v1310_v31, %v4904_v19  ;;  %v4968_v31 = vrot.slane %v1005_v6, 7 }
  0x5b   : > { %4324 = vmatpush2.bf16.msra.mxu1 %v4404_v30  ;;  %1788 = vmatpush2.bf16.msra.mxu0 %v4404_v30  ;;  %v4923_v30 = vld [vmem:[%s4687_s26 + $0xe0] sm:$0xff]   ;;  %v4993_v4 = vsel %vm988_vm2, %v4968_v31, %v1017_v40  ;;  %v1279_v40 = vrot.slane %v6324_v22, 1 }
  0x5c   : > { %4313 = vmatprep.subr.bf16.mxu1 %v6325_v41  ;;  %1789 = vmatprep.subr.bf16.mxu0 %v6325_v41  ;;  %6402 = vst [vmem:[#allocation15_spill] sm:$0xff] %v4923_v30 }
  0x5d   : > { %1392 = vrot.lane.b32.xlu0 %v4775_v5, %s4488_s16  ;;  %1428 = vrot.lane.b32.xlu1 %v4782_v7, %s4488_s16  ;;  %v1280_v0 = vor.u32 %v1279_v40, %v6332_v16 }
  0x5f   : > { %4325 = vmatpush2.bf16.msra.mxu1 %v4405_v44  ;;  %1790 = vmatpush2.bf16.msra.mxu0 %v4405_v44  ;;  %v4937_v44 = vrot.slane %v1030_v43, 1 }
  0x60   : > { %4314 = vmatprep.subr.bf16.mxu1 %v6325_v41  ;;  %1791 = vmatprep.subr.bf16.mxu0 %v6325_v41 }
  0x61   : > { %1394 = vrot.lane.b32.xlu0 %v4795_v12, %s4488_s16  ;;  %1430 = vrot.lane.b32.xlu1 %v4804_v15, %s4488_s16  ;;  %6403 = vst [vmem:[#allocation16_spill] sm:$0xff] %v4937_v44  ;;  %v4987_v32 = vsel %vm1263_vm1, %v1275_v9, %v4937_v44  ;;  %v6328_v9 = vshrl.u32 %v4723_v53, 16 }
  0x63   : > { %4326 = vmatpush2.bf16.msra.mxu1 %v4408_v18  ;;  %1792 = vmatpush2.bf16.msra.mxu0 %v4408_v18  ;;  %v1134_v18 = vrot.slane %v6320_v17, 7  ;;  %v5019_v17 = vsel %vm1263_vm1, %v1315_v2, %v4976_v39  ;;  %v1149_v22 = vrot.slane %v6328_v9, 7  ;;  %v5036_v2 = vrot.slane %v6330_v46, 1 }
  0x64   : > { %4315 = vmatprep.subr.bf16.mxu1 %v6325_v41  ;;  %1793 = vmatprep.subr.bf16.mxu0 %v6325_v41  ;;  %v5046_v9 = vrot.slane %v1140_v33, 7  ;;  %v1180_v46 = vshll.u32 %v4782_v7, 16  ;;  %v6409_v33 = vshrl.u32 %v4733_v55, 16  ;;  %v6427_v39 = vshll.u32 %v4845_v35, 16 }
  0x65   : > { %1396 = vrot.lane.b32.xlu0 %v4818_v21, %s4488_s16  ;;  %1432 = vrot.lane.b32.xlu1 %v4825_v23, %s4488_s16  ;;  %v1137_v6 = vor.u32 %v1135_v28, %v1134_v18  ;;  %v5000_v28 = vld [vmem:[%s4687_s26 + $0x60] sm:$0xff]   ;;  %6407 = vst [vmem:[#allocation20_spill] sm:$0xff] %v5036_v2 }
  0x66   : > { %6405 = vst [vmem:[#allocation18_spill] sm:$0xff] %v5000_v28 }
  0x67   : > { %4327 = vmatpush2.bf16.msra.mxu1 %v4409_v20  ;;  %1794 = vmatpush2.bf16.msra.mxu0 %v4409_v20  ;;  %v5005_v18 = vsel %vm988_vm2, %v4981_v8, %v1137_v6  ;;  %v6327_v20 = vshrl.u32 %v4736_v56, 16  ;;  %v5023_v6 = vrot.slane %v6331_v59, 1  ;;  %v1060_v59 = vshll.u32 %v4818_v21, 16 }
  0x68   : > { %2381 = vmatprep.subr.bf16.mxu1 %v6325_v41  ;;  %3063 = vmatprep.subr.bf16.mxu0 %v6325_v41  ;;  %v1319_v41 = vrot.slane %v6329_v3, 1  ;;  %v1152_v3 = vor.u32 %v1150_v42, %v1149_v22  ;;  %v6338_v22 = vshrl.u32 %v4775_v5, 16 }
  0x69   : > { %1398 = vrot.lane.b32.xlu0 %v4845_v35, %s4488_s16  ;;  %1434 = vrot.lane.b32.xlu1 %v4852_v37, %s4488_s16  ;;  %6406 = vst [vmem:[#allocation19_spill] sm:$0xff] %v5023_v6  ;;  %v1029_v10 = vrot.slane %v6327_v20, 7  ;;  %v5042_v20 = vrot.slane %v1020_v36, 7  ;;  %v5058_v36 = vsel %vm1263_vm1, %v1280_v0, %v5023_v6  ;;  %v5087_v44 = vrot.slane %v1060_v59, 1 }
  0x6a   : > { %6408 = vst [vmem:[#allocation21_spill] sm:$0xff] %v5058_v36  ;;  %v1320_v16 = vor.u32 %v1319_v41, %v6409_v33  ;;  %v5068_v42 = vsel %vm988_vm2, %v5046_v9, %v1152_v3  ;;  %v6413_v41 = vshll.u32 %v4795_v12, 16  ;;  %v1075_v36 = vshll.u32 %v4870_v58, 16 }
  0x6b   : > { %v1032_v40 = vor.u32 %v1030_v43, %v1029_v10  ;;  %6411 = vst [vmem:[#allocation23_spill] sm:$0xff] %v5068_v42  ;;  %v6339_v10 = vshrl.u32 %v4741_v57, 16  ;;  %6415 = vst [vmem:[#allocation25_spill] sm:$0xff] %v5087_v44  ;;  %v6420_v6 = vshll.u32 %v4741_v57, 16 }
  0x6c   : > { %v5075_v0 = vsel %vm1263_vm1, %v1320_v16, %v5036_v2  ;;  %v1284_v33 = vrot.slane %v6413_v41, 1  ;;  %v6416_v16 = vshrl.u32 %v4752_v60, 16  ;;  %v6418_v41 = vshrl.u32 %v4733_v55, 16 }
  0x6d   : > { %1400 = vrot.lane.b32.xlu0 %v4870_v58, %s4488_s16  ;;  %1436 = vrot.lane.b32.xlu1 %v4885_v48, %s4488_s16  ;;  %v5064_v43 = vsel %vm988_vm2, %v5042_v20, %v1032_v40  ;;  %6412 = vst [vmem:[#allocation24_spill] sm:$0xff] %v5075_v0  ;;  %v1044_v40 = vrot.slane %v6338_v22, 7  ;;  %v1164_v3 = vrot.slane %v6339_v10, 7  ;;  %v6419_v22 = vshll.u32 %v4775_v5, 16 }
  0x6e   : > { %6410 = vst [vmem:[#allocation22_spill] sm:$0xff] %v5064_v43  ;;  %v6414_v43 = vshrl.u32 %v4795_v12, 16  ;;  %v5091_v2 = vrot.slane %v6416_v16, 7  ;;  %v5095_v0 = vrot.slane %v6418_v41, 7  ;;  %v5108_v60 = vrot.slane %v1180_v46, 1 }
  0x6f   : > { %v1047_v10 = vor.u32 %v6419_v22, %v1044_v40  ;;  %v1167_v56 = vor.u32 %v6420_v6, %v1164_v3  ;;  %v1065_v41 = vshrl.u32 %v4845_v35, 16  ;;  %v6348_v22 = vshrl.u32 %v4818_v21, 16 }
  0x70   : > { %v1285_v42 = vor.u32 %v1284_v33, %v6414_v43  ;;  %6417 = vst [vmem:[#allocation26_spill] sm:$0xff] %v5091_v2  ;;  %v6422_v33 = vshll.u32 %v4762_v63, 16  ;;  %6423 = vst [vmem:[#allocation28_spill] sm:$0xff] %v5108_v60  ;;  %v6426_v40 = vshrl.u32 %v4762_v63, 16 }
  0x71   : > { %1402 = vrot.lane.b32.xlu0 %v4910_v24, %s4488_s16  ;;  %1438 = vrot.lane.b32.xlu1 %v4923_v30, %s4488_s16  ;;  %v5113_v5 = vsel %vm988_vm2, %v5091_v2, %v1047_v10  ;;  %v5117_v6 = vsel %vm988_vm2, %v5095_v0, %v1167_v56  ;;  %v1059_v10 = vrot.slane %v6348_v22, 7  ;;  %v6430_v22 = vshrl.u32 %v4762_v63, 16 }
  0x72   : > { %v5104_v43 = vsel %vm1263_vm1, %v1285_v42, %v5087_v44  ;;  %v1324_v16 = vrot.slane %v6422_v33, 1  ;;  %6424 = vst [vmem:[#allocation29_spill] sm:$0xff] %v5113_v5  ;;  %6425 = vst [vmem:[#allocation30_spill] sm:$0xff] %v5117_v6  ;;  %v1195_v42 = vshll.u32 %v4825_v23, 16  ;;  %v6352_v33 = vshrl.u32 %v4782_v7, 16 }
  0x73   : > { %6421 = vst [vmem:[#allocation27_spill] sm:$0xff] %v5104_v43  ;;  %v1289_v44 = vrot.slane %v6427_v39, 1  ;;  %v5128_v43 = vrot.slane %v1075_v36, 1  ;;  %v1062_v39 = vor.u32 %v1060_v59, %v1059_v10  ;;  %v5144_v57 = vrot.slane %v6430_v22, 7 }
  0x74   : > { %v1325_v3 = vor.u32 %v1324_v16, %v6426_v40  ;;  %v1179_v6 = vrot.slane %v6352_v33, 7  ;;  %v6429_v40 = vshrl.u32 %v4795_v12, 16  ;;  %v6431_v2 = vshll.u32 %v4804_v15, 16 }
  0x75   : > { %1404 = vrot.lane.b32.xlu0 %v4953_v13, %s4488_s16  ;;  %1440 = vrot.lane.b32.xlu1 %v4964_v25, %s4488_s16  ;;  %6428 = vst [vmem:[#allocation31_spill] sm:$0xff] %v5128_v43  ;;  %v1290_v21 = vor.u32 %v1289_v44, %v1065_v41  ;;  %v1210_v33 = vshll.u32 %v4885_v48, 16  ;;  %v1090_v16 = vshll.u32 %v4953_v13, 16 }
  0x76   : > { %v5133_v5 = vsel %vm1263_vm1, %v1325_v3, %v5108_v60  ;;  %v5140_v35 = vrot.slane %v6429_v40, 7  ;;  %v1182_v56 = vor.u32 %v1180_v46, %v1179_v6  ;;  %v1329_v3 = vrot.slane %v6431_v2, 1 }
  0x77   : > { %v5148_v60 = vrot.slane %v1195_v42, 1  ;;  %v5158_v44 = vsel %vm1263_vm1, %v1290_v21, %v5128_v43  ;;  %v6357_v2 = vshrl.u32 %v4870_v58, 16  ;;  %v6359_v6 = vshrl.u32 %v4825_v23, 16 }
  0x78   : > { %v5154_v40 = vsel %vm988_vm2, %v5140_v35, %v1062_v39  ;;  %6434 = vst [vmem:[#allocation34_spill] sm:$0xff] %v5158_v44  ;;  %v5162_v46 = vsel %vm988_vm2, %v5144_v57, %v1182_v56  ;;  %v1330_v59 = vor.u32 %v1329_v3, %v1185_v34  ;;  %v1080_v39 = vshrl.u32 %v4910_v24, 16 }
  0x79   : > { %1406 = vrot.lane.b32.xlu0 %v5000_v28, %s4488_s16  ;;  %1408 = vrot.lane.b32.xlu1 %v5014_v38, %s4488_s16  ;;  %6432 = vst [vmem:[#allocation32_spill] sm:$0xff] %v5148_v60  ;;  %6433 = vst [vmem:[#allocation33_spill] sm:$0xff] %v5154_v40  ;;  %v1074_v10 = vrot.slane %v6357_v2, 7  ;;  %v1194_v21 = vrot.slane %v6359_v6, 7  ;;  %v5175_v43 = vrot.slane %v1065_v41, 7  ;;  %v6437_v56 = vshll.u32 %v4910_v24, 16 }
  0x7a   : > { %6435 = vst [vmem:[#allocation35_spill] sm:$0xff] %v5162_v46  ;;  %v5168_v22 = vsel %vm1263_vm1, %v1330_v59, %v5148_v60  ;;  %v5179_v44 = vrot.slane %v1185_v34, 7  ;;  %v5181_v46 = vrot.slane %v1090_v16, 1  ;;  %v1200_v59 = vshrl.u32 %v4852_v37, 16 }
  0x7b   : > { %6436 = vst [vmem:[#allocation36_spill] sm:$0xff] %v5168_v22  ;;  %v1294_v3 = vrot.slane %v6437_v56, 1  ;;  %v1077_v15 = vor.u32 %v1075_v36, %v1074_v10  ;;  %v1197_v40 = vor.u32 %v1195_v42, %v1194_v21  ;;  %v6439_v2 = vshll.u32 %v4852_v37, 16  ;;  %v5228_v56 = vld [vmem:[%s4687_s26 + $0x70] sm:$0xff]  }
  0x7c   : > { %6438 = vst [vmem:[#allocation37_spill] sm:$0xff] %v5181_v46  ;;  %v5186_v6 = vrot.slane %v1210_v33, 1  ;;  %v6364_v21 = vshrl.u32 %v4885_v48, 16  ;;  %6444 = vst [vmem:[#allocation42_spill] sm:$0xff] %v5228_v56 }
  0x7d   : > { %v1295_v58 = vor.u32 %v1294_v3, %v1080_v39  ;;  %v1334_v60 = vrot.slane %v6439_v2, 1  ;;  %v5190_v41 = vsel %vm988_vm2, %v5175_v43, %v1077_v15  ;;  %v5194_v34 = vsel %vm988_vm2, %v5179_v44, %v1197_v40  ;;  %2248 = vrot.lane.b32.xlu0 %v5228_v56, %s4488_s16 }
  0x7e   : > { %6440 = vst [vmem:[#allocation38_spill] sm:$0xff] %v5186_v6  ;;  %v6363_v2 = vshrl.u32 %v4953_v13, 16  ;;  %v1209_v40 = vrot.slane %v6364_v21, 7  ;;  %v5214_v3 = vrot.slane %v1200_v59, 7 }
  0x7f   : > { %v5198_v36 = vsel %vm1263_vm1, %v1295_v58, %v5181_v46  ;;  %v1335_v42 = vor.u32 %v1334_v60, %v1200_v59  ;;  %v1105_v58 = vshll.u32 %v5014_v38, 16  ;;  %v5212_v60 = vrot.slane %v1080_v39, 7 }
  0x80   : > { %6441 = vst [vmem:[#allocation39_spill] sm:$0xff] %v5198_v36  ;;  %v1089_v15 = vrot.slane %v6363_v2, 7  ;;  %v1212_v46 = vor.u32 %v1210_v33, %v1209_v40  ;;  %v1225_v36 = vshll.u32 %v4964_v25, 16  ;;  %v1095_v39 = vshrl.u32 %v5000_v28, 16 }
  0x81   : > { %v5202_v10 = vsel %vm1263_vm1, %v1335_v42, %v5186_v6  ;;  %v6366_v6 = vshll.u32 %v4923_v30, 16  ;;  %v5232_v59 = vrot.slane %v1105_v58, 1 }
  0x82   : > { %v1092_v42 = vor.u32 %v1090_v16, %v1089_v15  ;;  %v5224_v21 = vsel %vm988_vm2, %v5214_v3, %v1212_v46  ;;  %v6445_v16 = vshll.u32 %v5000_v28, 16  ;;  %v1215_v15 = vshrl.u32 %v4923_v30, 16  ;;  %v5250_v28 = vld [vmem:[%s4687_s26 + $0x78] sm:$0xff]  }
  0x83   : > { %6443 = vst [vmem:[#allocation41_spill] sm:$0xff] %v5224_v21  ;;  %6446 = vst [vmem:[#allocation43_spill] sm:$0xff] %v5232_v59  ;;  %v1339_v40 = vrot.slane %v6366_v6, 1  ;;  %v6374_v6 = vshrl.u32 %v5014_v38, 16  ;;  %v6375_v30 = vshrl.u32 %v4964_v25, 16  ;;  %2250 = vrot.lane.b32.xlu1 %v5250_v28, %s4488_s16 }
  0x84   : > { %v5220_v2 = vsel %vm988_vm2, %v5212_v60, %v1092_v42  ;;  %v1299_v33 = vrot.slane %v6445_v16, 1  ;;  %v5237_v42 = vrot.slane %v1225_v36, 1  ;;  %6449 = vst [vmem:[#allocation46_spill] sm:$0xff] %v5250_v28  ;;  %v5262_v56 = vrot.slane %v1215_v15, 7 }
  0x85   : > { %6442 = vst [vmem:[#allocation40_spill] sm:$0xff] %v5220_v2  ;;  %v1340_v2 = vor.u32 %v1339_v40, %v1215_v15  ;;  %v1224_v40 = vrot.slane %v6375_v30, 7  ;;  %v4412_v15 = vld [vmem:[%s6315_s3 + $0x98] sm:$0xff]   ;;  %v1370_v30 = vsel %vm5288_vm6, %v4892_v11, 0  ;;  %v6456_v11 = vmov 0  }
  0x86   : > { %6447 = vst [vmem:[#allocation44_spill] sm:$0xff] %v5237_v42  ;;  %v1300_v46 = vor.u32 %v1299_v33, %v1095_v39  ;;  %v1104_v33 = vrot.slane %v6374_v6, 7 }
  0x87   : > { %v5247_v16 = vsel %vm1263_vm1, %v1340_v2, %v5237_v42 }
  0x88   : > { %v5243_v21 = vsel %vm1263_vm1, %v1300_v46, %v5232_v59  ;;  %6448 = vst [vmem:[#allocation45_spill] sm:$0xff] %v5247_v16  ;;  %v5260_v46 = vrot.slane %v1095_v39, 7  ;;  %v1107_v2 = vor.u32 %v1105_v58, %v1104_v33  ;;  %v1227_v59 = vor.u32 %v1225_v36, %v1224_v40  ;;  %v5282_v58 = vld [vmem:[%s5279_s8] sm:$0xff]  }
  0x89   : > { %6452 = vst [vmem:[#allocation47_spill] sm:$0xff] %v5282_v58  ;;  %v1255_v36 = vsel %vm5273_vm4, 0, %v4831_v27  ;;  %2930 = vrot.lane.b32.xlu0 %v5282_v58, %s4488_s16 }
  0x8a   : > { %v5266_v42 = vsel %vm988_vm2, %v5260_v46, %v1107_v2  ;;  %v5270_v28 = vsel %vm988_vm2, %v5262_v56, %v1227_v59  ;;  %v1247_v59 = vsel %vm5273_vm4, 0, %v4799_v14  ;;  %v1362_v2 = vsel %vm5288_vm6, %v4834_v29, 0  ;;  %v4415_v14 = vld [vmem:[%s6315_s3 + $0xf8] sm:$0xff]  }
  0xaf   : > { %v1411_v33 = vpop.permute.xlu0 %1410  ;;  %v1379_v40 = vpop.permute.xlu1 %1378 }
  0xb0   : > { %v1509_v27 = vsel %vm1442_vm0, %v1255_v36, %v1411_v33  ;;  %v1445_v58 = vsel %vm1442_vm0, %v1247_v59, %v1379_v40  ;;  %v4416_v36 = vld [vmem:[%s6315_s3 + $0x90] sm:$0xff]   ;;  %v5315_v33 = vld [vmem:[%s5279_s8 + $0x8] sm:$0xff]  }
  0xb1   : > { %1924 = vmatmul.mubr.bf16.vlgmr.msra.gmra.mxu1 %v1509_v27  ;;  %1796 = vmatmul.mubr.bf16.vlgmr.msra.gmra.mxu0 %v1445_v58  ;;  %6455 = vst [vmem:[#allocation48_spill] sm:$0xff] %v5315_v33  ;;  %v4417_v59 = vld [vmem:[%s6315_s3 + $0xf0] sm:$0xff]   ;;  %v4418_v27 = vld [vmem:[%s6315_s3 + $0x88] sm:$0xff]  }
  0xb2   : > { %2382 = vmatpush1.bf16.msra.mxu1 %v4412_v15  ;;  %4084 = vmatprep.mubr.msk.bf16.mxu0 %vm1442_vm0, %v1362_v2 }
  0xb3   : > { %v1413_v29 = vpop.permute.xlu0 %1412  ;;  %4100 = vmatprep.mubr.msk.bf16.mxu1 %vm1442_vm0, %v1370_v30  ;;  %2383 = vmatprep.subr.bf16.mxu1 %v6456_v11  ;;  %v6457_v30 = vshll.u32 %v4690_v47, 16  ;;  %v1415_v47 = vpop.permute.xlu1 %1414 }
  0xb4   : > { %3064 = vmatpush1.bf16.msra.mxu0 %v4415_v14  ;;  %2932 = vrot.lane.b32.xlu1 %v5315_v33, %s4488_s16  ;;  %v1513_v58 = vsel %vm1442_vm0, %v4930_v45, %v1413_v29  ;;  %v6458_v14 = vshll.u32 %v4705_v50, 16  ;;  %v4420_v45 = vld [vmem:[%s6315_s3 + $0xe8] sm:$0xff]  }
  0xb5   : > { %3065 = vmatprep.subr.bf16.mxu0 %v6456_v11  ;;  %v1130_v40 = vor.u32 %v6457_v30, %v4981_v8  ;;  %v6459_v8 = vshrl.u32 %v4701_v49, 16  ;;  %v4421_v49 = vld [vmem:[%s6315_s3 + $0xe0] sm:$0xff]   ;;  %v4423_v30 = vld [vmem:[%s6315_s3 + $0xd8] sm:$0xff]  }
  0xb6   : > { %2384 = vmatpush1.bf16.msra.mxu1 %v4416_v36  ;;  %v1010_v33 = vor.u32 %v6458_v14, %v4968_v31  ;;  %v4419_v31 = vld [vmem:[%s6315_s3 + $0x80] sm:$0xff]   ;;  %v4426_v14 = vld [vmem:[%s6315_s3 + $0xd0] sm:$0xff]  }
  0xb7   : > { %v1381_v15 = vpop.permute.xlu0 %1380  ;;  %2385 = vmatprep.subr.bf16.mxu1 %v6456_v11  ;;  %v1256_v50 = vsel %vm5273_vm4, 0, %v1130_v40  ;;  %v1417_v40 = vpop.permute.xlu1 %1416 }
  0xb8   : > { %v1449_v2 = vsel %vm1442_vm0, %v4889_v1, %v1381_v15  ;;  %3066 = vmatpush1.bf16.msra.mxu0 %v4417_v59  ;;  %v1313_v1 = vor.u32 %v4904_v19, %v6459_v8  ;;  %v1248_v29 = vsel %vm5273_vm4, 0, %v1010_v33  ;;  %v6460_v59 = vshrl.u32 %v4716_v52, 16 }
  0xb9   : > { %1932 = vmatmul.mubr.bf16.gmra.mxu1 %v1513_v58  ;;  %3067 = vmatprep.subr.bf16.mxu0 %v6456_v11  ;;  %v5367_v19 = vsel %vm1442_vm0, %v1256_v50, %v1415_v47  ;;  %v6461_v50 = vshll.u32 %v4713_v51, 16 }
  0xba   : > { %1804 = vmatmul.mubr.bf16.gmra.mxu0 %v1449_v2  ;;  %4101 = vmatprep.mubr.msk.bf16.mxu1 %vm1442_vm0, %v4946_v61  ;;  %v1273_v58 = vor.u32 %v4878_v62, %v6460_v59  ;;  %v5374_v52 = vsel %vm5288_vm6, %v1313_v1, 0  ;;  %v4422_v62 = vld [vmem:[%s6315_s3 + $0x78] sm:$0xff]   ;;  %v4425_v1 = vld [vmem:[%s6315_s3 + $0x68] sm:$0xff]  }
  0xbb   : > { %4085 = vmatprep.mubr.msk.bf16.mxu0 %vm1442_vm0, %v4917_v26  ;;  %2386 = vmatpush1.bf16.msra.mxu1 %v4418_v27  ;;  %v1383_v36 = vpop.permute.xlu0 %1382  ;;  %v4424_v27 = vld [vmem:[%s6315_s3 + $0x70] sm:$0xff]   ;;  %v1145_v8 = vor.u32 %v6461_v50, %v5046_v9  ;;  %v1419_v51 = vpop.permute.xlu1 %1418  ;;  %v4430_v50 = vld [vmem:[%s6315_s3 + $0xb8] sm:$0xff]  }
  0xbc   : > { %2387 = vmatprep.subr.bf16.mxu1 %v6456_v11  ;;  %3068 = vmatpush1.bf16.msra.mxu0 %v4420_v45  ;;  %v5370_v15 = vsel %vm1442_vm0, %v1248_v29, %v1383_v36  ;;  %v5381_v33 = vsel %vm5288_vm6, %v1273_v58, 0  ;;  %v5404_v45 = vsel %vm1442_vm0, %v5005_v18, %v1417_v40  ;;  %v6463_v18 = vshrl.u32 %v4723_v53, 16  ;;  %v4428_v29 = vld [vmem:[%s6315_s3 + $0x60] sm:$0xff]  }
  0xbd   : > { %3069 = vmatprep.subr.bf16.mxu0 %v6456_v11  ;;  %v4429_v53 = vld [vmem:[%s6315_s3 + $0xc0] sm:$0xff]  }
  0xbf   : > { %2388 = vmatpush1.bf16.msra.mxu1 %v4419_v31  ;;  %v1385_v2 = vpop.permute.xlu0 %1384  ;;  %v6462_v31 = vshll.u32 %v4728_v54, 16  ;;  %v1257_v54 = vsel %vm5273_vm4, 0, %v1145_v8 }
  0xc0   : > { %2389 = vmatprep.subr.bf16.mxu1 %v6456_v11  ;;  %3070 = vmatpush1.bf16.msra.mxu0 %v4421_v49  ;;  %v5408_v47 = vsel %vm1442_vm0, %v4993_v4, %v1385_v2  ;;  %v4427_v4 = vld [vmem:[%s6315_s3 + $0xc8] sm:$0xff]   ;;  %v6465_v49 = vld [vmem:[#allocation7_spill] sm:$0xff] }
  0xc1   : > { %1940 = vmatmul.mubr.bf16.gmra.mxu1 %v5367_v19  ;;  %3071 = vmatprep.subr.bf16.mxu0 %v6456_v11  ;;  %v1025_v36 = vor.u32 %v6462_v31, %v5042_v20  ;;  %v6464_v20 = vld [vmem:[#allocation17_spill] sm:$0xff]  ;;  %v1421_v31 = vpop.permute.xlu1 %1420 }
  0xc2   : > { %1812 = vmatmul.mubr.bf16.gmra.mxu0 %v5370_v15  ;;  %4102 = vmatprep.mubr.msk.bf16.mxu1 %vm1442_vm0, %v5374_v52  ;;  %v1318_v9 = vor.u32 %v6464_v20, %v6463_v18  ;;  %v6469_v20 = vld [vmem:[#allocation22_spill] sm:$0xff] }
  0xc3   : > { %4086 = vmatprep.mubr.msk.bf16.mxu0 %vm1442_vm0, %v5381_v33  ;;  %2390 = vmatpush1.bf16.msra.mxu1 %v4422_v62  ;;  %v1387_v59 = vpop.permute.xlu0 %1386  ;;  %v1249_v58 = vsel %vm5273_vm4, 0, %v1025_v36  ;;  %v6466_v62 = vshrl.u32 %v6465_v49, 16  ;;  %v4431_v36 = vld [vmem:[%s6315_s3 + $0xb0] sm:$0xff]   ;;  %v6471_v49 = vld [vmem:[#allocation26_spill] sm:$0xff] }
  0xc4   : > { %2391 = vmatprep.subr.bf16.mxu1 %v6456_v11  ;;  %3072 = vmatpush1.bf16.msra.mxu0 %v4423_v30  ;;  %v6467_v30 = vld [vmem:[#allocation16_spill] sm:$0xff]  ;;  %v5452_v2 = vsel %vm1442_vm0, %v1249_v58, %v1387_v59 }
  0xc5   : > { %3073 = vmatprep.subr.bf16.mxu0 %v6456_v11  ;;  %v1278_v40 = vor.u32 %v6467_v30, %v6466_v62  ;;  %v4434_v58 = vld [vmem:[%s6315_s3 + $0xa8] sm:$0xff]   ;;  %v6472_v62 = vld [vmem:[#allocation9_spill] sm:$0xff] }
  0xc6   : > { %v6473_v30 = vshll.u32 %v6472_v62, 16 }
  0xc7   : > { %2392 = vmatpush1.bf16.msra.mxu1 %v4424_v27  ;;  %v5449_v27 = vsel %vm1442_vm0, %v1257_v54, %v1419_v51  ;;  %v5463_v8 = vsel %vm5288_vm6, %v1278_v40, 0  ;;  %v4433_v51 = vld [vmem:[%s6315_s3 + $0x110] sm:$0xff]   ;;  %v6468_v54 = vld [vmem:[#allocation23_spill] sm:$0xff] }
  0xc8   : > { %2393 = vmatprep.subr.bf16.mxu1 %v6456_v11  ;;  %3074 = vmatpush1.bf16.msra.mxu0 %v4426_v14  ;;  %v5456_v14 = vsel %vm5288_vm6, %v1318_v9, 0  ;;  %v5486_v18 = vsel %vm1442_vm0, %v6468_v54, %v1421_v31  ;;  %v1040_v40 = vor.u32 %v6473_v30, %v6471_v49  ;;  %v6476_v31 = vld [vmem:[#allocation8_spill] sm:$0xff]  ;;  %v4438_v54 = vld [vmem:[%s6315_s3 + $0xa0] sm:$0xff]   ;;  %v6479_v49 = vld [vmem:[#allocation10_spill] sm:$0xff] }
  0xc9   : > { %1948 = vmatmul.mubr.bf16.gmra.mxu1 %v5404_v45  ;;  %3075 = vmatprep.subr.bf16.mxu0 %v6456_v11  ;;  %v6480_v62 = vshrl.u32 %v6479_v49, 16  ;;  %v6481_v30 = vld [vmem:[#allocation19_spill] sm:$0xff] }
  0xca   : > { %1820 = vmatmul.mubr.bf16.gmra.mxu0 %v5408_v47  ;;  %4103 = vmatprep.mubr.msk.bf16.mxu1 %vm1442_vm0, %v5019_v17 }
  0xcb   : > { %4087 = vmatprep.mubr.msk.bf16.mxu0 %vm1442_vm0, %v4987_v32  ;;  %2394 = vmatpush1.bf16.msra.mxu1 %v4425_v1  ;;  %v4432_v1 = vld [vmem:[%s6315_s3 + $0x118] sm:$0xff]  }
  0xcc   : > { %2395 = vmatprep.subr.bf16.mxu1 %v6456_v11  ;;  %3076 = vmatpush1.bf16.msra.mxu0 %v4427_v4  ;;  %v1389_v4 = vpop.permute.xlu0 %1388 }
  0xcd   : > { %3077 = vmatprep.subr.bf16.mxu0 %v6456_v11  ;;  %v5490_v9 = vsel %vm1442_vm0, %v6469_v20, %v1389_v4  ;;  %v6478_v4 = vld [vmem:[#allocation20_spill] sm:$0xff] }
  0xcf   : > { %2396 = vmatpush1.bf16.msra.mxu1 %v4428_v29  ;;  %v6470_v29 = vshll.u32 %v4733_v55, 16  ;;  %v6474_v55 = vld [vmem:[#allocation24_spill] sm:$0xff] }
  0xd0   : > { %2405 = vmatprep.subr.bf16.mxu1 %v6456_v11  ;;  %3078 = vmatpush1.bf16.msra.mxu0 %v4429_v53  ;;  %v4437_v53 = vld [vmem:[%s6315_s3 + $0x108] sm:$0xff]   ;;  %v1391_v20 = vpop.permute.xlu0 %1390 }
  0xd1   : > { %1956 = vmatmul.mubr.bf16.gmra.mxu1 %v5449_v27  ;;  %3087 = vmatprep.subr.bf16.mxu0 %v6456_v11  ;;  %v1160_v59 = vor.u32 %v6470_v29, %v5095_v0  ;;  %v1423_v0 = vpop.permute.xlu1 %1422  ;;  %v1250_v29 = vsel %vm5273_vm4, 0, %v1040_v40 }
  0xd2   : > { %1828 = vmatmul.mubr.bf16.gmra.mxu0 %v5452_v2  ;;  %4104 = vmatprep.mubr.msk.bf16.mxu1 %vm1442_vm0, %v5456_v14 }
  0xd3   : > { %4088 = vmatprep.mubr.msk.bf16.mxu0 %vm1442_vm0, %v5463_v8  ;;  %2406 = vmatpush2.bf16.msra.mxu1 %v4430_v50  ;;  %v6475_v50 = vld [vmem:[#allocation21_spill] sm:$0xff] }
  0xd4   : > { %2407 = vmatprep.subr.bf16.mxu1 %v6456_v11  ;;  %3088 = vmatpush2.bf16.msra.mxu0 %v4432_v1  ;;  %v1258_v1 = vsel %vm5273_vm4, 0, %v1160_v59  ;;  %v4440_v59 = vld [vmem:[%s6315_s3 + $0x100] sm:$0xff]  }
  0xd5   : > { %3089 = vmatprep.subr.bf16.mxu0 %v6456_v11 }
  0xd7   : > { %2408 = vmatpush2.bf16.msra.mxu1 %v4431_v36  ;;  %v6477_v36 = vshrl.u32 %v6476_v31, 16  ;;  %v5534_v31 = vsel %vm1442_vm0, %v1250_v29, %v1391_v20  ;;  %v6485_v20 = vshll.u32 %v4795_v12, 16 }
  0xd8   : > { %2409 = vmatprep.subr.bf16.mxu1 %v6456_v11  ;;  %3090 = vmatpush2.bf16.msra.mxu0 %v4433_v51 }
  0xd9   : > { %1964 = vmatmul.mubr.bf16.gmra.mxu1 %v5486_v18  ;;  %3091 = vmatprep.subr.bf16.mxu0 %v6456_v11  ;;  %v1323_v51 = vor.u32 %v6478_v4, %v6477_v36  ;;  %v6483_v4 = vld [vmem:[#allocation29_spill] sm:$0xff]  ;;  %v1055_v29 = vor.u32 %v6485_v20, %v5140_v35 }
  0xda   : > { %1836 = vmatmul.mubr.bf16.gmra.mxu0 %v5490_v9  ;;  %4105 = vmatprep.mubr.msk.bf16.mxu1 %vm1442_vm0, %v6474_v55  ;;  %v1283_v55 = vor.u32 %v6481_v30, %v6480_v62  ;;  %v6486_v62 = vld [vmem:[#allocation27_spill] sm:$0xff] }
  0xdb   : > { %4089 = vmatprep.mubr.msk.bf16.mxu0 %vm1442_vm0, %v6475_v50  ;;  %2410 = vmatpush2.bf16.msra.mxu1 %v4434_v58  ;;  %v5531_v58 = vsel %vm1442_vm0, %v1258_v1, %v1423_v0  ;;  %v5538_v40 = vsel %vm5288_vm6, %v1323_v51, 0  ;;  %v1393_v0 = vpop.permute.xlu0 %1392  ;;  %v6482_v1 = vld [vmem:[#allocation30_spill] sm:$0xff]  ;;  %v6484_v51 = vshll.u32 %v4762_v63, 16  ;;  %v6488_v63 = vld [vmem:[#allocation28_spill] sm:$0xff]  ;;  %v1251_v35 = vsel %vm5273_vm4, 0, %v1055_v29 }
  0xdc   : > { %2411 = vmatprep.subr.bf16.mxu1 %v6456_v11  ;;  %3092 = vmatpush2.bf16.msra.mxu0 %v4437_v53  ;;  %v5542_v53 = vsel %vm5288_vm6, %v1283_v55, 0  ;;  %v5556_v55 = vsel %vm1442_vm0, %v6483_v4, %v1393_v0 }
  0xdd   : > { %3093 = vmatprep.subr.bf16.mxu0 %v6456_v11  ;;  %v1425_v11 = vpop.permute.xlu1 %1424 }
  0xde   : > { %v5552_v36 = vsel %vm1442_vm0, %v6482_v1, %v1425_v11  ;;  %v6489_v11 = vld [vmem:[#allocation12_spill] sm:$0xff]  ;;  %v6491_v1 = vld [vmem:[#allocation25_spill] sm:$0xff] }
  0xdf   : > { %2412 = vmatpush2.bf16.msra.mxu1 %v4438_v54  ;;  %v1175_v54 = vor.u32 %v6484_v51, %v5144_v57  ;;  %v6487_v57 = vshrl.u32 %v4782_v7, 16  ;;  %v1395_v12 = vpop.permute.xlu0 %1394  ;;  %v6490_v0 = vshrl.u32 %v6489_v11, 16 }
  0xe0   : > { %3094 = vmatpush2.bf16.msra.mxu0 %v4440_v59  ;;  %v5584_v20 = vsel %vm1442_vm0, %v1251_v35, %v1395_v12  ;;  %v6497_v12 = vld [vmem:[#allocation11_spill] sm:$0xff] }
  0xe1   : > { %1972 = vmatmul.mubr.bf16.gmra.mxu1 %v5531_v58  ;;  %v1427_v49 = vpop.permute.xlu1 %1426  ;;  %v1259_v30 = vsel %vm5273_vm4, 0, %v1175_v54  ;;  %v1328_v59 = vor.u32 %v6488_v63, %v6487_v57  ;;  %v1288_v4 = vor.u32 %v6491_v1, %v6490_v0  ;;  %v6496_v63 = vld [vmem:[#allocation33_spill] sm:$0xff]  ;;  %v6498_v35 = vshll.u32 %v6497_v12, 16 }
  0xe2   : > { %1844 = vmatmul.mubr.bf16.gmra.mxu0 %v5534_v31  ;;  %4106 = vmatprep.mubr.msk.bf16.mxu1 %vm1442_vm0, %v5538_v40  ;;  %v5581_v51 = vsel %vm1442_vm0, %v1259_v30, %v1427_v49  ;;  %v6494_v30 = vld [vmem:[#allocation35_spill] sm:$0xff]  ;;  %v6499_v0 = vld [vmem:[#allocation13_spill] sm:$0xff] }
  0xe3   : > { %4090 = vmatprep.mubr.msk.bf16.mxu0 %vm1442_vm0, %v5542_v53  ;;  %6492 = vst [vmem:[#allocation17_spill] sm:$0xff] %v5581_v51  ;;  %v5588_v54 = vsel %vm5288_vm6, %v1328_v59, 0  ;;  %v5592_v7 = vsel %vm5288_vm6, %v1288_v4, 0  ;;  %v1397_v49 = vpop.permute.xlu0 %1396  ;;  %v1190_v11 = vor.u32 %v6498_v35, %v5179_v44  ;;  %v6500_v1 = vshll.u32 %v6499_v0, 16  ;;  %v6504_v0 = vld [vmem:[#allocation14_spill] sm:$0xff] }
  0xe4   : > { %6493 = vst [vmem:[#allocation7_spill] sm:$0xff] %v5588_v54  ;;  %v5606_v59 = vsel %vm1442_vm0, %v6496_v63, %v1397_v49  ;;  %v6502_v44 = vshrl.u32 %v4825_v23, 16  ;;  %v6503_v63 = vld [vmem:[#allocation32_spill] sm:$0xff] }
  0xe5   : > { %v1429_v29 = vpop.permute.xlu1 %1428  ;;  %v1070_v4 = vor.u32 %v6500_v1, %v5175_v43  ;;  %v1260_v49 = vsel %vm5273_vm4, 0, %v1190_v11  ;;  %v6505_v1 = vshrl.u32 %v6504_v0, 16  ;;  %v6512_v0 = vshrl.u32 %v4953_v13, 16 }
  0xe6   : > { %v5602_v57 = vsel %vm1442_vm0, %v6494_v30, %v1429_v29  ;;  %v6501_v30 = vld [vmem:[#allocation34_spill] sm:$0xff]  ;;  %v1333_v12 = vor.u32 %v6503_v63, %v6502_v44  ;;  %v6508_v63 = vshll.u32 %v4910_v24, 16 }
  0xe7   : > { %6495 = vst [vmem:[#allocation16_spill] sm:$0xff] %v5602_v57  ;;  %v1399_v35 = vpop.permute.xlu0 %1398  ;;  %v1252_v43 = vsel %vm5273_vm4, 0, %v1070_v4 }
  0xe8   : > { %v5638_v11 = vsel %vm5288_vm6, %v1333_v12, 0  ;;  %v1085_v12 = vor.u32 %v6508_v63, %v5212_v60 }
  0xe9   : > { %1980 = vmatmul.mubr.bf16.gmra.mxu1 %v5552_v36  ;;  %v1431_v29 = vpop.permute.xlu1 %1430 }
  0xea   : > { %1852 = vmatmul.mubr.bf16.gmra.mxu0 %v5556_v55  ;;  %4107 = vmatprep.mubr.msk.bf16.mxu1 %vm1442_vm0, %v5133_v5  ;;  %v1253_v60 = vsel %vm5273_vm4, 0, %v1085_v12  ;;  %v6514_v12 = vld [vmem:[#allocation41_spill] sm:$0xff] }
  0xeb   : > { %4091 = vmatprep.mubr.msk.bf16.mxu0 %vm1442_vm0, %v6486_v62  ;;  %v1401_v4 = vpop.permute.xlu0 %1400 }
  0xef   : > { %v1403_v24 = vpop.permute.xlu0 %1402 }
  0xf1   : > { %1988 = vmatmul.mubr.bf16.gmra.mxu1 %v5581_v51  ;;  %v5634_v51 = vsel %vm1442_vm0, %v1252_v43, %v1399_v35  ;;  %v6509_v35 = vld [vmem:[#allocation39_spill] sm:$0xff] }
  0xf2   : > { %1860 = vmatmul.mubr.bf16.gmra.mxu0 %v5584_v20  ;;  %4108 = vmatprep.mubr.msk.bf16.mxu1 %vm1442_vm0, %v5588_v54 }
  0xf3   : > { %4092 = vmatprep.mubr.msk.bf16.mxu0 %vm1442_vm0, %v5592_v7  ;;  %v1405_v63 = vpop.permute.xlu0 %1404 }
  0xf9   : > { %1996 = vmatmul.mubr.bf16.gmra.mxu1 %v5602_v57  ;;  %v6506_v57 = vld [vmem:[#allocation31_spill] sm:$0xff] }
  0xfa   : > { %1868 = vmatmul.mubr.bf16.gmra.mxu0 %v5606_v59  ;;  %4109 = vmatprep.mubr.msk.bf16.mxu1 %vm1442_vm0, %v5168_v22  ;;  %v1293_v54 = vor.u32 %v6506_v57, %v6505_v1  ;;  %v5631_v22 = vsel %vm1442_vm0, %v1260_v49, %v1431_v29  ;;  %v1433_v57 = vpop.permute.xlu1 %1432  ;;  %v6507_v49 = vshll.u32 %v4852_v37, 16  ;;  %v6510_v37 = vshrl.u32 %v4885_v48, 16  ;;  %v6513_v1 = vld [vmem:[#allocation37_spill] sm:$0xff] }
  0xfb   : > { %4093 = vmatprep.mubr.msk.bf16.mxu0 %vm1442_vm0, %v6501_v30  ;;  %v5652_v29 = vsel %vm1442_vm0, %v5194_v34, %v1433_v57  ;;  %v1298_v57 = vor.u32 %v6513_v1, %v6512_v0  ;;  %v6519_v0 = vld [vmem:[#allocation18_spill] sm:$0xff] }
  0xfc   : > { %v5642_v23 = vsel %vm5288_vm6, %v1293_v54, 0  ;;  %v5656_v54 = vsel %vm1442_vm0, %v5190_v41, %v1401_v4  ;;  %v1205_v44 = vor.u32 %v6507_v49, %v5214_v3  ;;  %v6511_v3 = vld [vmem:[#allocation38_spill] sm:$0xff]  ;;  %v5684_v49 = vsel %vm1442_vm0, %v1253_v60, %v1403_v24 }
  0xfd   : > { %v1338_v43 = vor.u32 %v6511_v3, %v6510_v37  ;;  %v5692_v48 = vsel %vm5288_vm6, %v1298_v57, 0  ;;  %v6517_v3 = vld [vmem:[#allocation15_spill] sm:$0xff]  ;;  %v6520_v1 = vshll.u32 %v6519_v0, 16 }
  0xfe   : > { %v1435_v34 = vpop.permute.xlu1 %1434  ;;  %v1261_v41 = vsel %vm5273_vm4, 0, %v1205_v44 }
  0xff   : > { %v5681_v4 = vsel %vm1442_vm0, %v1261_v41, %v1435_v34  ;;  %v5688_v44 = vsel %vm5288_vm6, %v1338_v43, 0  ;;  %v6516_v41 = vld [vmem:[#allocation40_spill] sm:$0xff]  ;;  %v6518_v43 = vshll.u32 %v6517_v3, 16  ;;  %v1100_v57 = vor.u32 %v6520_v1, %v5260_v46 }
 0x100   : > { %v5706_v37 = vsel %vm1442_vm0, %v6516_v41, %v1405_v63  ;;  %v6522_v63 = vld [vmem:[#allocation44_spill] sm:$0xff]  ;;  %v1407_v41 = vpop.permute.xlu0 %1406  ;;  %v6523_v3 = vshrl.u32 %v5014_v38, 16  ;;  %v5745_v38 = vld [vmem:[%s4687_s26 + $0xf0] sm:$0xff]  }
 0x101   : > { %2004 = vmatmul.mubr.bf16.gmra.mxu1 %v5631_v22  ;;  %v1220_v24 = vor.u32 %v6518_v43, %v5262_v56  ;;  %v6521_v56 = vshrl.u32 %v4964_v25, 16  ;;  %v1254_v46 = vsel %vm5273_vm4, 0, %v1100_v57  ;;  %v6524_v43 = vld [vmem:[#allocation43_spill] sm:$0xff]  ;;  %2252 = vrot.lane.b32.xlu0 %v5745_v38, %s4488_s16 }
 0x102   : > { %1876 = vmatmul.mubr.bf16.gmra.mxu0 %v5634_v51  ;;  %4110 = vmatprep.mubr.msk.bf16.mxu1 %vm1442_vm0, %v5638_v11  ;;  %v1437_v13 = vpop.permute.xlu1 %1436  ;;  %v1303_v0 = vor.u32 %v6524_v43, %v6523_v3 }
 0x103   : > { %4094 = vmatprep.mubr.msk.bf16.mxu0 %vm1442_vm0, %v5642_v23  ;;  %v5702_v34 = vsel %vm1442_vm0, %v6514_v12, %v1437_v13  ;;  %v1262_v13 = vsel %vm5273_vm4, 0, %v1220_v24  ;;  %v1343_v12 = vor.u32 %v6522_v63, %v6521_v56  ;;  %v5764_v56 = vld [vmem:[%s4687_s26 + $0xf8] sm:$0xff]  }
 0x104   : > { %6515 = vst [vmem:[#allocation23_spill] sm:$0xff] %v5702_v34  ;;  %v5742_v24 = vsel %vm5288_vm6, %v1303_v0, 0  ;;  %2254 = vrot.lane.b32.xlu1 %v5764_v56, %s4488_s16 }
 0x105   : > { %v5738_v25 = vsel %vm5288_vm6, %v1343_v12, 0 }
 0x106   : > { %v1439_v60 = vpop.permute.xlu1 %1438 }
 0x107   : > { %v5731_v1 = vsel %vm1442_vm0, %v1262_v13, %v1439_v60 }
 0x109   : > { %2012 = vmatmul.mubr.bf16.gmra.mxu1 %v5652_v29 }
 0x10a   : > { %1884 = vmatmul.mubr.bf16.gmra.mxu0 %v5656_v54  ;;  %4111 = vmatprep.mubr.msk.bf16.mxu1 %vm1442_vm0, %v5202_v10 }
 0x10b   : > { %4095 = vmatprep.mubr.msk.bf16.mxu0 %vm1442_vm0, %v6509_v35 }
 0x111   : > { %2020 = vmatmul.mubr.bf16.gmra.mxu1 %v5681_v4 }
 0x112   : > { %1892 = vmatmul.mubr.bf16.gmra.mxu0 %v5684_v49  ;;  %4112 = vmatprep.mubr.msk.bf16.mxu1 %vm1442_vm0, %v5688_v44 }
 0x113   : > { %4096 = vmatprep.mubr.msk.bf16.mxu0 %vm1442_vm0, %v5692_v48 }
 0x119   : > { %2028 = vmatmul.mubr.bf16.gmra.mxu1 %v5702_v34  ;;  %v5734_v34 = vsel %vm1442_vm0, %v1254_v46, %v1407_v41 }
 0x11a   : > { %1900 = vmatmul.mubr.bf16.gmra.mxu0 %v5706_v37  ;;  %4113 = vmatprep.mubr.msk.bf16.mxu1 %vm1442_vm0, %v5247_v16  ;;  %v1441_v16 = vpop.permute.xlu1 %1440 }
 0x11b   : > { %4097 = vmatprep.mubr.msk.bf16.mxu0 %vm1442_vm0, %v5243_v21  ;;  %v5757_v57 = vsel %vm1442_vm0, %v5270_v28, %v1441_v16  ;;  %v5775_v28 = vld [vmem:[%s5279_s8 + $0x10] sm:$0xff]  }
 0x11c   : > { %2934 = vrot.lane.b32.xlu0 %v5775_v28, %s4488_s16 }
 0x11e   : > { %v1409_v60 = vpop.permute.xlu1 %1408 }
 0x11f   : > { %v5761_v13 = vsel %vm1442_vm0, %v5266_v42, %v1409_v60 }
 0x121   : > { %2036 = vmatmul.mubr.bf16.gmra.mxu1 %v5731_v1 }
 0x122   : > { %1908 = vmatmul.mubr.bf16.gmra.mxu0 %v5734_v34  ;;  %4114 = vmatprep.mubr.msk.bf16.mxu1 %vm1442_vm0, %v5738_v25 }
 0x123   : > { %4098 = vmatprep.mubr.msk.bf16.mxu0 %vm1442_vm0, %v5742_v24 }
 0x129   : > { %2044 = vmatmul.mubr.bf16.gmra.mxu1 %v5757_v57 }
 0x12a   : > { %1916 = vmatmul.mubr.bf16.gmra.mxu0 %v5761_v13  ;;  %4155 = vmatprep.mubr.msk.bf16.mxu1 %vm1442_vm0, %v4917_v26  ;;  %v5786_v26 = vld [vmem:[%s5279_s8 + $0x18] sm:$0xff]   ;;  %s4038_s8 = sshll.u32 %s4658_s25, 6 }
 0x12b   : > { %4227 = vmatprep.mubr.msk.bf16.mxu0 %vm1442_vm0, %v4987_v32  ;;  %2936 = vrot.lane.b32.xlu1 %v5786_v26, %s4488_s16  ;;  %s6119_s18 = scalar_lea.vmem [#allocation6], %s4038_s8 }
 0x131   : > { %2414 = vmatmul.mubr.bf16.vlgmr.msra.gmra.mxu1 %v5370_v15 }
 0x132   : > { %3096 = vmatmul.mubr.bf16.vlgmr.msra.gmra.mxu0 %v5452_v2  ;;  %4156 = vmatprep.mubr.msk.bf16.mxu1 %vm1442_vm0, %v5381_v33 }
 0x133   : > { %4228 = vmatprep.mubr.msk.bf16.mxu0 %vm1442_vm0, %v5463_v8 }
 0x139   : > { %2422 = vmatmul.mubr.bf16.gmra.mxu1 %v5408_v47 }
 0x13a   : > { %3104 = vmatmul.mubr.bf16.gmra.mxu0 %v5490_v9  ;;  %4157 = vmatprep.mubr.msk.bf16.mxu1 %vm1442_vm0, %v4987_v32 }
 0x13b   : > { %4229 = vmatprep.mubr.msk.bf16.mxu0 %vm1442_vm0, %v6475_v50 }
 0x141   : > { %2430 = vmatmul.mubr.bf16.gmra.mxu1 %v5452_v2 }
 0x142   : > { %3112 = vmatmul.mubr.bf16.gmra.mxu0 %v5534_v31  ;;  %4158 = vmatprep.mubr.msk.bf16.mxu1 %vm1442_vm0, %v5463_v8 }
 0x143   : > { %4230 = vmatprep.mubr.msk.bf16.mxu0 %vm1442_vm0, %v5542_v53 }
 0x149   : > { %2438 = vmatmul.mubr.bf16.gmra.mxu1 %v5490_v9 }
 0x14a   : > { %3120 = vmatmul.mubr.bf16.gmra.mxu0 %v5556_v55  ;;  %4159 = vmatprep.mubr.msk.bf16.mxu1 %vm1442_vm0, %v6475_v50 }
 0x14b   : > { %4231 = vmatprep.mubr.msk.bf16.mxu0 %vm1442_vm0, %v6486_v62 }
 0x151   : > { %2446 = vmatmul.mubr.bf16.gmra.mxu1 %v5534_v31 }
 0x152   : > { %3128 = vmatmul.mubr.bf16.gmra.mxu0 %v5584_v20  ;;  %4160 = vmatprep.mubr.msk.bf16.mxu1 %vm1442_vm0, %v5542_v53 }
 0x153   : > { %4232 = vmatprep.mubr.msk.bf16.mxu0 %vm1442_vm0, %v5592_v7 }
 0x159   : > { %2454 = vmatmul.mubr.bf16.gmra.mxu1 %v5556_v55  ;;  %v6525_v55 = vld [vmem:[#allocation42_spill] sm:$0xff] }
 0x15a   : > { %3136 = vmatmul.mubr.bf16.gmra.mxu0 %v5606_v59  ;;  %4161 = vmatprep.mubr.msk.bf16.mxu1 %vm1442_vm0, %v6486_v62  ;;  %v2204_v62 = vshll.u32 %v6525_v55, 16 }
 0x15b   : > { %4233 = vmatprep.mubr.msk.bf16.mxu0 %vm1442_vm0, %v6501_v30 }
 0x161   : > { %2462 = vmatmul.mubr.bf16.gmra.mxu1 %v5584_v20 }
 0x162   : > { %3144 = vmatmul.mubr.bf16.gmra.mxu0 %v5634_v51  ;;  %4162 = vmatprep.mubr.msk.bf16.mxu1 %vm1442_vm0, %v5592_v7 }
 0x163   : > { %4234 = vmatprep.mubr.msk.bf16.mxu0 %vm1442_vm0, %v5642_v23 }
 0x169   : > { %2470 = vmatmul.mubr.bf16.gmra.mxu1 %v5606_v59  ;;  %v2201_v59 = vshrl.u32 %v6525_v55, 16 }
 0x16a   : > { %3152 = vmatmul.mubr.bf16.gmra.mxu0 %v5656_v54  ;;  %4163 = vmatprep.mubr.msk.bf16.mxu1 %vm1442_vm0, %v6501_v30  ;;  %v6526_v30 = vld [vmem:[#allocation46_spill] sm:$0xff] }
 0x16b   : > { %4235 = vmatprep.mubr.msk.bf16.mxu0 %vm1442_vm0, %v6509_v35  ;;  %v2203_v3 = vrot.slane %v2201_v59, 7 }
 0x171   : > { %v1925_v32 = vpop.f32.mrf.mxu1  ;;  %2478 = vmatmul.mubr.bf16.gmra.mxu1 %v5634_v51  ;;  %v1797_v42 = vpop.f32.mrf.mxu0 }
 0x172   : > { %2084 = vst.msk [vmem:[#allocation2 + $0x100] sm:$0xff] %vm1442_vm0, %v1925_v32  ;;  %3160 = vmatmul.mubr.bf16.gmra.mxu0 %v5684_v49  ;;  %4164 = vmatprep.mubr.msk.bf16.mxu1 %vm1442_vm0, %v5642_v23  ;;  %2052 = vst.msk [vmem:[#allocation2] sm:$0xff] %vm1442_vm0, %v1797_v42  ;;  %v2211_v23 = vshll.u32 %v6526_v30, 16  ;;  %v2208_v42 = vshrl.u32 %v6526_v30, 16 }
 0x173   : > { %v1927_v16 = vpop.f32.mrf.mxu1  ;;  %4236 = vmatprep.mubr.msk.bf16.mxu0 %vm1442_vm0, %v5692_v48  ;;  %v1799_v15 = vpop.f32.mrf.mxu0 }
 0x174   : > { %v2236_v0 = vrot.slane %v2211_v23, 1  ;;  %v2206_v16 = vor.u32 %v2204_v62, %v2203_v3 }
 0x175   : > { %v1928_v33 = vpop.f32.mrf.mxu1  ;;  %v1800_v47 = vpop.f32.mrf.mxu0 }
 0x176   : > { %2085 = vst.msk [vmem:[#allocation2 + $0x108] sm:$0xff] %vm1442_vm0, %v1928_v33  ;;  %2053 = vst.msk [vmem:[#allocation2 + $0x8] sm:$0xff] %vm1442_vm0, %v1800_v47 }
 0x177   : > { %v1930_v2 = vpop.f32.mrf.mxu1  ;;  %v1802_v8 = vpop.f32.mrf.mxu0 }
 0x179   : > { %v1933_v9 = vpop.f32.mrf.mxu1  ;;  %2486 = vmatmul.mubr.bf16.gmra.mxu1 %v5656_v54 }
 0x17a   : > { %v1805_v50 = vpop.f32.mrf.mxu0  ;;  %2086 = vst.msk [vmem:[#allocation2 + $0x110] sm:$0xff] %vm1442_vm0, %v1933_v9  ;;  %3168 = vmatmul.mubr.bf16.gmra.mxu0 %v5706_v37  ;;  %4165 = vmatprep.mubr.msk.bf16.mxu1 %vm1442_vm0, %v6509_v35  ;;  %v2234_v35 = vrot.slane %v2204_v62, 1  ;;  %v2232_v9 = vsel %vm5273_vm4, 0, %v2206_v16 }
 0x17b   : > { %2054 = vst.msk [vmem:[#allocation2 + $0x10] sm:$0xff] %vm1442_vm0, %v1805_v50  ;;  %v1935_v31 = vpop.f32.mrf.mxu1  ;;  %4237 = vmatprep.mubr.msk.bf16.mxu0 %vm1442_vm0, %v5243_v21  ;;  %v2249_v50 = vpop.permute.xlu0 %2248 }
 0x17c   : > { %v1807_v53 = vpop.f32.mrf.mxu0  ;;  %v2235_v43 = vor.u32 %v2234_v35, %v2201_v59  ;;  %v2210_v31 = vrot.slane %v2208_v42, 7  ;;  %v6528_v59 = vld [vmem:[#allocation48_spill] sm:$0xff] }
 0x17d   : > { %v1936_v51 = vpop.f32.mrf.mxu1  ;;  %v6527_v53 = vld [vmem:[#allocation47_spill] sm:$0xff]  ;;  %v2893_v30 = vshll.u32 %v6528_v59, 16 }
 0x17e   : > { %v1808_v20 = vpop.f32.mrf.mxu0  ;;  %2087 = vst.msk [vmem:[#allocation2 + $0x118] sm:$0xff] %vm1442_vm0, %v1936_v51  ;;  %v2237_v15 = vsel %vm1263_vm1, %v2235_v43, %v2236_v0  ;;  %v2886_v55 = vshll.u32 %v6527_v53, 16  ;;  %v2213_v35 = vor.u32 %v2211_v23, %v2210_v31 }
 0x17f   : > { %2055 = vst.msk [vmem:[#allocation2 + $0x18] sm:$0xff] %vm1442_vm0, %v1808_v20  ;;  %v1938_v7 = vpop.f32.mrf.mxu1 }
 0x180   : > { %v1810_v54 = vpop.f32.mrf.mxu0  ;;  %v2258_v7 = vsel %vm1442_vm0, %v2232_v9, %v2249_v50 }
 0x181   : > { %v1941_v63 = vpop.f32.mrf.mxu1  ;;  %2494 = vmatmul.mubr.bf16.gmra.mxu1 %v5684_v49 }
 0x182   : > { %v1813_v12 = vpop.f32.mrf.mxu0  ;;  %2088 = vst.msk [vmem:[#allocation2 + $0x120] sm:$0xff] %vm1442_vm0, %v1941_v63  ;;  %3176 = vmatmul.mubr.bf16.gmra.mxu0 %v5734_v34  ;;  %4166 = vmatprep.mubr.msk.bf16.mxu1 %vm1442_vm0, %v5692_v48 }
 0x183   : > { %2056 = vst.msk [vmem:[#allocation2 + $0x20] sm:$0xff] %vm1442_vm0, %v1813_v12  ;;  %v1943_v41 = vpop.f32.mrf.mxu1  ;;  %4238 = vmatprep.mubr.msk.bf16.mxu0 %vm1442_vm0, %v5742_v24  ;;  %v2916_v12 = vrot.slane %v2886_v55, 1 }
 0x184   : > { %v1815_v46 = vpop.f32.mrf.mxu0 }
 0x185   : > { %v1944_v60 = vpop.f32.mrf.mxu1 }
 0x186   : > { %v1816_v49 = vpop.f32.mrf.mxu0  ;;  %2089 = vst.msk [vmem:[#allocation2 + $0x128] sm:$0xff] %vm1442_vm0, %v1944_v60  ;;  %v2251_v60 = vpop.permute.xlu1 %2250 }
 0x187   : > { %2057 = vst.msk [vmem:[#allocation2 + $0x28] sm:$0xff] %vm1442_vm0, %v1816_v49  ;;  %v1946_v32 = vpop.f32.mrf.mxu1 }
 0x188   : > { %v1818_v48 = vpop.f32.mrf.mxu0 }
 0x189   : > { %v1949_v33 = vpop.f32.mrf.mxu1  ;;  %2502 = vmatmul.mubr.bf16.gmra.mxu1 %v5706_v37  ;;  %v2238_v37 = vor.u32 %v2236_v0, %v2208_v42  ;;  %v2214_v0 = vsel %vm988_vm2, %v2203_v3, %v2213_v35  ;;  %v2918_v42 = vrot.slane %v2893_v30, 1 }
 0x18a   : > { %v1821_v47 = vpop.f32.mrf.mxu0  ;;  %2090 = vst.msk [vmem:[#allocation2 + $0x130] sm:$0xff] %vm1442_vm0, %v1949_v33  ;;  %3184 = vmatmul.mubr.bf16.gmra.mxu0 %v5761_v13  ;;  %4167 = vmatprep.mubr.msk.bf16.mxu1 %vm1442_vm0, %v5243_v21  ;;  %v2883_v21 = vshrl.u32 %v6527_v53, 16  ;;  %v2890_v33 = vshrl.u32 %v6528_v59, 16  ;;  %v2931_v53 = vpop.permute.xlu0 %2930 }
 0x18b   : > { %2058 = vst.msk [vmem:[#allocation2 + $0x30] sm:$0xff] %vm1442_vm0, %v1821_v47  ;;  %v1951_v2 = vpop.f32.mrf.mxu1  ;;  %4239 = vmatprep.mubr.msk.bf16.mxu0 %vm1442_vm0, %v2237_v15  ;;  %v2246_v63 = vsel %vm5288_vm6, %v2238_v37, 0 }
 0x18c   : > { %v1823_v8 = vpop.f32.mrf.mxu0  ;;  %v2885_v49 = vrot.slane %v2883_v21, 7  ;;  %v2917_v32 = vor.u32 %v2916_v12, %v2883_v21 }
 0x18d   : > { %v1952_v62 = vpop.f32.mrf.mxu1 }
 0x18e   : > { %v1824_v51 = vpop.f32.mrf.mxu0  ;;  %2091 = vst.msk [vmem:[#allocation2 + $0x138] sm:$0xff] %vm1442_vm0, %v1952_v62  ;;  %v2888_v2 = vor.u32 %v2886_v55, %v2885_v49  ;;  %v2919_v8 = vsel %vm1263_vm1, %v2917_v32, %v2918_v42  ;;  %v2892_v55 = vrot.slane %v2890_v33, 7  ;;  %v2920_v62 = vor.u32 %v2918_v42, %v2890_v33 }
 0x18f   : > { %2059 = vst.msk [vmem:[#allocation2 + $0x38] sm:$0xff] %vm1442_vm0, %v1824_v51  ;;  %v1954_v20 = vpop.f32.mrf.mxu1 }
 0x190   : > { %v1826_v54 = vpop.f32.mrf.mxu0  ;;  %v2914_v37 = vsel %vm5273_vm4, 0, %v2888_v2  ;;  %v2895_v59 = vor.u32 %v2893_v30, %v2892_v55  ;;  %v2933_v30 = vpop.permute.xlu1 %2932 }
 0x191   : > { %v1957_v41 = vpop.f32.mrf.mxu1  ;;  %2510 = vmatmul.mubr.bf16.gmra.mxu1 %v5734_v34  ;;  %v2928_v54 = vsel %vm5288_vm6, %v2920_v62, 0 }
 0x192   : > { %v1829_v46 = vpop.f32.mrf.mxu0  ;;  %2092 = vst.msk [vmem:[#allocation2 + $0x140] sm:$0xff] %vm1442_vm0, %v1957_v41  ;;  %3192 = vmatmul.mubr.bf16.gmra.mxu0 %v2258_v7  ;;  %4168 = vmatprep.mubr.msk.bf16.mxu1 %vm1442_vm0, %v5742_v24  ;;  %v2262_v24 = vsel %vm1442_vm0, %v2214_v0, %v2251_v60 }
 0x193   : > { %2060 = vst.msk [vmem:[#allocation2 + $0x40] sm:$0xff] %vm1442_vm0, %v1829_v46  ;;  %v1959_v43 = vpop.f32.mrf.mxu1  ;;  %4240 = vmatprep.mubr.msk.bf16.mxu0 %vm1442_vm0, %v2246_v63 }
 0x194   : > { %v1831_v23 = vpop.f32.mrf.mxu0  ;;  %v2896_v43 = vsel %vm988_vm2, %v2885_v49, %v2895_v59 }
 0x195   : > { %v1960_v34 = vpop.f32.mrf.mxu1  ;;  %v2944_v60 = vsel %vm1442_vm0, %v2896_v43, %v2933_v30 }
 0x196   : > { %v1832_v48 = vpop.f32.mrf.mxu0  ;;  %2093 = vst.msk [vmem:[#allocation2 + $0x148] sm:$0xff] %vm1442_vm0, %v1960_v34 }
 0x197   : > { %2061 = vst.msk [vmem:[#allocation2 + $0x48] sm:$0xff] %vm1442_vm0, %v1832_v48  ;;  %v1962_v16 = vpop.f32.mrf.mxu1 }
 0x198   : > { %v1834_v47 = vpop.f32.mrf.mxu0 }
 0x199   : > { %v1965_v3 = vpop.f32.mrf.mxu1  ;;  %2518 = vmatmul.mubr.bf16.gmra.mxu1 %v5761_v13 }
 0x19a   : > { %v1837_v9 = vpop.f32.mrf.mxu0  ;;  %2094 = vst.msk [vmem:[#allocation2 + $0x150] sm:$0xff] %vm1442_vm0, %v1965_v3  ;;  %3200 = vmatmul.mubr.bf16.gmra.mxu0 %v2262_v24  ;;  %4169 = vmatprep.mubr.msk.bf16.mxu1 %vm1442_vm0, %v2237_v15  ;;  %v2940_v15 = vsel %vm1442_vm0, %v2914_v37, %v2931_v53  ;;  %v6529_v53 = vld [vmem:[#allocation24_spill] sm:$0xff] }
 0x19b   : > { %2062 = vst.msk [vmem:[#allocation2 + $0x50] sm:$0xff] %vm1442_vm0, %v1837_v9  ;;  %v1967_v50 = vpop.f32.mrf.mxu1  ;;  %4241 = vmatprep.mubr.msk.bf16.mxu0 %vm1442_vm0, %v2919_v8 }
 0x19c   : > { %v1839_v31 = vpop.f32.mrf.mxu0 }
 0x19d   : > { %v1968_v51 = vpop.f32.mrf.mxu1 }
 0x19e   : > { %v1840_v13 = vpop.f32.mrf.mxu0  ;;  %2095 = vst.msk [vmem:[#allocation2 + $0x158] sm:$0xff] %vm1442_vm0, %v1968_v51 }
 0x19f   : > { %2063 = vst.msk [vmem:[#allocation2 + $0x58] sm:$0xff] %vm1442_vm0, %v1840_v13  ;;  %v1970_v21 = vpop.f32.mrf.mxu1 }
 0x1a0   : > { %v1842_v20 = vpop.f32.mrf.mxu0 }
 0x1a1   : > { %v1973_v35 = vpop.f32.mrf.mxu1  ;;  %2526 = vmatmul.mubr.bf16.gmra.mxu1 %v2258_v7 }
 0x1a2   : > { %2096 = vst.msk [vmem:[#allocation2 + $0x160] sm:$0xff] %vm1442_vm0, %v1973_v35  ;;  %v1845_v12 = vpop.f32.mrf.mxu0  ;;  %3208 = vmatmul.mubr.bf16.gmra.mxu0 %v2940_v15  ;;  %4170 = vmatprep.mubr.msk.bf16.mxu1 %vm1442_vm0, %v2246_v63 }
 0x1a3   : > { %2064 = vst.msk [vmem:[#allocation2 + $0x60] sm:$0xff] %vm1442_vm0, %v1845_v12  ;;  %v1975_v41 = vpop.f32.mrf.mxu1  ;;  %4242 = vmatprep.mubr.msk.bf16.mxu0 %vm1442_vm0, %v2928_v54 }
 0x1a4   : > { %v1847_v46 = vpop.f32.mrf.mxu0 }
 0x1a5   : > { %v1976_v23 = vpop.f32.mrf.mxu1 }
 0x1a6   : > { %v1848_v0 = vpop.f32.mrf.mxu0  ;;  %2097 = vst.msk [vmem:[#allocation2 + $0x168] sm:$0xff] %vm1442_vm0, %v1976_v23 }
 0x1a7   : > { %2065 = vst.msk [vmem:[#allocation2 + $0x68] sm:$0xff] %vm1442_vm0, %v1848_v0  ;;  %v1978_v7 = vpop.f32.mrf.mxu1 }
 0x1a8   : > { %v1850_v32 = vpop.f32.mrf.mxu0 }
 0x1a9   : > { %v1981_v63 = vpop.f32.mrf.mxu1  ;;  %2534 = vmatmul.mubr.bf16.gmra.mxu1 %v2262_v24 }
 0x1aa   : > { %2098 = vst.msk [vmem:[#allocation2 + $0x170] sm:$0xff] %vm1442_vm0, %v1981_v63  ;;  %v1853_v42 = vpop.f32.mrf.mxu0  ;;  %3216 = vmatmul.mubr.bf16.gmra.mxu0 %v2944_v60  ;;  %4171 = vmatprep.mubr.msk.bf16.mxu1 %vm1442_vm0, %v4946_v61  ;;  %v6530_v60 = vld [vmem:[#allocation17_spill] sm:$0xff]  ;;  %v6531_v63 = vld [vmem:[#allocation7_spill] sm:$0xff] }
 0x1ab   : > { %2066 = vst.msk [vmem:[#allocation2 + $0x70] sm:$0xff] %vm1442_vm0, %v1853_v42  ;;  %v1983_v49 = vpop.f32.mrf.mxu1  ;;  %4243 = vmatprep.mubr.msk.bf16.mxu0 %vm1442_vm0, %v5019_v17 }
 0x1ac   : > { %v1855_v34 = vpop.f32.mrf.mxu0 }
 0x1ad   : > { %v1984_v48 = vpop.f32.mrf.mxu1 }
 0x1ae   : > { %v1856_v16 = vpop.f32.mrf.mxu0  ;;  %2099 = vst.msk [vmem:[#allocation2 + $0x178] sm:$0xff] %vm1442_vm0, %v1984_v48 }
 0x1af   : > { %2067 = vst.msk [vmem:[#allocation2 + $0x78] sm:$0xff] %vm1442_vm0, %v1856_v16  ;;  %v1986_v24 = vpop.f32.mrf.mxu1 }
 0x1b0   : > { %v1858_v33 = vpop.f32.mrf.mxu0 }
 0x1b1   : > { %v1989_v47 = vpop.f32.mrf.mxu1  ;;  %2542 = vmatmul.mubr.bf16.gmra.mxu1 %v5367_v19 }
 0x1b2   : > { %2100 = vst.msk [vmem:[#allocation2 + $0x180] sm:$0xff] %vm1442_vm0, %v1989_v47  ;;  %v1861_v61 = vpop.f32.mrf.mxu0  ;;  %3224 = vmatmul.mubr.bf16.gmra.mxu0 %v5449_v27  ;;  %4172 = vmatprep.mubr.msk.bf16.mxu1 %vm1442_vm0, %v5374_v52  ;;  %v6533_v47 = vld [vmem:[#allocation36_spill] sm:$0xff] }
 0x1b3   : > { %2068 = vst.msk [vmem:[#allocation2 + $0x80] sm:$0xff] %vm1442_vm0, %v1861_v61  ;;  %v1991_v2 = vpop.f32.mrf.mxu1  ;;  %4244 = vmatprep.mubr.msk.bf16.mxu0 %vm1442_vm0, %v5456_v14 }
 0x1b4   : > { %v1863_v8 = vpop.f32.mrf.mxu0 }
 0x1b5   : > { %v1992_v3 = vpop.f32.mrf.mxu1 }
 0x1b6   : > { %v1864_v9 = vpop.f32.mrf.mxu0  ;;  %2101 = vst.msk [vmem:[#allocation2 + $0x188] sm:$0xff] %vm1442_vm0, %v1992_v3 }
 0x1b7   : > { %2069 = vst.msk [vmem:[#allocation2 + $0x88] sm:$0xff] %vm1442_vm0, %v1864_v9  ;;  %v1994_v19 = vpop.f32.mrf.mxu1 }
 0x1b8   : > { %v1866_v50 = vpop.f32.mrf.mxu0 }
 0x1b9   : > { %v1997_v31 = vpop.f32.mrf.mxu1  ;;  %2550 = vmatmul.mubr.bf16.gmra.mxu1 %v5404_v45 }
 0x1ba   : > { %2102 = vst.msk [vmem:[#allocation2 + $0x190] sm:$0xff] %vm1442_vm0, %v1997_v31  ;;  %v1869_v52 = vpop.f32.mrf.mxu0  ;;  %3232 = vmatmul.mubr.bf16.gmra.mxu0 %v5486_v18  ;;  %4173 = vmatprep.mubr.msk.bf16.mxu1 %vm1442_vm0, %v5019_v17 }
 0x1bb   : > { %2070 = vst.msk [vmem:[#allocation2 + $0x90] sm:$0xff] %vm1442_vm0, %v1869_v52  ;;  %v1999_v37 = vpop.f32.mrf.mxu1  ;;  %4245 = vmatprep.mubr.msk.bf16.mxu0 %vm1442_vm0, %v6529_v53 }
 0x1bc   : > { %v1871_v55 = vpop.f32.mrf.mxu0 }
 0x1bd   : > { %v2000_v62 = vpop.f32.mrf.mxu1 }
 0x1be   : > { %v1872_v51 = vpop.f32.mrf.mxu0  ;;  %2103 = vst.msk [vmem:[#allocation2 + $0x198] sm:$0xff] %vm1442_vm0, %v2000_v62 }
 0x1bf   : > { %2071 = vst.msk [vmem:[#allocation2 + $0x98] sm:$0xff] %vm1442_vm0, %v1872_v51  ;;  %v2002_v45 = vpop.f32.mrf.mxu1 }
 0x1c0   : > { %v1874_v13 = vpop.f32.mrf.mxu0 }
 0x1c1   : > { %v2005_v21 = vpop.f32.mrf.mxu1  ;;  %2558 = vmatmul.mubr.bf16.gmra.mxu1 %v5449_v27 }
 0x1c2   : > { %v1877_v15 = vpop.f32.mrf.mxu0  ;;  %2104 = vst.msk [vmem:[#allocation2 + $0x1a0] sm:$0xff] %vm1442_vm0, %v2005_v21  ;;  %3240 = vmatmul.mubr.bf16.gmra.mxu0 %v5531_v58  ;;  %4174 = vmatprep.mubr.msk.bf16.mxu1 %vm1442_vm0, %v5456_v14 }
 0x1c3   : > { %2072 = vst.msk [vmem:[#allocation2 + $0xa0] sm:$0xff] %vm1442_vm0, %v1877_v15  ;;  %v2007_v17 = vpop.f32.mrf.mxu1  ;;  %4246 = vmatprep.mubr.msk.bf16.mxu0 %vm1442_vm0, %v5538_v40 }
 0x1c4   : > { %v1879_v20 = vpop.f32.mrf.mxu0 }
 0x1c5   : > { %v2008_v59 = vpop.f32.mrf.mxu1  ;;  %v2116_v20 = vld [vmem:[#allocation2] sm:$0xff] }
 0x1c6   : > { %v1880_v54 = vpop.f32.mrf.mxu0  ;;  %2105 = vst.msk [vmem:[#allocation2 + $0x1a8] sm:$0xff] %vm1442_vm0, %v2008_v59 }
 0x1c7   : > { %2073 = vst.msk [vmem:[#allocation2 + $0xa8] sm:$0xff] %vm1442_vm0, %v1880_v54  ;;  %v2010_v27 = vpop.f32.mrf.mxu1 }
 0x1c8   : > { %v1882_v35 = vpop.f32.mrf.mxu0 }
 0x1c9   : > { %v2013_v12 = vpop.f32.mrf.mxu1  ;;  %2566 = vmatmul.mubr.bf16.gmra.mxu1 %v5486_v18 }
 0x1ca   : > { %v1885_v41 = vpop.f32.mrf.mxu0  ;;  %2106 = vst.msk [vmem:[#allocation2 + $0x1b0] sm:$0xff] %vm1442_vm0, %v2013_v12  ;;  %3248 = vmatmul.mubr.bf16.gmra.mxu0 %v5552_v36  ;;  %4175 = vmatprep.mubr.msk.bf16.mxu1 %vm1442_vm0, %v6529_v53 }
 0x1cb   : > { %2074 = vst.msk [vmem:[#allocation2 + $0xb0] sm:$0xff] %vm1442_vm0, %v1885_v41  ;;  %v2015_v14 = vpop.f32.mrf.mxu1  ;;  %4247 = vmatprep.mubr.msk.bf16.mxu0 %vm1442_vm0, %v5133_v5  ;;  %v2117_v41 = vld [vmem:[#allocation2 + $0x8] sm:$0xff] }
 0x1cc   : > { %v1887_v46 = vpop.f32.mrf.mxu0 }
 0x1cd   : > { %v2016_v43 = vpop.f32.mrf.mxu1 }
 0x1ce   : > { %v1888_v30 = vpop.f32.mrf.mxu0  ;;  %2107 = vst.msk [vmem:[#allocation2 + $0x1b8] sm:$0xff] %vm1442_vm0, %v2016_v43 }
 0x1cf   : > { %2075 = vst.msk [vmem:[#allocation2 + $0xb8] sm:$0xff] %vm1442_vm0, %v1888_v30  ;;  %v2018_v18 = vpop.f32.mrf.mxu1 }
 0x1d0   : > { %v1890_v23 = vpop.f32.mrf.mxu0  ;;  %v2118_v18 = vld [vmem:[#allocation2 + $0x10] sm:$0xff] }
 0x1d1   : > { %v2021_v0 = vpop.f32.mrf.mxu1  ;;  %2574 = vmatmul.mubr.bf16.gmra.mxu1 %v5531_v58 }
 0x1d2   : > { %v1893_v7 = vpop.f32.mrf.mxu0  ;;  %2108 = vst.msk [vmem:[#allocation2 + $0x1c0] sm:$0xff] %vm1442_vm0, %v2021_v0  ;;  %3256 = vmatmul.mubr.bf16.gmra.mxu0 %v6530_v60  ;;  %4176 = vmatprep.mubr.msk.bf16.mxu1 %vm1442_vm0, %v5538_v40  ;;  %v6532_v40 = vld [vmem:[#allocation16_spill] sm:$0xff] }
 0x1d3   : > { %2076 = vst.msk [vmem:[#allocation2 + $0xc0] sm:$0xff] %vm1442_vm0, %v1893_v7  ;;  %v2023_v32 = vpop.f32.mrf.mxu1  ;;  %4248 = vmatprep.mubr.msk.bf16.mxu0 %vm1442_vm0, %v6531_v63  ;;  %v6534_v7 = vld [vmem:[#allocation23_spill] sm:$0xff] }
 0x1d4   : > { %v1895_v42 = vpop.f32.mrf.mxu0 }
 0x1d5   : > { %v2024_v49 = vpop.f32.mrf.mxu1 }
 0x1d6   : > { %v1896_v34 = vpop.f32.mrf.mxu0  ;;  %2109 = vst.msk [vmem:[#allocation2 + $0x1c8] sm:$0xff] %vm1442_vm0, %v2024_v49 }
 0x1d7   : > { %2077 = vst.msk [vmem:[#allocation2 + $0xc8] sm:$0xff] %vm1442_vm0, %v1896_v34  ;;  %v2026_v58 = vpop.f32.mrf.mxu1  ;;  %v2219_v34 = vshll.u32 %v5745_v38, 16 }
 0x1d8   : > { %v1898_v48 = vpop.f32.mrf.mxu0  ;;  %v2119_v58 = vld [vmem:[#allocation2 + $0x18] sm:$0xff] }
 0x1d9   : > { %v2029_v16 = vpop.f32.mrf.mxu1  ;;  %2582 = vmatmul.mubr.bf16.gmra.mxu1 %v5552_v36 }
 0x1da   : > { %v1901_v24 = vpop.f32.mrf.mxu0  ;;  %2110 = vst.msk [vmem:[#allocation2 + $0x1d0] sm:$0xff] %vm1442_vm0, %v2029_v16  ;;  %3264 = vmatmul.mubr.bf16.gmra.mxu0 %v6532_v40  ;;  %4177 = vmatprep.mubr.msk.bf16.mxu1 %vm1442_vm0, %v5133_v5 }
 0x1db   : > { %2078 = vst.msk [vmem:[#allocation2 + $0xd0] sm:$0xff] %vm1442_vm0, %v1901_v24  ;;  %v2031_v33 = vpop.f32.mrf.mxu1  ;;  %4249 = vmatprep.mubr.msk.bf16.mxu0 %vm1442_vm0, %v6533_v47  ;;  %v2216_v24 = vshrl.u32 %v5745_v38, 16 }
 0x1dc   : > { %v1903_v61 = vpop.f32.mrf.mxu0  ;;  %v2226_v33 = vshll.u32 %v5764_v56, 16 }
 0x1dd   : > { %v2032_v2 = vpop.f32.mrf.mxu1 }
 0x1de   : > { %v1904_v8 = vpop.f32.mrf.mxu0  ;;  %2111 = vst.msk [vmem:[#allocation2 + $0x1d8] sm:$0xff] %vm1442_vm0, %v2032_v2  ;;  %v2239_v2 = vrot.slane %v2219_v34, 1 }
 0x1df   : > { %2079 = vst.msk [vmem:[#allocation2 + $0xd8] sm:$0xff] %vm1442_vm0, %v1904_v8  ;;  %v2034_v36 = vpop.f32.mrf.mxu1  ;;  %v2120_v8 = vld [vmem:[#allocation2 + $0x20] sm:$0xff] }
 0x1e0   : > { %v1906_v3 = vpop.f32.mrf.mxu0 }
 0x1e1   : > { %v2037_v9 = vpop.f32.mrf.mxu1  ;;  %2590 = vmatmul.mubr.bf16.gmra.mxu1 %v6530_v60 }
 0x1e2   : > { %v1909_v19 = vpop.f32.mrf.mxu0  ;;  %2112 = vst.msk [vmem:[#allocation2 + $0x1e0] sm:$0xff] %vm1442_vm0, %v2037_v9  ;;  %3272 = vmatmul.mubr.bf16.gmra.mxu0 %v5631_v22  ;;  %4178 = vmatprep.mubr.msk.bf16.mxu1 %vm1442_vm0, %v6531_v63  ;;  %v6535_v63 = vld [vmem:[#allocation45_spill] sm:$0xff] }
 0x1e3   : > { %2080 = vst.msk [vmem:[#allocation2 + $0xe0] sm:$0xff] %vm1442_vm0, %v1909_v19  ;;  %v2039_v5 = vpop.f32.mrf.mxu1  ;;  %4250 = vmatprep.mubr.msk.bf16.mxu0 %vm1442_vm0, %v5638_v11 }
 0x1e4   : > { %v1911_v50 = vpop.f32.mrf.mxu0  ;;  %v6031_v5 = vrot.slane %v2216_v24, 7 }
 0x1e5   : > { %v2040_v31 = vpop.f32.mrf.mxu1 }
 0x1e6   : > { %v1912_v52 = vpop.f32.mrf.mxu0  ;;  %2113 = vst.msk [vmem:[#allocation2 + $0x1e8] sm:$0xff] %vm1442_vm0, %v2040_v31  ;;  %v2240_v31 = vor.u32 %v2239_v2, %v2216_v24 }
 0x1e7   : > { %2081 = vst.msk [vmem:[#allocation2 + $0xe8] sm:$0xff] %vm1442_vm0, %v1912_v52  ;;  %v2042_v37 = vpop.f32.mrf.mxu1  ;;  %v2241_v52 = vrot.slane %v2226_v33, 1 }
 0x1e8   : > { %v1914_v53 = vpop.f32.mrf.mxu0  ;;  %v2121_v37 = vld [vmem:[#allocation2 + $0x28] sm:$0xff] }
 0x1e9   : > { %v2045_v55 = vpop.f32.mrf.mxu1  ;;  %2598 = vmatmul.mubr.bf16.gmra.mxu1 %v6532_v40 }
 0x1ea   : > { %v1917_v62 = vpop.f32.mrf.mxu0  ;;  %2114 = vst.msk [vmem:[#allocation2 + $0x1f0] sm:$0xff] %vm1442_vm0, %v2045_v55  ;;  %3280 = vmatmul.mubr.bf16.gmra.mxu0 %v5652_v29  ;;  %4179 = vmatprep.mubr.msk.bf16.mxu1 %vm1442_vm0, %v6533_v47 }
 0x1eb   : > { %2082 = vst.msk [vmem:[#allocation2 + $0xf0] sm:$0xff] %vm1442_vm0, %v1917_v62  ;;  %v2047_v51 = vpop.f32.mrf.mxu1  ;;  %4251 = vmatprep.mubr.msk.bf16.mxu0 %vm1442_vm0, %v5202_v10 }
 0x1ec   : > { %v1919_v45 = vpop.f32.mrf.mxu0 }
 0x1ed   : > { %v2048_v13 = vpop.f32.mrf.mxu1  ;;  %v2221_v45 = vor.u32 %v2219_v34, %v6031_v5 }
 0x1ee   : > { %v1920_v21 = vpop.f32.mrf.mxu0  ;;  %2115 = vst.msk [vmem:[#allocation2 + $0x1f8] sm:$0xff] %vm1442_vm0, %v2048_v13  ;;  %v2223_v13 = vshrl.u32 %v5764_v56, 16 }
 0x1ef   : > { %2083 = vst.msk [vmem:[#allocation2 + $0xf8] sm:$0xff] %vm1442_vm0, %v1920_v21  ;;  %v2050_v15 = vpop.f32.mrf.mxu1 }
 0x1f0   : > { %v1922_v17 = vpop.f32.mrf.mxu0 }
 0x1f1   : > { %v2415_v59 = vpop.f32.mrf.mxu1  ;;  %2606 = vmatmul.mubr.bf16.gmra.mxu1 %v5631_v22  ;;  %v6041_v17 = vsel %vm1263_vm1, %v2240_v31, %v2241_v52 }
 0x1f2   : > { %v2670_v54 = vadd.f32 %v2415_v59, %v2116_v20  ;;  %v3097_v27 = vpop.f32.mrf.mxu0  ;;  %3288 = vmatmul.mubr.bf16.gmra.mxu0 %v5681_v4  ;;  %4180 = vmatprep.mubr.msk.bf16.mxu1 %vm1442_vm0, %v5638_v11  ;;  %v2122_v20 = vld [vmem:[#allocation2 + $0x30] sm:$0xff] }
 0x1f3   : > { %v2417_v35 = vpop.f32.mrf.mxu1  ;;  %4252 = vmatprep.mubr.msk.bf16.mxu0 %vm1442_vm0, %v5688_v44 }
 0x1f4   : > { %2734 = vst.msk [vmem:[#allocation2] sm:$0xff] %vm1442_vm0, %v2670_v54  ;;  %v3099_v12 = vpop.f32.mrf.mxu0 }
 0x1f5   : > { %v2418_v14 = vpop.f32.mrf.mxu1 }
 0x1f6   : > { %v2671_v46 = vadd.f32 %v2418_v14, %v2117_v41  ;;  %v3100_v43 = vpop.f32.mrf.mxu0  ;;  %v2233_v41 = vsel %vm5273_vm4, 0, %v2221_v45 }
 0x1f7   : > { %v2420_v30 = vpop.f32.mrf.mxu1 }
 0x1f8   : > { %2735 = vst.msk [vmem:[#allocation2 + $0x8] sm:$0xff] %vm1442_vm0, %v2671_v46  ;;  %v3102_v22 = vpop.f32.mrf.mxu0  ;;  %v2225_v30 = vrot.slane %v2223_v13, 7 }
 0x1f9   : > { %v2423_v23 = vpop.f32.mrf.mxu1  ;;  %2614 = vmatmul.mubr.bf16.gmra.mxu1 %v5652_v29  ;;  %v2243_v22 = vor.u32 %v2241_v52, %v2223_v13  ;;  %v2126_v13 = vld [vmem:[#allocation2 + $0x50] sm:$0xff] }
 0x1fa   : > { %v2672_v11 = vadd.f32 %v2423_v23, %v2118_v18  ;;  %v3105_v0 = vpop.f32.mrf.mxu0  ;;  %3296 = vmatmul.mubr.bf16.gmra.mxu0 %v6534_v7  ;;  %4181 = vmatprep.mubr.msk.bf16.mxu1 %vm1442_vm0, %v5202_v10  ;;  %v2901_v18 = vshll.u32 %v5775_v28, 16  ;;  %v2123_v23 = vld [vmem:[#allocation2 + $0x38] sm:$0xff] }
 0x1fb   : > { %v2798_v60 = vld [vmem:[#allocation2] sm:$0xff]  ;;  %v2425_v32 = vpop.f32.mrf.mxu1  ;;  %4253 = vmatprep.mubr.msk.bf16.mxu0 %vm1442_vm0, %v6535_v63 }
 0x1fc   : > { %v3352_v42 = vadd.f32 %v3097_v27, %v2798_v60  ;;  %2736 = vst.msk [vmem:[#allocation2 + $0x10] sm:$0xff] %vm1442_vm0, %v2672_v11  ;;  %v3107_v49 = vpop.f32.mrf.mxu0  ;;  %v2898_v60 = vshrl.u32 %v5775_v28, 16  ;;  %v2908_v32 = vshll.u32 %v5786_v26, 16  ;;  %v2124_v28 = vld [vmem:[#allocation2 + $0x40] sm:$0xff] }
 0x1fd   : > { %v2426_v29 = vpop.f32.mrf.mxu1 }
 0x1fe   : > { %3416 = vst.msk [vmem:[#allocation2] sm:$0xff] %vm1442_vm0, %v3352_v42  ;;  %v2673_v48 = vadd.f32 %v2426_v29, %v2119_v58  ;;  %v3108_v16 = vpop.f32.mrf.mxu0  ;;  %v2228_v29 = vor.u32 %v2226_v33, %v2225_v30 }
 0x1ff   : > { %v2799_v10 = vld [vmem:[#allocation2 + $0x8] sm:$0xff]  ;;  %v2428_v40 = vpop.f32.mrf.mxu1 }
 0x200   : > { %v3353_v47 = vadd.f32 %v3100_v43, %v2799_v10  ;;  %2737 = vst.msk [vmem:[#allocation2 + $0x18] sm:$0xff] %vm1442_vm0, %v2673_v48  ;;  %v3110_v61 = vpop.f32.mrf.mxu0  ;;  %v2253_v43 = vpop.permute.xlu0 %2252  ;;  %v6065_v48 = vsel %vm5288_vm6, %v2243_v22, 0  ;;  %v2229_v2 = vsel %vm988_vm2, %v6031_v5, %v2228_v29  ;;  %v2127_v22 = vld [vmem:[#allocation2 + $0x58] sm:$0xff] }
 0x201   : > { %v2431_v36 = vpop.f32.mrf.mxu1  ;;  %2622 = vmatmul.mubr.bf16.gmra.mxu1 %v5681_v4  ;;  %v6058_v49 = vsel %vm1442_vm0, %v2233_v41, %v2253_v43 }
 0x202   : > { %3417 = vst.msk [vmem:[#allocation2 + $0x8] sm:$0xff] %vm1442_vm0, %v3353_v47  ;;  %v2674_v3 = vadd.f32 %v2431_v36, %v2120_v8  ;;  %v3113_v9 = vpop.f32.mrf.mxu0  ;;  %3304 = vmatmul.mubr.bf16.gmra.mxu0 %v5731_v1  ;;  %4182 = vmatprep.mubr.msk.bf16.mxu1 %vm1442_vm0, %v5688_v44  ;;  %v6074_v47 = vrot.slane %v2898_v60, 7  ;;  %v2255_v8 = vpop.permute.xlu1 %2254 }
 0x203   : > { %v2800_v38 = vld [vmem:[#allocation2 + $0x10] sm:$0xff]  ;;  %v2433_v19 = vpop.f32.mrf.mxu1  ;;  %4254 = vmatprep.mubr.msk.bf16.mxu0 %vm1442_vm0, %v5738_v25 }
 0x204   : > { %v3354_v50 = vadd.f32 %v3105_v0, %v2800_v38  ;;  %2738 = vst.msk [vmem:[#allocation2 + $0x20] sm:$0xff] %vm1442_vm0, %v2674_v3  ;;  %v3115_v4 = vpop.f32.mrf.mxu0  ;;  %v2923_v3 = vrot.slane %v2908_v32, 1  ;;  %v2903_v5 = vor.u32 %v2901_v18, %v6074_v47  ;;  %v2935_v43 = vpop.permute.xlu0 %2934 }
 0x205   : > { %v2434_v53 = vpop.f32.mrf.mxu1 }
 0x206   : > { %3418 = vst.msk [vmem:[#allocation2 + $0x10] sm:$0xff] %vm1442_vm0, %v3354_v50  ;;  %v2675_v44 = vadd.f32 %v2434_v53, %v2121_v37  ;;  %v3116_v55 = vpop.f32.mrf.mxu0  ;;  %v6083_v37 = vsel %vm1442_vm0, %v2229_v2, %v2255_v8  ;;  %v2905_v53 = vshrl.u32 %v5786_v26, 16 }
 0x207   : > { %v2801_v62 = vld [vmem:[#allocation2 + $0x18] sm:$0xff]  ;;  %v2436_v51 = vpop.f32.mrf.mxu1 }
 0x208   : > { %v3355_v21 = vadd.f32 %v3108_v16, %v2801_v62  ;;  %2739 = vst.msk [vmem:[#allocation2 + $0x28] sm:$0xff] %vm1442_vm0, %v2675_v44  ;;  %v3118_v15 = vpop.f32.mrf.mxu0  ;;  %v2921_v16 = vrot.slane %v2901_v18, 1  ;;  %v2907_v30 = vrot.slane %v2905_v53, 7 }
 0x209   : > { %v2439_v59 = vpop.f32.mrf.mxu1  ;;  %2630 = vmatmul.mubr.bf16.gmra.mxu1 %v6534_v7  ;;  %v3480_v50 = vld [vmem:[#allocation2] ss:$2 sm:$0xff]  ;;  %v3544_v4 = vld [vmem:[#allocation2 + $0x1] ss:$2 sm:$0xff] }
 0x20a   : > { %3419 = vst.msk [vmem:[#allocation2 + $0x18] sm:$0xff] %vm1442_vm0, %v3355_v21  ;;  %v2676_v54 = vadd.f32 %v2439_v59, %v2122_v20  ;;  %v3121_v27 = vpop.f32.mrf.mxu0  ;;  %3312 = vmatmul.mubr.bf16.gmra.mxu0 %v5757_v57  ;;  %4183 = vmatprep.mubr.msk.bf16.mxu1 %vm1442_vm0, %v6535_v63  ;;  %v2922_v36 = vor.u32 %v2921_v16, %v2898_v60 }
 0x20b   : > { %v2802_v35 = vld [vmem:[#allocation2 + $0x20] sm:$0xff]  ;;  %v2441_v12 = vpop.f32.mrf.mxu1  ;;  %4255 = vmatprep.mubr.msk.bf16.mxu0 %vm1442_vm0, %v6041_v17  ;;  %v3607_v15 = vmax.f32 %v3480_v50, %v3544_v4  ;;  %v2910_v16 = vor.u32 %v2908_v32, %v2907_v30 }
 0x20c   : > { %v3356_v14 = vadd.f32 %v3113_v9, %v2802_v35  ;;  %2740 = vst.msk [vmem:[#allocation2 + $0x30] sm:$0xff] %vm1442_vm0, %v2676_v54  ;;  %v3123_v46 = vpop.f32.mrf.mxu0  ;;  %v2924_v62 = vsel %vm1263_vm1, %v2922_v36, %v2923_v3 }
 0x20d   : > { %v2442_v11 = vpop.f32.mrf.mxu1 }
 0x20e   : > { %3420 = vst.msk [vmem:[#allocation2 + $0x20] sm:$0xff] %vm1442_vm0, %v3356_v14  ;;  %v2677_v0 = vadd.f32 %v2442_v11, %v2123_v23  ;;  %v3124_v7 = vpop.f32.mrf.mxu0 }
 0x20f   : > { %v2803_v63 = vld [vmem:[#allocation2 + $0x28] sm:$0xff]  ;;  %v2444_v42 = vpop.f32.mrf.mxu1 }
 0x210   : > { %v3357_v34 = vadd.f32 %v3116_v55, %v2803_v63  ;;  %2741 = vst.msk [vmem:[#allocation2 + $0x38] sm:$0xff] %vm1442_vm0, %v2677_v0  ;;  %v3126_v58 = vpop.f32.mrf.mxu0 }
 0x211   : > { %v2447_v24 = vpop.f32.mrf.mxu1  ;;  %2638 = vmatmul.mubr.bf16.gmra.mxu1 %v5731_v1  ;;  %v3482_v23 = vld [vmem:[#allocation2 + $0x10] ss:$2 sm:$0xff]  ;;  %v3546_v11 = vld [vmem:[#allocation2 + $0x11] ss:$2 sm:$0xff] }
 0x212   : > { %3421 = vst.msk [vmem:[#allocation2 + $0x28] sm:$0xff] %vm1442_vm0, %v3357_v34  ;;  %v2678_v10 = vadd.f32 %v2447_v24, %v2124_v28  ;;  %v3129_v40 = vpop.f32.mrf.mxu0  ;;  %3320 = vmatmul.mubr.bf16.gmra.mxu0 %v6058_v49  ;;  %4184 = vmatprep.mubr.msk.bf16.mxu1 %vm1442_vm0, %v5738_v25  ;;  %v2125_v25 = vld [vmem:[#allocation2 + $0x48] sm:$0xff]  ;;  %v3608_v24 = vmax.f32 %v3482_v23, %v3546_v11 }
 0x213   : > { %v2804_v56 = vld [vmem:[#allocation2 + $0x30] sm:$0xff]  ;;  %v2449_v33 = vpop.f32.mrf.mxu1  ;;  %4256 = vmatprep.mubr.msk.bf16.mxu0 %vm1442_vm0, %v6065_v48 }
 0x214   : > { %v3358_v61 = vadd.f32 %v3121_v27, %v2804_v56  ;;  %2742 = vst.msk [vmem:[#allocation2 + $0x40] sm:$0xff] %vm1442_vm0, %v2678_v10  ;;  %v3131_v1 = vpop.f32.mrf.mxu0  ;;  %v6097_v27 = vld [vmem:[%s6316_s4] ss:$0 sm:$0xff] }
 0x215   : > { %v2450_v9 = vpop.f32.mrf.mxu1  ;;  %v2128_v56 = vld [vmem:[#allocation2 + $0x60] sm:$0xff] }
 0x216   : > { %3422 = vst.msk [vmem:[#allocation2 + $0x30] sm:$0xff] %vm1442_vm0, %v3358_v61  ;;  %v2679_v38 = vadd.f32 %v2450_v9, %v2125_v25  ;;  %v3132_v19 = vpop.f32.mrf.mxu0  ;;  %v2937_v25 = vpop.permute.xlu1 %2936 }
 0x217   : > { %v2805_v31 = vld [vmem:[#allocation2 + $0x38] sm:$0xff]  ;;  %v2452_v52 = vpop.f32.mrf.mxu1 }
 0x218   : > { %v3359_v44 = vadd.f32 %v3124_v7, %v2805_v31  ;;  %2743 = vst.msk [vmem:[#allocation2 + $0x48] sm:$0xff] %vm1442_vm0, %v2679_v38  ;;  %v3134_v55 = vpop.f32.mrf.mxu0 }
 0x219   : > { %v3484_v51 = vld [vmem:[#allocation2 + $0x20] ss:$2 sm:$0xff]  ;;  %v3548_v45 = vld [vmem:[#allocation2 + $0x21] ss:$2 sm:$0xff]  ;;  %v2455_v21 = vpop.f32.mrf.mxu1  ;;  %2646 = vmatmul.mubr.bf16.gmra.mxu1 %v5757_v57  ;;  %v2915_v57 = vsel %vm5273_vm4, 0, %v2903_v5 }
 0x21a   : > { %v3609_v20 = vmax.f32 %v3484_v51, %v3548_v45  ;;  %3423 = vst.msk [vmem:[#allocation2 + $0x38] sm:$0xff] %vm1442_vm0, %v3359_v44  ;;  %v2680_v59 = vadd.f32 %v2455_v21, %v2126_v13  ;;  %v3137_v54 = vpop.f32.mrf.mxu0  ;;  %3328 = vmatmul.mubr.bf16.gmra.mxu0 %v6083_v37  ;;  %4185 = vmatprep.mubr.msk.bf16.mxu1 %vm1442_vm0, %v6041_v17 }
 0x21b   : > { %v2806_v35 = vld [vmem:[#allocation2 + $0x40] sm:$0xff]  ;;  %v2457_v12 = vpop.f32.mrf.mxu1  ;;  %4257 = vmatprep.mubr.msk.bf16.mxu0 %vm1442_vm0, %v2924_v62  ;;  %v2925_v17 = vor.u32 %v2923_v3, %v2905_v53  ;;  %v2948_v42 = vsel %vm1442_vm0, %v2915_v57, %v2935_v43  ;;  %v2911_v3 = vsel %vm988_vm2, %v6074_v47, %v2910_v16  ;;  %v2130_v47 = vld [vmem:[#allocation2 + $0x70] sm:$0xff] }
 0x21c   : > { %v3639_v41 = vmax.f32 %v3607_v15, %v3609_v20  ;;  %v3360_v14 = vadd.f32 %v3129_v40, %v2806_v35  ;;  %2744 = vst.msk [vmem:[#allocation2 + $0x50] sm:$0xff] %vm1442_vm0, %v2680_v59  ;;  %v3139_v46 = vpop.f32.mrf.mxu0  ;;  %v2952_v52 = vsel %vm1442_vm0, %v2911_v3, %v2937_v25  ;;  %v2131_v59 = vld [vmem:[#allocation2 + $0x78] sm:$0xff] }
 0x21d   : > { %v2458_v18 = vpop.f32.mrf.mxu1  ;;  %v2929_v28 = vsel %vm5288_vm6, %v2925_v17, 0  ;;  %v2132_v46 = vld [vmem:[#allocation2 + $0x80] sm:$0xff] }
 0x21e   : > { %v3662_v0 = vadd.f32 %v6097_v27, %v3639_v41  ;;  %3424 = vst.msk [vmem:[#allocation2 + $0x40] sm:$0xff] %vm1442_vm0, %v3360_v14  ;;  %v2681_v6 = vadd.f32 %v2458_v18, %v2127_v22  ;;  %v3140_v7 = vpop.f32.mrf.mxu0 }
 0x21f   : > { %v2807_v60 = vld [vmem:[#allocation2 + $0x48] sm:$0xff]  ;;  %v2460_v63 = vpop.f32.mrf.mxu1 }
 0x220   : > { %v3678_v34 = vmax.f32 %v3662_v0, 0.0  ;;  %v3361_v58 = vadd.f32 %v3132_v19, %v2807_v60  ;;  %2745 = vst.msk [vmem:[#allocation2 + $0x58] sm:$0xff] %vm1442_vm0, %v2681_v6  ;;  %v3142_v29 = vpop.f32.mrf.mxu0  ;;  %v2133_v0 = vld [vmem:[#allocation2 + $0x88] sm:$0xff] }
 0x221   : > { %v3486_v10 = vld [vmem:[#allocation2 + $0x30] ss:$2 sm:$0xff]  ;;  %v3550_v40 = vld [vmem:[#allocation2 + $0x31] ss:$2 sm:$0xff]  ;;  %v2463_v33 = vpop.f32.mrf.mxu1  ;;  %2654 = vmatmul.mubr.bf16.gmra.mxu1 %v6058_v49 }
 0x222   : > { %v4286_v61 = vpack.c.bf16 %v3678_v34, %v3678_v34  ;;  %v3610_v1 = vmax.f32 %v3486_v10, %v3550_v40  ;;  %3425 = vst.msk [vmem:[#allocation2 + $0x48] sm:$0xff] %vm1442_vm0, %v3361_v58  ;;  %v2682_v2 = vadd.f32 %v2463_v33, %v2128_v56  ;;  %v3145_v8 = vpop.f32.mrf.mxu0  ;;  %3336 = vmatmul.mubr.bf16.gmra.mxu0 %v2948_v42  ;;  %v2134_v10 = vld [vmem:[#allocation2 + $0x90] sm:$0xff] }
 0x223   : > { %4186 = vmatprep.mubr.msk.bf16.mxu1 %vm1442_vm0, %v6065_v48  ;;  %v2808_v39 = vld [vmem:[#allocation2 + $0x50] sm:$0xff]  ;;  %v2465_v26 = vpop.f32.mrf.mxu1  ;;  %4258 = vmatprep.mubr.msk.bf16.mxu0 %vm1442_vm0, %v2929_v28  ;;  %v2129_v48 = vld [vmem:[#allocation2 + $0x68] sm:$0xff] }
 0x224   : > { %3759 = vst.msk [vmem:[%s6119_s18] sm:$0xf] %vm3758_vm7, %v4286_v61  ;;  %v3640_v32 = vmax.f32 %v3608_v24, %v3610_v1  ;;  %v3362_v49 = vadd.f32 %v3137_v54, %v2808_v39  ;;  %v3147_v36 = vpop.f32.mrf.mxu0 }
 0x225   : > { %2746 = vst.msk [vmem:[#allocation2 + $0x60] sm:$0xff] %vm1442_vm0, %v2682_v2  ;;  %v2466_v9 = vpop.f32.mrf.mxu1 }
 0x226   : > { %v3663_v38 = vadd.f32 %v6097_v27, %v3640_v32  ;;  %3426 = vst.msk [vmem:[#allocation2 + $0x50] sm:$0xff] %vm1442_vm0, %v3362_v49  ;;  %v2683_v19 = vadd.f32 %v2466_v9, %v2129_v48  ;;  %v3148_v50 = vpop.f32.mrf.mxu0  ;;  %v2135_v49 = vld [vmem:[#allocation2 + $0x98] sm:$0xff] }
 0x227   : > { %v2809_v4 = vld [vmem:[#allocation2 + $0x58] sm:$0xff]  ;;  %v2468_v31 = vpop.f32.mrf.mxu1 }
 0x228   : > { %v3679_v5 = vmax.f32 %v3663_v38, 0.0  ;;  %v3363_v53 = vadd.f32 %v3140_v7, %v2809_v4  ;;  %2747 = vst.msk [vmem:[#allocation2 + $0x68] sm:$0xff] %vm1442_vm0, %v2683_v19  ;;  %v3150_v44 = vpop.f32.mrf.mxu0 }
 0x229   : > { %v2471_v55 = vpop.f32.mrf.mxu1  ;;  %2662 = vmatmul.mubr.bf16.gmra.mxu1 %v6083_v37  ;;  %v3488_v63 = vld [vmem:[#allocation2 + $0x40] ss:$2 sm:$0xff]  ;;  %v3552_v42 = vld [vmem:[#allocation2 + $0x41] ss:$2 sm:$0xff] }
 0x22a   : > { %v4287_v62 = vpack.c.bf16 %v3679_v5, %v3679_v5  ;;  %3427 = vst.msk [vmem:[#allocation2 + $0x58] sm:$0xff] %vm1442_vm0, %v3363_v53  ;;  %v2684_v51 = vadd.f32 %v2471_v55, %v2130_v47  ;;  %v3153_v45 = vpop.f32.mrf.mxu0  ;;  %3344 = vmatmul.mubr.bf16.gmra.mxu0 %v2952_v52  ;;  %v3611_v56 = vmax.f32 %v3488_v63, %v3552_v42  ;;  %v2136_v44 = vld [vmem:[#allocation2 + $0xa0] sm:$0xff]  ;;  %v2139_v42 = vld [vmem:[#allocation2 + $0xb8] sm:$0xff] }
 0x22b   : > { %v2473_v21 = vpop.f32.mrf.mxu1 }
 0x22c   : > { %v2810_v13 = vld [vmem:[#allocation2 + $0x60] sm:$0xff]  ;;  %3760 = vst.msk [vmem:[%s6119_s18 + $0x4] sm:$0xf] %vm3758_vm7, %v4287_v62  ;;  %v3155_v20 = vpop.f32.mrf.mxu0 }
 0x22d   : > { %v3364_v15 = vadd.f32 %v3145_v8, %v2810_v13  ;;  %2748 = vst.msk [vmem:[#allocation2 + $0x70] sm:$0xff] %vm1442_vm0, %v2684_v51  ;;  %v2474_v54 = vpop.f32.mrf.mxu1 }
 0x22e   : > { %v2685_v35 = vadd.f32 %v2474_v54, %v2131_v59  ;;  %v3156_v37 = vpop.f32.mrf.mxu0 }
 0x22f   : > { %3428 = vst.msk [vmem:[#allocation2 + $0x60] sm:$0xff] %vm1442_vm0, %v3364_v15  ;;  %v2811_v12 = vld [vmem:[#allocation2 + $0x68] sm:$0xff]  ;;  %v2476_v57 = vpop.f32.mrf.mxu1 }
 0x230   : > { %v3365_v41 = vadd.f32 %v3148_v50, %v2811_v12  ;;  %2749 = vst.msk [vmem:[#allocation2 + $0x78] sm:$0xff] %vm1442_vm0, %v2685_v35  ;;  %v3158_v14 = vpop.f32.mrf.mxu0  ;;  %v2137_v35 = vld [vmem:[#allocation2 + $0xa8] sm:$0xff] }
 0x231   : > { %v2479_v43 = vpop.f32.mrf.mxu1  ;;  %v3490_v9 = vld [vmem:[#allocation2 + $0x50] ss:$2 sm:$0xff]  ;;  %v3554_v38 = vld [vmem:[#allocation2 + $0x51] ss:$2 sm:$0xff] }
 0x232   : > { %3429 = vst.msk [vmem:[#allocation2 + $0x68] sm:$0xff] %vm1442_vm0, %v3365_v41  ;;  %v2686_v30 = vadd.f32 %v2479_v43, %v2132_v46  ;;  %v3161_v17 = vpop.f32.mrf.mxu0  ;;  %v3612_v55 = vmax.f32 %v3490_v9, %v3554_v38 }
 0x233   : > { %v2481_v18 = vpop.f32.mrf.mxu1 }
 0x234   : > { %v2812_v22 = vld [vmem:[#allocation2 + $0x70] sm:$0xff]  ;;  %2750 = vst.msk [vmem:[#allocation2 + $0x80] sm:$0xff] %vm1442_vm0, %v2686_v30  ;;  %v3163_v11 = vpop.f32.mrf.mxu0 }
 0x235   : > { %v3366_v23 = vadd.f32 %v3153_v45, %v2812_v22  ;;  %v2482_v6 = vpop.f32.mrf.mxu1  ;;  %v2138_v22 = vld [vmem:[#allocation2 + $0xb0] sm:$0xff] }
 0x236   : > { %v2687_v7 = vadd.f32 %v2482_v6, %v2133_v0  ;;  %v3164_v60 = vpop.f32.mrf.mxu0 }
 0x237   : > { %3430 = vst.msk [vmem:[#allocation2 + $0x70] sm:$0xff] %vm1442_vm0, %v3366_v23  ;;  %v2813_v34 = vld [vmem:[#allocation2 + $0x78] sm:$0xff]  ;;  %v2484_v58 = vpop.f32.mrf.mxu1 }
 0x238   : > { %v3367_v29 = vadd.f32 %v3156_v37, %v2813_v34  ;;  %2751 = vst.msk [vmem:[#allocation2 + $0x88] sm:$0xff] %vm1442_vm0, %v2687_v7  ;;  %v3166_v16 = vpop.f32.mrf.mxu0 }
 0x239   : > { %v3492_v28 = vld [vmem:[#allocation2 + $0x60] ss:$2 sm:$0xff]  ;;  %v3556_v24 = vld [vmem:[#allocation2 + $0x61] ss:$2 sm:$0xff]  ;;  %v2487_v40 = vpop.f32.mrf.mxu1 }
 0x23a   : > { %v3613_v33 = vmax.f32 %v3492_v28, %v3556_v24  ;;  %3431 = vst.msk [vmem:[#allocation2 + $0x78] sm:$0xff] %vm1442_vm0, %v3367_v29  ;;  %v2688_v61 = vadd.f32 %v2487_v40, %v2134_v10  ;;  %v3169_v1 = vpop.f32.mrf.mxu0  ;;  %v2140_v40 = vld [vmem:[#allocation2 + $0xc0] sm:$0xff] }
 0x23b   : > { %v2814_v2 = vld [vmem:[#allocation2 + $0x80] sm:$0xff]  ;;  %v2489_v8 = vpop.f32.mrf.mxu1 }
 0x23c   : > { %v3641_v39 = vmax.f32 %v3611_v56, %v3613_v33  ;;  %v3368_v26 = vadd.f32 %v3161_v17, %v2814_v2  ;;  %2752 = vst.msk [vmem:[#allocation2 + $0x90] sm:$0xff] %vm1442_vm0, %v2688_v61  ;;  %v3171_v32 = vpop.f32.mrf.mxu0 }
 0x23d   : > { %v2490_v36 = vpop.f32.mrf.mxu1 }
 0x23e   : > { %v3664_v3 = vadd.f32 %v6097_v27, %v3641_v39  ;;  %3432 = vst.msk [vmem:[#allocation2 + $0x80] sm:$0xff] %vm1442_vm0, %v3368_v26  ;;  %v2689_v25 = vadd.f32 %v2490_v36, %v2135_v49  ;;  %v3172_v48 = vpop.f32.mrf.mxu0  ;;  %v2141_v26 = vld [vmem:[#allocation2 + $0xc8] sm:$0xff] }
 0x23f   : > { %v2815_v19 = vld [vmem:[#allocation2 + $0x88] sm:$0xff]  ;;  %v2492_v50 = vpop.f32.mrf.mxu1 }
 0x240   : > { %v3680_v4 = vmax.f32 %v3664_v3, 0.0  ;;  %v3369_v31 = vadd.f32 %v3164_v60, %v2815_v19  ;;  %2753 = vst.msk [vmem:[#allocation2 + $0x98] sm:$0xff] %vm1442_vm0, %v2689_v25  ;;  %v3174_v52 = vpop.f32.mrf.mxu0 }
 0x241   : > { %v3494_v5 = vld [vmem:[#allocation2 + $0x70] ss:$2 sm:$0xff]  ;;  %v3558_v53 = vld [vmem:[#allocation2 + $0x71] ss:$2 sm:$0xff]  ;;  %v2495_v47 = vpop.f32.mrf.mxu1 }
 0x242   : > { %v4288_v62 = vpack.c.bf16 %v3680_v4, %v3680_v4  ;;  %v3614_v51 = vmax.f32 %v3494_v5, %v3558_v53  ;;  %3433 = vst.msk [vmem:[#allocation2 + $0x88] sm:$0xff] %vm1442_vm0, %v3369_v31  ;;  %v2690_v45 = vadd.f32 %v2495_v47, %v2136_v44  ;;  %v3177_v13 = vpop.f32.mrf.mxu0  ;;  %v2142_v31 = vld [vmem:[#allocation2 + $0xd0] sm:$0xff] }
 0x243   : > { %v2816_v21 = vld [vmem:[#allocation2 + $0x90] sm:$0xff]  ;;  %v2497_v15 = vpop.f32.mrf.mxu1 }
 0x244   : > { %3761 = vst.msk [vmem:[%s6119_s18 + $0x8] sm:$0xf] %vm3758_vm7, %v4288_v62  ;;  %v3642_v20 = vmax.f32 %v3612_v55, %v3614_v51  ;;  %v3370_v59 = vadd.f32 %v3169_v1, %v2816_v21  ;;  %v3179_v54 = vpop.f32.mrf.mxu0  ;;  %v2143_v21 = vld [vmem:[#allocation2 + $0xd8] sm:$0xff] }
 0x245   : > { %2754 = vst.msk [vmem:[#allocation2 + $0xa0] sm:$0xff] %vm1442_vm0, %v2690_v45  ;;  %v2498_v37 = vpop.f32.mrf.mxu1 }
 0x246   : > { %v3665_v12 = vadd.f32 %v6097_v27, %v3642_v20  ;;  %3434 = vst.msk [vmem:[#allocation2 + $0x90] sm:$0xff] %vm1442_vm0, %v3370_v59  ;;  %v2691_v57 = vadd.f32 %v2498_v37, %v2137_v35  ;;  %v3180_v41 = vpop.f32.mrf.mxu0 }
 0x247   : > { %v2817_v14 = vld [vmem:[#allocation2 + $0x98] sm:$0xff]  ;;  %v2500_v46 = vpop.f32.mrf.mxu1 }
 0x248   : > { %v3681_v43 = vmax.f32 %v3665_v12, 0.0  ;;  %v3371_v30 = vadd.f32 %v3172_v48, %v2817_v14  ;;  %2755 = vst.msk [vmem:[#allocation2 + $0xa8] sm:$0xff] %vm1442_vm0, %v2691_v57  ;;  %v3182_v17 = vpop.f32.mrf.mxu0 }
 0x249   : > { %v2503_v18 = vpop.f32.mrf.mxu1  ;;  %v3496_v3 = vld [vmem:[#allocation2 + $0x80] ss:$2 sm:$0xff]  ;;  %v3560_v25 = vld [vmem:[#allocation2 + $0x81] ss:$2 sm:$0xff] }
 0x24a   : > { %v4289_v23 = vpack.c.bf16 %v3681_v43, %v3681_v43  ;;  %3435 = vst.msk [vmem:[#allocation2 + $0x98] sm:$0xff] %vm1442_vm0, %v3371_v30  ;;  %v2692_v11 = vadd.f32 %v2503_v18, %v2138_v22  ;;  %v3185_v0 = vpop.f32.mrf.mxu0  ;;  %v3615_v5 = vmax.f32 %v3496_v3, %v3560_v25  ;;  %v2144_v17 = vld [vmem:[#allocation2 + $0xe0] sm:$0xff]  ;;  %v2147_v25 = vld [vmem:[#allocation2 + $0xf8] sm:$0xff] }
 0x24b   : > { %v2505_v7 = vpop.f32.mrf.mxu1 }
 0x24c   : > { %v2818_v6 = vld [vmem:[#allocation2 + $0xa0] sm:$0xff]  ;;  %3762 = vst.msk [vmem:[%s6119_s18 + $0xc] sm:$0xf] %vm3758_vm7, %v4289_v23  ;;  %v3187_v63 = vpop.f32.mrf.mxu0 }
 0x24d   : > { %v3372_v60 = vadd.f32 %v3177_v13, %v2818_v6  ;;  %2756 = vst.msk [vmem:[#allocation2 + $0xb0] sm:$0xff] %vm1442_vm0, %v2692_v11  ;;  %v2506_v34 = vpop.f32.mrf.mxu1 }
 0x24e   : > { %v2693_v58 = vadd.f32 %v2506_v34, %v2139_v42  ;;  %v3188_v29 = vpop.f32.mrf.mxu0 }
 0x24f   : > { %3436 = vst.msk [vmem:[#allocation2 + $0xa0] sm:$0xff] %vm1442_vm0, %v3372_v60  ;;  %v2819_v16 = vld [vmem:[#allocation2 + $0xa8] sm:$0xff]  ;;  %v2508_v28 = vpop.f32.mrf.mxu1 }
 0x250   : > { %v3373_v24 = vadd.f32 %v3180_v41, %v2819_v16  ;;  %2757 = vst.msk [vmem:[#allocation2 + $0xb8] sm:$0xff] %vm1442_vm0, %v2693_v58  ;;  %v3190_v10 = vpop.f32.mrf.mxu0  ;;  %v2145_v58 = vld [vmem:[#allocation2 + $0xe8] sm:$0xff] }
 0x251   : > { %v2511_v56 = vpop.f32.mrf.mxu1  ;;  %v3498_v35 = vld [vmem:[#allocation2 + $0x90] ss:$2 sm:$0xff]  ;;  %v3562_v37 = vld [vmem:[#allocation2 + $0x91] ss:$2 sm:$0xff] }
 0x252   : > { %3437 = vst.msk [vmem:[#allocation2 + $0xa8] sm:$0xff] %vm1442_vm0, %v3373_v24  ;;  %v2694_v33 = vadd.f32 %v2511_v56, %v2140_v40  ;;  %v3193_v61 = vpop.f32.mrf.mxu0  ;;  %v3616_v18 = vmax.f32 %v3498_v35, %v3562_v37 }
 0x253   : > { %v2513_v2 = vpop.f32.mrf.mxu1 }
 0x254   : > { %v2820_v1 = vld [vmem:[#allocation2 + $0xb0] sm:$0xff]  ;;  %2758 = vst.msk [vmem:[#allocation2 + $0xc0] sm:$0xff] %vm1442_vm0, %v2694_v33  ;;  %v3195_v39 = vpop.f32.mrf.mxu0 }
 0x255   : > { %v3374_v8 = vadd.f32 %v3185_v0, %v2820_v1  ;;  %v2514_v32 = vpop.f32.mrf.mxu1  ;;  %v2146_v1 = vld [vmem:[#allocation2 + $0xf0] sm:$0xff] }
 0x256   : > { %v2695_v49 = vadd.f32 %v2514_v32, %v2141_v26  ;;  %v3196_v36 = vpop.f32.mrf.mxu0 }
 0x257   : > { %3438 = vst.msk [vmem:[#allocation2 + $0xb0] sm:$0xff] %vm1442_vm0, %v3374_v8  ;;  %v2821_v48 = vld [vmem:[#allocation2 + $0xb8] sm:$0xff]  ;;  %v2516_v9 = vpop.f32.mrf.mxu1 }
 0x258   : > { %v3375_v38 = vadd.f32 %v3188_v29, %v2821_v48  ;;  %2759 = vst.msk [vmem:[#allocation2 + $0xc8] sm:$0xff] %vm1442_vm0, %v2695_v49  ;;  %v3198_v19 = vpop.f32.mrf.mxu0 }
 0x259   : > { %v3500_v50 = vld [vmem:[#allocation2 + $0xa0] ss:$2 sm:$0xff]  ;;  %v3564_v4 = vld [vmem:[#allocation2 + $0xa1] ss:$2 sm:$0xff]  ;;  %v2519_v52 = vpop.f32.mrf.mxu1 }
 0x25a   : > { %v3617_v53 = vmax.f32 %v3500_v50, %v3564_v4  ;;  %3439 = vst.msk [vmem:[#allocation2 + $0xb8] sm:$0xff] %vm1442_vm0, %v3375_v38  ;;  %v2696_v44 = vadd.f32 %v2519_v52, %v2142_v31  ;;  %v3201_v47 = vpop.f32.mrf.mxu0  ;;  %v2148_v52 = vld [vmem:[#allocation2 + $0x100] sm:$0xff] }
 0x25b   : > { %v2822_v55 = vld [vmem:[#allocation2 + $0xc0] sm:$0xff]  ;;  %v2521_v62 = vpop.f32.mrf.mxu1 }
 0x25c   : > { %v3643_v51 = vmax.f32 %v3615_v5, %v3617_v53  ;;  %v3376_v45 = vadd.f32 %v3193_v61, %v2822_v55  ;;  %2760 = vst.msk [vmem:[#allocation2 + $0xd0] sm:$0xff] %vm1442_vm0, %v2696_v44  ;;  %v3203_v13 = vpop.f32.mrf.mxu0 }
 0x25d   : > { %v2522_v15 = vpop.f32.mrf.mxu1 }
 0x25e   : > { %v3666_v20 = vadd.f32 %v6097_v27, %v3643_v51  ;;  %3440 = vst.msk [vmem:[#allocation2 + $0xc0] sm:$0xff] %vm1442_vm0, %v3376_v45  ;;  %v2697_v59 = vadd.f32 %v2522_v15, %v2143_v21  ;;  %v3204_v54 = vpop.f32.mrf.mxu0  ;;  %v2149_v45 = vld [vmem:[#allocation2 + $0x108] sm:$0xff] }
 0x25f   : > { %v2823_v12 = vld [vmem:[#allocation2 + $0xc8] sm:$0xff]  ;;  %v2524_v57 = vpop.f32.mrf.mxu1 }
 0x260   : > { %v3682_v41 = vmax.f32 %v3666_v20, 0.0  ;;  %v3377_v14 = vadd.f32 %v3196_v36, %v2823_v12  ;;  %2761 = vst.msk [vmem:[#allocation2 + $0xd8] sm:$0xff] %vm1442_vm0, %v2697_v59  ;;  %v3206_v46 = vpop.f32.mrf.mxu0 }
 0x261   : > { %v3502_v43 = vld [vmem:[#allocation2 + $0xb0] ss:$2 sm:$0xff]  ;;  %v3566_v30 = vld [vmem:[#allocation2 + $0xb1] ss:$2 sm:$0xff]  ;;  %v2527_v22 = vpop.f32.mrf.mxu1 }
 0x262   : > { %v4290_v23 = vpack.c.bf16 %v3682_v41, %v3682_v41  ;;  %v3618_v11 = vmax.f32 %v3502_v43, %v3566_v30  ;;  %3441 = vst.msk [vmem:[#allocation2 + $0xc8] sm:$0xff] %vm1442_vm0, %v3377_v14  ;;  %v2698_v0 = vadd.f32 %v2527_v22, %v2144_v17  ;;  %v3209_v6 = vpop.f32.mrf.mxu0  ;;  %v2150_v14 = vld [vmem:[#allocation2 + $0x110] sm:$0xff] }
 0x263   : > { %v2824_v7 = vld [vmem:[#allocation2 + $0xd0] sm:$0xff]  ;;  %v2529_v60 = vpop.f32.mrf.mxu1 }
 0x264   : > { %3763 = vst.msk [vmem:[%s6119_s18 + $0x10] sm:$0xf] %vm3758_vm7, %v4290_v23  ;;  %v3644_v63 = vmax.f32 %v3616_v18, %v3618_v11  ;;  %v3378_v42 = vadd.f32 %v3201_v47, %v2824_v7  ;;  %v3211_v34 = vpop.f32.mrf.mxu0  ;;  %v2151_v7 = vld [vmem:[#allocation2 + $0x118] sm:$0xff] }
 0x265   : > { %2762 = vst.msk [vmem:[#allocation2 + $0xe0] sm:$0xff] %vm1442_vm0, %v2698_v0  ;;  %v2530_v29 = vpop.f32.mrf.mxu1 }
 0x266   : > { %v3667_v16 = vadd.f32 %v6097_v27, %v3644_v63  ;;  %3442 = vst.msk [vmem:[#allocation2 + $0xd0] sm:$0xff] %vm1442_vm0, %v3378_v42  ;;  %v2699_v28 = vadd.f32 %v2530_v29, %v2145_v58  ;;  %v3212_v24 = vpop.f32.mrf.mxu0 }
 0x267   : > { %v2825_v10 = vld [vmem:[#allocation2 + $0xd8] sm:$0xff]  ;;  %v2532_v40 = vpop.f32.mrf.mxu1 }
 0x268   : > { %v3683_v56 = vmax.f32 %v3667_v16, 0.0  ;;  %v3379_v33 = vadd.f32 %v3204_v54, %v2825_v10  ;;  %2763 = vst.msk [vmem:[#allocation2 + $0xe8] sm:$0xff] %vm1442_vm0, %v2699_v28  ;;  %v3214_v61 = vpop.f32.mrf.mxu0 }
 0x269   : > { %v2535_v2 = vpop.f32.mrf.mxu1  ;;  %v3504_v20 = vld [vmem:[#allocation2 + $0xc0] ss:$2 sm:$0xff]  ;;  %v3568_v59 = vld [vmem:[#allocation2 + $0xc1] ss:$2 sm:$0xff] }
 0x26a   : > { %v4291_v8 = vpack.c.bf16 %v3683_v56, %v3683_v56  ;;  %3443 = vst.msk [vmem:[#allocation2 + $0xd8] sm:$0xff] %vm1442_vm0, %v3379_v33  ;;  %v2700_v39 = vadd.f32 %v2535_v2, %v2146_v1  ;;  %v3217_v26 = vpop.f32.mrf.mxu0  ;;  %v3619_v43 = vmax.f32 %v3504_v20, %v3568_v59  ;;  %v2152_v61 = vld [vmem:[#allocation2 + $0x120] sm:$0xff]  ;;  %v2155_v59 = vld [vmem:[#allocation2 + $0x138] sm:$0xff] }
 0x26b   : > { %v2537_v49 = vpop.f32.mrf.mxu1 }
 0x26c   : > { %v2826_v32 = vld [vmem:[#allocation2 + $0xe0] sm:$0xff]  ;;  %3764 = vst.msk [vmem:[%s6119_s18 + $0x14] sm:$0xf] %vm3758_vm7, %v4291_v8  ;;  %v3219_v3 = vpop.f32.mrf.mxu0 }
 0x26d   : > { %v3380_v36 = vadd.f32 %v3209_v6, %v2826_v32  ;;  %2764 = vst.msk [vmem:[#allocation2 + $0xf0] sm:$0xff] %vm1442_vm0, %v2700_v39  ;;  %v2538_v48 = vpop.f32.mrf.mxu1 }
 0x26e   : > { %v2701_v9 = vadd.f32 %v2538_v48, %v2147_v25  ;;  %v3220_v38 = vpop.f32.mrf.mxu0 }
 0x26f   : > { %3444 = vst.msk [vmem:[#allocation2 + $0xe0] sm:$0xff] %vm1442_vm0, %v3380_v36  ;;  %v2827_v19 = vld [vmem:[#allocation2 + $0xe8] sm:$0xff]  ;;  %v2540_v50 = vpop.f32.mrf.mxu1 }
 0x270   : > { %v3381_v4 = vadd.f32 %v3212_v24, %v2827_v19  ;;  %2765 = vst.msk [vmem:[#allocation2 + $0xf8] sm:$0xff] %vm1442_vm0, %v2701_v9  ;;  %v3222_v31 = vpop.f32.mrf.mxu0  ;;  %v2153_v9 = vld [vmem:[#allocation2 + $0x128] sm:$0xff] }
 0x271   : > { %v2543_v5 = vpop.f32.mrf.mxu1  ;;  %v3506_v58 = vld [vmem:[#allocation2 + $0xd0] ss:$2 sm:$0xff]  ;;  %v3570_v29 = vld [vmem:[#allocation2 + $0xd1] ss:$2 sm:$0xff] }
 0x272   : > { %3445 = vst.msk [vmem:[#allocation2 + $0xe8] sm:$0xff] %vm1442_vm0, %v3381_v4  ;;  %v2702_v53 = vadd.f32 %v2543_v5, %v2148_v52  ;;  %v3225_v44 = vpop.f32.mrf.mxu0  ;;  %v3620_v2 = vmax.f32 %v3506_v58, %v3570_v29 }
 0x273   : > { %v2545_v55 = vpop.f32.mrf.mxu1 }
 0x274   : > { %v2828_v47 = vld [vmem:[#allocation2 + $0xf0] sm:$0xff]  ;;  %2766 = vst.msk [vmem:[#allocation2 + $0x100] sm:$0xff] %vm1442_vm0, %v2702_v53  ;;  %v3227_v51 = vpop.f32.mrf.mxu0 }
 0x275   : > { %v3382_v62 = vadd.f32 %v3217_v26, %v2828_v47  ;;  %v2546_v13 = vpop.f32.mrf.mxu1  ;;  %v2154_v47 = vld [vmem:[#allocation2 + $0x130] sm:$0xff] }
 0x276   : > { %v2703_v21 = vadd.f32 %v2546_v13, %v2149_v45  ;;  %v3228_v15 = vpop.f32.mrf.mxu0 }
 0x277   : > { %3446 = vst.msk [vmem:[#allocation2 + $0xf0] sm:$0xff] %vm1442_vm0, %v3382_v62  ;;  %v2829_v54 = vld [vmem:[#allocation2 + $0xf8] sm:$0xff]  ;;  %v2548_v35 = vpop.f32.mrf.mxu1 }
 0x278   : > { %v3383_v37 = vadd.f32 %v3220_v38, %v2829_v54  ;;  %2767 = vst.msk [vmem:[#allocation2 + $0x108] sm:$0xff] %vm1442_vm0, %v2703_v21  ;;  %v3230_v12 = vpop.f32.mrf.mxu0 }
 0x279   : > { %v3508_v57 = vld [vmem:[#allocation2 + $0xe0] ss:$2 sm:$0xff]  ;;  %v3572_v41 = vld [vmem:[#allocation2 + $0xe1] ss:$2 sm:$0xff]  ;;  %v2551_v46 = vpop.f32.mrf.mxu1 }
 0x27a   : > { %v3621_v30 = vmax.f32 %v3508_v57, %v3572_v41  ;;  %3447 = vst.msk [vmem:[#allocation2 + $0xf8] sm:$0xff] %vm1442_vm0, %v3383_v37  ;;  %v2704_v17 = vadd.f32 %v2551_v46, %v2150_v14  ;;  %v3233_v22 = vpop.f32.mrf.mxu0  ;;  %v2156_v46 = vld [vmem:[#allocation2 + $0x140] sm:$0xff] }
 0x27b   : > { %v2830_v18 = vld [vmem:[#allocation2 + $0x100] sm:$0xff]  ;;  %v2553_v23 = vpop.f32.mrf.mxu1 }
 0x27c   : > { %v3645_v11 = vmax.f32 %v3619_v43, %v3621_v30  ;;  %v3384_v0 = vadd.f32 %v3225_v44, %v2830_v18  ;;  %2768 = vst.msk [vmem:[#allocation2 + $0x110] sm:$0xff] %vm1442_vm0, %v2704_v17  ;;  %v3235_v6 = vpop.f32.mrf.mxu0 }
 0x27d   : > { %v2554_v60 = vpop.f32.mrf.mxu1 }
 0x27e   : > { %v3668_v63 = vadd.f32 %v6097_v27, %v3645_v11  ;;  %3448 = vst.msk [vmem:[#allocation2 + $0x100] sm:$0xff] %vm1442_vm0, %v3384_v0  ;;  %v2705_v42 = vadd.f32 %v2554_v60, %v2151_v7  ;;  %v3236_v34 = vpop.f32.mrf.mxu0  ;;  %v2157_v0 = vld [vmem:[#allocation2 + $0x148] sm:$0xff] }
 0x27f   : > { %v2831_v16 = vld [vmem:[#allocation2 + $0x108] sm:$0xff]  ;;  %v2556_v28 = vpop.f32.mrf.mxu1 }
 0x280   : > { %v3684_v24 = vmax.f32 %v3668_v63, 0.0  ;;  %v3385_v10 = vadd.f32 %v3228_v15, %v2831_v16  ;;  %2769 = vst.msk [vmem:[#allocation2 + $0x118] sm:$0xff] %vm1442_vm0, %v2705_v42  ;;  %v3238_v40 = vpop.f32.mrf.mxu0 }
 0x281   : > { %v3510_v56 = vld [vmem:[#allocation2 + $0xf0] ss:$2 sm:$0xff]  ;;  %v3574_v33 = vld [vmem:[#allocation2 + $0xf1] ss:$2 sm:$0xff]  ;;  %v2559_v1 = vpop.f32.mrf.mxu1 }
 0x282   : > { %v4292_v8 = vpack.c.bf16 %v3684_v24, %v3684_v24  ;;  %v3622_v39 = vmax.f32 %v3510_v56, %v3574_v33  ;;  %3449 = vst.msk [vmem:[#allocation2 + $0x108] sm:$0xff] %vm1442_vm0, %v3385_v10  ;;  %v2706_v26 = vadd.f32 %v2559_v1, %v2152_v61  ;;  %v3241_v32 = vpop.f32.mrf.mxu0  ;;  %v2158_v10 = vld [vmem:[#allocation2 + $0x150] sm:$0xff] }
 0x283   : > { %v2832_v49 = vld [vmem:[#allocation2 + $0x110] sm:$0xff]  ;;  %v2561_v36 = vpop.f32.mrf.mxu1 }
 0x284   : > { %3765 = vst.msk [vmem:[%s6119_s18 + $0x18] sm:$0xf] %vm3758_vm7, %v4292_v8  ;;  %v3646_v3 = vmax.f32 %v3620_v2, %v3622_v39  ;;  %v3386_v25 = vadd.f32 %v3233_v22, %v2832_v49  ;;  %v3243_v48 = vpop.f32.mrf.mxu0  ;;  %v2159_v49 = vld [vmem:[#allocation2 + $0x158] sm:$0xff] }
 0x285   : > { %2770 = vst.msk [vmem:[#allocation2 + $0x120] sm:$0xff] %vm1442_vm0, %v2706_v26  ;;  %v2562_v38 = vpop.f32.mrf.mxu1 }
 0x286   : > { %v3669_v19 = vadd.f32 %v6097_v27, %v3646_v3  ;;  %3450 = vst.msk [vmem:[#allocation2 + $0x110] sm:$0xff] %vm1442_vm0, %v3386_v25  ;;  %v2707_v50 = vadd.f32 %v2562_v38, %v2153_v9  ;;  %v3244_v4 = vpop.f32.mrf.mxu0 }
 0x287   : > { %v2833_v31 = vld [vmem:[#allocation2 + $0x118] sm:$0xff]  ;;  %v2564_v52 = vpop.f32.mrf.mxu1 }
 0x288   : > { %v3685_v5 = vmax.f32 %v3669_v19, 0.0  ;;  %v3387_v53 = vadd.f32 %v3236_v34, %v2833_v31  ;;  %2771 = vst.msk [vmem:[#allocation2 + $0x128] sm:$0xff] %vm1442_vm0, %v2707_v50  ;;  %v3246_v44 = vpop.f32.mrf.mxu0 }
 0x289   : > { %v2567_v55 = vpop.f32.mrf.mxu1  ;;  %v3512_v63 = vld [vmem:[#allocation2 + $0x100] ss:$2 sm:$0xff]  ;;  %v3576_v42 = vld [vmem:[#allocation2 + $0x101] ss:$2 sm:$0xff] }
 0x28a   : > { %v4293_v62 = vpack.c.bf16 %v3685_v5, %v3685_v5  ;;  %3451 = vst.msk [vmem:[#allocation2 + $0x118] sm:$0xff] %vm1442_vm0, %v3387_v53  ;;  %v2708_v51 = vadd.f32 %v2567_v55, %v2154_v47  ;;  %v3249_v45 = vpop.f32.mrf.mxu0  ;;  %v3623_v56 = vmax.f32 %v3512_v63, %v3576_v42  ;;  %v2160_v44 = vld [vmem:[#allocation2 + $0x160] sm:$0xff]  ;;  %v2163_v63 = vld [vmem:[#allocation2 + $0x178] sm:$0xff] }
 0x28b   : > { %v2569_v21 = vpop.f32.mrf.mxu1 }
 0x28c   : > { %v2834_v13 = vld [vmem:[#allocation2 + $0x120] sm:$0xff]  ;;  %3766 = vst.msk [vmem:[%s6119_s18 + $0x1c] sm:$0xf] %vm3758_vm7, %v4293_v62  ;;  %v3251_v20 = vpop.f32.mrf.mxu0 }
 0x28d   : > { %v3388_v15 = vadd.f32 %v3241_v32, %v2834_v13  ;;  %2772 = vst.msk [vmem:[#allocation2 + $0x130] sm:$0xff] %vm1442_vm0, %v2708_v51  ;;  %v2570_v54 = vpop.f32.mrf.mxu1 }
 0x28e   : > { %v2709_v35 = vadd.f32 %v2570_v54, %v2155_v59  ;;  %v3252_v37 = vpop.f32.mrf.mxu0 }
 0x28f   : > { %3452 = vst.msk [vmem:[#allocation2 + $0x120] sm:$0xff] %vm1442_vm0, %v3388_v15  ;;  %v2835_v12 = vld [vmem:[#allocation2 + $0x128] sm:$0xff]  ;;  %v2572_v57 = vpop.f32.mrf.mxu1 }
 0x290   : > { %v3389_v41 = vadd.f32 %v3244_v4, %v2835_v12  ;;  %2773 = vst.msk [vmem:[#allocation2 + $0x138] sm:$0xff] %vm1442_vm0, %v2709_v35  ;;  %v3254_v14 = vpop.f32.mrf.mxu0  ;;  %v2161_v35 = vld [vmem:[#allocation2 + $0x168] sm:$0xff] }
 0x291   : > { %v2575_v43 = vpop.f32.mrf.mxu1  ;;  %v3514_v9 = vld [vmem:[#allocation2 + $0x110] ss:$2 sm:$0xff]  ;;  %v3578_v38 = vld [vmem:[#allocation2 + $0x111] ss:$2 sm:$0xff] }
 0x292   : > { %3453 = vst.msk [vmem:[#allocation2 + $0x128] sm:$0xff] %vm1442_vm0, %v3389_v41  ;;  %v2710_v30 = vadd.f32 %v2575_v43, %v2156_v46  ;;  %v3257_v17 = vpop.f32.mrf.mxu0  ;;  %v3624_v55 = vmax.f32 %v3514_v9, %v3578_v38 }
 0x293   : > { %v2577_v18 = vpop.f32.mrf.mxu1 }
 0x294   : > { %v2836_v22 = vld [vmem:[#allocation2 + $0x130] sm:$0xff]  ;;  %2774 = vst.msk [vmem:[#allocation2 + $0x140] sm:$0xff] %vm1442_vm0, %v2710_v30  ;;  %v3259_v11 = vpop.f32.mrf.mxu0 }
 0x295   : > { %v3390_v23 = vadd.f32 %v3249_v45, %v2836_v22  ;;  %v2578_v6 = vpop.f32.mrf.mxu1  ;;  %v2162_v22 = vld [vmem:[#allocation2 + $0x170] sm:$0xff] }
 0x296   : > { %v2711_v7 = vadd.f32 %v2578_v6, %v2157_v0  ;;  %v3260_v60 = vpop.f32.mrf.mxu0 }
 0x297   : > { %3454 = vst.msk [vmem:[#allocation2 + $0x130] sm:$0xff] %vm1442_vm0, %v3390_v23  ;;  %v2837_v34 = vld [vmem:[#allocation2 + $0x138] sm:$0xff]  ;;  %v2580_v58 = vpop.f32.mrf.mxu1 }
 0x298   : > { %v3391_v29 = vadd.f32 %v3252_v37, %v2837_v34  ;;  %2775 = vst.msk [vmem:[#allocation2 + $0x148] sm:$0xff] %vm1442_vm0, %v2711_v7  ;;  %v3262_v16 = vpop.f32.mrf.mxu0 }
 0x299   : > { %v3516_v28 = vld [vmem:[#allocation2 + $0x120] ss:$2 sm:$0xff]  ;;  %v3580_v24 = vld [vmem:[#allocation2 + $0x121] ss:$2 sm:$0xff]  ;;  %v2583_v40 = vpop.f32.mrf.mxu1 }
 0x29a   : > { %v3625_v33 = vmax.f32 %v3516_v28, %v3580_v24  ;;  %3455 = vst.msk [vmem:[#allocation2 + $0x138] sm:$0xff] %vm1442_vm0, %v3391_v29  ;;  %v2712_v61 = vadd.f32 %v2583_v40, %v2158_v10  ;;  %v3265_v1 = vpop.f32.mrf.mxu0  ;;  %v2164_v10 = vld [vmem:[#allocation2 + $0x180] sm:$0xff] }
 0x29b   : > { %v2838_v2 = vld [vmem:[#allocation2 + $0x140] sm:$0xff]  ;;  %v2585_v8 = vpop.f32.mrf.mxu1 }
 0x29c   : > { %v3647_v39 = vmax.f32 %v3623_v56, %v3625_v33  ;;  %v3392_v26 = vadd.f32 %v3257_v17, %v2838_v2  ;;  %2776 = vst.msk [vmem:[#allocation2 + $0x150] sm:$0xff] %vm1442_vm0, %v2712_v61  ;;  %v3267_v32 = vpop.f32.mrf.mxu0 }
 0x29d   : > { %v2586_v36 = vpop.f32.mrf.mxu1 }
 0x29e   : > { %v3670_v3 = vadd.f32 %v6097_v27, %v3647_v39  ;;  %3456 = vst.msk [vmem:[#allocation2 + $0x140] sm:$0xff] %vm1442_vm0, %v3392_v26  ;;  %v2713_v25 = vadd.f32 %v2586_v36, %v2159_v49  ;;  %v3268_v48 = vpop.f32.mrf.mxu0  ;;  %v2165_v39 = vld [vmem:[#allocation2 + $0x188] sm:$0xff] }
 0x29f   : > { %v2839_v19 = vld [vmem:[#allocation2 + $0x148] sm:$0xff]  ;;  %v2588_v50 = vpop.f32.mrf.mxu1 }
 0x2a0   : > { %v3686_v4 = vmax.f32 %v3670_v3, 0.0  ;;  %v3393_v31 = vadd.f32 %v3260_v60, %v2839_v19  ;;  %2777 = vst.msk [vmem:[#allocation2 + $0x158] sm:$0xff] %vm1442_vm0, %v2713_v25  ;;  %v3270_v52 = vpop.f32.mrf.mxu0 }
 0x2a1   : > { %v3518_v5 = vld [vmem:[#allocation2 + $0x130] ss:$2 sm:$0xff]  ;;  %v3582_v53 = vld [vmem:[#allocation2 + $0x131] ss:$2 sm:$0xff]  ;;  %v2591_v47 = vpop.f32.mrf.mxu1 }
 0x2a2   : > { %v4294_v62 = vpack.c.bf16 %v3686_v4, %v3686_v4  ;;  %v3626_v51 = vmax.f32 %v3518_v5, %v3582_v53  ;;  %3457 = vst.msk [vmem:[#allocation2 + $0x148] sm:$0xff] %vm1442_vm0, %v3393_v31  ;;  %v2714_v45 = vadd.f32 %v2591_v47, %v2160_v44  ;;  %v3273_v13 = vpop.f32.mrf.mxu0  ;;  %v2166_v4 = vld [vmem:[#allocation2 + $0x190] sm:$0xff] }
 0x2a3   : > { %v2840_v21 = vld [vmem:[#allocation2 + $0x150] sm:$0xff]  ;;  %v2593_v15 = vpop.f32.mrf.mxu1 }
 0x2a4   : > { %3767 = vst.msk [vmem:[%s6119_s18 + $0x20] sm:$0xf] %vm3758_vm7, %v4294_v62  ;;  %v3648_v20 = vmax.f32 %v3624_v55, %v3626_v51  ;;  %v3394_v59 = vadd.f32 %v3265_v1, %v2840_v21  ;;  %v3275_v54 = vpop.f32.mrf.mxu0  ;;  %v6234_v15 = vld [vmem:[%s6316_s4] ss:$0 sm:$0xff] }
 0x2a5   : > { %2778 = vst.msk [vmem:[#allocation2 + $0x160] sm:$0xff] %vm1442_vm0, %v2714_v45  ;;  %v2594_v37 = vpop.f32.mrf.mxu1 }
 0x2a6   : > { %v3671_v12 = vadd.f32 %v6097_v27, %v3648_v20  ;;  %3458 = vst.msk [vmem:[#allocation2 + $0x150] sm:$0xff] %vm1442_vm0, %v3394_v59  ;;  %v2715_v57 = vadd.f32 %v2594_v37, %v2161_v35  ;;  %v3276_v41 = vpop.f32.mrf.mxu0 }
 0x2a7   : > { %v2841_v14 = vld [vmem:[#allocation2 + $0x158] sm:$0xff]  ;;  %v2596_v46 = vpop.f32.mrf.mxu1 }
 0x2a8   : > { %v3687_v43 = vmax.f32 %v3671_v12, 0.0  ;;  %v3395_v30 = vadd.f32 %v3268_v48, %v2841_v14  ;;  %2779 = vst.msk [vmem:[#allocation2 + $0x168] sm:$0xff] %vm1442_vm0, %v2715_v57  ;;  %v3278_v17 = vpop.f32.mrf.mxu0 }
 0x2a9   : > { %v2599_v18 = vpop.f32.mrf.mxu1  ;;  %v3520_v36 = vld [vmem:[#allocation2 + $0x140] ss:$2 sm:$0xff]  ;;  %v3584_v3 = vld [vmem:[#allocation2 + $0x141] ss:$2 sm:$0xff] }
 0x2aa   : > { %v4295_v23 = vpack.c.bf16 %v3687_v43, %v3687_v43  ;;  %3459 = vst.msk [vmem:[#allocation2 + $0x158] sm:$0xff] %vm1442_vm0, %v3395_v30  ;;  %v2716_v11 = vadd.f32 %v2599_v18, %v2162_v22  ;;  %v3281_v0 = vpop.f32.mrf.mxu0  ;;  %v3627_v52 = vmax.f32 %v3520_v36, %v3584_v3  ;;  %v2168_v17 = vld [vmem:[#allocation2 + $0x1a0] sm:$0xff]  ;;  %v2171_v3 = vld [vmem:[#allocation2 + $0x1b8] sm:$0xff] }
 0x2ab   : > { %v2601_v6 = vpop.f32.mrf.mxu1 }
 0x2ac   : > { %v2842_v27 = vld [vmem:[#allocation2 + $0x160] sm:$0xff]  ;;  %3768 = vst.msk [vmem:[%s6119_s18 + $0x24] sm:$0xf] %vm3758_vm7, %v4295_v23  ;;  %v3283_v60 = vpop.f32.mrf.mxu0 }
 0x2ad   : > { %v3396_v7 = vadd.f32 %v3273_v13, %v2842_v27  ;;  %2780 = vst.msk [vmem:[#allocation2 + $0x170] sm:$0xff] %vm1442_vm0, %v2716_v11  ;;  %v2602_v42 = vpop.f32.mrf.mxu1  ;;  %v2167_v13 = vld [vmem:[#allocation2 + $0x198] sm:$0xff] }
 0x2ae   : > { %v2717_v34 = vadd.f32 %v2602_v42, %v2163_v63  ;;  %v3284_v58 = vpop.f32.mrf.mxu0 }
 0x2af   : > { %3460 = vst.msk [vmem:[#allocation2 + $0x160] sm:$0xff] %vm1442_vm0, %v3396_v7  ;;  %v2843_v29 = vld [vmem:[#allocation2 + $0x168] sm:$0xff]  ;;  %v2604_v16 = vpop.f32.mrf.mxu1 }
 0x2b0   : > { %v3397_v28 = vadd.f32 %v3276_v41, %v2843_v29  ;;  %2781 = vst.msk [vmem:[#allocation2 + $0x178] sm:$0xff] %vm1442_vm0, %v2717_v34  ;;  %v3286_v24 = vpop.f32.mrf.mxu0  ;;  %v2169_v34 = vld [vmem:[#allocation2 + $0x1a8] sm:$0xff] }
 0x2b1   : > { %v2607_v40 = vpop.f32.mrf.mxu1  ;;  %v3522_v35 = vld [vmem:[#allocation2 + $0x150] ss:$2 sm:$0xff]  ;;  %v3586_v37 = vld [vmem:[#allocation2 + $0x151] ss:$2 sm:$0xff] }
 0x2b2   : > { %3461 = vst.msk [vmem:[#allocation2 + $0x168] sm:$0xff] %vm1442_vm0, %v3397_v28  ;;  %v2718_v56 = vadd.f32 %v2607_v40, %v2164_v10  ;;  %v3289_v33 = vpop.f32.mrf.mxu0  ;;  %v3628_v18 = vmax.f32 %v3522_v35, %v3586_v37 }
 0x2b3   : > { %v2609_v1 = vpop.f32.mrf.mxu1 }
 0x2b4   : > { %v2844_v61 = vld [vmem:[#allocation2 + $0x170] sm:$0xff]  ;;  %2782 = vst.msk [vmem:[#allocation2 + $0x180] sm:$0xff] %vm1442_vm0, %v2718_v56  ;;  %v3291_v8 = vpop.f32.mrf.mxu0 }
 0x2b5   : > { %v3398_v2 = vadd.f32 %v3281_v0, %v2844_v61  ;;  %v2610_v26 = vpop.f32.mrf.mxu1  ;;  %v2170_v61 = vld [vmem:[#allocation2 + $0x1b0] sm:$0xff] }
 0x2b6   : > { %v2719_v32 = vadd.f32 %v2610_v26, %v2165_v39  ;;  %v3292_v49 = vpop.f32.mrf.mxu0 }
 0x2b7   : > { %3462 = vst.msk [vmem:[#allocation2 + $0x170] sm:$0xff] %vm1442_vm0, %v3398_v2  ;;  %v2845_v25 = vld [vmem:[#allocation2 + $0x178] sm:$0xff]  ;;  %v2612_v48 = vpop.f32.mrf.mxu1 }
 0x2b8   : > { %v3399_v9 = vadd.f32 %v3284_v58, %v2845_v25  ;;  %2783 = vst.msk [vmem:[#allocation2 + $0x188] sm:$0xff] %vm1442_vm0, %v2719_v32  ;;  %v3294_v38 = vpop.f32.mrf.mxu0 }
 0x2b9   : > { %v3524_v19 = vld [vmem:[#allocation2 + $0x160] ss:$2 sm:$0xff]  ;;  %v3588_v50 = vld [vmem:[#allocation2 + $0x161] ss:$2 sm:$0xff]  ;;  %v2615_v31 = vpop.f32.mrf.mxu1 }
 0x2ba   : > { %v3629_v5 = vmax.f32 %v3524_v19, %v3588_v50  ;;  %3463 = vst.msk [vmem:[#allocation2 + $0x178] sm:$0xff] %vm1442_vm0, %v3399_v9  ;;  %v2720_v53 = vadd.f32 %v2615_v31, %v2166_v4  ;;  %v3297_v44 = vpop.f32.mrf.mxu0  ;;  %v2172_v31 = vld [vmem:[#allocation2 + $0x1c0] sm:$0xff] }
 0x2bb   : > { %v2846_v47 = vld [vmem:[#allocation2 + $0x180] sm:$0xff]  ;;  %v2617_v55 = vpop.f32.mrf.mxu1 }
 0x2bc   : > { %v3649_v62 = vmax.f32 %v3627_v52, %v3629_v5  ;;  %v3400_v51 = vadd.f32 %v3289_v33, %v2846_v47  ;;  %2784 = vst.msk [vmem:[#allocation2 + $0x190] sm:$0xff] %vm1442_vm0, %v2720_v53  ;;  %v3299_v45 = vpop.f32.mrf.mxu0 }
 0x2bd   : > { %v2618_v21 = vpop.f32.mrf.mxu1 }
 0x2be   : > { %v3672_v20 = vadd.f32 %v6234_v15, %v3649_v62  ;;  %3464 = vst.msk [vmem:[#allocation2 + $0x180] sm:$0xff] %vm1442_vm0, %v3400_v51  ;;  %v2721_v59 = vadd.f32 %v2618_v21, %v2167_v13  ;;  %v3300_v54 = vpop.f32.mrf.mxu0  ;;  %v2173_v51 = vld [vmem:[#allocation2 + $0x1c8] sm:$0xff] }
 0x2bf   : > { %v2847_v12 = vld [vmem:[#allocation2 + $0x188] sm:$0xff]  ;;  %v2620_v57 = vpop.f32.mrf.mxu1 }
 0x2c0   : > { %v3688_v41 = vmax.f32 %v3672_v20, 0.0  ;;  %v3401_v14 = vadd.f32 %v3292_v49, %v2847_v12  ;;  %2785 = vst.msk [vmem:[#allocation2 + $0x198] sm:$0xff] %vm1442_vm0, %v2721_v59  ;;  %v3302_v46 = vpop.f32.mrf.mxu0 }
 0x2c1   : > { %v3526_v43 = vld [vmem:[#allocation2 + $0x170] ss:$2 sm:$0xff]  ;;  %v3590_v30 = vld [vmem:[#allocation2 + $0x171] ss:$2 sm:$0xff]  ;;  %v2623_v22 = vpop.f32.mrf.mxu1 }
 0x2c2   : > { %v4296_v23 = vpack.c.bf16 %v3688_v41, %v3688_v41  ;;  %v3630_v11 = vmax.f32 %v3526_v43, %v3590_v30  ;;  %3465 = vst.msk [vmem:[#allocation2 + $0x188] sm:$0xff] %vm1442_vm0, %v3401_v14  ;;  %v2722_v0 = vadd.f32 %v2623_v22, %v2168_v17  ;;  %v3305_v27 = vpop.f32.mrf.mxu0  ;;  %v2174_v14 = vld [vmem:[#allocation2 + $0x1d0] sm:$0xff] }
 0x2c3   : > { %v2848_v6 = vld [vmem:[#allocation2 + $0x190] sm:$0xff]  ;;  %v2625_v7 = vpop.f32.mrf.mxu1 }
 0x2c4   : > { %3769 = vst.msk [vmem:[%s6119_s18 + $0x28] sm:$0xf] %vm3758_vm7, %v4296_v23  ;;  %v3650_v60 = vmax.f32 %v3628_v18, %v3630_v11  ;;  %v3402_v63 = vadd.f32 %v3297_v44, %v2848_v6  ;;  %v3307_v42 = vpop.f32.mrf.mxu0  ;;  %v2175_v6 = vld [vmem:[#allocation2 + $0x1d8] sm:$0xff] }
 0x2c5   : > { %2786 = vst.msk [vmem:[#allocation2 + $0x1a0] sm:$0xff] %vm1442_vm0, %v2722_v0  ;;  %v2626_v58 = vpop.f32.mrf.mxu1 }
 0x2c6   : > { %v3673_v29 = vadd.f32 %v6234_v15, %v3650_v60  ;;  %3466 = vst.msk [vmem:[#allocation2 + $0x190] sm:$0xff] %vm1442_vm0, %v3402_v63  ;;  %v2723_v16 = vadd.f32 %v2626_v58, %v2169_v34  ;;  %v3308_v28 = vpop.f32.mrf.mxu0 }
 0x2c7   : > { %v2849_v24 = vld [vmem:[#allocation2 + $0x198] sm:$0xff]  ;;  %v2628_v10 = vpop.f32.mrf.mxu1 }
 0x2c8   : > { %v3689_v40 = vmax.f32 %v3673_v29, 0.0  ;;  %v3403_v56 = vadd.f32 %v3300_v54, %v2849_v24  ;;  %2787 = vst.msk [vmem:[#allocation2 + $0x1a8] sm:$0xff] %vm1442_vm0, %v2723_v16  ;;  %v3310_v33 = vpop.f32.mrf.mxu0 }
 0x2c9   : > { %v2631_v1 = vpop.f32.mrf.mxu1  ;;  %v3528_v20 = vld [vmem:[#allocation2 + $0x180] ss:$2 sm:$0xff]  ;;  %v3592_v59 = vld [vmem:[#allocation2 + $0x181] ss:$2 sm:$0xff] }
 0x2ca   : > { %v4297_v2 = vpack.c.bf16 %v3689_v40, %v3689_v40  ;;  %3467 = vst.msk [vmem:[#allocation2 + $0x198] sm:$0xff] %vm1442_vm0, %v3403_v56  ;;  %v2724_v8 = vadd.f32 %v2631_v1, %v2170_v61  ;;  %v3313_v39 = vpop.f32.mrf.mxu0  ;;  %v3631_v43 = vmax.f32 %v3528_v20, %v3592_v59  ;;  %v2176_v33 = vld [vmem:[#allocation2 + $0x1e0] sm:$0xff]  ;;  %v2179_v59 = vld [vmem:[#allocation2 + $0x1f8] sm:$0xff] }
 0x2cb   : > { %v2633_v32 = vpop.f32.mrf.mxu1 }
 0x2cc   : > { %v2850_v26 = vld [vmem:[#allocation2 + $0x1a0] sm:$0xff]  ;;  %3770 = vst.msk [vmem:[%s6119_s18 + $0x2c] sm:$0xf] %vm3758_vm7, %v4297_v2  ;;  %v3315_v36 = vpop.f32.mrf.mxu0 }
 0x2cd   : > { %v3404_v49 = vadd.f32 %v3305_v27, %v2850_v26  ;;  %2788 = vst.msk [vmem:[#allocation2 + $0x1b0] sm:$0xff] %vm1442_vm0, %v2724_v8  ;;  %v2634_v25 = vpop.f32.mrf.mxu1 }
 0x2ce   : > { %v2725_v48 = vadd.f32 %v2634_v25, %v2171_v3  ;;  %v3316_v9 = vpop.f32.mrf.mxu0 }
 0x2cf   : > { %3468 = vst.msk [vmem:[#allocation2 + $0x1a0] sm:$0xff] %vm1442_vm0, %v3404_v49  ;;  %v2851_v38 = vld [vmem:[#allocation2 + $0x1a8] sm:$0xff]  ;;  %v2636_v19 = vpop.f32.mrf.mxu1 }
 0x2d0   : > { %v3405_v50 = vadd.f32 %v3308_v28, %v2851_v38  ;;  %2789 = vst.msk [vmem:[#allocation2 + $0x1b8] sm:$0xff] %vm1442_vm0, %v2725_v48  ;;  %v3318_v4 = vpop.f32.mrf.mxu0  ;;  %v2177_v48 = vld [vmem:[#allocation2 + $0x1e8] sm:$0xff] }
 0x2d1   : > { %v2639_v52 = vpop.f32.mrf.mxu1  ;;  %v3530_v34 = vld [vmem:[#allocation2 + $0x190] ss:$2 sm:$0xff]  ;;  %v3594_v58 = vld [vmem:[#allocation2 + $0x191] ss:$2 sm:$0xff] }
 0x2d2   : > { %3469 = vst.msk [vmem:[#allocation2 + $0x1a8] sm:$0xff] %vm1442_vm0, %v3405_v50  ;;  %v2726_v5 = vadd.f32 %v2639_v52, %v2172_v31  ;;  %v3321_v53 = vpop.f32.mrf.mxu0  ;;  %v3632_v1 = vmax.f32 %v3530_v34, %v3594_v58 }
 0x2d3   : > { %v2641_v47 = vpop.f32.mrf.mxu1 }
 0x2d4   : > { %v2852_v44 = vld [vmem:[#allocation2 + $0x1b0] sm:$0xff]  ;;  %2790 = vst.msk [vmem:[#allocation2 + $0x1c0] sm:$0xff] %vm1442_vm0, %v2726_v5  ;;  %v3323_v62 = vpop.f32.mrf.mxu0 }
 0x2d5   : > { %v3406_v55 = vadd.f32 %v3313_v39, %v2852_v44  ;;  %v2642_v45 = vpop.f32.mrf.mxu1  ;;  %v2178_v44 = vld [vmem:[#allocation2 + $0x1f0] sm:$0xff] }
 0x2d6   : > { %v2727_v13 = vadd.f32 %v2642_v45, %v2173_v51  ;;  %v3324_v21 = vpop.f32.mrf.mxu0 }
 0x2d7   : > { %3470 = vst.msk [vmem:[#allocation2 + $0x1b0] sm:$0xff] %vm1442_vm0, %v3406_v55  ;;  %v2853_v54 = vld [vmem:[#allocation2 + $0x1b8] sm:$0xff]  ;;  %v2644_v35 = vpop.f32.mrf.mxu1 }
 0x2d8   : > { %v3407_v37 = vadd.f32 %v3316_v9, %v2853_v54  ;;  %2791 = vst.msk [vmem:[#allocation2 + $0x1c8] sm:$0xff] %vm1442_vm0, %v2727_v13  ;;  %v3326_v12 = vpop.f32.mrf.mxu0 }
 0x2d9   : > { %v3532_v57 = vld [vmem:[#allocation2 + $0x1a0] ss:$2 sm:$0xff]  ;;  %v3596_v41 = vld [vmem:[#allocation2 + $0x1a1] ss:$2 sm:$0xff]  ;;  %v2647_v46 = vpop.f32.mrf.mxu1 }
 0x2da   : > { %v3633_v30 = vmax.f32 %v3532_v57, %v3596_v41  ;;  %3471 = vst.msk [vmem:[#allocation2 + $0x1b8] sm:$0xff] %vm1442_vm0, %v3407_v37  ;;  %v2728_v17 = vadd.f32 %v2647_v46, %v2174_v14  ;;  %v3329_v22 = vpop.f32.mrf.mxu0 }
 0x2db   : > { %v2854_v18 = vld [vmem:[#allocation2 + $0x1c0] sm:$0xff]  ;;  %v2649_v23 = vpop.f32.mrf.mxu1 }
 0x2dc   : > { %v3651_v11 = vmax.f32 %v3631_v43, %v3633_v30  ;;  %v3408_v0 = vadd.f32 %v3321_v53, %v2854_v18  ;;  %2792 = vst.msk [vmem:[#allocation2 + $0x1d0] sm:$0xff] %vm1442_vm0, %v2728_v17  ;;  %v3331_v27 = vpop.f32.mrf.mxu0 }
 0x2dd   : > { %v2650_v7 = vpop.f32.mrf.mxu1 }
 0x2de   : > { %v3674_v60 = vadd.f32 %v6234_v15, %v3651_v11  ;;  %3472 = vst.msk [vmem:[#allocation2 + $0x1c0] sm:$0xff] %vm1442_vm0, %v3408_v0  ;;  %v2729_v63 = vadd.f32 %v2650_v7, %v2175_v6  ;;  %v3332_v42 = vpop.f32.mrf.mxu0 }
 0x2df   : > { %v2855_v29 = vld [vmem:[#allocation2 + $0x1c8] sm:$0xff]  ;;  %v2652_v16 = vpop.f32.mrf.mxu1 }
 0x2e0   : > { %v3690_v28 = vmax.f32 %v3674_v60, 0.0  ;;  %v3409_v24 = vadd.f32 %v3324_v21, %v2855_v29  ;;  %2793 = vst.msk [vmem:[#allocation2 + $0x1d8] sm:$0xff] %vm1442_vm0, %v2729_v63  ;;  %v3334_v10 = vpop.f32.mrf.mxu0 }
 0x2e1   : > { %v3534_v40 = vld [vmem:[#allocation2 + $0x1b0] ss:$2 sm:$0xff]  ;;  %v3598_v56 = vld [vmem:[#allocation2 + $0x1b1] ss:$2 sm:$0xff]  ;;  %v2655_v61 = vpop.f32.mrf.mxu1 }
 0x2e2   : > { %v4298_v2 = vpack.c.bf16 %v3690_v28, %v3690_v28  ;;  %v3634_v8 = vmax.f32 %v3534_v40, %v3598_v56  ;;  %3473 = vst.msk [vmem:[#allocation2 + $0x1c8] sm:$0xff] %vm1442_vm0, %v3409_v24  ;;  %v2730_v39 = vadd.f32 %v2655_v61, %v2176_v33  ;;  %v3337_v26 = vpop.f32.mrf.mxu0  ;;  %v3803_v33 = vld [vmem:[%s6119_s18] sm:$0xff] (%p4558_p6)   ;;  %v3807_v61 = vld [vmem:[%s6119_s18 + $0x8] sm:$0xff] (%p4558_p6)  }
 0x2e3   : > { %v2856_v32 = vld [vmem:[#allocation2 + $0x1d0] sm:$0xff]  ;;  %v2657_v49 = vpop.f32.mrf.mxu1  ;;  %3804 = vst [vmem:[%s3786_s30] sm:$0xff] (%p4558_p6), %v3803_v33   ;;  %3808 = vst [vmem:[%s3786_s30 + $0x8] sm:$0xff] (%p4558_p6), %v3807_v61  }
 0x2e4   : > { %3771 = vst.msk [vmem:[%s6119_s18 + $0x30] sm:$0xf] %vm3758_vm7, %v4298_v2  ;;  %v3652_v36 = vmax.f32 %v3632_v1, %v3634_v8  ;;  %v3410_v3 = vadd.f32 %v3329_v22, %v2856_v32  ;;  %v3339_v25 = vpop.f32.mrf.mxu0  ;;  %v3815_v1 = vld [vmem:[%s6119_s18 + $0x18] sm:$0xff] (%p4558_p6)   ;;  %v3819_v2 = vld [vmem:[%s6119_s18 + $0x20] sm:$0xff] (%p4558_p6)   ;;  %v3823_v8 = vld [vmem:[%s6119_s18 + $0x28] sm:$0xff] (%p4558_p6)  }
 0x2e5   : > { %2794 = vst.msk [vmem:[#allocation2 + $0x1e0] sm:$0xff] %vm1442_vm0, %v2730_v39  ;;  %v2658_v9 = vpop.f32.mrf.mxu1  ;;  %3816 = vst [vmem:[%s3786_s30 + $0x18] sm:$0xff] (%p4558_p6), %v3815_v1  }
 0x2e6   : > { %v3675_v38 = vadd.f32 %v6234_v15, %v3652_v36  ;;  %3474 = vst.msk [vmem:[#allocation2 + $0x1d0] sm:$0xff] %vm1442_vm0, %v3410_v3  ;;  %v2731_v19 = vadd.f32 %v2658_v9, %v2177_v48  ;;  %v3340_v50 = vpop.f32.mrf.mxu0  ;;  %3820 = vst [vmem:[%s3786_s30 + $0x80] sm:$0xff] (%p4558_p6), %v3819_v2  }
 0x2e7   : > { %v2857_v4 = vld [vmem:[#allocation2 + $0x1d8] sm:$0xff]  ;;  %v2660_v31 = vpop.f32.mrf.mxu1  ;;  %3824 = vst [vmem:[%s3786_s30 + $0x88] sm:$0xff] (%p4558_p6), %v3823_v8  }
 0x2e8   : > { %v3691_v52 = vmax.f32 %v3675_v38, 0.0  ;;  %v3411_v5 = vadd.f32 %v3332_v42, %v2857_v4  ;;  %2795 = vst.msk [vmem:[#allocation2 + $0x1e8] sm:$0xff] %vm1442_vm0, %v2731_v19  ;;  %v3342_v53 = vpop.f32.mrf.mxu0 }
 0x2e9   : > { %v2663_v47 = vpop.f32.mrf.mxu1  ;;  %v3536_v30 = vld [vmem:[#allocation2 + $0x1c0] ss:$2 sm:$0xff]  ;;  %v3600_v17 = vld [vmem:[#allocation2 + $0x1c1] ss:$2 sm:$0xff] }
 0x2ea   : > { %v4299_v55 = vpack.c.bf16 %v3691_v52, %v3691_v52  ;;  %3475 = vst.msk [vmem:[#allocation2 + $0x1d8] sm:$0xff] %vm1442_vm0, %v3411_v5  ;;  %v2732_v62 = vadd.f32 %v2663_v47, %v2178_v44  ;;  %v3345_v51 = vpop.f32.mrf.mxu0  ;;  %v3635_v0 = vmax.f32 %v3536_v30, %v3600_v17 }
 0x2eb   : > { %v2665_v13 = vpop.f32.mrf.mxu1 }
 0x2ec   : > { %v2858_v45 = vld [vmem:[#allocation2 + $0x1e0] sm:$0xff]  ;;  %3772 = vst.msk [vmem:[%s6119_s18 + $0x34] sm:$0xf] %vm3758_vm7, %v4299_v55  ;;  %v3347_v20 = vpop.f32.mrf.mxu0 }
 0x2ed   : > { %v3412_v21 = vadd.f32 %v3337_v26, %v2858_v45  ;;  %2796 = vst.msk [vmem:[#allocation2 + $0x1f0] sm:$0xff] %vm1442_vm0, %v2732_v62  ;;  %v2666_v54 = vpop.f32.mrf.mxu1 }
 0x2ee   : > { %v2733_v35 = vadd.f32 %v2666_v54, %v2179_v59  ;;  %v3348_v37 = vpop.f32.mrf.mxu0 }
 0x2ef   : > { %3476 = vst.msk [vmem:[#allocation2 + $0x1e0] sm:$0xff] %vm1442_vm0, %v3412_v21  ;;  %v2859_v12 = vld [vmem:[#allocation2 + $0x1e8] sm:$0xff]  ;;  %v2668_v57 = vpop.f32.mrf.mxu1 }
 0x2f0   : > { %v3413_v41 = vadd.f32 %v3340_v50, %v2859_v12  ;;  %2797 = vst.msk [vmem:[#allocation2 + $0x1f8] sm:$0xff] %vm1442_vm0, %v2733_v35  ;;  %v3350_v14 = vpop.f32.mrf.mxu0 }
 0x2f1   : > { %v3538_v60 = vld [vmem:[#allocation2 + $0x1d0] ss:$2 sm:$0xff]  ;;  %v3602_v63 = vld [vmem:[#allocation2 + $0x1d1] ss:$2 sm:$0xff] }
 0x2f2   : > { %3477 = vst.msk [vmem:[#allocation2 + $0x1e8] sm:$0xff] %vm1442_vm0, %v3413_v41  ;;  %v3636_v29 = vmax.f32 %v3538_v60, %v3602_v63 }
 0x2f3   : > { %v3827_v39 = vld [vmem:[%s6119_s18 + $0x30] sm:$0xff] (%p4558_p6)  }
 0x2f4   : > { %v2860_v46 = vld [vmem:[#allocation2 + $0x1f0] sm:$0xff]  ;;  %3828 = vst [vmem:[%s3786_s30 + $0x90] sm:$0xff] (%p4558_p6), %v3827_v39  }
 0x2f5   : > { %v3414_v43 = vadd.f32 %v3345_v51, %v2860_v46 }
 0x2f7   : > { %3478 = vst.msk [vmem:[#allocation2 + $0x1f0] sm:$0xff] %vm1442_vm0, %v3414_v43  ;;  %v2861_v22 = vld [vmem:[#allocation2 + $0x1f8] sm:$0xff] }
 0x2f8   : > { %v3415_v18 = vadd.f32 %v3348_v37, %v2861_v22 }
 0x2f9   : > { %v3540_v23 = vld [vmem:[#allocation2 + $0x1e0] ss:$2 sm:$0xff]  ;;  %v3604_v11 = vld [vmem:[#allocation2 + $0x1e1] ss:$2 sm:$0xff] }
 0x2fa   : > { %v3637_v27 = vmax.f32 %v3540_v23, %v3604_v11  ;;  %3479 = vst.msk [vmem:[#allocation2 + $0x1f8] sm:$0xff] %vm1442_vm0, %v3415_v18 }
 0x2fc   : > { %v3653_v6 = vmax.f32 %v3635_v0, %v3637_v27 }
 0x2fe   : > { %v3676_v7 = vadd.f32 %v6234_v15, %v3653_v6 }
 0x300   : > { %v3692_v42 = vmax.f32 %v3676_v7, 0.0 }
 0x301   : > { %v3542_v34 = vld [vmem:[#allocation2 + $0x1f0] ss:$2 sm:$0xff]  ;;  %v3606_v58 = vld [vmem:[#allocation2 + $0x1f1] ss:$2 sm:$0xff] }
 0x302   : > { %v4300_v16 = vpack.c.bf16 %v3692_v42, %v3692_v42  ;;  %v3638_v28 = vmax.f32 %v3542_v34, %v3606_v58 }
 0x304   : > { %3773 = vst.msk [vmem:[%s6119_s18 + $0x38] sm:$0xf] %vm3758_vm7, %v4300_v16  ;;  %v3654_v24 = vmax.f32 %v3636_v29, %v3638_v28 }
 0x306   : > { %v3677_v10 = vadd.f32 %v6234_v15, %v3654_v24  ;;  %v3811_v15 = vld [vmem:[%s6119_s18 + $0x10] sm:$0xff] (%p4558_p6)  }
 0x307   : > { %3812 = vst [vmem:[%s3786_s30 + $0x10] sm:$0xff] (%p4558_p6), %v3811_v15  }
 0x308   : > { %v3693_v40 = vmax.f32 %v3677_v10, 0.0  ;;  %3781 = sbr.rel (!%p4558_p6) target bundleno = 789 (0x315), region = 167 }
 0x30a   : > { %v4301_v56 = vpack.c.bf16 %v3693_v40, %v3693_v40 }
 0x30c   : > { %3774 = vst.msk [vmem:[%s6119_s18 + $0x3c] sm:$0xf] %vm3758_vm7, %v4301_v56 }
 0x313   : > { %v3831_v26 = vld [vmem:[%s6119_s18 + $0x38] sm:$0xff]  }
 0x314   : > { %3832 = vst [vmem:[%s3786_s30 + $0x98] sm:$0xff] %v3831_v26  }
 0x315 PF: > { %s15_s22 = sadd.s32 1, %s4485_s22   ;;  %s6536_s18 = smov %s4473_s19 }
 0x316   : > { %p12_p11 = scmp.ge.s32.totalorder %s15_s22, 6   ;;  %s6537_s19 = smov %s4563_s29 }
 0x317   : > { %s6538_s20 = smov %s4481_s21  ;;  %s6539_s21 = smov %s6541_s23 }
 0x318   :  { %14 = sbr.rel (!%p12_p11) target bundleno = 3 (0x3), region = 326 }

// kernel: block2_forward.4
= control target key start
LH: loop header
LB: loop body
LE: loop exit
PB: predicated region body
PF: predicated region fallthrough
CT: control target
= control target key end

     0   :  { %s5048_s18 = smov 0   ;;  %s5050_s19 = smov 0   ;;  %s6583_s0 = inlined_call_operand.vmem [shape: bf16[2,32,32,3], index: 0, kind: input, shape index: {}]   ;;  %s6584_s1 = inlined_call_operand.vmem [shape: bf16[2,4,32,3], index: 1, kind: input, shape index: {}]   ;;  %s6585_s2 = inlined_call_operand.vmem [shape: bf16[2,4,32,3], index: 2, kind: input, shape index: {}]   ;;  %s6586_s3 = inlined_call_operand.vmem [shape: bf16[3,9,64], index: 3, kind: input, shape index: {}]   ;;  %s6587_s4 = inlined_call_operand.vmem [shape: f32[1,64], index: 4, kind: input, shape index: {}]   ;;  %s6588_s5 = inlined_call_operand.vmem [shape: bf16[2,32,32,64], index: 5, kind: output, shape index: {}]  }
   0x1   :  { %s5052_s20 = smov 0   ;;  %s5054_s21 = smov 0  }
   0x2   :  { %s5056_s22 = smov 0  }
   0x3 LB: > { %s24_s23 = sadd.s32 1, %s5009_s21  ;;  %s4284_s24 = sadd.s32 4294967295, %s5013_s22   ;;  %s5013_s22 = sphi %s5056_s22, %s15_s22   ;;  %s5009_s21 = sphi %s5054_s21, %s6604_s21   ;;  %s5005_s20 = sphi %s5052_s20, %s6603_s20   ;;  %s5001_s19 = sphi %s5050_s19, %s6602_s19   ;;  %s4997_s18 = sphi %s5048_s18, %s6601_s18  }
   0x4   : > { %p25_p0 = scmp.ge.s32.totalorder %s24_s23, 4  ;;  %p41_p1 = scmp.ne.s32.totalorder %s5001_s19, %s4997_s18 }
   0x5   : > { %p42_p2 = scmp.eq.s32.totalorder %s5013_s22, 0  ;;  %p177_p4 = scmp.eq.s32.totalorder %s4284_s24, 3 }
   0x6   : > { %s6606_s23 = smov (%p25_p0, %s24_s23), 0  ;;  %s34_s27 = sadd.s32 1, %s5001_s19 }
   0x7   : > { %p5080_p3 = por %p42_p2, %p41_p1  ;;  %s31_s26 = ssub.s32 %s5009_s21, %s6606_s23 }
   0x8   : > { %p32_p5 = scmp.eq.s32.totalorder %s31_s26, 0  ;;  %p5087_p6 = por %p177_p4, %p41_p1 }
   0x9   : > { %p4289_p7 = scmp.ge.s32.totalorder %s5013_s22, 4 }
   0xa   : > { %s5092_s29 = scalar_select %p32_p5, %s5001_s19, %s34_s27  }
   0xb   : > { %212 = sbr.rel (%p4289_p7) target bundleno = 48 (0x30), region = 24 }
  0x10   : > { %215 = sbr.rel (!%p5080_p3) target bundleno = 36 (0x24), region = 28  ;;  %s217_s30 = sand.u32 (%p5080_p3), 1, %s5001_s19  }
  0x11   : > { %s4520_s6 = sshll.u32 (%p5080_p3), %s5009_s21, 7  ;;  %s4290_s7 = sshll.u32 (%p5080_p3), %s217_s30, 8 }
  0x12   : > { %s5102_s10 = scalar_lea.vmem (%p5080_p3), %s6583_s0, %s4520_s6  ;;  %s5107_s11 = scalar_lea.vmem (%p5080_p3), [#allocation3], %s4290_s7 }
  0x13   : > { %v240_v0 = vld [vmem:[%s5102_s10] sm:$0xff] (%p5080_p3)   ;;  %v244_v1 = vld [vmem:[%s5102_s10 + $0x8] sm:$0xff] (%p5080_p3)   ;;  %v248_v2 = vld [vmem:[%s5102_s10 + $0x10] sm:$0xff] (%p5080_p3)  }
  0x14   : > { %241 = vst [vmem:[%s5107_s11] sm:$0xff] (%p5080_p3), %v240_v0   ;;  %245 = vst [vmem:[%s5107_s11 + $0x8] sm:$0xff] (%p5080_p3), %v244_v1   ;;  %v252_v3 = vld [vmem:[%s5102_s10 + $0x18] sm:$0xff] (%p5080_p3)   ;;  %v256_v4 = vld [vmem:[%s5102_s10 + $0x20] sm:$0xff] (%p5080_p3)  }
  0x15   : > { %249 = vst [vmem:[%s5107_s11 + $0x10] sm:$0xff] %v248_v2   ;;  %v260_v5 = vld [vmem:[%s5102_s10 + $0x28] sm:$0xff]   ;;  %253 = vst [vmem:[%s5107_s11 + $0x18] sm:$0xff] %v252_v3   ;;  %v264_v6 = vld [vmem:[%s5102_s10 + $0x30] sm:$0xff]  }
  0x16   : > { %257 = vst [vmem:[%s5107_s11 + $0x20] sm:$0xff] %v256_v4   ;;  %261 = vst [vmem:[%s5107_s11 + $0x28] sm:$0xff] %v260_v5   ;;  %v268_v7 = vld [vmem:[%s5102_s10 + $0x38] sm:$0xff]   ;;  %v272_v8 = vld [vmem:[%s5102_s10 + $0x40] sm:$0xff]  }
  0x17   : > { %265 = vst [vmem:[%s5107_s11 + $0x30] sm:$0xff] %v264_v6   ;;  %269 = vst [vmem:[%s5107_s11 + $0x38] sm:$0xff] %v268_v7   ;;  %v276_v9 = vld [vmem:[%s5102_s10 + $0x48] sm:$0xff]   ;;  %v280_v10 = vld [vmem:[%s5102_s10 + $0x50] sm:$0xff]  }
  0x18   : > { %273 = vst [vmem:[%s5107_s11 + $0x40] sm:$0xff] %v272_v8   ;;  %v284_v11 = vld [vmem:[%s5102_s10 + $0x58] sm:$0xff]   ;;  %277 = vst [vmem:[%s5107_s11 + $0x48] sm:$0xff] %v276_v9   ;;  %v288_v12 = vld [vmem:[%s5102_s10 + $0x60] sm:$0xff]  }
  0x19   : > { %281 = vst [vmem:[%s5107_s11 + $0x50] sm:$0xff] %v280_v10   ;;  %285 = vst [vmem:[%s5107_s11 + $0x58] sm:$0xff] %v284_v11   ;;  %v292_v13 = vld [vmem:[%s5102_s10 + $0x68] sm:$0xff]   ;;  %v296_v14 = vld [vmem:[%s5102_s10 + $0x70] sm:$0xff]  }
  0x1a   : > { %289 = vst [vmem:[%s5107_s11 + $0x60] sm:$0xff] %v288_v12   ;;  %293 = vst [vmem:[%s5107_s11 + $0x68] sm:$0xff] %v292_v13   ;;  %v300_v15 = vld [vmem:[%s5102_s10 + $0x78] sm:$0xff]   ;;  %v304_v16 = vld [vmem:[%s5102_s10 + $0x200] sm:$0xff]  }
  0x1b   : > { %297 = vst [vmem:[%s5107_s11 + $0x70] sm:$0xff] %v296_v14   ;;  %v308_v17 = vld [vmem:[%s5102_s10 + $0x208] sm:$0xff]   ;;  %301 = vst [vmem:[%s5107_s11 + $0x78] sm:$0xff] %v300_v15   ;;  %v312_v18 = vld [vmem:[%s5102_s10 + $0x210] sm:$0xff]  }
  0x1c   : > { %305 = vst [vmem:[%s5107_s11 + $0x80] sm:$0xff] %v304_v16   ;;  %309 = vst [vmem:[%s5107_s11 + $0x88] sm:$0xff] %v308_v17   ;;  %v316_v19 = vld [vmem:[%s5102_s10 + $0x218] sm:$0xff]   ;;  %v320_v20 = vld [vmem:[%s5102_s10 + $0x220] sm:$0xff]  }
  0x1d   : > { %313 = vst [vmem:[%s5107_s11 + $0x90] sm:$0xff] %v312_v18   ;;  %317 = vst [vmem:[%s5107_s11 + $0x98] sm:$0xff] %v316_v19   ;;  %v324_v21 = vld [vmem:[%s5102_s10 + $0x228] sm:$0xff]   ;;  %v328_v22 = vld [vmem:[%s5102_s10 + $0x230] sm:$0xff]  }
  0x1e   : > { %321 = vst [vmem:[%s5107_s11 + $0xa0] sm:$0xff] %v320_v20   ;;  %v332_v23 = vld [vmem:[%s5102_s10 + $0x238] sm:$0xff]   ;;  %325 = vst [vmem:[%s5107_s11 + $0xa8] sm:$0xff] %v324_v21   ;;  %v336_v24 = vld [vmem:[%s5102_s10 + $0x240] sm:$0xff]  }
  0x1f   : > { %329 = vst [vmem:[%s5107_s11 + $0xb0] sm:$0xff] %v328_v22   ;;  %333 = vst [vmem:[%s5107_s11 + $0xb8] sm:$0xff] %v332_v23   ;;  %v340_v25 = vld [vmem:[%s5102_s10 + $0x248] sm:$0xff]   ;;  %v344_v26 = vld [vmem:[%s5102_s10 + $0x250] sm:$0xff]  }
  0x20   : > { %337 = vst [vmem:[%s5107_s11 + $0xc0] sm:$0xff] %v336_v24   ;;  %341 = vst [vmem:[%s5107_s11 + $0xc8] sm:$0xff] %v340_v25   ;;  %v348_v27 = vld [vmem:[%s5102_s10 + $0x258] sm:$0xff]   ;;  %v352_v28 = vld [vmem:[%s5102_s10 + $0x260] sm:$0xff]  }
  0x21   : > { %345 = vst [vmem:[%s5107_s11 + $0xd0] sm:$0xff] %v344_v26   ;;  %v356_v29 = vld [vmem:[%s5102_s10 + $0x268] sm:$0xff]   ;;  %349 = vst [vmem:[%s5107_s11 + $0xd8] sm:$0xff] %v348_v27   ;;  %v360_v30 = vld [vmem:[%s5102_s10 + $0x270] sm:$0xff]  }
  0x22   : > { %353 = vst [vmem:[%s5107_s11 + $0xe0] sm:$0xff] %v352_v28   ;;  %357 = vst [vmem:[%s5107_s11 + $0xe8] sm:$0xff] %v356_v29   ;;  %v364_v31 = vld [vmem:[%s5102_s10 + $0x278] sm:$0xff]  }
  0x23   : > { %361 = vst [vmem:[%s5107_s11 + $0xf0] sm:$0xff] %v360_v30   ;;  %365 = vst [vmem:[%s5107_s11 + $0xf8] sm:$0xff] %v364_v31  }
  0x24 PF: > { %519 = sbr.rel (!%p5080_p3) target bundleno = 42 (0x2a), region = 69  ;;  %s521_s12 = sand.u32 (%p5080_p3), 1, %s5001_s19  }
  0x25   : > { %s4521_s13 = sshll.u32 (%p5080_p3), %s5009_s21, 4  ;;  %s4294_s14 = sshll.u32 (%p5080_p3), %s521_s12, 5 }
  0x26   : > { %s526_s17 = scalar_lea.vmem (%p5080_p3), %s6584_s1, %s4521_s13  ;;  %s523_s24 = scalar_lea.vmem (%p5080_p3), [#allocation4], %s4294_s14 }
  0x27   : > { %v543_v32 = vld [vmem:[%s526_s17] sm:$0xff] (%p5080_p3)   ;;  %v547_v33 = vld [vmem:[%s526_s17 + $0x8] sm:$0xff] (%p5080_p3)  }
  0x28   : > { %v551_v34 = vld [vmem:[%s526_s17 + $0x40] sm:$0xff] (%p5080_p3)   ;;  %544 = vst [vmem:[%s523_s24] sm:$0xff] (%p5080_p3), %v543_v32   ;;  %548 = vst [vmem:[%s523_s24 + $0x8] sm:$0xff] (%p5080_p3), %v547_v33   ;;  %v555_v35 = vld [vmem:[%s526_s17 + $0x48] sm:$0xff] (%p5080_p3)  }
  0x29   : > { %552 = vst [vmem:[%s523_s24 + $0x10] sm:$0xff] %v551_v34   ;;  %556 = vst [vmem:[%s523_s24 + $0x18] sm:$0xff] %v555_v35  }
  0x2a PF: > { %598 = sbr.rel (!%p5080_p3) target bundleno = 48 (0x30), region = 110  ;;  %s600_s26 = sand.u32 (%p5080_p3), 1, %s5001_s19  }
  0x2b   : > { %s4522_s27 = sshll.u32 (%p5080_p3), %s5009_s21, 4  ;;  %s4297_s30 = sshll.u32 (%p5080_p3), %s600_s26, 5 }
  0x2c   : > { %s605_s8 = scalar_lea.vmem (%p5080_p3), %s6585_s2, %s4522_s27  ;;  %s602_s9 = scalar_lea.vmem (%p5080_p3), [#allocation5], %s4297_s30 }
  0x2d   : > { %v622_v36 = vld [vmem:[%s605_s8] sm:$0xff] (%p5080_p3)   ;;  %v626_v37 = vld [vmem:[%s605_s8 + $0x8] sm:$0xff] (%p5080_p3)  }
  0x2e   : > { %v630_v38 = vld [vmem:[%s605_s8 + $0x40] sm:$0xff] (%p5080_p3)   ;;  %623 = vst [vmem:[%s602_s9] sm:$0xff] (%p5080_p3), %v622_v36   ;;  %627 = vst [vmem:[%s602_s9 + $0x8] sm:$0xff] (%p5080_p3), %v626_v37   ;;  %v634_v39 = vld [vmem:[%s605_s8 + $0x48] sm:$0xff] (%p5080_p3)  }
  0x2f   : > { %631 = vst [vmem:[%s602_s9 + $0x10] sm:$0xff] %v630_v38   ;;  %635 = vst [vmem:[%s602_s9 + $0x18] sm:$0xff] %v634_v39  }
  0x30 PF: > { %p4300_p8 = scmp.ge.s32.totalorder %s5013_s22, 1  ;;  %p676_p9 = scmp.lt.s32.totalorder %s5013_s22, 5 }
  0x32   : > { %p677_p10 = pnand %p4300_p8, %p676_p9 }
  0x33   : > { %s683_s25 = sand.u32 (!%p677_p10), 1, %s4997_s18   ;;  %s5015_s14 = smov (!%p677_p10), 3  }
  0x34   : > { %680 = sbr.rel (%p677_p10) target bundleno = 652 (0x28c), region = 151  ;;  %s5187_s10 = sshll.u32 (!%p677_p10), %s683_s25, 5 }
  0x35   : > { %s5189_s11 = sshll.u32 (!%p677_p10), %s683_s25, 8  ;;  %s692_s12 = scalar_lea.vmem (!%p677_p10), [#allocation4], %s5187_s10 }
  0x36   : > { %s5195_s13 = scalar_lea.vmem (!%p677_p10), [#allocation3], %s5189_s11  ;;  %s5016_s18 = smov (!%p677_p10), 6  }
  0x37   : > { %s5378_s17 = scalar_lea.vmem (!%p677_p10), [#allocation5], %s5187_s10  ;;  %s6193_s8 = scalar_lea.vmem (!%p677_p10), [#allocation6], %s5189_s11 }
  0x39   : > { %vm1263_vm0 = vsmask.f32 7424  ;;  %v5192_v40 = vld [vmem:[%s692_s12 + $0x10] sm:$0xff]   ;;  %v4932_v41 = vld [vmem:[%s5195_s13 + $0x88] sm:$0xff]   ;;  %v4933_v43 = vld [vmem:[%s692_s12 + $0x18] sm:$0xff]   ;;  %vm1360_vm1 = vcmask 1047552  }
  0x3a   : > { %1410 = vrot.lane.b32.xlu0 %v5192_v40, %s5015_s14  ;;  %v1113_v42 = vshll.u32 %v5192_v40, 16  ;;  %1416 = vrot.lane.b32.xlu1 %v4932_v41, %s5015_s14  ;;  %v5202_v44 = vld [vmem:[%s692_s12] sm:$0xff]   ;;  %v1110_v45 = vshrl.u32 %v5192_v40, 16  ;;  %v1120_v46 = vshll.u32 %v4933_v43, 16  ;;  %v1117_v49 = vshrl.u32 %v4933_v43, 16  ;;  %v4936_v53 = vld [vmem:[%s692_s12 + $0x8] sm:$0xff]   ;;  %vm5220_vm2 = vmand %vm1360_vm1, %vm1263_vm0 }
  0x3b   : > { %v5208_v48 = vld [vmem:[%s5195_s13 + $0x80] sm:$0xff]   ;;  %v1135_v50 = vshll.u32 %v4932_v41, 16  ;;  %v993_v54 = vshll.u32 %v5202_v44, 16  ;;  %v1132_v57 = vshrl.u32 %v4932_v41, 16  ;;  %v1000_v63 = vshll.u32 %v4936_v53, 16  ;;  %v4937_v2 = vld [vmem:[%s5195_s13 + $0x98] sm:$0xff]  }
  0x3c   : > { %v1304_v47 = vrot.slane %v1113_v42, 1  ;;  %v1306_v52 = vrot.slane %v1120_v46, 1  ;;  %v1128_v55 = vshll.u32 %v5208_v48, 16  ;;  %v1125_v56 = vshrl.u32 %v5208_v48, 16  ;;  %v5231_v3 = vld [vmem:[%s5195_s13 + $0x90] sm:$0xff]   ;;  %v5254_v22 = vld [vmem:[%s5195_s13] sm:$0xff]  }
  0x3d   : > { %v1311_v62 = vrot.slane %v1135_v50, 1  ;;  %v1119_v0 = vrot.slane %v1117_v49, 7  ;;  %v990_v1 = vshrl.u32 %v5202_v44, 16  ;;  %v1134_v5 = vrot.slane %v1132_v57, 7  ;;  %v4940_v29 = vld [vmem:[%s5195_s13 + $0x8] sm:$0xff]   ;;  %s4588_s10 = sshll.u32 (%p5087_p6), %s5005_s20, 7 }
  0x3e   : > { %1412 = vrot.lane.b32.xlu0 %v4933_v43, %s5015_s14  ;;  %v1305_v51 = vor.u32 %v1304_v47, %v1110_v45  ;;  %1378 = vrot.lane.b32.xlu1 %v5202_v44, %s5015_s14  ;;  %v1308_v59 = vor.u32 %v1306_v52, %v1117_v49  ;;  %v1309_v61 = vrot.slane %v1128_v55, 1  ;;  %v1264_v7 = vrot.slane %v993_v54, 1  ;;  %v4941_v36 = vld [vmem:[%s5195_s13 + $0xa8] sm:$0xff]   ;;  %v5282_v43 = vld [vmem:[%s5195_s13 + $0xa0] sm:$0xff]  }
  0x3f   : > { %v1313_v6 = vor.u32 %v1311_v62, %v1132_v57  ;;  %v997_v9 = vshrl.u32 %v4936_v53, 16  ;;  %v1266_v10 = vrot.slane %v1000_v63, 1  ;;  %v1147_v11 = vshrl.u32 %v4937_v2, 16 }
  0x40   : > { %v1307_v58 = vsel %vm1263_vm0, %v1305_v51, %v1306_v52  ;;  %v1310_v4 = vor.u32 %v1309_v61, %v1125_v56  ;;  %v1370_v8 = vsel %vm5220_vm2, %v1308_v59, 0  ;;  %v1143_v14 = vshll.u32 %v5231_v3, 16 }
  0x41   : > { %v999_v13 = vrot.slane %v997_v9, 7  ;;  %v1149_v15 = vrot.slane %v1147_v11, 7  ;;  %v1371_v16 = vsel %vm5220_vm2, %v1313_v6, 0  ;;  %v1265_v17 = vor.u32 %v1264_v7, %v990_v1 }
  0x42   : > { %1414 = vrot.lane.b32.xlu0 %v5208_v48, %s5015_s14  ;;  %1490 = vrot.lane.b32.xlu1 %v1307_v58, %s5016_s18  ;;  %v1312_v12 = vsel %vm1263_vm0, %v1310_v4, %v1311_v62  ;;  %v1150_v18 = vshll.u32 %v4937_v2, 16  ;;  %v5248_v19 = vor.u32 %v1135_v50, %v1134_v5  ;;  %v1268_v20 = vor.u32 %v1266_v10, %v997_v9  ;;  %v5301_v4 = vld [vmem:[%s5195_s13 + $0x10] sm:$0xff]  }
  0x43   : > { %v5250_v21 = vor.u32 %v1120_v46, %v1119_v0  ;;  %v5256_v23 = vor.u32 %v1000_v63, %v999_v13  ;;  %v1267_v25 = vsel %vm1263_vm0, %v1265_v17, %v1266_v10  ;;  %v1140_v26 = vshrl.u32 %v5231_v3, 16  ;;  %v4944_v46 = vld [vmem:[%s5195_s13 + $0x18] sm:$0xff]  }
  0x44   : > { %v5258_v24 = vor.u32 %v1150_v18, %v1149_v15  ;;  %v1314_v27 = vrot.slane %v1143_v14, 1  ;;  %v1362_v28 = vsel %vm5220_vm2, %v1268_v20, 0  ;;  %v1008_v30 = vshll.u32 %v5254_v22, 16 }
  0x45   : > { %v1012_v31 = vshrl.u32 %v4940_v29, 16  ;;  %v1316_v33 = vrot.slane %v1150_v18, 1  ;;  %v1015_v35 = vshll.u32 %v4940_v29, 16  ;;  %v1005_v37 = vshrl.u32 %v5254_v22, 16 }
  0x46   : > { %1494 = vrot.lane.b32.xlu0 %v1312_v12, %s5016_s18  ;;  %1492 = vrot.lane.b32.xlu1 %v1370_v8, %s5016_s18  ;;  %v1315_v32 = vor.u32 %v1314_v27, %v1140_v26  ;;  %v1269_v38 = vrot.slane %v1008_v30, 1  ;;  %v1162_v47 = vshrl.u32 %v4941_v36, 16  ;;  %v1027_v52 = vshrl.u32 %v4944_v46, 16  ;;  %v5318_v12 = vld [vmem:[%s5195_s13 + $0xb0] sm:$0xff]   ;;  %v5330_v27 = vld [vmem:[%s5195_s13 + $0xb8] sm:$0xff]  }
  0x47   : > { %v1014_v34 = vrot.slane %v1012_v31, 7  ;;  %v1318_v41 = vor.u32 %v1316_v33, %v1147_v11  ;;  %v1271_v49 = vrot.slane %v1015_v35, 1  ;;  %v1158_v58 = vshll.u32 %v5282_v43, 16 }
  0x48   : > { %v1317_v39 = vsel %vm1263_vm0, %v1315_v32, %v1316_v33  ;;  %v1164_v51 = vrot.slane %v1162_v47, 7  ;;  %v1165_v59 = vshll.u32 %v4941_v36, 16  ;;  %v1029_v61 = vrot.slane %v1027_v52, 7  ;;  %v5347_v33 = vld [vmem:[%s5195_s13 + $0x28] sm:$0xff]  }
  0x49   : > { %v5285_v50 = vor.u32 %v1015_v35, %v1014_v34  ;;  %v1372_v57 = vsel %vm5220_vm2, %v1318_v41, 0  ;;  %v1273_v62 = vor.u32 %v1271_v49, %v1012_v31  ;;  %v1030_v63 = vshll.u32 %v4944_v46, 16  ;;  %v4963_v35 = vld [vmem:[%s6586_s3] sm:$0x1f]  }
  0x4a   : > { %1496 = vrot.lane.b32.xlu0 %v1371_v16, %s5016_s18  ;;  %1380 = vrot.lane.b32.xlu1 %v4936_v53, %s5015_s14  ;;  %v1270_v53 = vor.u32 %v1269_v38, %v1005_v37  ;;  %v5295_v0 = vor.u32 %v1165_v59, %v1164_v51  ;;  %v1155_v5 = vshrl.u32 %v5282_v43, 16  ;;  %v1319_v6 = vrot.slane %v1158_v58, 1 }
  0x4b   : > { %v5306_v7 = vor.u32 %v1030_v63, %v1029_v61  ;;  %v1363_v8 = vsel %vm5220_vm2, %v1273_v62, 0  ;;  %v1023_v9 = vshll.u32 %v5301_v4, 16  ;;  %v1321_v11 = vrot.slane %v1165_v59, 1 }
  0x4c   : > { %v1320_v10 = vor.u32 %v1319_v6, %v1155_v5  ;;  %v1020_v16 = vshrl.u32 %v5301_v4, 16  ;;  %v1276_v18 = vrot.slane %v1030_v63, 1  ;;  %v1112_v20 = vrot.slane %v1110_v45, 7 }
  0x4d   : > { %v1323_v15 = vor.u32 %v1321_v11, %v1162_v47  ;;  %v1274_v17 = vrot.slane %v1023_v9, 1  ;;  %vm988_vm3 = vsmask.f32 256  ;;  %vm1756_vm4 = vcmask 1043456  }
  0x4e   : > { %1458 = vrot.lane.b32.xlu0 %v1267_v25, %s5016_s18  ;;  %1460 = vrot.lane.b32.xlu1 %v1362_v28, %s5016_s18  ;;  %v1322_v13 = vsel %vm1263_vm0, %v1320_v10, %v1321_v11  ;;  %v1127_v25 = vrot.slane %v1125_v56, 7  ;;  %v1173_v28 = vshll.u32 %v5318_v12, 16  ;;  %v5343_v56 = vld [vmem:[%s5195_s13 + $0x20] sm:$0xff]   ;;  %v1170_v32 = vshrl.u32 %v5318_v12, 16 }
  0x4f   : > { %v1373_v45 = vsel %vm5220_vm2, %v1323_v15, 0  ;;  %v1275_v31 = vor.u32 %v1274_v17, %v1020_v16  ;;  %v5355_v34 = vsel %vm988_vm3, %v1112_v20, %v5250_v21  ;;  %v992_v38 = vrot.slane %v990_v1, 7  ;;  %v4950_v15 = vld [vmem:[%s5195_s13 + $0xc0] sm:$0xff]   ;;  %v5447_v17 = vld [vmem:[%s5195_s13 + $0x38] sm:$0xff]  }
  0x50   : > { %v5351_v40 = vsel %vm988_vm3, %v1127_v25, %v5248_v19  ;;  %v1324_v19 = vrot.slane %v1173_v28, 1  ;;  %vm1757_vm5 = vcmask 1044480   ;;  %v5017_v47 = vmov 65535  }
  0x51   : > { %v1277_v21 = vsel %vm1263_vm0, %v1275_v31, %v1276_v18  ;;  %v5374_v41 = vor.u32 %v993_v54, %v992_v38  ;;  %v1758_v1 = vsel %vm1756_vm4, 4294967295, %v5017_v47  ;;  %v1038_v48 = vshll.u32 %v5343_v56, 16  ;;  %v4951_v31 = vld [vmem:[%s5195_s13 + $0x30] sm:$0xff]  }
  0x52   : > { %1418 = vrot.lane.b32.xlu0 %v5231_v3, %s5015_s14  ;;  %1420 = vrot.lane.b32.xlu1 %v4937_v2, %s5015_s14  ;;  %v1272_v2 = vsel %vm1263_vm0, %v1270_v53, %v1271_v49  ;;  %v1759_v51 = vsel %vm1757_vm5, %v1758_v1, 0  ;;  %v1045_v44 = vshll.u32 %v5347_v33, 16  ;;  %v1325_v53 = vor.u32 %v1324_v19, %v1170_v32 }
  0x53   : > { %v1761_v54 = vand.u32 %v4963_v35, %v1759_v51  ;;  %v5390_v59 = vsel %vm988_vm3, %v992_v38, %v5256_v23  ;;  %v1142_v61 = vrot.slane %v1140_v26, 7  ;;  %v1007_v63 = vrot.slane %v1005_v37, 7  ;;  %v4966_v23 = vld [vmem:[%s6586_s3 + $0x8] sm:$0x1f]  }
  0x54   : > { %v1022_v6 = vrot.slane %v1020_v16, 7  ;;  %v1172_v10 = vrot.slane %v1170_v32, 7  ;;  %v1185_v38 = vshrl.u32 %v4950_v15, 16  ;;  %v1050_v47 = vshrl.u32 %v4951_v31, 16 }
  0x55   : > { %4886 = vmatprep.subr.bf16.mxu1 %v1761_v54  ;;  %4688 = vmatprep.subr.bf16.mxu0 %v1761_v54  ;;  %v5404_v26 = vsel %vm988_vm3, %v1142_v61, %v5258_v24  ;;  %v5408_v37 = vor.u32 %v1143_v14, %v1142_v61  ;;  %v5416_v11 = vsel %vm988_vm3, %v1007_v63, %v5285_v50  ;;  %v1279_v14 = vrot.slane %v1038_v48, 1  ;;  %v5425_v24 = vld [vmem:[%s5195_s13 + $0xc8] sm:$0xff]   ;;  %v4954_v61 = vld [vmem:[%s5195_s13 + $0xd0] sm:$0xff]  }
  0x56   : > { %1498 = vrot.lane.b32.xlu0 %v1317_v39, %s5016_s18  ;;  %1382 = vrot.lane.b32.xlu1 %v5254_v22, %s5015_s14  ;;  %v5368_v39 = vor.u32 %v1128_v55, %v1127_v25  ;;  %v1177_v55 = vshrl.u32 %v5330_v27, 16  ;;  %vm1245_vm6 = vcmask 1040384   ;;  %vm1522_vm8 = vcmask 23552  }
  0x57   : > { %4887 = vmatpush3.bf16.msra.mxu1 %v1761_v54  ;;  %4689 = vmatpush3.bf16.msra.mxu0 %v1761_v54  ;;  %vm5592_vm7 = vmand %vm1245_vm6, %vm988_vm3  ;;  %vm1619_vm9 = vcmask 48128   ;;  %vm1691_vm10 = vcmask 72704   ;;  %vm2052_vm11 = vcmask 523264   ;;  %vm3784_vm12 = vcmask 519168  }
  0x58   : > { %v1179_v62 = vrot.slane %v1177_v55, 7 }
  0x5a   : > { %1500 = vrot.lane.b32.xlu0 %v1372_v57, %s5016_s18  ;;  %1384 = vrot.lane.b32.xlu1 %v4940_v29, %s5015_s14  ;;  %v5336_v29 = vor.u32 %v1113_v42, %v1112_v20  ;;  %v1278_v42 = vor.u32 %v1276_v18, %v1027_v52  ;;  %v1042_v52 = vshrl.u32 %v5347_v33, 16  ;;  %v1035_v57 = vshrl.u32 %v5343_v56, 16 }
  0x5b   : > { %v5457_v20 = vand.u32 %v4966_v23, %v1759_v51 }
  0x5c   : > { %v1364_v49 = vsel %vm5220_vm2, %v1278_v42, 0 }
  0x5d   : > { %4754 = vmatprep.subr.bf16.mxu1 %v5457_v20 }
  0x5e   : > { %1462 = vrot.lane.b32.xlu0 %v1272_v2, %s5016_s18  ;;  %1464 = vrot.lane.b32.xlu1 %v1363_v8, %s5016_s18  ;;  %v1157_v2 = vrot.slane %v1155_v5, 7  ;;  %v1044_v8 = vrot.slane %v1042_v52, 7  ;;  %v5412_v5 = vor.u32 %v1008_v30, %v1007_v63  ;;  %v5434_v30 = vor.u32 %v1023_v9, %v1022_v6 }
  0x5f   : > { %v1192_v9 = vshrl.u32 %v5425_v24, 16 }
  0x60   : > { %v5430_v22 = vor.u32 %v1158_v58, %v1157_v2  ;;  %v1281_v58 = vrot.slane %v1045_v44, 1  ;;  %v1047_v42 = vor.u32 %v1045_v44, %v1044_v8  ;;  %v1052_v44 = vrot.slane %v1050_v47, 7 }
  0x61   : > { %v1200_v8 = vshrl.u32 %v4954_v61, 16  ;;  %v1249_v60 = vsel %vm5592_vm7, 0, %v5434_v30 }
  0x62   : > { %1422 = vrot.lane.b32.xlu0 %v5282_v43, %s5015_s14  ;;  %1424 = vrot.lane.b32.xlu1 %v4941_v36, %s5015_s14  ;;  %v1180_v36 = vshll.u32 %v5330_v27, 16  ;;  %v4969_v43 = vld [vmem:[%s6586_s3 + $0x10] sm:$0x1f]  }
  0x63   : > { %v5469_v35 = vand.u32 %v4969_v43, %v1759_v51  ;;  %v4955_v43 = vld [vmem:[%s5195_s13 + $0x40] sm:$0xff]  }
  0x64   : > { %v1182_v16 = vor.u32 %v1180_v36, %v1179_v62 }
  0x65   : > { %4820 = vmatprep.subr.bf16.mxu0 %v5469_v35 }
  0x66   : > { %1502 = vrot.lane.b32.xlu0 %v1322_v13, %s5016_s18  ;;  %1386 = vrot.lane.b32.xlu1 %v5301_v4, %s5015_s14  ;;  %v5420_v13 = vsel %vm988_vm3, %v1157_v2, %v5295_v0  ;;  %v5441_v0 = vsel %vm988_vm3, %v1022_v6, %v5306_v7  ;;  %v5451_v4 = vor.u32 %v1173_v28, %v1172_v10  ;;  %v1037_v7 = vrot.slane %v1035_v57, 7 }
  0x67   : > { %v5455_v18 = vsel %vm988_vm3, %v1172_v10, %v1182_v16  ;;  %v1194_v28 = vrot.slane %v1192_v9, 7 }
  0x68   : > { %v5467_v32 = vor.u32 %v1038_v48, %v1037_v7  ;;  %v5473_v1 = vsel %vm988_vm3, %v1037_v7, %v1047_v42  ;;  %v1187_v48 = vrot.slane %v1185_v38, 7 }
  0x6a   : > { %1504 = vrot.lane.b32.xlu0 %v1373_v45, %s5016_s18  ;;  %1388 = vrot.lane.b32.xlu1 %v4944_v46, %s5015_s14  ;;  %v1326_v46 = vrot.slane %v1180_v36, 1  ;;  %v1188_v45 = vshll.u32 %v4950_v15, 16  ;;  %v1283_v36 = vor.u32 %v1281_v58, %v1042_v52 }
  0x6c   : > { %v1328_v3 = vor.u32 %v1326_v46, %v1177_v55  ;;  %v1327_v50 = vsel %vm1263_vm0, %v1325_v53, %v1326_v46  ;;  %v1329_v51 = vrot.slane %v1188_v45, 1  ;;  %v5482_v46 = vld [vmem:[%s5195_s13 + $0xd8] sm:$0xff]   ;;  %v1365_v54 = vsel %vm5220_vm2, %v1283_v36, 0 }
  0x6d   : > { %v5486_v53 = vor.u32 %v1188_v45, %v1187_v48  ;;  %v1207_v62 = vshrl.u32 %v5482_v46, 16  ;;  %v1065_v36 = vshrl.u32 %v4955_v43, 16 }
  0x6e   : > { %1466 = vrot.lane.b32.xlu0 %v1277_v21, %s5016_s18  ;;  %1468 = vrot.lane.b32.xlu1 %v1364_v49, %s5016_s18  ;;  %v1374_v25 = vsel %vm5220_vm2, %v1328_v3, 0  ;;  %v1195_v21 = vshll.u32 %v5425_v24, 16  ;;  %v1060_v49 = vshll.u32 %v5447_v17, 16  ;;  %v1330_v6 = vor.u32 %v1329_v51, %v1185_v38 }
  0x6f   : > { %v1209_v10 = vrot.slane %v1207_v62, 7  ;;  %v1203_v3 = vshll.u32 %v4954_v61, 16 }
  0x70   : > { %v1197_v52 = vor.u32 %v1195_v21, %v1194_v28  ;;  %v1331_v23 = vrot.slane %v1195_v21, 1  ;;  %v1286_v28 = vrot.slane %v1060_v49, 1 }
  0x72   : > { %1426 = vrot.lane.b32.xlu0 %v5318_v12, %s5015_s14  ;;  %1428 = vrot.lane.b32.xlu1 %v5330_v27, %s5015_s14  ;;  %v1280_v27 = vor.u32 %v1279_v14, %v1035_v57  ;;  %v1057_v12 = vshrl.u32 %v5447_v17, 16  ;;  %v1210_v14 = vshll.u32 %v5482_v46, 16  ;;  %v1332_v7 = vsel %vm1263_vm0, %v1330_v6, %v1331_v23 }
  0x74   : > { %v1059_v19 = vrot.slane %v1057_v12, 7  ;;  %v1282_v55 = vsel %vm1263_vm0, %v1280_v27, %v1281_v58  ;;  %v5504_v58 = vld [vmem:[%s5195_s13 + $0x48] sm:$0xff]   ;;  %v1212_v27 = vor.u32 %v1210_v14, %v1209_v10 }
  0x75   : > { %v1072_v42 = vshrl.u32 %v5504_v58, 16 }
  0x76   : > { %1506 = vrot.lane.b32.xlu0 %v1327_v50, %s5016_s18  ;;  %1390 = vrot.lane.b32.xlu1 %v5343_v56, %s5015_s14  ;;  %v1053_v56 = vshll.u32 %v4951_v31, 16  ;;  %v1062_v57 = vor.u32 %v1060_v49, %v1059_v19  ;;  %v1202_v50 = vrot.slane %v1200_v8, 7  ;;  %v1075_v49 = vshll.u32 %v5504_v58, 16 }
  0x77   : > { %v1074_v19 = vrot.slane %v1072_v42, 7 }
  0x78   : > { %v5493_v63 = vor.u32 %v1053_v56, %v1052_v44  ;;  %v5497_v2 = vsel %vm988_vm3, %v1052_v44, %v1062_v57  ;;  %v1284_v16 = vrot.slane %v1053_v56, 1  ;;  %v5509_v45 = vor.u32 %v1203_v3, %v1202_v50  ;;  %v4957_v44 = vld [vmem:[%s5195_s13 + $0xe8] sm:$0xff]  }
  0x79   : > { %v5513_v38 = vsel %vm988_vm3, %v1202_v50, %v1212_v27  ;;  %v1288_v56 = vor.u32 %v1286_v28, %v1057_v12 }
  0x7a   : > { %1508 = vrot.lane.b32.xlu0 %v1374_v25, %s5016_s18  ;;  %1392 = vrot.lane.b32.xlu1 %v5347_v33, %s5015_s14  ;;  %v5491_v33 = vsel %vm988_vm3, %v1187_v48, %v1197_v52  ;;  %v1333_v25 = vor.u32 %v1331_v23, %v1192_v9  ;;  %v1285_v21 = vor.u32 %v1284_v16, %v1050_v47  ;;  %v1334_v52 = vrot.slane %v1203_v3, 1  ;;  %v4958_v47 = vld [vmem:[%s5195_s13 + $0xe0] sm:$0xff]  }
  0x7b   : > { %v1215_v6 = vshrl.u32 %v4958_v47, 16  ;;  %v1218_v10 = vshll.u32 %v4958_v47, 16  ;;  %v1225_v3 = vshll.u32 %v4957_v44, 16 }
  0x7c   : > { %v1375_v9 = vsel %vm5220_vm2, %v1333_v25, 0  ;;  %v1287_v51 = vsel %vm1263_vm0, %v1285_v21, %v1286_v28  ;;  %v1335_v57 = vor.u32 %v1334_v52, %v1200_v8  ;;  %v4960_v25 = vld [vmem:[%s5195_s13 + $0x58] sm:$0xff]   ;;  %v1291_v8 = vrot.slane %v1075_v49, 1 }
  0x7d   : > { %v1217_v50 = vrot.slane %v1215_v6, 7 }
  0x7e   : > { %1470 = vrot.lane.b32.xlu0 %v1282_v55, %s5016_s18  ;;  %1472 = vrot.lane.b32.xlu1 %v1365_v54, %s5016_s18  ;;  %v1077_v55 = vor.u32 %v1075_v49, %v1074_v19  ;;  %v1222_v54 = vshrl.u32 %v4957_v44, 16  ;;  %v1090_v49 = vshll.u32 %v4960_v25, 16 }
  0x80   : > { %v1224_v23 = vrot.slane %v1222_v54, 7 }
  0x82   : > { %1430 = vrot.lane.b32.xlu0 %v4950_v15, %s5015_s14  ;;  %1432 = vrot.lane.b32.xlu1 %v5425_v24, %s5015_s14  ;;  %v1068_v15 = vshll.u32 %v4955_v43, 16  ;;  %v1067_v24 = vrot.slane %v1065_v36, 7  ;;  %v1227_v19 = vor.u32 %v1225_v3, %v1224_v23 }
  0x84   : > { %v5520_v48 = vor.u32 %v1068_v15, %v1067_v24  ;;  %v5530_v12 = vsel %vm988_vm3, %v1067_v24, %v1077_v55  ;;  %v1289_v16 = vrot.slane %v1068_v15, 1  ;;  %v5541_v24 = vor.u32 %v1218_v10, %v1217_v50 }
  0x85   : > { %v5544_v21 = vsel %vm988_vm3, %v1217_v50, %v1227_v19  ;;  %v1293_v55 = vor.u32 %v1291_v8, %v1072_v42  ;;  %v4962_v42 = vld [vmem:[%s5195_s13 + $0x60] sm:$0xff]  }
  0x86   : > { %1510 = vrot.lane.b32.xlu0 %v1332_v7, %s5016_s18  ;;  %1394 = vrot.lane.b32.xlu1 %v4951_v31, %s5015_s14  ;;  %v1366_v31 = vsel %vm5220_vm2, %v1288_v56, 0  ;;  %v4959_v7 = vld [vmem:[%s5195_s13 + $0x50] sm:$0xff]  }
  0x8a   : > { %1512 = vrot.lane.b32.xlu0 %v1375_v9, %s5016_s18  ;;  %1396 = vrot.lane.b32.xlu1 %v5447_v17, %s5015_s14  ;;  %v1336_v17 = vrot.slane %v1210_v14, 1  ;;  %v1087_v14 = vshrl.u32 %v4960_v25, 16  ;;  %v1080_v9 = vshrl.u32 %v4959_v7, 16 }
  0x8c   : > { %v1337_v27 = vsel %vm1263_vm0, %v1335_v57, %v1336_v17  ;;  %v1338_v28 = vor.u32 %v1336_v17, %v1207_v62  ;;  %v1089_v15 = vrot.slane %v1087_v14, 7  ;;  %v1082_v56 = vrot.slane %v1080_v9, 7  ;;  %v4961_v17 = vld [vmem:[%s5195_s13 + $0x68] sm:$0xff]  }
  0x8d   : > { %v1290_v62 = vor.u32 %v1289_v16, %v1065_v36  ;;  %v1339_v57 = vrot.slane %v1218_v10, 1  ;;  %v1102_v36 = vshrl.u32 %v4961_v17, 16  ;;  %v1341_v16 = vrot.slane %v1225_v3, 1 }
  0x8e   : > { %1474 = vrot.lane.b32.xlu0 %v1287_v51, %s5016_s18  ;;  %1476 = vrot.lane.b32.xlu1 %v1366_v31, %s5016_s18  ;;  %v1092_v52 = vor.u32 %v1090_v49, %v1089_v15  ;;  %v1105_v19 = vshll.u32 %v4961_v17, 16 }
  0x8f   : > { %v1292_v31 = vsel %vm1263_vm0, %v1290_v62, %v1291_v8  ;;  %v1340_v50 = vor.u32 %v1339_v57, %v1215_v6  ;;  %v1343_v8 = vor.u32 %v1341_v16, %v1222_v54  ;;  %v5586_v57 = vld [vmem:[%s5195_s13 + $0x78] sm:$0xff]  }
  0x90   : > { %v5560_v23 = vsel %vm988_vm3, %v1082_v56, %v1092_v52 }
  0x91   : > { %v1342_v15 = vsel %vm1263_vm0, %v1340_v50, %v1341_v16 }
  0x92   : > { %1434 = vrot.lane.b32.xlu0 %v4954_v61, %s5015_s14  ;;  %1436 = vrot.lane.b32.xlu1 %v5482_v46, %s5015_s14  ;;  %v1083_v61 = vshll.u32 %v4959_v7, 16  ;;  %v1376_v46 = vsel %vm5220_vm2, %v1338_v28, 0  ;;  %v1098_v28 = vshll.u32 %v4962_v42, 16 }
  0x94   : > { %v5550_v51 = vor.u32 %v1083_v61, %v1082_v56  ;;  %v1294_v56 = vrot.slane %v1083_v61, 1  ;;  %v1299_v61 = vrot.slane %v1098_v28, 1 }
  0x96   : > { %1514 = vrot.lane.b32.xlu0 %v1337_v27, %s5016_s18  ;;  %1398 = vrot.lane.b32.xlu1 %v4955_v43, %s5015_s14  ;;  %v1367_v43 = vsel %vm5220_vm2, %v1293_v55, 0  ;;  %v1104_v27 = vrot.slane %v1102_v36, 7  ;;  %v1296_v55 = vrot.slane %v1090_v49, 1  ;;  %v5581_v49 = vld [vmem:[%s5195_s13 + $0x70] sm:$0xff]  }
  0x98   : > { %v1298_v54 = vor.u32 %v1296_v55, %v1087_v14 }
  0x9a   : > { %1516 = vrot.lane.b32.xlu0 %v1376_v46, %s5016_s18  ;;  %1400 = vrot.lane.b32.xlu1 %v5504_v58, %s5015_s14  ;;  %v1095_v58 = vshrl.u32 %v4962_v42, 16  ;;  %v1107_v46 = vor.u32 %v1105_v19, %v1104_v27  ;;  %v2212_v27 = vshll.u32 %v5586_v57, 16 }
  0x9c   : > { %v1097_v10 = vrot.slane %v1095_v58, 7  ;;  %v1300_v14 = vor.u32 %v1299_v61, %v1095_v58 }
  0x9e   : > { %1478 = vrot.lane.b32.xlu0 %v1292_v31, %s5016_s18  ;;  %1480 = vrot.lane.b32.xlu1 %v1367_v43, %s5016_s18  ;;  %v5568_v62 = vor.u32 %v1098_v28, %v1097_v10  ;;  %v5571_v6 = vsel %vm988_vm3, %v1097_v10, %v1107_v46  ;;  %v1368_v31 = vsel %vm5220_vm2, %v1298_v54, 0  ;;  %v2202_v10 = vshrl.u32 %v5581_v49, 16 }
  0xa2   : > { %1438 = vrot.lane.b32.xlu0 %v4958_v47, %s5015_s14  ;;  %1440 = vrot.lane.b32.xlu1 %v4957_v44, %s5015_s14  ;;  %v1377_v47 = vsel %vm5220_vm2, %v1343_v8, 0  ;;  %v1295_v44 = vor.u32 %v1294_v56, %v1080_v9  ;;  %v2205_v9 = vshll.u32 %v5581_v49, 16  ;;  %v5609_v8 = vld [vmem:[%s5378_s17] sm:$0xff]  }
  0xa4   : > { %v1297_v3 = vsel %vm1263_vm0, %v1295_v44, %v1296_v55 }
  0xa6   : > { %1518 = vrot.lane.b32.xlu0 %v1342_v15, %s5016_s18  ;;  %1402 = vrot.lane.b32.xlu1 %v4959_v7, %s5015_s14  ;;  %v1301_v7 = vrot.slane %v1105_v19, 1  ;;  %v1255_v19 = vsel %vm5592_vm7, 0, %v5336_v29  ;;  %v2237_v29 = vrot.slane %v2212_v27, 1 }
  0xa8   : > { %v1303_v16 = vor.u32 %v1301_v7, %v1102_v36  ;;  %v1302_v58 = vsel %vm1263_vm0, %v1300_v14, %v1301_v7  ;;  %v2235_v36 = vrot.slane %v2205_v9, 1 }
  0xaa   : > { %1520 = vrot.lane.b32.xlu0 %v1377_v47, %s5016_s18  ;;  %1404 = vrot.lane.b32.xlu1 %v4960_v25, %s5015_s14  ;;  %v1369_v56 = vsel %vm5220_vm2, %v1303_v16, 0  ;;  %v1256_v47 = vsel %vm5592_vm7, 0, %v5368_v39  ;;  %v2236_v54 = vor.u32 %v2235_v36, %v2202_v10  ;;  %v2808_v36 = vshrl.u32 %v5609_v8, 16 }
  0xac   : > { %v1411_v52 = vpop.permute.xlu0 %1410  ;;  %v5588_v43 = vpop.permute.xlu1 %1416 }
  0xad   : > { %v1573_v46 = vsel %vm1522_vm8, %v1255_v19, %v1411_v52 }
  0xae   : > { %1482 = vrot.lane.b32.xlu0 %v1297_v3, %s5016_s18  ;;  %1484 = vrot.lane.b32.xlu1 %v1368_v31, %s5016_s18  ;;  %v2811_v3 = vshll.u32 %v5609_v8, 16 }
  0xb0   : > { %v1413_v50 = vpop.permute.xlu0 %1412  ;;  %v1379_v28 = vpop.permute.xlu1 %1378 }
  0xb1   : > { %v1576_v7 = vsel %vm1522_vm8, %v5355_v34, %v1413_v50  ;;  %v2841_v34 = vrot.slane %v2811_v3, 1  ;;  %v5650_v50 = vld [vmem:[%s5195_s13 + $0xf0] sm:$0xff]  }
  0xb2   : > { %1406 = vrot.lane.b32.xlu0 %v4962_v42, %s5015_s14  ;;  %1408 = vrot.lane.b32.xlu1 %v4961_v17, %s5015_s14  ;;  %v2209_v17 = vshrl.u32 %v5586_v57, 16  ;;  %v5617_v42 = vld [vmem:[%s5378_s17 + $0x8] sm:$0xff]  }
  0xb3   : > { %v2818_v31 = vshll.u32 %v5617_v42, 16 }
  0xb4   : > { %v1415_v15 = vpop.permute.xlu0 %1414  ;;  %v1491_v55 = vpop.permute.xlu1 %1490  ;;  %v2239_v39 = vor.u32 %v2237_v29, %v2209_v17 }
  0xb5   : > { %v1653_v44 = vsel %vm1619_vm9, %v1573_v46, %v1491_v55  ;;  %v1579_v61 = vsel %vm1522_vm8, %v1256_v47, %v1415_v15  ;;  %v2843_v46 = vrot.slane %v2818_v31, 1  ;;  %v1247_v55 = vsel %vm5592_vm7, 0, %v5374_v41 }
  0xb6   : > { %1486 = vrot.lane.b32.xlu0 %v1302_v58, %s5016_s18  ;;  %4722 = vmatprep.mubr.msk.bf16.mxu1 %vm1691_vm10, %v1653_v44  ;;  %v2238_v58 = vsel %vm1263_vm0, %v2236_v54, %v2237_v29  ;;  %v2815_v29 = vshrl.u32 %v5617_v42, 16  ;;  %v5664_v44 = vld [vmem:[%s5195_s13 + $0xf8] sm:$0xff]   ;;  %v2220_v54 = vshll.u32 %v5650_v50, 16  ;;  %v1582_v41 = vsel %vm1522_vm8, %v5351_v40, %v5588_v43  ;;  %s6505_s13 = scalar_lea.vmem (%p5087_p6), %s6588_s5, %s4588_s10 }
  0xb7   : > { %1488 = vrot.lane.b32.xlu1 %v1369_v56, %s5016_s18  ;;  %v2247_v56 = vsel %vm5220_vm2, %v2239_v39, 0 }
  0xb8   : > { %v1495_v52 = vpop.permute.xlu0 %1494  ;;  %v1493_v14 = vpop.permute.xlu1 %1492  ;;  %v2845_v39 = vor.u32 %v2843_v46, %v2815_v29  ;;  %v2240_v43 = vrot.slane %v2220_v54, 1 }
  0xb9   : > { %v5637_v16 = vsel %vm1619_vm9, %v1579_v61, %v1495_v52  ;;  %v1655_v19 = vsel %vm1619_vm9, %v1576_v7, %v1493_v14  ;;  %v1525_v61 = vsel %vm1522_vm8, %v1247_v55, %v1379_v28 }
  0xba   : > { %2249 = vrot.lane.b32.xlu0 %v5581_v49, %s5015_s14  ;;  %4723 = vmatmul.mubr.msk.bf16.vlgmr.msra.gmra.mxu1 %vm1691_vm10, %v1655_v19 }
  0xbb   : > { %2251 = vrot.lane.b32.xlu1 %v5586_v57, %s5015_s14  ;;  %4726 = vmatprep.mubr.msk.bf16.mxu1 %vm1691_vm10, %v5637_v16 }
  0xbc   : > { %v1497_v15 = vpop.permute.xlu0 %1496  ;;  %4755 = vmatpush3.bf16.msra.mxu1 %v5457_v20  ;;  %v1381_v47 = vpop.permute.xlu1 %1380  ;;  %v2842_v20 = vor.u32 %v2841_v34, %v2808_v36 }
  0xbd   : > { %v1528_v7 = vsel %vm1522_vm8, %v5390_v59, %v1381_v47  ;;  %v5682_v34 = vsel %vm1619_vm9, %v1582_v41, %v1497_v15  ;;  %v2217_v59 = vshrl.u32 %v5650_v50, 16  ;;  %v5696_v15 = vld [vmem:[%s5378_s17 + $0x10] sm:$0xff]   ;;  %v1257_v47 = vsel %vm5592_vm7, 0, %v5408_v37 }
  0xbe   : > { %2259 = vrot.lane.b32.xlu0 %v2238_v58, %s5016_s18  ;;  %v6591_v58 = vshll.u32 %v5664_v44, 16  ;;  %v2844_v40 = vsel %vm1263_vm0, %v2842_v20, %v2843_v46  ;;  %v2853_v46 = vsel %vm5220_vm2, %v2845_v39, 0  ;;  %v6589_v41 = vshll.u32 %v5696_v15, 16 }
  0xbf   : > { %2261 = vrot.lane.b32.xlu1 %v2247_v56, %s5016_s18 }
  0xc0   : > { %v1459_v52 = vpop.permute.xlu0 %1458  ;;  %v1461_v14 = vpop.permute.xlu1 %1460  ;;  %v2242_v20 = vrot.slane %v6591_v58, 1 }
  0xc1   : > { %v1621_v19 = vsel %vm1619_vm9, %v1525_v61, %v1459_v52  ;;  %v1623_v28 = vsel %vm1619_vm9, %v1528_v7, %v1461_v14  ;;  %v2224_v61 = vshrl.u32 %v5664_v44, 16  ;;  %v5710_v52 = vld [vmem:[%s5378_s17 + $0x18] sm:$0xff]  }
  0xc2   : > { %4690 = vmatprep.mubr.msk.bf16.mxu0 %vm1691_vm10, %v1621_v19  ;;  %2855 = vrot.lane.b32.xlu0 %v5609_v8, %s5015_s14 }
  0xc3   : > { %4727 = vmatmul.mubr.msk.bf16.gmra.mxu1 %vm1691_vm10, %v5682_v34  ;;  %4691 = vmatmul.mubr.msk.bf16.vlgmr.msra.gmra.mxu0 %vm1691_vm10, %v1623_v28  ;;  %v2244_v19 = vor.u32 %v2242_v20, %v2224_v61  ;;  %v6590_v28 = vshll.u32 %v5710_v52, 16 }
  0xc4   : > { %v1419_v56 = vpop.permute.xlu0 %1418  ;;  %2857 = vrot.lane.b32.xlu1 %v5617_v42, %s5015_s14  ;;  %4821 = vmatpush3.bf16.msra.mxu0 %v5469_v35  ;;  %v1421_v55 = vpop.permute.xlu1 %1420  ;;  %v2241_v35 = vor.u32 %v2240_v43, %v2217_v59  ;;  %v2823_v43 = vshrl.u32 %v5696_v15, 16 }
  0xc5   : > { %v1585_v7 = vsel %vm1522_vm8, %v1257_v47, %v1419_v56  ;;  %v2846_v56 = vrot.slane %v6589_v41, 1  ;;  %v1588_v47 = vsel %vm1522_vm8, %v5404_v26, %v1421_v55  ;;  %v2848_v41 = vrot.slane %v6590_v28, 1 }
  0xc6   : > { %2865 = vrot.lane.b32.xlu0 %v2844_v40, %s5016_s18  ;;  %v2243_v40 = vsel %vm1263_vm0, %v2241_v35, %v2242_v20  ;;  %v2248_v35 = vsel %vm5220_vm2, %v2244_v19, 0  ;;  %v2830_v26 = vshrl.u32 %v5710_v52, 16 }
  0xc8   : > { %v1499_v37 = vpop.permute.xlu0 %1498  ;;  %2867 = vrot.lane.b32.xlu1 %v2853_v46, %s5016_s18  ;;  %v1383_v14 = vpop.permute.xlu1 %1382  ;;  %v1248_v46 = vsel %vm5592_vm7, 0, %v5412_v5  ;;  %v2847_v5 = vor.u32 %v2846_v56, %v2823_v43  ;;  %v2850_v58 = vor.u32 %v2848_v41, %v2830_v26 }
  0xc9   : > { %v5719_v39 = vsel %vm1619_vm9, %v1585_v7, %v1499_v37  ;;  %v1531_v55 = vsel %vm1522_vm8, %v1248_v46, %v1383_v14  ;;  %v1258_v46 = vsel %vm5592_vm7, 0, %v5430_v22 }
  0xca   : > { %4730 = vmatprep.mubr.msk.bf16.mxu1 %vm1691_vm10, %v5719_v39  ;;  %2253 = vrot.lane.b32.xlu0 %v5650_v50, %s5015_s14 }
  0xcc   : > { %v1501_v7 = vpop.permute.xlu0 %1500  ;;  %2255 = vrot.lane.b32.xlu1 %v5664_v44, %s5015_s14  ;;  %v1385_v20 = vpop.permute.xlu1 %1384 }
  0xcd   : > { %v5740_v37 = vsel %vm1619_vm9, %v1588_v47, %v1501_v7  ;;  %v1534_v19 = vsel %vm1522_vm8, %v5416_v11, %v1385_v20  ;;  %v2849_v11 = vsel %vm1263_vm0, %v2847_v5, %v2848_v41  ;;  %v2854_v20 = vsel %vm5220_vm2, %v2850_v58, 0 }
  0xce   : > { %4731 = vmatmul.mubr.msk.bf16.gmra.mxu1 %vm1691_vm10, %v5740_v37  ;;  %2263 = vrot.lane.b32.xlu0 %v2243_v40, %s5016_s18 }
  0xd0   : > { %v1463_v47 = vpop.permute.xlu0 %1462  ;;  %2265 = vrot.lane.b32.xlu1 %v2248_v35, %s5016_s18  ;;  %v1465_v7 = vpop.permute.xlu1 %1464 }
  0xd1   : > { %v5757_v28 = vsel %vm1619_vm9, %v1531_v55, %v1463_v47  ;;  %v5762_v40 = vsel %vm1619_vm9, %v1534_v19, %v1465_v7 }
  0xd2   : > { %4694 = vmatprep.mubr.msk.bf16.mxu0 %vm1691_vm10, %v5757_v28  ;;  %2859 = vrot.lane.b32.xlu0 %v5696_v15, %s5015_s14 }
  0xd3   : > { %4695 = vmatmul.mubr.msk.bf16.gmra.mxu0 %vm1691_vm10, %v5762_v40 }
  0xd4   : > { %v1423_v14 = vpop.permute.xlu0 %1422  ;;  %2861 = vrot.lane.b32.xlu1 %v5710_v52, %s5015_s14  ;;  %v1425_v56 = vpop.permute.xlu1 %1424 }
  0xd5   : > { %v1591_v35 = vsel %vm1522_vm8, %v1258_v46, %v1423_v14  ;;  %v1594_v22 = vsel %vm1522_vm8, %v5420_v13, %v1425_v56 }
  0xd6   : > { %2869 = vrot.lane.b32.xlu0 %v2849_v11, %s5016_s18 }
  0xd8   : > { %v1503_v55 = vpop.permute.xlu0 %1502  ;;  %2871 = vrot.lane.b32.xlu1 %v2854_v20, %s5016_s18  ;;  %v1387_v41 = vpop.permute.xlu1 %1386 }
  0xd9   : > { %v5782_v5 = vsel %vm1619_vm9, %v1591_v35, %v1503_v55  ;;  %v1537_v7 = vsel %vm1522_vm8, %v1249_v60, %v1387_v41  ;;  %v1259_v35 = vsel %vm5592_vm7, 0, %v5451_v4 }
  0xda   : > { %4734 = vmatprep.mubr.msk.bf16.mxu1 %vm1691_vm10, %v5782_v5 }
  0xdc   : > { %v1505_v47 = vpop.permute.xlu0 %1504  ;;  %v1389_v58 = vpop.permute.xlu1 %1388 }
  0xdd   : > { %v5792_v19 = vsel %vm1619_vm9, %v1594_v22, %v1505_v47  ;;  %v1540_v14 = vsel %vm1522_vm8, %v5441_v0, %v1389_v58  ;;  %v1250_v58 = vsel %vm5592_vm7, 0, %v5467_v32 }
  0xde   : > { %4735 = vmatmul.mubr.msk.bf16.gmra.mxu1 %vm1691_vm10, %v5792_v19 }
  0xe0   : > { %v1467_v11 = vpop.permute.xlu0 %1466  ;;  %v1469_v46 = vpop.permute.xlu1 %1468 }
  0xe1   : > { %v5800_v13 = vsel %vm1619_vm9, %v1537_v7, %v1467_v11  ;;  %v5803_v56 = vsel %vm1619_vm9, %v1540_v14, %v1469_v46 }
  0xe2   : > { %4698 = vmatprep.mubr.msk.bf16.mxu0 %vm1691_vm10, %v5800_v13 }
  0xe3   : > { %4699 = vmatmul.mubr.msk.bf16.gmra.mxu0 %vm1691_vm10, %v5803_v56 }
  0xe4   : > { %v1427_v30 = vpop.permute.xlu0 %1426  ;;  %v1429_v20 = vpop.permute.xlu1 %1428 }
  0xe5   : > { %v1597_v0 = vsel %vm1522_vm8, %v1259_v35, %v1427_v30  ;;  %v1600_v47 = vsel %vm1522_vm8, %v5455_v18, %v1429_v20 }
  0xe8   : > { %v1507_v55 = vpop.permute.xlu0 %1506  ;;  %v1391_v41 = vpop.permute.xlu1 %1390 }
  0xe9   : > { %v5814_v22 = vsel %vm1619_vm9, %v1597_v0, %v1507_v55  ;;  %v1543_v11 = vsel %vm1522_vm8, %v1250_v58, %v1391_v41  ;;  %v1260_v0 = vsel %vm5592_vm7, 0, %v5486_v53 }
  0xea   : > { %4738 = vmatprep.mubr.msk.bf16.mxu1 %vm1691_vm10, %v5814_v22 }
  0xec   : > { %v1509_v60 = vpop.permute.xlu0 %1508  ;;  %v1393_v7 = vpop.permute.xlu1 %1392 }
  0xed   : > { %v5824_v4 = vsel %vm1619_vm9, %v1600_v47, %v1509_v60  ;;  %v1546_v46 = vsel %vm1522_vm8, %v5473_v1, %v1393_v7  ;;  %v1251_v7 = vsel %vm5592_vm7, 0, %v5493_v63 }
  0xee   : > { %4739 = vmatmul.mubr.msk.bf16.gmra.mxu1 %vm1691_vm10, %v5824_v4 }
  0xf0   : > { %v1471_v14 = vpop.permute.xlu0 %1470  ;;  %v1473_v30 = vpop.permute.xlu1 %1472 }
  0xf1   : > { %v5832_v18 = vsel %vm1619_vm9, %v1543_v11, %v1471_v14  ;;  %v5835_v20 = vsel %vm1619_vm9, %v1546_v46, %v1473_v30 }
  0xf2   : > { %4702 = vmatprep.mubr.msk.bf16.mxu0 %vm1691_vm10, %v5832_v18 }
  0xf3   : > { %4703 = vmatmul.mubr.msk.bf16.gmra.mxu0 %vm1691_vm10, %v5835_v20 }
  0xf4   : > { %v1431_v32 = vpop.permute.xlu0 %1430  ;;  %v1433_v35 = vpop.permute.xlu1 %1432 }
  0xf5   : > { %v1603_v1 = vsel %vm1522_vm8, %v1260_v0, %v1431_v32  ;;  %v1606_v60 = vsel %vm1522_vm8, %v5491_v33, %v1433_v35 }
  0xf8   : > { %v1511_v55 = vpop.permute.xlu0 %1510  ;;  %v1395_v41 = vpop.permute.xlu1 %1394 }
  0xf9   : > { %v5846_v47 = vsel %vm1619_vm9, %v1603_v1, %v1511_v55  ;;  %v1549_v14 = vsel %vm1522_vm8, %v1251_v7, %v1395_v41  ;;  %v1261_v1 = vsel %vm5592_vm7, 0, %v5509_v45 }
  0xfa   : > { %4742 = vmatprep.mubr.msk.bf16.mxu1 %vm1691_vm10, %v5846_v47 }
  0xfc   : > { %v1513_v58 = vpop.permute.xlu0 %1512  ;;  %v1397_v11 = vpop.permute.xlu1 %1396 }
  0xfd   : > { %v5856_v53 = vsel %vm1619_vm9, %v1606_v60, %v1513_v58  ;;  %v1552_v30 = vsel %vm1522_vm8, %v5497_v2, %v1397_v11  ;;  %v1252_v11 = vsel %vm5592_vm7, 0, %v5520_v48 }
  0xfe   : > { %4743 = vmatmul.mubr.msk.bf16.gmra.mxu1 %vm1691_vm10, %v5856_v53 }
 0x100   : > { %v1475_v46 = vpop.permute.xlu0 %1474  ;;  %v1477_v32 = vpop.permute.xlu1 %1476 }
 0x101   : > { %v5864_v33 = vsel %vm1619_vm9, %v1549_v14, %v1475_v46  ;;  %v5867_v35 = vsel %vm1619_vm9, %v1552_v30, %v1477_v32 }
 0x102   : > { %4706 = vmatprep.mubr.msk.bf16.mxu0 %vm1691_vm10, %v5864_v33 }
 0x103   : > { %4707 = vmatmul.mubr.msk.bf16.gmra.mxu0 %vm1691_vm10, %v5867_v35 }
 0x104   : > { %v1435_v63 = vpop.permute.xlu0 %1434  ;;  %v1437_v0 = vpop.permute.xlu1 %1436 }
 0x105   : > { %v1609_v2 = vsel %vm1522_vm8, %v1261_v1, %v1435_v63  ;;  %v1612_v58 = vsel %vm1522_vm8, %v5513_v38, %v1437_v0 }
 0x108   : > { %v1515_v55 = vpop.permute.xlu0 %1514  ;;  %v1399_v41 = vpop.permute.xlu1 %1398 }
 0x109   : > { %v5878_v60 = vsel %vm1619_vm9, %v1609_v2, %v1515_v55  ;;  %v1555_v46 = vsel %vm1522_vm8, %v1252_v11, %v1399_v41  ;;  %v1262_v2 = vsel %vm5592_vm7, 0, %v5541_v24 }
 0x10a   : > { %4746 = vmatprep.mubr.msk.bf16.mxu1 %vm1691_vm10, %v5878_v60 }
 0x10c   : > { %v1517_v7 = vpop.permute.xlu0 %1516  ;;  %v1401_v14 = vpop.permute.xlu1 %1400 }
 0x10d   : > { %v5888_v45 = vsel %vm1619_vm9, %v1612_v58, %v1517_v7  ;;  %v1558_v32 = vsel %vm1522_vm8, %v5530_v12, %v1401_v14  ;;  %v1253_v14 = vsel %vm5592_vm7, 0, %v5550_v51 }
 0x10e   : > { %4747 = vmatmul.mubr.msk.bf16.gmra.mxu1 %vm1691_vm10, %v5888_v45 }
 0x110   : > { %v1479_v30 = vpop.permute.xlu0 %1478  ;;  %v1481_v63 = vpop.permute.xlu1 %1480 }
 0x111   : > { %v1641_v38 = vsel %vm1619_vm9, %v1555_v46, %v1479_v30  ;;  %v1643_v0 = vsel %vm1619_vm9, %v1558_v32, %v1481_v63 }
 0x112   : > { %4710 = vmatprep.mubr.msk.bf16.mxu0 %vm1691_vm10, %v1641_v38 }
 0x113   : > { %4711 = vmatmul.mubr.msk.bf16.gmra.mxu0 %vm1691_vm10, %v1643_v0 }
 0x114   : > { %v1439_v48 = vpop.permute.xlu0 %1438  ;;  %v1441_v1 = vpop.permute.xlu1 %1440 }
 0x115   : > { %v1615_v55 = vsel %vm1522_vm8, %v1262_v2, %v1439_v48  ;;  %v1618_v7 = vsel %vm1522_vm8, %v5544_v21, %v1441_v1 }
 0x118   : > { %v1519_v41 = vpop.permute.xlu0 %1518  ;;  %v1403_v58 = vpop.permute.xlu1 %1402 }
 0x119   : > { %v5904_v12 = vsel %vm1619_vm9, %v1615_v55, %v1519_v41  ;;  %v1561_v30 = vsel %vm1522_vm8, %v1253_v14, %v1403_v58  ;;  %v2817_v14 = vrot.slane %v2815_v29, 7 }
 0x11a   : > { %4750 = vmatprep.mubr.msk.bf16.mxu1 %vm1691_vm10, %v5904_v12 }
 0x11c   : > { %v1521_v11 = vpop.permute.xlu0 %1520  ;;  %v1405_v46 = vpop.permute.xlu1 %1404 }
 0x11d   : > { %v5914_v24 = vsel %vm1619_vm9, %v1618_v7, %v1521_v11  ;;  %v1564_v21 = vsel %vm1522_vm8, %v5560_v23, %v1405_v46  ;;  %v2820_v46 = vor.u32 %v2818_v31, %v2817_v14 }
 0x11e   : > { %4751 = vmatmul.mubr.msk.bf16.gmra.mxu1 %vm1691_vm10, %v5914_v24 }
 0x11f   : > { %4756 = vmatprep.mubr.msk.bf16.mxu1 %vm1691_vm10, %v5757_v28  ;;  %v1254_v28 = vsel %vm5592_vm7, 0, %v5568_v62  ;;  %v2204_v62 = vrot.slane %v2202_v10, 7 }
 0x120   : > { %v1483_v32 = vpop.permute.xlu0 %1482  ;;  %v1485_v63 = vpop.permute.xlu1 %1484 }
 0x121   : > { %v1645_v48 = vsel %vm1619_vm9, %v1561_v30, %v1483_v32  ;;  %v1647_v51 = vsel %vm1619_vm9, %v1564_v21, %v1485_v63 }
 0x122   : > { %4714 = vmatprep.mubr.msk.bf16.mxu0 %vm1691_vm10, %v1645_v48 }
 0x123   : > { %4715 = vmatmul.mubr.msk.bf16.gmra.mxu0 %vm1691_vm10, %v1647_v51 }
 0x124   : > { %v1407_v1 = vpop.permute.xlu0 %1406  ;;  %v1409_v2 = vpop.permute.xlu1 %1408 }
 0x125   : > { %v1567_v23 = vsel %vm1522_vm8, %v1254_v28, %v1407_v1  ;;  %v1570_v41 = vsel %vm1522_vm8, %v5571_v6, %v1409_v2  ;;  %v2207_v6 = vor.u32 %v2205_v9, %v2204_v62  ;;  %v2226_v28 = vrot.slane %v2224_v61, 7 }
 0x126   : > { %4757 = vmatmul.mubr.msk.bf16.vlgmr.msra.gmra.mxu1 %vm1691_vm10, %v5762_v40 }
 0x127   : > { %4760 = vmatprep.mubr.msk.bf16.mxu1 %vm1691_vm10, %v5800_v13 }
 0x128   : > { %v1487_v55 = vpop.permute.xlu0 %1486 }
 0x129   : > { %v1489_v58 = vpop.permute.xlu1 %1488  ;;  %v1649_v7 = vsel %vm1619_vm9, %v1567_v23, %v1487_v55 }
 0x12a   : > { %v1651_v11 = vsel %vm1619_vm9, %v1570_v41, %v1489_v58  ;;  %4718 = vmatprep.mubr.msk.bf16.mxu0 %vm1691_vm10, %v1649_v7 }
 0x12b   : > { %4719 = vmatmul.mubr.msk.bf16.gmra.mxu0 %vm1691_vm10, %v1651_v11 }
 0x12c   : > { %4822 = vmatprep.mubr.msk.bf16.mxu0 %vm1691_vm10, %v5800_v13  ;;  %v2250_v40 = vpop.permute.xlu0 %2249  ;;  %v2211_v13 = vrot.slane %v2209_v17, 7 }
 0x12e   : > { %4761 = vmatmul.mubr.msk.bf16.gmra.mxu1 %vm1691_vm10, %v5803_v56  ;;  %v2214_v49 = vor.u32 %v2212_v27, %v2211_v13 }
 0x12f   : > { %4764 = vmatprep.mubr.msk.bf16.mxu1 %vm1691_vm10, %v5832_v18 }
 0x130   : > { %v2260_v9 = vpop.permute.xlu0 %2259 }
 0x133   : > { %4823 = vmatmul.mubr.msk.bf16.vlgmr.msra.gmra.mxu0 %vm1691_vm10, %v5803_v56  ;;  %v2233_v56 = vsel %vm5592_vm7, 0, %v2207_v6 }
 0x134   : > { %4826 = vmatprep.mubr.msk.bf16.mxu0 %vm1691_vm10, %v5832_v18  ;;  %v2269_v10 = vsel %vm1522_vm8, %v2233_v56, %v2250_v40  ;;  %v2252_v18 = vpop.permute.xlu1 %2251 }
 0x135   : > { %v2280_v17 = vsel %vm1619_vm9, %v2269_v10, %v2260_v9 }
 0x136   : > { %4765 = vmatmul.mubr.msk.bf16.gmra.mxu1 %vm1691_vm10, %v5835_v20 }
 0x137   : > { %4768 = vmatprep.mubr.msk.bf16.mxu1 %vm1691_vm10, %v5864_v33 }
 0x13b   : > { %4827 = vmatmul.mubr.msk.bf16.gmra.mxu0 %vm1691_vm10, %v5835_v20  ;;  %v2810_v20 = vrot.slane %v2808_v36, 7 }
 0x13c   : > { %4830 = vmatprep.mubr.msk.bf16.mxu0 %vm1691_vm10, %v5864_v33  ;;  %v2215_v33 = vsel %vm988_vm3, %v2204_v62, %v2214_v49 }
 0x13d   : > { %v2813_v57 = vor.u32 %v2811_v3, %v2810_v20  ;;  %v2272_v27 = vsel %vm1522_vm8, %v2215_v33, %v2252_v18  ;;  %v2821_v29 = vsel %vm988_vm3, %v2810_v20, %v2820_v46 }
 0x13e   : > { %4769 = vmatmul.mubr.msk.bf16.gmra.mxu1 %vm1691_vm10, %v5867_v35 }
 0x13f   : > { %4772 = vmatprep.mubr.msk.bf16.mxu1 %vm1691_vm10, %v1641_v38 }
 0x143   : > { %4831 = vmatmul.mubr.msk.bf16.gmra.mxu0 %vm1691_vm10, %v5867_v35  ;;  %v2262_v35 = vpop.permute.xlu1 %2261 }
 0x144   : > { %4834 = vmatprep.mubr.msk.bf16.mxu0 %vm1691_vm10, %v1641_v38  ;;  %v2856_v38 = vpop.permute.xlu0 %2855  ;;  %v2282_v36 = vsel %vm1619_vm9, %v2272_v27, %v2262_v35 }
 0x146   : > { %4773 = vmatmul.mubr.msk.bf16.gmra.mxu1 %vm1691_vm10, %v1643_v0 }
 0x147   : > { %4776 = vmatprep.mubr.msk.bf16.mxu1 %vm1691_vm10, %v1645_v48  ;;  %v2858_v30 = vpop.permute.xlu1 %2857 }
 0x148   : > { %v2866_v3 = vpop.permute.xlu0 %2865  ;;  %v2878_v21 = vsel %vm1522_vm8, %v2821_v29, %v2858_v30 }
 0x14b   : > { %4835 = vmatmul.mubr.msk.bf16.gmra.mxu0 %vm1691_vm10, %v1643_v0  ;;  %v2839_v0 = vsel %vm5592_vm7, 0, %v2813_v57  ;;  %v2868_v63 = vpop.permute.xlu1 %2867 }
 0x14c   : > { %4838 = vmatprep.mubr.msk.bf16.mxu0 %vm1691_vm10, %v1645_v48  ;;  %v2875_v8 = vsel %vm1522_vm8, %v2839_v0, %v2856_v38  ;;  %v2888_v42 = vsel %vm1619_vm9, %v2878_v21, %v2868_v63  ;;  %v2219_v48 = vrot.slane %v2217_v59, 7  ;;  %v2254_v59 = vpop.permute.xlu0 %2253 }
 0x14d   : > { %v2886_v32 = vsel %vm1619_vm9, %v2875_v8, %v2866_v3 }
 0x14e   : > { %4777 = vmatmul.mubr.msk.bf16.gmra.mxu1 %vm1691_vm10, %v1647_v51  ;;  %v2222_v2 = vor.u32 %v2220_v54, %v2219_v48 }
 0x14f   : > { %4780 = vmatprep.mubr.msk.bf16.mxu1 %vm1691_vm10, %v1649_v7  ;;  %v2256_v58 = vpop.permute.xlu1 %2255 }
 0x150   : > { %v2234_v55 = vsel %vm5592_vm7, 0, %v2222_v2 }
 0x151   : > { %v2275_v54 = vsel %vm1522_vm8, %v2234_v55, %v2254_v59 }
 0x153   : > { %4839 = vmatmul.mubr.msk.bf16.gmra.mxu0 %vm1691_vm10, %v1647_v51  ;;  %v2266_v56 = vpop.permute.xlu1 %2265 }
 0x154   : > { %4842 = vmatprep.mubr.msk.bf16.mxu0 %vm1691_vm10, %v1649_v7 }
 0x156   : > { %4781 = vmatmul.mubr.msk.bf16.gmra.mxu1 %vm1691_vm10, %v1651_v11 }
 0x157   : > { %4784 = vmatprep.mubr.msk.bf16.mxu1 %vm1691_vm10, %v2280_v17  ;;  %v2862_v25 = vpop.permute.xlu1 %2861 }
 0x15b   : > { %4843 = vmatmul.mubr.msk.bf16.gmra.mxu0 %vm1691_vm10, %v1651_v11  ;;  %v2825_v11 = vrot.slane %v2823_v43, 7  ;;  %v6599_v43 = vshll.u32 %v5696_v15, 16  ;;  %v2832_v15 = vrot.slane %v2830_v26, 7  ;;  %v2872_v8 = vpop.permute.xlu1 %2871 }
 0x15c   : > { %4846 = vmatprep.mubr.msk.bf16.mxu0 %vm1691_vm10, %v2280_v17 }
 0x15d   : > { %v2828_v13 = vor.u32 %v6599_v43, %v2825_v11 }
 0x15e   : > { %4785 = vmatmul.mubr.msk.bf16.gmra.mxu1 %vm1691_vm10, %v2282_v36 }
 0x15f   : > { %4788 = vmatprep.mubr.msk.bf16.mxu1 %vm1691_vm10, %v5637_v16  ;;  %v2840_v18 = vsel %vm5592_vm7, 0, %v2828_v13 }
 0x163   : > { %4847 = vmatmul.mubr.msk.bf16.gmra.mxu0 %vm1691_vm10, %v2282_v36 }
 0x164   : > { %4850 = vmatprep.mubr.msk.bf16.mxu0 %vm1691_vm10, %v2886_v32 }
 0x166   : > { %4789 = vmatmul.mubr.msk.bf16.gmra.mxu1 %vm1691_vm10, %v5682_v34 }
 0x167   : > { %4792 = vmatprep.mubr.msk.bf16.mxu1 %vm1691_vm10, %v5719_v39 }
 0x16b   : > { %4851 = vmatmul.mubr.msk.bf16.gmra.mxu0 %vm1691_vm10, %v2888_v42 }
 0x16c   : > { %4854 = vmatprep.mubr.msk.bf16.mxu0 %vm1691_vm10, %v5719_v39 }
 0x16e   : > { %4793 = vmatmul.mubr.msk.bf16.gmra.mxu1 %vm1691_vm10, %v5740_v37 }
 0x16f   : > { %4796 = vmatprep.mubr.msk.bf16.mxu1 %vm1691_vm10, %v5782_v5 }
 0x173   : > { %4855 = vmatmul.mubr.msk.bf16.gmra.mxu0 %vm1691_vm10, %v5740_v37 }
 0x174   : > { %4858 = vmatprep.mubr.msk.bf16.mxu0 %vm1691_vm10, %v5782_v5 }
 0x176   : > { %4797 = vmatmul.mubr.msk.bf16.gmra.mxu1 %vm1691_vm10, %v5792_v19 }
 0x177   : > { %4800 = vmatprep.mubr.msk.bf16.mxu1 %vm1691_vm10, %v5814_v22 }
 0x17a   : > { %v4724_v31 = vpop.f32.mrf.mxu1 }
 0x17b   : > { %4859 = vmatmul.mubr.msk.bf16.gmra.mxu0 %vm1691_vm10, %v5792_v19  ;;  %2087 = vst.msk [vmem:[#allocation2 + $0x110] sm:$0xff] %vm2052_vm11, %v4724_v31 }
 0x17c   : > { %4862 = vmatprep.mubr.msk.bf16.mxu0 %vm1691_vm10, %v5814_v22  ;;  %v1925_v16 = vpop.f32.mrf.mxu1 }
 0x17d   : > { %2085 = vst.msk [vmem:[#allocation2 + $0x100] sm:$0xff] %vm2052_vm11, %v1925_v16 }
 0x17e   : > { %4801 = vmatmul.mubr.msk.bf16.gmra.mxu1 %vm1691_vm10, %v5824_v4  ;;  %v4725_v34 = vpop.f32.mrf.mxu1 }
 0x17f   : > { %4804 = vmatprep.mubr.msk.bf16.mxu1 %vm1691_vm10, %v5846_v47  ;;  %2088 = vst.msk [vmem:[#allocation2 + $0x118] sm:$0xff] %vm2052_vm11, %v4725_v34 }
 0x180   : > { %v1928_v39 = vpop.f32.mrf.mxu1 }
 0x181   : > { %2086 = vst.msk [vmem:[#allocation2 + $0x108] sm:$0xff] %vm2052_vm11, %v1928_v39 }
 0x183   : > { %v4728_v37 = vpop.f32.mrf.mxu1  ;;  %v4692_v5 = vpop.f32.mrf.mxu0  ;;  %4863 = vmatmul.mubr.msk.bf16.gmra.mxu0 %vm1691_vm10, %v5824_v4 }
 0x184   : > { %2091 = vst.msk [vmem:[#allocation2 + $0x130] sm:$0xff] %vm2052_vm11, %v4728_v37  ;;  %2055 = vst.msk [vmem:[#allocation2 + $0x10] sm:$0xff] %vm2052_vm11, %v4692_v5  ;;  %4866 = vmatprep.mubr.msk.bf16.mxu0 %vm1691_vm10, %v5846_v47 }
 0x185   : > { %v1941_v19 = vpop.f32.mrf.mxu1  ;;  %v1797_v22 = vpop.f32.mrf.mxu0 }
 0x186   : > { %2089 = vst.msk [vmem:[#allocation2 + $0x120] sm:$0xff] %vm2052_vm11, %v1941_v19  ;;  %2053 = vst.msk [vmem:[#allocation2] sm:$0xff] %vm2052_vm11, %v1797_v22  ;;  %4805 = vmatmul.mubr.msk.bf16.gmra.mxu1 %vm1691_vm10, %v5856_v53 }
 0x187   : > { %v4729_v4 = vpop.f32.mrf.mxu1  ;;  %v4693_v51 = vpop.f32.mrf.mxu0  ;;  %4808 = vmatprep.mubr.msk.bf16.mxu1 %vm1691_vm10, %v5878_v60 }
 0x188   : > { %2092 = vst.msk [vmem:[#allocation2 + $0x138] sm:$0xff] %vm2052_vm11, %v4729_v4  ;;  %2056 = vst.msk [vmem:[#allocation2 + $0x18] sm:$0xff] %vm2052_vm11, %v4693_v51 }
 0x189   : > { %v1944_v47 = vpop.f32.mrf.mxu1  ;;  %v1800_v1 = vpop.f32.mrf.mxu0 }
 0x18a   : > { %2090 = vst.msk [vmem:[#allocation2 + $0x128] sm:$0xff] %vm2052_vm11, %v1944_v47  ;;  %2054 = vst.msk [vmem:[#allocation2 + $0x8] sm:$0xff] %vm2052_vm11, %v1800_v1 }
 0x18b   : > { %4867 = vmatmul.mubr.msk.bf16.gmra.mxu0 %vm1691_vm10, %v5856_v53  ;;  %v6598_v53 = vshll.u32 %v5664_v44, 16 }
 0x18c   : > { %4870 = vmatprep.mubr.msk.bf16.mxu0 %vm1691_vm10, %v5878_v60  ;;  %v2264_v60 = vpop.permute.xlu0 %2263 }
 0x18d   : > { %v2229_v61 = vor.u32 %v6598_v53, %v2226_v28  ;;  %v2284_v44 = vsel %vm1619_vm9, %v2275_v54, %v2264_v60 }
 0x18e   : > { %v4732_v23 = vpop.f32.mrf.mxu1  ;;  %4809 = vmatmul.mubr.msk.bf16.gmra.mxu1 %vm1691_vm10, %v5888_v45 }
 0x18f   : > { %2095 = vst.msk [vmem:[#allocation2 + $0x150] sm:$0xff] %vm2052_vm11, %v4732_v23  ;;  %4812 = vmatprep.mubr.msk.bf16.mxu1 %vm1691_vm10, %v5904_v12  ;;  %v2230_v40 = vsel %vm988_vm3, %v2219_v48, %v2229_v61  ;;  %v2120_v13 = vld [vmem:[#allocation2 + $0x18] sm:$0xff] }
 0x190   : > { %v1957_v50 = vpop.f32.mrf.mxu1  ;;  %v2860_v10 = vpop.permute.xlu0 %2859 }
 0x191   : > { %2093 = vst.msk [vmem:[#allocation2 + $0x140] sm:$0xff] %vm2052_vm11, %v1957_v50  ;;  %v2881_v17 = vsel %vm1522_vm8, %v2840_v18, %v2860_v10 }
 0x192   : > { %v4733_v41 = vpop.f32.mrf.mxu1 }
 0x193   : > { %2096 = vst.msk [vmem:[#allocation2 + $0x158] sm:$0xff] %vm2052_vm11, %v4733_v41  ;;  %v4696_v7 = vpop.f32.mrf.mxu0  ;;  %4871 = vmatmul.mubr.msk.bf16.gmra.mxu0 %vm1691_vm10, %v5888_v45 }
 0x194   : > { %2059 = vst.msk [vmem:[#allocation2 + $0x30] sm:$0xff] %vm2052_vm11, %v4696_v7  ;;  %v1960_v62 = vpop.f32.mrf.mxu1  ;;  %4874 = vmatprep.mubr.msk.bf16.mxu0 %vm1691_vm10, %v5904_v12  ;;  %v2278_v12 = vsel %vm1522_vm8, %v2230_v40, %v2256_v58  ;;  %v2870_v33 = vpop.permute.xlu0 %2869  ;;  %v2119_v7 = vld [vmem:[#allocation2 + $0x10] sm:$0xff] }
 0x195   : > { %2094 = vst.msk [vmem:[#allocation2 + $0x148] sm:$0xff] %vm2052_vm11, %v1960_v62  ;;  %v1813_v6 = vpop.f32.mrf.mxu0  ;;  %v2286_v9 = vsel %vm1619_vm9, %v2278_v12, %v2266_v56  ;;  %v2890_v35 = vsel %vm1619_vm9, %v2881_v17, %v2870_v33 }
 0x196   : > { %2057 = vst.msk [vmem:[#allocation2 + $0x20] sm:$0xff] %vm2052_vm11, %v1813_v6  ;;  %4813 = vmatmul.mubr.msk.bf16.gmra.mxu1 %vm1691_vm10, %v5914_v24  ;;  %v2117_v6 = vld [vmem:[#allocation2] sm:$0xff] }
 0x197   : > { %v4697_v45 = vpop.f32.mrf.mxu0  ;;  %4816 = vmatprep.mubr.msk.bf16.mxu1 %vm1691_vm10, %v2284_v44 }
 0x198   : > { %2060 = vst.msk [vmem:[#allocation2 + $0x38] sm:$0xff] %vm2052_vm11, %v4697_v45 }
 0x199   : > { %v1816_v49 = vpop.f32.mrf.mxu0 }
 0x19a   : > { %2058 = vst.msk [vmem:[#allocation2 + $0x28] sm:$0xff] %vm2052_vm11, %v1816_v49  ;;  %v2118_v49 = vld [vmem:[#allocation2 + $0x8] sm:$0xff] }
 0x19b   : > { %4875 = vmatmul.mubr.msk.bf16.gmra.mxu0 %vm1691_vm10, %v5914_v24  ;;  %v6600_v24 = vshll.u32 %v5710_v52, 16 }
 0x19c   : > { %4878 = vmatprep.mubr.msk.bf16.mxu0 %vm1691_vm10, %v2284_v44 }
 0x19d   : > { %v2835_v27 = vor.u32 %v6600_v24, %v2832_v15  ;;  %v2121_v24 = vld [vmem:[#allocation2 + $0x20] sm:$0xff] }
 0x19e   : > { %v4736_v20 = vpop.f32.mrf.mxu1  ;;  %4817 = vmatmul.mubr.msk.bf16.gmra.mxu1 %vm1691_vm10, %v2286_v9 }
 0x19f   : > { %2099 = vst.msk [vmem:[#allocation2 + $0x170] sm:$0xff] %vm2052_vm11, %v4736_v20  ;;  %v2836_v36 = vsel %vm988_vm3, %v2825_v11, %v2835_v27  ;;  %v2123_v20 = vld [vmem:[#allocation2 + $0x30] sm:$0xff] }
 0x1a0   : > { %v1973_v57 = vpop.f32.mrf.mxu1  ;;  %v2884_v14 = vsel %vm1522_vm8, %v2836_v36, %v2862_v25 }
 0x1a1   : > { %2097 = vst.msk [vmem:[#allocation2 + $0x160] sm:$0xff] %vm2052_vm11, %v1973_v57  ;;  %v2892_v30 = vsel %vm1619_vm9, %v2884_v14, %v2872_v8  ;;  %v2122_v8 = vld [vmem:[#allocation2 + $0x28] sm:$0xff] }
 0x1a2   : > { %v4737_v26 = vpop.f32.mrf.mxu1 }
 0x1a3   : > { %2100 = vst.msk [vmem:[#allocation2 + $0x178] sm:$0xff] %vm2052_vm11, %v4737_v26  ;;  %v4700_v38 = vpop.f32.mrf.mxu0  ;;  %4879 = vmatmul.mubr.msk.bf16.gmra.mxu0 %vm1691_vm10, %v2286_v9  ;;  %v2124_v26 = vld [vmem:[#allocation2 + $0x38] sm:$0xff] }
 0x1a4   : > { %2063 = vst.msk [vmem:[#allocation2 + $0x50] sm:$0xff] %vm2052_vm11, %v4700_v38  ;;  %v1976_v0 = vpop.f32.mrf.mxu1  ;;  %4882 = vmatprep.mubr.msk.bf16.mxu0 %vm1691_vm10, %v2890_v35 }
 0x1a5   : > { %2098 = vst.msk [vmem:[#allocation2 + $0x168] sm:$0xff] %vm2052_vm11, %v1976_v0  ;;  %v1829_v52 = vpop.f32.mrf.mxu0 }
 0x1a6   : > { %2061 = vst.msk [vmem:[#allocation2 + $0x40] sm:$0xff] %vm2052_vm11, %v1829_v52 }
 0x1a7   : > { %v4701_v3 = vpop.f32.mrf.mxu0 }
 0x1a8   : > { %2064 = vst.msk [vmem:[#allocation2 + $0x58] sm:$0xff] %vm2052_vm11, %v4701_v3 }
 0x1a9   : > { %v1832_v46 = vpop.f32.mrf.mxu0 }
 0x1aa   : > { %2062 = vst.msk [vmem:[#allocation2 + $0x48] sm:$0xff] %vm2052_vm11, %v1832_v46 }
 0x1ab   : > { %4883 = vmatmul.mubr.msk.bf16.gmra.mxu0 %vm1691_vm10, %v2892_v30 }
 0x1ae   : > { %v4740_v32 = vpop.f32.mrf.mxu1 }
 0x1af   : > { %2103 = vst.msk [vmem:[#allocation2 + $0x190] sm:$0xff] %vm2052_vm11, %v4740_v32 }
 0x1b0   : > { %v1989_v29 = vpop.f32.mrf.mxu1 }
 0x1b1   : > { %2101 = vst.msk [vmem:[#allocation2 + $0x180] sm:$0xff] %vm2052_vm11, %v1989_v29 }
 0x1b2   : > { %v4741_v21 = vpop.f32.mrf.mxu1 }
 0x1b3   : > { %2104 = vst.msk [vmem:[#allocation2 + $0x198] sm:$0xff] %vm2052_vm11, %v4741_v21  ;;  %v4704_v63 = vpop.f32.mrf.mxu0  ;;  %v2127_v21 = vld [vmem:[#allocation2 + $0x50] sm:$0xff] }
 0x1b4   : > { %2067 = vst.msk [vmem:[#allocation2 + $0x70] sm:$0xff] %vm2052_vm11, %v4704_v63  ;;  %v1992_v42 = vpop.f32.mrf.mxu1 }
 0x1b5   : > { %2102 = vst.msk [vmem:[#allocation2 + $0x188] sm:$0xff] %vm2052_vm11, %v1992_v42  ;;  %v1845_v31 = vpop.f32.mrf.mxu0 }
 0x1b6   : > { %2065 = vst.msk [vmem:[#allocation2 + $0x60] sm:$0xff] %vm2052_vm11, %v1845_v31 }
 0x1b7   : > { %v4705_v16 = vpop.f32.mrf.mxu0 }
 0x1b8   : > { %2068 = vst.msk [vmem:[#allocation2 + $0x78] sm:$0xff] %vm2052_vm11, %v4705_v16 }
 0x1b9   : > { %v1848_v34 = vpop.f32.mrf.mxu0 }
 0x1ba   : > { %2066 = vst.msk [vmem:[#allocation2 + $0x68] sm:$0xff] %vm2052_vm11, %v1848_v34 }
 0x1be   : > { %v4744_v39 = vpop.f32.mrf.mxu1 }
 0x1bf   : > { %2107 = vst.msk [vmem:[#allocation2 + $0x1b0] sm:$0xff] %vm2052_vm11, %v4744_v39  ;;  %v2125_v39 = vld [vmem:[#allocation2 + $0x40] sm:$0xff] }
 0x1c0   : > { %v2005_v37 = vpop.f32.mrf.mxu1 }
 0x1c1   : > { %2105 = vst.msk [vmem:[#allocation2 + $0x1a0] sm:$0xff] %vm2052_vm11, %v2005_v37 }
 0x1c2   : > { %v4745_v5 = vpop.f32.mrf.mxu1 }
 0x1c3   : > { %2108 = vst.msk [vmem:[#allocation2 + $0x1b8] sm:$0xff] %vm2052_vm11, %v4745_v5  ;;  %v4708_v19 = vpop.f32.mrf.mxu0 }
 0x1c4   : > { %2071 = vst.msk [vmem:[#allocation2 + $0x90] sm:$0xff] %vm2052_vm11, %v4708_v19  ;;  %v2008_v22 = vpop.f32.mrf.mxu1 }
 0x1c5   : > { %2106 = vst.msk [vmem:[#allocation2 + $0x1a8] sm:$0xff] %vm2052_vm11, %v2008_v22  ;;  %v1861_v48 = vpop.f32.mrf.mxu0 }
 0x1c6   : > { %2069 = vst.msk [vmem:[#allocation2 + $0x80] sm:$0xff] %vm2052_vm11, %v1861_v48 }
 0x1c7   : > { %v4709_v4 = vpop.f32.mrf.mxu0 }
 0x1c8   : > { %2072 = vst.msk [vmem:[#allocation2 + $0x98] sm:$0xff] %vm2052_vm11, %v4709_v4  ;;  %v2128_v4 = vld [vmem:[#allocation2 + $0x58] sm:$0xff] }
 0x1c9   : > { %v1864_v51 = vpop.f32.mrf.mxu0 }
 0x1ca   : > { %2070 = vst.msk [vmem:[#allocation2 + $0x88] sm:$0xff] %vm2052_vm11, %v1864_v51 }
 0x1ce   : > { %v4748_v47 = vpop.f32.mrf.mxu1 }
 0x1cf   : > { %2111 = vst.msk [vmem:[#allocation2 + $0x1d0] sm:$0xff] %vm2052_vm11, %v4748_v47  ;;  %v6178_v47 = vld [vmem:[%s6587_s4] ss:$0 sm:$0xff] }
 0x1d0   : > { %v2021_v1 = vpop.f32.mrf.mxu1 }
 0x1d1   : > { %2109 = vst.msk [vmem:[#allocation2 + $0x1c0] sm:$0xff] %vm2052_vm11, %v2021_v1 }
 0x1d2   : > { %v4749_v2 = vpop.f32.mrf.mxu1 }
 0x1d3   : > { %2112 = vst.msk [vmem:[#allocation2 + $0x1d8] sm:$0xff] %vm2052_vm11, %v4749_v2  ;;  %v4712_v59 = vpop.f32.mrf.mxu0 }
 0x1d4   : > { %2075 = vst.msk [vmem:[#allocation2 + $0xb0] sm:$0xff] %vm2052_vm11, %v4712_v59  ;;  %v2024_v28 = vpop.f32.mrf.mxu1 }
 0x1d5   : > { %2110 = vst.msk [vmem:[#allocation2 + $0x1c8] sm:$0xff] %vm2052_vm11, %v2024_v28  ;;  %v1877_v23 = vpop.f32.mrf.mxu0 }
 0x1d6   : > { %2073 = vst.msk [vmem:[#allocation2 + $0xa0] sm:$0xff] %vm2052_vm11, %v1877_v23  ;;  %v2126_v23 = vld [vmem:[#allocation2 + $0x48] sm:$0xff] }
 0x1d7   : > { %v4713_v55 = vpop.f32.mrf.mxu0 }
 0x1d8   : > { %2076 = vst.msk [vmem:[#allocation2 + $0xb8] sm:$0xff] %vm2052_vm11, %v4713_v55 }
 0x1d9   : > { %v1880_v50 = vpop.f32.mrf.mxu0 }
 0x1da   : > { %2074 = vst.msk [vmem:[#allocation2 + $0xa8] sm:$0xff] %vm2052_vm11, %v1880_v50 }
 0x1de   : > { %v4752_v54 = vpop.f32.mrf.mxu1 }
 0x1df   : > { %2115 = vst.msk [vmem:[#allocation2 + $0x1f0] sm:$0xff] %vm2052_vm11, %v4752_v54 }
 0x1e0   : > { %v2037_v53 = vpop.f32.mrf.mxu1 }
 0x1e1   : > { %2113 = vst.msk [vmem:[#allocation2 + $0x1e0] sm:$0xff] %vm2052_vm11, %v2037_v53 }
 0x1e2   : > { %v4753_v61 = vpop.f32.mrf.mxu1 }
 0x1e3   : > { %2116 = vst.msk [vmem:[#allocation2 + $0x1f8] sm:$0xff] %vm2052_vm11, %v4753_v61  ;;  %v4716_v60 = vpop.f32.mrf.mxu0 }
 0x1e4   : > { %2079 = vst.msk [vmem:[#allocation2 + $0xd0] sm:$0xff] %vm2052_vm11, %v4716_v60  ;;  %v2040_v41 = vpop.f32.mrf.mxu1 }
 0x1e5   : > { %2114 = vst.msk [vmem:[#allocation2 + $0x1e8] sm:$0xff] %vm2052_vm11, %v2040_v41  ;;  %v1893_v58 = vpop.f32.mrf.mxu0 }
 0x1e6   : > { %2077 = vst.msk [vmem:[#allocation2 + $0xc0] sm:$0xff] %vm2052_vm11, %v1893_v58  ;;  %v4758_v11 = vpop.f32.mrf.mxu1  ;;  %v2131_v58 = vld [vmem:[#allocation2 + $0x70] sm:$0xff] }
 0x1e7   : > { %v2597_v62 = vadd.f32 %v4758_v11, %v2119_v7  ;;  %v4717_v44 = vpop.f32.mrf.mxu0 }
 0x1e8   : > { %2080 = vst.msk [vmem:[#allocation2 + $0xd8] sm:$0xff] %vm2052_vm11, %v4717_v44  ;;  %v2340_v40 = vpop.f32.mrf.mxu1 }
 0x1e9   : > { %2661 = vst.msk [vmem:[#allocation2 + $0x10] sm:$0xff] %vm2052_vm11, %v2597_v62  ;;  %v2595_v45 = vadd.f32 %v2340_v40, %v2117_v6  ;;  %v1896_v43 = vpop.f32.mrf.mxu0 }
 0x1ea   : > { %2078 = vst.msk [vmem:[#allocation2 + $0xc8] sm:$0xff] %vm2052_vm11, %v1896_v43  ;;  %v4759_v12 = vpop.f32.mrf.mxu1 }
 0x1eb   : > { %2659 = vst.msk [vmem:[#allocation2] sm:$0xff] %vm2052_vm11, %v2595_v45  ;;  %v2598_v56 = vadd.f32 %v4759_v12, %v2120_v13  ;;  %v4720_v10 = vpop.f32.mrf.mxu0  ;;  %v2129_v13 = vld [vmem:[#allocation2 + $0x60] sm:$0xff] }
 0x1ec   : > { %2083 = vst.msk [vmem:[#allocation2 + $0xf0] sm:$0xff] %vm2052_vm11, %v4720_v10  ;;  %v2343_v9 = vpop.f32.mrf.mxu1 }
 0x1ed   : > { %2662 = vst.msk [vmem:[#allocation2 + $0x18] sm:$0xff] %vm2052_vm11, %v2598_v56  ;;  %v2596_v18 = vadd.f32 %v2343_v9, %v2118_v49  ;;  %v1909_v15 = vpop.f32.mrf.mxu0 }
 0x1ee   : > { %2081 = vst.msk [vmem:[#allocation2 + $0xe0] sm:$0xff] %vm2052_vm11, %v1909_v15  ;;  %v4762_v17 = vpop.f32.mrf.mxu1 }
 0x1ef   : > { %2660 = vst.msk [vmem:[#allocation2 + $0x8] sm:$0xff] %vm2052_vm11, %v2596_v18  ;;  %v2601_v33 = vadd.f32 %v4762_v17, %v2123_v20  ;;  %v4721_v57 = vpop.f32.mrf.mxu0 }
 0x1f0   : > { %2084 = vst.msk [vmem:[#allocation2 + $0xf8] sm:$0xff] %vm2052_vm11, %v4721_v57  ;;  %v2356_v27 = vpop.f32.mrf.mxu1  ;;  %v2725_v0 = vld [vmem:[#allocation2 + $0x10] sm:$0xff] }
 0x1f1   : > { %2665 = vst.msk [vmem:[#allocation2 + $0x30] sm:$0xff] %vm2052_vm11, %v2601_v33  ;;  %v2599_v25 = vadd.f32 %v2356_v27, %v2121_v24  ;;  %v1912_v35 = vpop.f32.mrf.mxu0  ;;  %v2132_v33 = vld [vmem:[#allocation2 + $0x78] sm:$0xff] }
 0x1f2   : > { %2082 = vst.msk [vmem:[#allocation2 + $0xe8] sm:$0xff] %vm2052_vm11, %v1912_v35  ;;  %v4763_v38 = vpop.f32.mrf.mxu1  ;;  %v2723_v30 = vld [vmem:[#allocation2] sm:$0xff] }
 0x1f3   : > { %2663 = vst.msk [vmem:[#allocation2 + $0x20] sm:$0xff] %vm2052_vm11, %v2599_v25  ;;  %v2602_v36 = vadd.f32 %v4763_v38, %v2124_v26  ;;  %v4824_v52 = vpop.f32.mrf.mxu0 }
 0x1f4   : > { %v3203_v14 = vadd.f32 %v4824_v52, %v2725_v0  ;;  %v2359_v3 = vpop.f32.mrf.mxu1  ;;  %v2726_v31 = vld [vmem:[#allocation2 + $0x18] sm:$0xff]  ;;  %v2130_v52 = vld [vmem:[#allocation2 + $0x68] sm:$0xff] }
 0x1f5   : > { %2666 = vst.msk [vmem:[#allocation2 + $0x38] sm:$0xff] %vm2052_vm11, %v2602_v36  ;;  %v2600_v46 = vadd.f32 %v2359_v3, %v2122_v8  ;;  %v2946_v32 = vpop.f32.mrf.mxu0 }
 0x1f6   : > { %3267 = vst.msk [vmem:[#allocation2 + $0x10] sm:$0xff] %vm2052_vm11, %v3203_v14  ;;  %v3201_v29 = vadd.f32 %v2946_v32, %v2723_v30  ;;  %v4766_v63 = vpop.f32.mrf.mxu1  ;;  %v2724_v19 = vld [vmem:[#allocation2 + $0x8] sm:$0xff] }
 0x1f7   : > { %2664 = vst.msk [vmem:[#allocation2 + $0x28] sm:$0xff] %vm2052_vm11, %v2600_v46  ;;  %v2605_v42 = vadd.f32 %v4766_v63, %v2127_v21  ;;  %v4825_v16 = vpop.f32.mrf.mxu0 }
 0x1f8   : > { %3265 = vst.msk [vmem:[#allocation2] sm:$0xff] %vm2052_vm11, %v3201_v29  ;;  %v3204_v34 = vadd.f32 %v4825_v16, %v2726_v31  ;;  %v2372_v37 = vpop.f32.mrf.mxu1  ;;  %v2729_v2 = vld [vmem:[#allocation2 + $0x30] sm:$0xff] }
 0x1f9   : > { %2669 = vst.msk [vmem:[#allocation2 + $0x50] sm:$0xff] %vm2052_vm11, %v2605_v42  ;;  %v2603_v5 = vadd.f32 %v2372_v37, %v2125_v39  ;;  %v2949_v22 = vpop.f32.mrf.mxu0  ;;  %v2135_v42 = vld [vmem:[#allocation2 + $0x90] sm:$0xff] }
 0x1fa   : > { %3268 = vst.msk [vmem:[#allocation2 + $0x18] sm:$0xff] %vm2052_vm11, %v3204_v34  ;;  %v3202_v48 = vadd.f32 %v2949_v22, %v2724_v19  ;;  %v4767_v51 = vpop.f32.mrf.mxu1  ;;  %v2727_v53 = vld [vmem:[#allocation2 + $0x20] sm:$0xff] }
 0x1fb   : > { %2667 = vst.msk [vmem:[#allocation2 + $0x40] sm:$0xff] %vm2052_vm11, %v2603_v5  ;;  %v2606_v1 = vadd.f32 %v4767_v51, %v2128_v4  ;;  %v4828_v59 = vpop.f32.mrf.mxu0  ;;  %v2133_v4 = vld [vmem:[#allocation2 + $0x80] sm:$0xff] }
 0x1fc   : > { %3266 = vst.msk [vmem:[#allocation2 + $0x8] sm:$0xff] %vm2052_vm11, %v3202_v48  ;;  %v3207_v28 = vadd.f32 %v4828_v59, %v2729_v2  ;;  %v2375_v55 = vpop.f32.mrf.mxu1  ;;  %v2730_v44 = vld [vmem:[#allocation2 + $0x38] sm:$0xff] }
 0x1fd   : > { %v3331_v50 = vld [vmem:[#allocation2 + $0x10] sm:$0xff]  ;;  %2670 = vst.msk [vmem:[#allocation2 + $0x58] sm:$0xff] %vm2052_vm11, %v2606_v1  ;;  %v2604_v54 = vadd.f32 %v2375_v55, %v2126_v23  ;;  %v2962_v61 = vpop.f32.mrf.mxu0 }
 0x1fe   : > { %v3402_v60 = vadd.f32 %v6178_v47, %v3331_v50  ;;  %3271 = vst.msk [vmem:[#allocation2 + $0x30] sm:$0xff] %vm2052_vm11, %v3207_v28  ;;  %v3205_v41 = vadd.f32 %v2962_v61, %v2727_v53  ;;  %v4770_v7 = vpop.f32.mrf.mxu1  ;;  %v2728_v49 = vld [vmem:[#allocation2 + $0x28] sm:$0xff]  ;;  %v2136_v53 = vld [vmem:[#allocation2 + $0x98] sm:$0xff] }
 0x1ff   : > { %v3329_v11 = vld [vmem:[#allocation2] sm:$0xff]  ;;  %2668 = vst.msk [vmem:[#allocation2 + $0x48] sm:$0xff] %vm2052_vm11, %v2604_v54  ;;  %v2609_v62 = vadd.f32 %v4770_v7, %v2131_v58  ;;  %v4829_v6 = vpop.f32.mrf.mxu0 }
 0x200   : > { %v3466_v40 = vmax.f32 %v3402_v60, 0.0  ;;  %v3400_v45 = vadd.f32 %v6178_v47, %v3329_v11  ;;  %3269 = vst.msk [vmem:[#allocation2 + $0x20] sm:$0xff] %vm2052_vm11, %v3205_v41  ;;  %v3208_v43 = vadd.f32 %v4829_v6, %v2730_v44  ;;  %v2388_v12 = vpop.f32.mrf.mxu1  ;;  %v2733_v25 = vld [vmem:[#allocation2 + $0x50] sm:$0xff] }
 0x201   : > { %v3332_v56 = vld [vmem:[#allocation2 + $0x18] sm:$0xff]  ;;  %2673 = vst.msk [vmem:[#allocation2 + $0x70] sm:$0xff] %vm2052_vm11, %v2609_v62  ;;  %v2607_v10 = vadd.f32 %v2388_v12, %v2129_v13  ;;  %v2965_v9 = vpop.f32.mrf.mxu0 }
 0x202   : > { %v4525_v18 = vpack.c.bf16 %v3466_v40, %v3466_v40  ;;  %v3464_v15 = vmax.f32 %v3400_v45, 0.0  ;;  %v3403_v20 = vadd.f32 %v6178_v47, %v3332_v56  ;;  %3272 = vst.msk [vmem:[#allocation2 + $0x38] sm:$0xff] %vm2052_vm11, %v3208_v43  ;;  %v3206_v17 = vadd.f32 %v2965_v9, %v2728_v49  ;;  %v4771_v57 = vpop.f32.mrf.mxu1  ;;  %v2731_v46 = vld [vmem:[#allocation2 + $0x40] sm:$0xff]  ;;  %v2134_v40 = vld [vmem:[#allocation2 + $0x88] sm:$0xff] }
 0x203   : > { %v3330_v24 = vld [vmem:[#allocation2 + $0x8] sm:$0xff]  ;;  %2671 = vst.msk [vmem:[#allocation2 + $0x60] sm:$0xff] %vm2052_vm11, %v2607_v10  ;;  %v2610_v27 = vadd.f32 %v4771_v57, %v2132_v33  ;;  %v4832_v35 = vpop.f32.mrf.mxu0 }
 0x204   : > { %3787 = vst.msk [vmem:[%s6193_s8 + $0x8] sm:$0xf] %vm3784_vm12, %v4525_v18  ;;  %v4523_v26 = vpack.c.bf16 %v3464_v15, %v3464_v15  ;;  %v3467_v38 = vmax.f32 %v3403_v20, 0.0  ;;  %v3401_v36 = vadd.f32 %v6178_v47, %v3330_v24  ;;  %v3211_v0 = vadd.f32 %v4832_v35, %v2733_v25  ;;  %v2391_v14 = vpop.f32.mrf.mxu1  ;;  %v2734_v39 = vld [vmem:[#allocation2 + $0x58] sm:$0xff]  ;;  %v2139_v15 = vld [vmem:[#allocation2 + $0xb0] sm:$0xff] }
 0x205   : > { %3270 = vst.msk [vmem:[#allocation2 + $0x28] sm:$0xff] %vm2052_vm11, %v3206_v17  ;;  %v3335_v8 = vld [vmem:[#allocation2 + $0x30] sm:$0xff]  ;;  %2674 = vst.msk [vmem:[#allocation2 + $0x78] sm:$0xff] %vm2052_vm11, %v2610_v27  ;;  %v2608_v3 = vadd.f32 %v2391_v14, %v2130_v52  ;;  %v2978_v30 = vpop.f32.mrf.mxu0 }
 0x206   : > { %3785 = vst.msk [vmem:[%s6193_s8] sm:$0xf] %vm3784_vm12, %v4523_v26  ;;  %v4526_v32 = vpack.c.bf16 %v3467_v38, %v3467_v38  ;;  %v3465_v29 = vmax.f32 %v3401_v36, 0.0  ;;  %v3406_v21 = vadd.f32 %v6178_v47, %v3335_v8  ;;  %v3209_v63 = vadd.f32 %v2978_v30, %v2731_v46  ;;  %v4774_v31 = vpop.f32.mrf.mxu1  ;;  %v2732_v59 = vld [vmem:[#allocation2 + $0x48] sm:$0xff]  ;;  %v2137_v38 = vld [vmem:[#allocation2 + $0xa0] sm:$0xff] }
 0x207   : > { %3275 = vst.msk [vmem:[#allocation2 + $0x50] sm:$0xff] %vm2052_vm11, %v3211_v0  ;;  %v3333_v16 = vld [vmem:[#allocation2 + $0x20] sm:$0xff]  ;;  %2672 = vst.msk [vmem:[#allocation2 + $0x68] sm:$0xff] %vm2052_vm11, %v2608_v3  ;;  %v2613_v34 = vadd.f32 %v4774_v31, %v2135_v42  ;;  %v4833_v37 = vpop.f32.mrf.mxu0 }
 0x208   : > { %3788 = vst.msk [vmem:[%s6193_s8 + $0xc] sm:$0xf] %vm3784_vm12, %v4526_v32  ;;  %v4524_v5 = vpack.c.bf16 %v3465_v29, %v3465_v29  ;;  %v3470_v19 = vmax.f32 %v3406_v21, 0.0  ;;  %v3404_v22 = vadd.f32 %v6178_v47, %v3333_v16  ;;  %v3212_v48 = vadd.f32 %v4833_v37, %v2734_v39  ;;  %v2404_v51 = vpop.f32.mrf.mxu1  ;;  %v2737_v58 = vld [vmem:[#allocation2 + $0x70] sm:$0xff]  ;;  %v2140_v29 = vld [vmem:[#allocation2 + $0xb8] sm:$0xff] }
 0x209   : > { %3273 = vst.msk [vmem:[#allocation2 + $0x40] sm:$0xff] %vm2052_vm11, %v3209_v63  ;;  %v3336_v1 = vld [vmem:[#allocation2 + $0x38] sm:$0xff]  ;;  %2677 = vst.msk [vmem:[#allocation2 + $0x90] sm:$0xff] %vm2052_vm11, %v2613_v34  ;;  %v2611_v2 = vadd.f32 %v2404_v51, %v2133_v4  ;;  %v2981_v28 = vpop.f32.mrf.mxu0 }
 0x20a   : > { %3786 = vst.msk [vmem:[%s6193_s8 + $0x4] sm:$0xf] %vm3784_vm12, %v4524_v5  ;;  %v4529_v23 = vpack.c.bf16 %v3470_v19, %v3470_v19  ;;  %v3468_v55 = vmax.f32 %v3404_v22, 0.0  ;;  %v3407_v50 = vadd.f32 %v6178_v47, %v3336_v1  ;;  %v3210_v54 = vadd.f32 %v2981_v28, %v2732_v59  ;;  %v4775_v61 = vpop.f32.mrf.mxu1  ;;  %v2735_v12 = vld [vmem:[#allocation2 + $0x60] sm:$0xff]  ;;  %v2138_v19 = vld [vmem:[#allocation2 + $0xa8] sm:$0xff] }
 0x20b   : > { %3276 = vst.msk [vmem:[#allocation2 + $0x58] sm:$0xff] %vm2052_vm11, %v3212_v48  ;;  %2675 = vst.msk [vmem:[#allocation2 + $0x80] sm:$0xff] %vm2052_vm11, %v2611_v2  ;;  %v2614_v41 = vadd.f32 %v4775_v61, %v2136_v53  ;;  %v4836_v7 = vpop.f32.mrf.mxu0 }
 0x20c   : > { %v3334_v60 = vld [vmem:[#allocation2 + $0x28] sm:$0xff]  ;;  %3791 = vst.msk [vmem:[%s6193_s8 + $0x18] sm:$0xf] %vm3784_vm12, %v4529_v23  ;;  %v4527_v11 = vpack.c.bf16 %v3468_v55, %v3468_v55  ;;  %v3471_v62 = vmax.f32 %v3407_v50, 0.0  ;;  %v3215_v6 = vadd.f32 %v4836_v7, %v2737_v58  ;;  %v2407_v45 = vpop.f32.mrf.mxu1  ;;  %v2738_v57 = vld [vmem:[#allocation2 + $0x78] sm:$0xff]  ;;  %v2143_v55 = vld [vmem:[#allocation2 + $0xd0] sm:$0xff] }
 0x20d   : > { %v3405_v44 = vadd.f32 %v6178_v47, %v3334_v60  ;;  %3274 = vst.msk [vmem:[#allocation2 + $0x48] sm:$0xff] %vm2052_vm11, %v3210_v54  ;;  %2678 = vst.msk [vmem:[#allocation2 + $0x98] sm:$0xff] %vm2052_vm11, %v2614_v41  ;;  %v2612_v13 = vadd.f32 %v2407_v45, %v2134_v40  ;;  %v2994_v56 = vpop.f32.mrf.mxu0 }
 0x20e   : > { %v3339_v43 = vld [vmem:[#allocation2 + $0x50] sm:$0xff]  ;;  %3789 = vst.msk [vmem:[%s6193_s8 + $0x10] sm:$0xf] %vm3784_vm12, %v4527_v11  ;;  %v4530_v10 = vpack.c.bf16 %v3471_v62, %v3471_v62  ;;  %v3213_v18 = vadd.f32 %v2994_v56, %v2735_v12  ;;  %v4778_v20 = vpop.f32.mrf.mxu1  ;;  %v2736_v14 = vld [vmem:[#allocation2 + $0x68] sm:$0xff]  ;;  %v2141_v62 = vld [vmem:[#allocation2 + $0xc0] sm:$0xff] }
 0x20f   : > { %v3469_v49 = vmax.f32 %v3405_v44, 0.0  ;;  %v3410_v9 = vadd.f32 %v6178_v47, %v3339_v43  ;;  %3279 = vst.msk [vmem:[#allocation2 + $0x70] sm:$0xff] %vm2052_vm11, %v3215_v6  ;;  %2676 = vst.msk [vmem:[#allocation2 + $0x88] sm:$0xff] %vm2052_vm11, %v2612_v13  ;;  %v2617_v33 = vadd.f32 %v4778_v20, %v2139_v15  ;;  %v4837_v24 = vpop.f32.mrf.mxu0 }
 0x210   : > { %v3337_v17 = vld [vmem:[#allocation2 + $0x40] sm:$0xff]  ;;  %3792 = vst.msk [vmem:[%s6193_s8 + $0x1c] sm:$0xf] %vm3784_vm12, %v4530_v10  ;;  %v3216_v26 = vadd.f32 %v4837_v24, %v2738_v57  ;;  %v2420_v36 = vpop.f32.mrf.mxu1  ;;  %v2741_v31 = vld [vmem:[#allocation2 + $0x90] sm:$0xff] }
 0x211   : > { %v4528_v27 = vpack.c.bf16 %v3469_v49, %v3469_v49  ;;  %v3474_v25 = vmax.f32 %v3410_v9, 0.0  ;;  %v3408_v35 = vadd.f32 %v6178_v47, %v3337_v17  ;;  %3277 = vst.msk [vmem:[#allocation2 + $0x60] sm:$0xff] %vm2052_vm11, %v3213_v18  ;;  %2681 = vst.msk [vmem:[#allocation2 + $0xb0] sm:$0xff] %vm2052_vm11, %v2617_v33  ;;  %v2615_v52 = vadd.f32 %v2420_v36, %v2137_v38  ;;  %v2997_v8 = vpop.f32.mrf.mxu0  ;;  %v2144_v49 = vld [vmem:[#allocation2 + $0xd8] sm:$0xff] }
 0x212   : > { %v3340_v0 = vld [vmem:[#allocation2 + $0x58] sm:$0xff]  ;;  %3280 = vst.msk [vmem:[#allocation2 + $0x78] sm:$0xff] %vm2052_vm11, %v3216_v26  ;;  %v3214_v32 = vadd.f32 %v2997_v8, %v2736_v14  ;;  %v4779_v21 = vpop.f32.mrf.mxu1  ;;  %v2739_v51 = vld [vmem:[#allocation2 + $0x80] sm:$0xff] }
 0x213   : > { %3790 = vst.msk [vmem:[%s6193_s8 + $0x14] sm:$0xf] %vm3784_vm12, %v4528_v27  ;;  %v4533_v3 = vpack.c.bf16 %v3474_v25, %v3474_v25  ;;  %v3472_v46 = vmax.f32 %v3408_v35, 0.0  ;;  %v3411_v30 = vadd.f32 %v6178_v47, %v3340_v0  ;;  %v2618_v42 = vadd.f32 %v4779_v21, %v2140_v29  ;;  %v4840_v16 = vpop.f32.mrf.mxu0  ;;  %v2142_v25 = vld [vmem:[#allocation2 + $0xc8] sm:$0xff] }
 0x214   : > { %v3338_v63 = vld [vmem:[#allocation2 + $0x48] sm:$0xff]  ;;  %2679 = vst.msk [vmem:[#allocation2 + $0xa0] sm:$0xff] %vm2052_vm11, %v2615_v52  ;;  %3278 = vst.msk [vmem:[#allocation2 + $0x68] sm:$0xff] %vm2052_vm11, %v3214_v32  ;;  %v3219_v5 = vadd.f32 %v4840_v16, %v2741_v31  ;;  %v2423_v22 = vpop.f32.mrf.mxu1  ;;  %v2742_v61 = vld [vmem:[#allocation2 + $0x98] sm:$0xff] }
 0x215   : > { %3795 = vst.msk [vmem:[%s6193_s8 + $0x28] sm:$0xf] %vm3784_vm12, %v4533_v3  ;;  %v4531_v34 = vpack.c.bf16 %v3472_v46, %v3472_v46  ;;  %v3475_v39 = vmax.f32 %v3411_v30, 0.0  ;;  %v3409_v37 = vadd.f32 %v6178_v47, %v3338_v63  ;;  %v2616_v4 = vadd.f32 %v2423_v22, %v2138_v19  ;;  %v3010_v1 = vpop.f32.mrf.mxu0  ;;  %v2147_v46 = vld [vmem:[#allocation2 + $0xf0] sm:$0xff] }
 0x216   : > { %v3343_v48 = vld [vmem:[#allocation2 + $0x70] sm:$0xff]  ;;  %2682 = vst.msk [vmem:[#allocation2 + $0xb8] sm:$0xff] %vm2052_vm11, %v2618_v42  ;;  %3283 = vst.msk [vmem:[#allocation2 + $0x90] sm:$0xff] %vm2052_vm11, %v3219_v5  ;;  %v3217_v23 = vadd.f32 %v3010_v1, %v2739_v51  ;;  %v4782_v50 = vpop.f32.mrf.mxu1  ;;  %v2740_v45 = vld [vmem:[#allocation2 + $0x88] sm:$0xff] }
 0x217   : > { %3793 = vst.msk [vmem:[%s6193_s8 + $0x20] sm:$0xf] %vm3784_vm12, %v4531_v34  ;;  %v4534_v2 = vpack.c.bf16 %v3475_v39, %v3475_v39  ;;  %v3473_v59 = vmax.f32 %v3409_v37, 0.0  ;;  %v3414_v28 = vadd.f32 %v6178_v47, %v3343_v48  ;;  %v2621_v53 = vadd.f32 %v4782_v50, %v2143_v55  ;;  %v4841_v60 = vpop.f32.mrf.mxu0  ;;  %v2145_v39 = vld [vmem:[#allocation2 + $0xe0] sm:$0xff] }
 0x218   : > { %v3341_v54 = vld [vmem:[#allocation2 + $0x60] sm:$0xff]  ;;  %2680 = vst.msk [vmem:[#allocation2 + $0xa8] sm:$0xff] %vm2052_vm11, %v2616_v4  ;;  %3281 = vst.msk [vmem:[#allocation2 + $0x80] sm:$0xff] %vm2052_vm11, %v3217_v23  ;;  %v3220_v11 = vadd.f32 %v4841_v60, %v2742_v61  ;;  %v2436_v44 = vpop.f32.mrf.mxu1  ;;  %v2745_v20 = vld [vmem:[#allocation2 + $0xb0] sm:$0xff] }
 0x219   : > { %3796 = vst.msk [vmem:[%s6193_s8 + $0x2c] sm:$0xf] %vm3784_vm12, %v4534_v2  ;;  %v4532_v41 = vpack.c.bf16 %v3473_v59, %v3473_v59  ;;  %v3478_v58 = vmax.f32 %v3414_v28, 0.0  ;;  %v3412_v7 = vadd.f32 %v6178_v47, %v3341_v54  ;;  %v3344_v6 = vld [vmem:[#allocation2 + $0x78] sm:$0xff]  ;;  %v2619_v40 = vadd.f32 %v2436_v44, %v2141_v62  ;;  %v3013_v43 = vpop.f32.mrf.mxu0 }
 0x21a   : > { %2685 = vst.msk [vmem:[#allocation2 + $0xd0] sm:$0xff] %vm2052_vm11, %v2621_v53  ;;  %v3415_v56 = vadd.f32 %v6178_v47, %v3344_v6  ;;  %3284 = vst.msk [vmem:[#allocation2 + $0x98] sm:$0xff] %vm2052_vm11, %v3220_v11  ;;  %v3218_v10 = vadd.f32 %v3013_v43, %v2740_v45  ;;  %v4783_v9 = vpop.f32.mrf.mxu1  ;;  %v2148_v59 = vld [vmem:[#allocation2 + $0xf8] sm:$0xff] }
 0x21b   : > { %3794 = vst.msk [vmem:[%s6193_s8 + $0x24] sm:$0xf] %vm3784_vm12, %v4532_v41  ;;  %v4537_v13 = vpack.c.bf16 %v3478_v58, %v3478_v58  ;;  %v3476_v12 = vmax.f32 %v3412_v7, 0.0  ;;  %v3342_v18 = vld [vmem:[#allocation2 + $0x68] sm:$0xff]  ;;  %v2622_v15 = vadd.f32 %v4783_v9, %v2144_v49  ;;  %v4844_v17 = vpop.f32.mrf.mxu0  ;;  %v2743_v36 = vld [vmem:[#allocation2 + $0xa0] sm:$0xff] }
 0x21c   : > { %2683 = vst.msk [vmem:[#allocation2 + $0xc0] sm:$0xff] %vm2052_vm11, %v2619_v40  ;;  %v3479_v57 = vmax.f32 %v3415_v56, 0.0  ;;  %v3413_v24 = vadd.f32 %v6178_v47, %v3342_v18  ;;  %3282 = vst.msk [vmem:[#allocation2 + $0x88] sm:$0xff] %vm2052_vm11, %v3218_v10  ;;  %v3223_v27 = vadd.f32 %v4844_v17, %v2745_v20  ;;  %v2439_v35 = vpop.f32.mrf.mxu1  ;;  %v2146_v58 = vld [vmem:[#allocation2 + $0xe8] sm:$0xff] }
 0x21d   : > { %3799 = vst.msk [vmem:[%s6193_s8 + $0x38] sm:$0xf] %vm3784_vm12, %v4537_v13  ;;  %v4535_v33 = vpack.c.bf16 %v3476_v12, %v3476_v12  ;;  %v3347_v26 = vld [vmem:[#allocation2 + $0x90] sm:$0xff]  ;;  %v2620_v38 = vadd.f32 %v2439_v35, %v2142_v25  ;;  %v3026_v0 = vpop.f32.mrf.mxu0  ;;  %v2746_v21 = vld [vmem:[#allocation2 + $0xb8] sm:$0xff] }
 0x21e   : > { %2686 = vst.msk [vmem:[#allocation2 + $0xd8] sm:$0xff] %vm2052_vm11, %v2622_v15  ;;  %v4538_v52 = vpack.c.bf16 %v3479_v57, %v3479_v57  ;;  %v3477_v14 = vmax.f32 %v3413_v24, 0.0  ;;  %v3418_v8 = vadd.f32 %v6178_v47, %v3347_v26  ;;  %3287 = vst.msk [vmem:[#allocation2 + $0xb0] sm:$0xff] %vm2052_vm11, %v3223_v27  ;;  %v3221_v3 = vadd.f32 %v3026_v0, %v2743_v36  ;;  %v4786_v30 = vpop.f32.mrf.mxu1  ;;  %v2151_v12 = vld [vmem:[#allocation2 + $0x110] sm:$0xff]  ;;  %v2149_v57 = vld [vmem:[#allocation2 + $0x100] sm:$0xff] }
 0x21f   : > { %3797 = vst.msk [vmem:[%s6193_s8 + $0x30] sm:$0xf] %vm3784_vm12, %v4535_v33  ;;  %v3345_v32 = vld [vmem:[#allocation2 + $0x80] sm:$0xff]  ;;  %v2625_v29 = vadd.f32 %v4786_v30, %v2147_v46  ;;  %v4845_v63 = vpop.f32.mrf.mxu0  ;;  %v2744_v22 = vld [vmem:[#allocation2 + $0xa8] sm:$0xff] }
 0x220   : > { %2684 = vst.msk [vmem:[#allocation2 + $0xc8] sm:$0xff] %vm2052_vm11, %v2620_v38  ;;  %v4536_v42 = vpack.c.bf16 %v3477_v14, %v3477_v14  ;;  %v3482_v31 = vmax.f32 %v3418_v8, 0.0  ;;  %v3416_v16 = vadd.f32 %v6178_v47, %v3345_v32  ;;  %3285 = vst.msk [vmem:[#allocation2 + $0xa0] sm:$0xff] %vm2052_vm11, %v3221_v3  ;;  %v3224_v34 = vadd.f32 %v4845_v63, %v2746_v21  ;;  %v2452_v37 = vpop.f32.mrf.mxu1  ;;  %v2152_v14 = vld [vmem:[#allocation2 + $0x118] sm:$0xff] }
 0x221   : > { %3800 = vst.msk [vmem:[%s6193_s8 + $0x3c] sm:$0xf] %vm3784_vm12, %v4538_v52  ;;  %v3348_v5 = vld [vmem:[#allocation2 + $0x98] sm:$0xff]  ;;  %v2623_v19 = vadd.f32 %v2452_v37, %v2145_v39  ;;  %v3029_v48 = vpop.f32.mrf.mxu0  ;;  %v2749_v50 = vld [vmem:[#allocation2 + $0xd0] sm:$0xff] }
 0x222   : > { %2689 = vst.msk [vmem:[#allocation2 + $0xf0] sm:$0xff] %vm2052_vm11, %v2625_v29  ;;  %v4541_v4 = vpack.c.bf16 %v3482_v31, %v3482_v31  ;;  %v3480_v51 = vmax.f32 %v3416_v16, 0.0  ;;  %v3419_v1 = vadd.f32 %v6178_v47, %v3348_v5  ;;  %3288 = vst.msk [vmem:[#allocation2 + $0xb8] sm:$0xff] %vm2052_vm11, %v3224_v34  ;;  %v3222_v2 = vadd.f32 %v3029_v48, %v2744_v22  ;;  %v4787_v28 = vpop.f32.mrf.mxu1  ;;  %v2150_v31 = vld [vmem:[#allocation2 + $0x108] sm:$0xff] }
 0x223   : > { %3798 = vst.msk [vmem:[%s6193_s8 + $0x34] sm:$0xf] %vm3784_vm12, %v4536_v42  ;;  %v3346_v23 = vld [vmem:[#allocation2 + $0x88] sm:$0xff]  ;;  %v2626_v55 = vadd.f32 %v4787_v28, %v2148_v59  ;;  %v4848_v54 = vpop.f32.mrf.mxu0  ;;  %v2747_v44 = vld [vmem:[#allocation2 + $0xc0] sm:$0xff] }
 0x224   : > { %2687 = vst.msk [vmem:[#allocation2 + $0xe0] sm:$0xff] %vm2052_vm11, %v2623_v19  ;;  %v4539_v53 = vpack.c.bf16 %v3480_v51, %v3480_v51  ;;  %v3483_v61 = vmax.f32 %v3419_v1, 0.0  ;;  %v3417_v60 = vadd.f32 %v6178_v47, %v3346_v23  ;;  %3286 = vst.msk [vmem:[#allocation2 + $0xa8] sm:$0xff] %vm2052_vm11, %v3222_v2  ;;  %v3227_v41 = vadd.f32 %v4848_v54, %v2749_v50  ;;  %v2455_v7 = vpop.f32.mrf.mxu1  ;;  %v2155_v51 = vld [vmem:[#allocation2 + $0x130] sm:$0xff] }
 0x225   : > { %3803 = vst.msk [vmem:[%s6193_s8 + $0x48] sm:$0xf] %vm3784_vm12, %v4541_v4  ;;  %v3351_v11 = vld [vmem:[#allocation2 + $0xb0] sm:$0xff]  ;;  %v2624_v62 = vadd.f32 %v2455_v7, %v2146_v58  ;;  %v3042_v6 = vpop.f32.mrf.mxu0  ;;  %v2750_v9 = vld [vmem:[#allocation2 + $0xd8] sm:$0xff] }
 0x226   : > { %2690 = vst.msk [vmem:[#allocation2 + $0xf8] sm:$0xff] %vm2052_vm11, %v2626_v55  ;;  %v4542_v40 = vpack.c.bf16 %v3483_v61, %v3483_v61  ;;  %v3481_v45 = vmax.f32 %v3417_v60, 0.0  ;;  %v3422_v43 = vadd.f32 %v6178_v47, %v3351_v11  ;;  %3291 = vst.msk [vmem:[#allocation2 + $0xd0] sm:$0xff] %vm2052_vm11, %v3227_v41  ;;  %v3225_v13 = vadd.f32 %v3042_v6, %v2747_v44  ;;  %v4790_v56 = vpop.f32.mrf.mxu1  ;;  %v2153_v61 = vld [vmem:[#allocation2 + $0x120] sm:$0xff] }
 0x227   : > { %3801 = vst.msk [vmem:[%s6193_s8 + $0x40] sm:$0xf] %vm3784_vm12, %v4539_v53  ;;  %v3349_v10 = vld [vmem:[#allocation2 + $0xa0] sm:$0xff]  ;;  %v2629_v49 = vadd.f32 %v4790_v56, %v2151_v12  ;;  %v4849_v18 = vpop.f32.mrf.mxu0  ;;  %v2748_v35 = vld [vmem:[#allocation2 + $0xc8] sm:$0xff] }
 0x228   : > { %2688 = vst.msk [vmem:[#allocation2 + $0xe8] sm:$0xff] %vm2052_vm11, %v2624_v62  ;;  %v4540_v15 = vpack.c.bf16 %v3481_v45, %v3481_v45  ;;  %v3486_v20 = vmax.f32 %v3422_v43, 0.0  ;;  %v3420_v17 = vadd.f32 %v6178_v47, %v3349_v10  ;;  %3289 = vst.msk [vmem:[#allocation2 + $0xc0] sm:$0xff] %vm2052_vm11, %v3225_v13  ;;  %v3228_v33 = vadd.f32 %v4849_v18, %v2750_v9  ;;  %v2468_v24 = vpop.f32.mrf.mxu1  ;;  %v2156_v45 = vld [vmem:[#allocation2 + $0x138] sm:$0xff] }
 0x229   : > { %3804 = vst.msk [vmem:[%s6193_s8 + $0x4c] sm:$0xf] %vm3784_vm12, %v4542_v40  ;;  %v3352_v27 = vld [vmem:[#allocation2 + $0xb8] sm:$0xff]  ;;  %v2627_v25 = vadd.f32 %v2468_v24, %v2149_v57  ;;  %v3045_v26 = vpop.f32.mrf.mxu0  ;;  %v2753_v30 = vld [vmem:[#allocation2 + $0xf0] sm:$0xff] }
 0x22a   : > { %2693 = vst.msk [vmem:[#allocation2 + $0x110] sm:$0xff] %vm2052_vm11, %v2629_v49  ;;  %v4545_v38 = vpack.c.bf16 %v3486_v20, %v3486_v20  ;;  %v3484_v36 = vmax.f32 %v3420_v17, 0.0  ;;  %v3423_v0 = vadd.f32 %v6178_v47, %v3352_v27  ;;  %3292 = vst.msk [vmem:[#allocation2 + $0xd8] sm:$0xff] %vm2052_vm11, %v3228_v33  ;;  %v3226_v52 = vadd.f32 %v3045_v26, %v2748_v35  ;;  %v4791_v8 = vpop.f32.mrf.mxu1  ;;  %v2154_v20 = vld [vmem:[#allocation2 + $0x128] sm:$0xff] }
 0x22b   : > { %3802 = vst.msk [vmem:[%s6193_s8 + $0x44] sm:$0xf] %vm3784_vm12, %v4540_v15  ;;  %v3350_v3 = vld [vmem:[#allocation2 + $0xa8] sm:$0xff]  ;;  %v2630_v46 = vadd.f32 %v4791_v8, %v2152_v14  ;;  %v4852_v32 = vpop.f32.mrf.mxu0  ;;  %v2751_v37 = vld [vmem:[#allocation2 + $0xe0] sm:$0xff] }
 0x22c   : > { %2691 = vst.msk [vmem:[#allocation2 + $0x100] sm:$0xff] %vm2052_vm11, %v2627_v25  ;;  %v4543_v29 = vpack.c.bf16 %v3484_v36, %v3484_v36  ;;  %v3487_v21 = vmax.f32 %v3423_v0, 0.0  ;;  %v3421_v63 = vadd.f32 %v6178_v47, %v3350_v3  ;;  %3290 = vst.msk [vmem:[#allocation2 + $0xc8] sm:$0xff] %vm2052_vm11, %v3226_v52  ;;  %v3231_v42 = vadd.f32 %v4852_v32, %v2753_v30  ;;  %v2471_v16 = vpop.f32.mrf.mxu1  ;;  %v2159_v36 = vld [vmem:[#allocation2 + $0x150] sm:$0xff] }
 0x22d   : > { %3807 = vst.msk [vmem:[%s6193_s8 + $0x58] sm:$0xf] %vm3784_vm12, %v4545_v38  ;;  %v3355_v34 = vld [vmem:[#allocation2 + $0xd0] sm:$0xff]  ;;  %v2628_v39 = vadd.f32 %v2471_v16, %v2150_v31  ;;  %v3058_v5 = vpop.f32.mrf.mxu0  ;;  %v2754_v28 = vld [vmem:[#allocation2 + $0xf8] sm:$0xff] }
 0x22e   : > { %2694 = vst.msk [vmem:[#allocation2 + $0x118] sm:$0xff] %vm2052_vm11, %v2630_v46  ;;  %v4546_v19 = vpack.c.bf16 %v3487_v21, %v3487_v21  ;;  %v3485_v22 = vmax.f32 %v3421_v63, 0.0  ;;  %v3426_v48 = vadd.f32 %v6178_v47, %v3355_v34  ;;  %3295 = vst.msk [vmem:[#allocation2 + $0xf0] sm:$0xff] %vm2052_vm11, %v3231_v42  ;;  %v3229_v4 = vadd.f32 %v3058_v5, %v2751_v37  ;;  %v4794_v1 = vpop.f32.mrf.mxu1  ;;  %v2157_v21 = vld [vmem:[#allocation2 + $0x140] sm:$0xff] }
 0x22f   : > { %3805 = vst.msk [vmem:[%s6193_s8 + $0x50] sm:$0xf] %vm3784_vm12, %v4543_v29  ;;  %v3353_v2 = vld [vmem:[#allocation2 + $0xc0] sm:$0xff]  ;;  %v2633_v59 = vadd.f32 %v4794_v1, %v2155_v51  ;;  %v4853_v23 = vpop.f32.mrf.mxu0  ;;  %v2752_v7 = vld [vmem:[#allocation2 + $0xe8] sm:$0xff] }
 0x230   : > { %2692 = vst.msk [vmem:[#allocation2 + $0x108] sm:$0xff] %vm2052_vm11, %v2628_v39  ;;  %v4544_v55 = vpack.c.bf16 %v3485_v22, %v3485_v22  ;;  %v3490_v50 = vmax.f32 %v3426_v48, 0.0  ;;  %v3424_v54 = vadd.f32 %v6178_v47, %v3353_v2  ;;  %3293 = vst.msk [vmem:[#allocation2 + $0xe0] sm:$0xff] %vm2052_vm11, %v3229_v4  ;;  %v3232_v53 = vadd.f32 %v4853_v23, %v2754_v28  ;;  %v2484_v60 = vpop.f32.mrf.mxu1  ;;  %v2160_v22 = vld [vmem:[#allocation2 + $0x158] sm:$0xff] }
 0x231   : > { %3808 = vst.msk [vmem:[%s6193_s8 + $0x5c] sm:$0xf] %vm3784_vm12, %v4546_v19  ;;  %v3356_v41 = vld [vmem:[#allocation2 + $0xd8] sm:$0xff]  ;;  %v2631_v58 = vadd.f32 %v2484_v60, %v2153_v61  ;;  %v3061_v11 = vpop.f32.mrf.mxu0  ;;  %v2757_v56 = vld [vmem:[#allocation2 + $0x110] sm:$0xff] }
 0x232   : > { %2697 = vst.msk [vmem:[#allocation2 + $0x130] sm:$0xff] %vm2052_vm11, %v2633_v59  ;;  %v4549_v62 = vpack.c.bf16 %v3490_v50, %v3490_v50  ;;  %v3488_v44 = vmax.f32 %v3424_v54, 0.0  ;;  %v3427_v6 = vadd.f32 %v6178_v47, %v3356_v41  ;;  %3296 = vst.msk [vmem:[#allocation2 + $0xf8] sm:$0xff] %vm2052_vm11, %v3232_v53  ;;  %v3230_v40 = vadd.f32 %v3061_v11, %v2752_v7  ;;  %v4795_v43 = vpop.f32.mrf.mxu1  ;;  %v2158_v50 = vld [vmem:[#allocation2 + $0x148] sm:$0xff] }
 0x233   : > { %3806 = vst.msk [vmem:[%s6193_s8 + $0x54] sm:$0xf] %vm3784_vm12, %v4544_v55  ;;  %v3354_v13 = vld [vmem:[#allocation2 + $0xc8] sm:$0xff]  ;;  %v2634_v12 = vadd.f32 %v4795_v43, %v2156_v45  ;;  %v4856_v10 = vpop.f32.mrf.mxu0  ;;  %v2755_v24 = vld [vmem:[#allocation2 + $0x100] sm:$0xff] }
 0x234   : > { %2695 = vst.msk [vmem:[#allocation2 + $0x120] sm:$0xff] %vm2052_vm11, %v2631_v58  ;;  %v4547_v49 = vpack.c.bf16 %v3488_v44, %v3488_v44  ;;  %v3491_v9 = vmax.f32 %v3427_v6, 0.0  ;;  %v3425_v18 = vadd.f32 %v6178_v47, %v3354_v13  ;;  %3294 = vst.msk [vmem:[#allocation2 + $0xe8] sm:$0xff] %vm2052_vm11, %v3230_v40  ;;  %v3235_v15 = vadd.f32 %v4856_v10, %v2757_v56  ;;  %v2487_v17 = vpop.f32.mrf.mxu1  ;;  %v2163_v44 = vld [vmem:[#allocation2 + $0x170] sm:$0xff] }
 0x235   : > { %3811 = vst.msk [vmem:[%s6193_s8 + $0x68] sm:$0xf] %vm3784_vm12, %v4549_v62  ;;  %v3359_v33 = vld [vmem:[#allocation2 + $0xf0] sm:$0xff]  ;;  %v2632_v57 = vadd.f32 %v2487_v17, %v2154_v20  ;;  %v3074_v27 = vpop.f32.mrf.mxu0  ;;  %v2758_v8 = vld [vmem:[#allocation2 + $0x118] sm:$0xff] }
 0x236   : > { %2698 = vst.msk [vmem:[#allocation2 + $0x138] sm:$0xff] %vm2052_vm11, %v2634_v12  ;;  %v4550_v25 = vpack.c.bf16 %v3491_v9, %v3491_v9  ;;  %v3489_v35 = vmax.f32 %v3425_v18, 0.0  ;;  %v3430_v26 = vadd.f32 %v6178_v47, %v3359_v33  ;;  %3299 = vst.msk [vmem:[#allocation2 + $0x110] sm:$0xff] %vm2052_vm11, %v3235_v15  ;;  %v3233_v38 = vadd.f32 %v3074_v27, %v2755_v24  ;;  %v4798_v0 = vpop.f32.mrf.mxu1  ;;  %v2161_v9 = vld [vmem:[#allocation2 + $0x160] sm:$0xff] }
 0x237   : > { %3809 = vst.msk [vmem:[%s6193_s8 + $0x60] sm:$0xf] %vm3784_vm12, %v4547_v49  ;;  %v3357_v52 = vld [vmem:[#allocation2 + $0xe0] sm:$0xff]  ;;  %v2637_v14 = vadd.f32 %v4798_v0, %v2159_v36  ;;  %v4857_v3 = vpop.f32.mrf.mxu0  ;;  %v2756_v16 = vld [vmem:[#allocation2 + $0x108] sm:$0xff] }
 0x238   : > { %2696 = vst.msk [vmem:[#allocation2 + $0x128] sm:$0xff] %vm2052_vm11, %v2632_v57  ;;  %v4548_v46 = vpack.c.bf16 %v3489_v35, %v3489_v35  ;;  %v3494_v30 = vmax.f32 %v3430_v26, 0.0  ;;  %v3428_v32 = vadd.f32 %v6178_v47, %v3357_v52  ;;  %3297 = vst.msk [vmem:[#allocation2 + $0x100] sm:$0xff] %vm2052_vm11, %v3233_v38  ;;  %v3236_v29 = vadd.f32 %v4857_v3, %v2758_v8  ;;  %v2500_v63 = vpop.f32.mrf.mxu1  ;;  %v2164_v35 = vld [vmem:[#allocation2 + $0x178] sm:$0xff] }
 0x239   : > { %3812 = vst.msk [vmem:[%s6193_s8 + $0x6c] sm:$0xf] %vm3784_vm12, %v4550_v25  ;;  %v3360_v42 = vld [vmem:[#allocation2 + $0xf8] sm:$0xff]  ;;  %v2635_v31 = vadd.f32 %v2500_v63, %v2157_v21  ;;  %v3077_v34 = vpop.f32.mrf.mxu0  ;;  %v2761_v1 = vld [vmem:[#allocation2 + $0x130] sm:$0xff] }
 0x23a   : > { %2701 = vst.msk [vmem:[#allocation2 + $0x150] sm:$0xff] %vm2052_vm11, %v2637_v14  ;;  %v4553_v39 = vpack.c.bf16 %v3494_v30, %v3494_v30  ;;  %v3492_v37 = vmax.f32 %v3428_v32, 0.0  ;;  %v3431_v5 = vadd.f32 %v6178_v47, %v3360_v42  ;;  %3300 = vst.msk [vmem:[#allocation2 + $0x118] sm:$0xff] %vm2052_vm11, %v3236_v29  ;;  %v3234_v19 = vadd.f32 %v3077_v34, %v2756_v16  ;;  %v4799_v48 = vpop.f32.mrf.mxu1  ;;  %v2162_v30 = vld [vmem:[#allocation2 + $0x168] sm:$0xff] }
 0x23b   : > { %3810 = vst.msk [vmem:[%s6193_s8 + $0x64] sm:$0xf] %vm3784_vm12, %v4548_v46  ;;  %v3358_v4 = vld [vmem:[#allocation2 + $0xe8] sm:$0xff]  ;;  %v2638_v51 = vadd.f32 %v4799_v48, %v2160_v22  ;;  %v4860_v2 = vpop.f32.mrf.mxu0  ;;  %v2759_v60 = vld [vmem:[#allocation2 + $0x120] sm:$0xff] }
 0x23c   : > { %2699 = vst.msk [vmem:[#allocation2 + $0x140] sm:$0xff] %vm2052_vm11, %v2635_v31  ;;  %v4551_v59 = vpack.c.bf16 %v3492_v37, %v3492_v37  ;;  %v3495_v28 = vmax.f32 %v3431_v5, 0.0  ;;  %v3429_v23 = vadd.f32 %v6178_v47, %v3358_v4  ;;  %3298 = vst.msk [vmem:[#allocation2 + $0x108] sm:$0xff] %vm2052_vm11, %v3234_v19  ;;  %v3239_v55 = vadd.f32 %v4860_v2, %v2761_v1  ;;  %v2503_v54 = vpop.f32.mrf.mxu1  ;;  %v2167_v37 = vld [vmem:[#allocation2 + $0x190] sm:$0xff] }
 0x23d   : > { %3815 = vst.msk [vmem:[%s6193_s8 + $0x78] sm:$0xf] %vm3784_vm12, %v4553_v39  ;;  %v3363_v53 = vld [vmem:[#allocation2 + $0x110] sm:$0xff]  ;;  %v2636_v61 = vadd.f32 %v2503_v54, %v2158_v50  ;;  %v3090_v41 = vpop.f32.mrf.mxu0  ;;  %v2762_v43 = vld [vmem:[#allocation2 + $0x138] sm:$0xff] }
 0x23e   : > { %2702 = vst.msk [vmem:[#allocation2 + $0x158] sm:$0xff] %vm2052_vm11, %v2638_v51  ;;  %v4554_v58 = vpack.c.bf16 %v3495_v28, %v3495_v28  ;;  %v3493_v7 = vmax.f32 %v3429_v23, 0.0  ;;  %v3434_v11 = vadd.f32 %v6178_v47, %v3363_v53  ;;  %3303 = vst.msk [vmem:[#allocation2 + $0x130] sm:$0xff] %vm2052_vm11, %v3239_v55  ;;  %v3237_v62 = vadd.f32 %v3090_v41, %v2759_v60  ;;  %v4802_v6 = vpop.f32.mrf.mxu1  ;;  %v2165_v28 = vld [vmem:[#allocation2 + $0x180] sm:$0xff] }
 0x23f   : > { %3813 = vst.msk [vmem:[%s6193_s8 + $0x70] sm:$0xf] %vm3784_vm12, %v4551_v59  ;;  %v3361_v40 = vld [vmem:[#allocation2 + $0x100] sm:$0xff]  ;;  %v2641_v45 = vadd.f32 %v4802_v6, %v2163_v44  ;;  %v4861_v13 = vpop.f32.mrf.mxu0  ;;  %v2760_v17 = vld [vmem:[#allocation2 + $0x128] sm:$0xff] }
 0x240   : > { %2700 = vst.msk [vmem:[#allocation2 + $0x148] sm:$0xff] %vm2052_vm11, %v2636_v61  ;;  %v4552_v12 = vpack.c.bf16 %v3493_v7, %v3493_v7  ;;  %v3498_v56 = vmax.f32 %v3434_v11, 0.0  ;;  %v3432_v10 = vadd.f32 %v6178_v47, %v3361_v40  ;;  %3301 = vst.msk [vmem:[#allocation2 + $0x120] sm:$0xff] %vm2052_vm11, %v3237_v62  ;;  %v3240_v49 = vadd.f32 %v4861_v13, %v2762_v43  ;;  %v2516_v18 = vpop.f32.mrf.mxu1  ;;  %v2168_v7 = vld [vmem:[#allocation2 + $0x198] sm:$0xff] }
 0x241   : > { %3816 = vst.msk [vmem:[%s6193_s8 + $0x7c] sm:$0xf] %vm3784_vm12, %v4554_v58  ;;  %v3364_v15 = vld [vmem:[#allocation2 + $0x118] sm:$0xff]  ;;  %v2639_v20 = vadd.f32 %v2516_v18, %v2161_v9  ;;  %v3093_v33 = vpop.f32.mrf.mxu0  ;;  %v2765_v0 = vld [vmem:[#allocation2 + $0x150] sm:$0xff] }
 0x242   : > { %2705 = vst.msk [vmem:[#allocation2 + $0x170] sm:$0xff] %vm2052_vm11, %v2641_v45  ;;  %v4557_v57 = vpack.c.bf16 %v3498_v56, %v3498_v56  ;;  %v3496_v24 = vmax.f32 %v3432_v10, 0.0  ;;  %v3435_v27 = vadd.f32 %v6178_v47, %v3364_v15  ;;  %3304 = vst.msk [vmem:[#allocation2 + $0x138] sm:$0xff] %vm2052_vm11, %v3240_v49  ;;  %v3238_v25 = vadd.f32 %v3093_v33, %v2760_v17  ;;  %v4803_v26 = vpop.f32.mrf.mxu1  ;;  %v2166_v56 = vld [vmem:[#allocation2 + $0x188] sm:$0xff] }
 0x243   : > { %3814 = vst.msk [vmem:[%s6193_s8 + $0x74] sm:$0xf] %vm3784_vm12, %v4552_v12  ;;  %v3362_v38 = vld [vmem:[#allocation2 + $0x108] sm:$0xff]  ;;  %v2642_v36 = vadd.f32 %v4803_v26, %v2164_v35  ;;  %v4864_v52 = vpop.f32.mrf.mxu0  ;;  %v2763_v63 = vld [vmem:[#allocation2 + $0x140] sm:$0xff] }
 0x244   : > { %2703 = vst.msk [vmem:[#allocation2 + $0x160] sm:$0xff] %vm2052_vm11, %v2639_v20  ;;  %v4555_v14 = vpack.c.bf16 %v3496_v24, %v3496_v24  ;;  %v3499_v8 = vmax.f32 %v3435_v27, 0.0  ;;  %v3433_v3 = vadd.f32 %v6178_v47, %v3362_v38  ;;  %3302 = vst.msk [vmem:[#allocation2 + $0x128] sm:$0xff] %vm2052_vm11, %v3238_v25  ;;  %v3243_v46 = vadd.f32 %v4864_v52, %v2765_v0  ;;  %v2519_v32 = vpop.f32.mrf.mxu1  ;;  %v2171_v24 = vld [vmem:[#allocation2 + $0x1b0] sm:$0xff] }
 0x245   : > { %3819 = vst.msk [vmem:[%s6193_s8 + $0x88] sm:$0xf] %vm3784_vm12, %v4557_v57  ;;  %v3367_v29 = vld [vmem:[#allocation2 + $0x130] sm:$0xff]  ;;  %v2640_v21 = vadd.f32 %v2519_v32, %v2162_v30  ;;  %v3106_v42 = vpop.f32.mrf.mxu0  ;;  %v2766_v48 = vld [vmem:[#allocation2 + $0x158] sm:$0xff] }
 0x246   : > { %2706 = vst.msk [vmem:[#allocation2 + $0x178] sm:$0xff] %vm2052_vm11, %v2642_v36  ;;  %v4558_v31 = vpack.c.bf16 %v3499_v8, %v3499_v8  ;;  %v3497_v16 = vmax.f32 %v3433_v3, 0.0  ;;  %v3438_v34 = vadd.f32 %v6178_v47, %v3367_v29  ;;  %3307 = vst.msk [vmem:[#allocation2 + $0x150] sm:$0xff] %vm2052_vm11, %v3243_v46  ;;  %v3241_v39 = vadd.f32 %v3106_v42, %v2763_v63  ;;  %v4806_v5 = vpop.f32.mrf.mxu1  ;;  %v2169_v8 = vld [vmem:[#allocation2 + $0x1a0] sm:$0xff] }
 0x247   : > { %3817 = vst.msk [vmem:[%s6193_s8 + $0x80] sm:$0xf] %vm3784_vm12, %v4555_v14  ;;  %v3365_v19 = vld [vmem:[#allocation2 + $0x120] sm:$0xff]  ;;  %v2645_v22 = vadd.f32 %v4806_v5, %v2167_v37  ;;  %v4865_v4 = vpop.f32.mrf.mxu0  ;;  %v2764_v54 = vld [vmem:[#allocation2 + $0x148] sm:$0xff] }
 0x248   : > { %2704 = vst.msk [vmem:[#allocation2 + $0x168] sm:$0xff] %vm2052_vm11, %v2640_v21  ;;  %v4556_v51 = vpack.c.bf16 %v3497_v16, %v3497_v16  ;;  %v3502_v1 = vmax.f32 %v3438_v34, 0.0  ;;  %v3436_v2 = vadd.f32 %v6178_v47, %v3365_v19  ;;  %3305 = vst.msk [vmem:[#allocation2 + $0x140] sm:$0xff] %vm2052_vm11, %v3241_v39  ;;  %v3244_v59 = vadd.f32 %v4865_v4, %v2766_v48  ;;  %v2532_v23 = vpop.f32.mrf.mxu1  ;;  %v2172_v16 = vld [vmem:[#allocation2 + $0x1b8] sm:$0xff] }
 0x249   : > { %3820 = vst.msk [vmem:[%s6193_s8 + $0x8c] sm:$0xf] %vm3784_vm12, %v4558_v31  ;;  %v3368_v55 = vld [vmem:[#allocation2 + $0x138] sm:$0xff]  ;;  %v2643_v50 = vadd.f32 %v2532_v23, %v2165_v28  ;;  %v3109_v53 = vpop.f32.mrf.mxu0  ;;  %v2769_v6 = vld [vmem:[#allocation2 + $0x170] sm:$0xff] }
 0x24a   : > { %2709 = vst.msk [vmem:[#allocation2 + $0x190] sm:$0xff] %vm2052_vm11, %v2645_v22  ;;  %v4561_v61 = vpack.c.bf16 %v3502_v1, %v3502_v1  ;;  %v3500_v60 = vmax.f32 %v3436_v2, 0.0  ;;  %v3439_v41 = vadd.f32 %v6178_v47, %v3368_v55  ;;  %3308 = vst.msk [vmem:[#allocation2 + $0x158] sm:$0xff] %vm2052_vm11, %v3244_v59  ;;  %v3242_v58 = vadd.f32 %v3109_v53, %v2764_v54  ;;  %v4807_v11 = vpop.f32.mrf.mxu1  ;;  %v6380_v47 = vld [vmem:[%s6587_s4] ss:$0 sm:$0xff]  ;;  %v2170_v1 = vld [vmem:[#allocation2 + $0x1a8] sm:$0xff] }
 0x24b   : > { %3818 = vst.msk [vmem:[%s6193_s8 + $0x84] sm:$0xf] %vm3784_vm12, %v4556_v51  ;;  %v3366_v62 = vld [vmem:[#allocation2 + $0x128] sm:$0xff]  ;;  %v2646_v44 = vadd.f32 %v4807_v11, %v2168_v7  ;;  %v4868_v40 = vpop.f32.mrf.mxu0  ;;  %v2767_v18 = vld [vmem:[#allocation2 + $0x160] sm:$0xff] }
 0x24c   : > { %2707 = vst.msk [vmem:[#allocation2 + $0x180] sm:$0xff] %vm2052_vm11, %v2643_v50  ;;  %v4559_v45 = vpack.c.bf16 %v3500_v60, %v3500_v60  ;;  %v3503_v43 = vmax.f32 %v3439_v41, 0.0  ;;  %v3437_v13 = vadd.f32 %v6380_v47, %v3366_v62  ;;  %3306 = vst.msk [vmem:[#allocation2 + $0x148] sm:$0xff] %vm2052_vm11, %v3242_v58  ;;  %v3247_v12 = vadd.f32 %v4868_v40, %v2769_v6  ;;  %v2535_v10 = vpop.f32.mrf.mxu1  ;;  %v2175_v60 = vld [vmem:[#allocation2 + $0x1d0] sm:$0xff] }
 0x24d   : > { %3823 = vst.msk [vmem:[%s6193_s8 + $0x98] sm:$0xf] %vm3784_vm12, %v4561_v61  ;;  %v3371_v49 = vld [vmem:[#allocation2 + $0x150] sm:$0xff]  ;;  %v2644_v9 = vadd.f32 %v2535_v10, %v2166_v56  ;;  %v3122_v15 = vpop.f32.mrf.mxu0  ;;  %v2770_v26 = vld [vmem:[#allocation2 + $0x178] sm:$0xff] }
 0x24e   : > { %2710 = vst.msk [vmem:[#allocation2 + $0x198] sm:$0xff] %vm2052_vm11, %v2646_v44  ;;  %v4562_v20 = vpack.c.bf16 %v3503_v43, %v3503_v43  ;;  %v3501_v17 = vmax.f32 %v3437_v13, 0.0  ;;  %v3442_v33 = vadd.f32 %v6380_v47, %v3371_v49  ;;  %3311 = vst.msk [vmem:[#allocation2 + $0x170] sm:$0xff] %vm2052_vm11, %v3247_v12  ;;  %v3245_v57 = vadd.f32 %v3122_v15, %v2767_v18  ;;  %v4810_v27 = vpop.f32.mrf.mxu1  ;;  %v2173_v43 = vld [vmem:[#allocation2 + $0x1c0] sm:$0xff] }
 0x24f   : > { %3821 = vst.msk [vmem:[%s6193_s8 + $0x90] sm:$0xf] %vm3784_vm12, %v4559_v45  ;;  %v3369_v25 = vld [vmem:[#allocation2 + $0x140] sm:$0xff]  ;;  %v2649_v35 = vadd.f32 %v4810_v27, %v2171_v24  ;;  %v4869_v38 = vpop.f32.mrf.mxu0  ;;  %v2768_v32 = vld [vmem:[#allocation2 + $0x168] sm:$0xff] }
 0x250   : > { %2708 = vst.msk [vmem:[#allocation2 + $0x188] sm:$0xff] %vm2052_vm11, %v2644_v9  ;;  %v4560_v36 = vpack.c.bf16 %v3501_v17, %v3501_v17  ;;  %v3506_v0 = vmax.f32 %v3442_v33, 0.0  ;;  %v3440_v52 = vadd.f32 %v6380_v47, %v3369_v25  ;;  %3309 = vst.msk [vmem:[#allocation2 + $0x160] sm:$0xff] %vm2052_vm11, %v3245_v57  ;;  %v3248_v14 = vadd.f32 %v4869_v38, %v2770_v26  ;;  %v2548_v3 = vpop.f32.mrf.mxu1  ;;  %v2176_v17 = vld [vmem:[#allocation2 + $0x1d8] sm:$0xff] }
 0x251   : > { %3824 = vst.msk [vmem:[%s6193_s8 + $0x9c] sm:$0xf] %vm3784_vm12, %v4562_v20  ;;  %v3372_v46 = vld [vmem:[#allocation2 + $0x158] sm:$0xff]  ;;  %v2647_v30 = vadd.f32 %v2548_v3, %v2169_v8  ;;  %v3125_v29 = vpop.f32.mrf.mxu0  ;;  %v2773_v5 = vld [vmem:[#allocation2 + $0x190] sm:$0xff] }
 0x252   : > { %2713 = vst.msk [vmem:[#allocation2 + $0x1b0] sm:$0xff] %vm2052_vm11, %v2649_v35  ;;  %v4565_v21 = vpack.c.bf16 %v3506_v0, %v3506_v0  ;;  %v3504_v63 = vmax.f32 %v3440_v52, 0.0  ;;  %v3443_v42 = vadd.f32 %v6380_v47, %v3372_v46  ;;  %3312 = vst.msk [vmem:[#allocation2 + $0x178] sm:$0xff] %vm2052_vm11, %v3248_v14  ;;  %v3246_v31 = vadd.f32 %v3125_v29, %v2768_v32  ;;  %v4811_v34 = vpop.f32.mrf.mxu1  ;;  %v2174_v0 = vld [vmem:[#allocation2 + $0x1c8] sm:$0xff] }
 0x253   : > { %3822 = vst.msk [vmem:[%s6193_s8 + $0x94] sm:$0xf] %vm3784_vm12, %v4560_v36  ;;  %v3370_v39 = vld [vmem:[#allocation2 + $0x148] sm:$0xff]  ;;  %v2650_v37 = vadd.f32 %v4811_v34, %v2172_v16  ;;  %v4872_v19 = vpop.f32.mrf.mxu0  ;;  %v2771_v23 = vld [vmem:[#allocation2 + $0x180] sm:$0xff] }
 0x254   : > { %2711 = vst.msk [vmem:[#allocation2 + $0x1a0] sm:$0xff] %vm2052_vm11, %v2647_v30  ;;  %v4563_v22 = vpack.c.bf16 %v3504_v63, %v3504_v63  ;;  %v3507_v48 = vmax.f32 %v3443_v42, 0.0  ;;  %v3441_v4 = vadd.f32 %v6380_v47, %v3370_v39  ;;  %3310 = vst.msk [vmem:[#allocation2 + $0x168] sm:$0xff] %vm2052_vm11, %v3246_v31  ;;  %v3251_v51 = vadd.f32 %v4872_v19, %v2773_v5  ;;  %v2551_v2 = vpop.f32.mrf.mxu1  ;;  %v2179_v63 = vld [vmem:[#allocation2 + $0x1f0] sm:$0xff] }
 0x255   : > { %3827 = vst.msk [vmem:[%s6193_s8 + $0xa8] sm:$0xf] %vm3784_vm12, %v4565_v21  ;;  %v3375_v59 = vld [vmem:[#allocation2 + $0x170] sm:$0xff]  ;;  %v2648_v28 = vadd.f32 %v2551_v2, %v2170_v1  ;;  %v3138_v55 = vpop.f32.mrf.mxu0  ;;  %v2774_v11 = vld [vmem:[#allocation2 + $0x198] sm:$0xff] }
 0x256   : > { %2714 = vst.msk [vmem:[#allocation2 + $0x1b8] sm:$0xff] %vm2052_vm11, %v2650_v37  ;;  %v4566_v50 = vpack.c.bf16 %v3507_v48, %v3507_v48  ;;  %v3505_v54 = vmax.f32 %v3441_v4, 0.0  ;;  %v3446_v53 = vadd.f32 %v6380_v47, %v3375_v59  ;;  %3315 = vst.msk [vmem:[#allocation2 + $0x190] sm:$0xff] %vm2052_vm11, %v3251_v51  ;;  %v3249_v61 = vadd.f32 %v3138_v55, %v2771_v23  ;;  %v4814_v41 = vpop.f32.mrf.mxu1  ;;  %v2177_v48 = vld [vmem:[#allocation2 + $0x1e0] sm:$0xff] }
 0x257   : > { %3825 = vst.msk [vmem:[%s6193_s8 + $0xa0] sm:$0xf] %vm3784_vm12, %v4563_v22  ;;  %v3373_v58 = vld [vmem:[#allocation2 + $0x160] sm:$0xff]  ;;  %v2653_v7 = vadd.f32 %v4814_v41, %v2175_v60  ;;  %v4873_v62 = vpop.f32.mrf.mxu0  ;;  %v2772_v10 = vld [vmem:[#allocation2 + $0x188] sm:$0xff] }
 0x258   : > { %2712 = vst.msk [vmem:[#allocation2 + $0x1a8] sm:$0xff] %vm2052_vm11, %v2648_v28  ;;  %v4564_v44 = vpack.c.bf16 %v3505_v54, %v3505_v54  ;;  %v3510_v6 = vmax.f32 %v3446_v53, 0.0  ;;  %v3444_v40 = vadd.f32 %v6380_v47, %v3373_v58  ;;  %3313 = vst.msk [vmem:[#allocation2 + $0x180] sm:$0xff] %vm2052_vm11, %v3249_v61  ;;  %v3252_v45 = vadd.f32 %v4873_v62, %v2774_v11  ;;  %v2564_v13 = vpop.f32.mrf.mxu1  ;;  %v2180_v54 = vld [vmem:[#allocation2 + $0x1f8] sm:$0xff] }
 0x259   : > { %3828 = vst.msk [vmem:[%s6193_s8 + $0xac] sm:$0xf] %vm3784_vm12, %v4566_v50  ;;  %v3376_v12 = vld [vmem:[#allocation2 + $0x178] sm:$0xff]  ;;  %v2651_v56 = vadd.f32 %v2564_v13, %v2173_v43  ;;  %v3141_v49 = vpop.f32.mrf.mxu0  ;;  %v2777_v27 = vld [vmem:[#allocation2 + $0x1b0] sm:$0xff] }
 0x25a   : > { %2717 = vst.msk [vmem:[#allocation2 + $0x1d0] sm:$0xff] %vm2052_vm11, %v2653_v7  ;;  %v4569_v9 = vpack.c.bf16 %v3510_v6, %v3510_v6  ;;  %v3508_v18 = vmax.f32 %v3444_v40, 0.0  ;;  %v3447_v15 = vadd.f32 %v6380_v47, %v3376_v12  ;;  %3316 = vst.msk [vmem:[#allocation2 + $0x198] sm:$0xff] %vm2052_vm11, %v3252_v45  ;;  %v3250_v20 = vadd.f32 %v3141_v49, %v2772_v10  ;;  %v4815_v33 = vpop.f32.mrf.mxu1  ;;  %v2178_v6 = vld [vmem:[#allocation2 + $0x1e8] sm:$0xff] }
 0x25b   : > { %3826 = vst.msk [vmem:[%s6193_s8 + $0xa4] sm:$0xf] %vm3784_vm12, %v4564_v44  ;;  %v3374_v57 = vld [vmem:[#allocation2 + $0x168] sm:$0xff]  ;;  %v2654_v24 = vadd.f32 %v4815_v33, %v2176_v17  ;;  %v4876_v25 = vpop.f32.mrf.mxu0  ;;  %v2775_v3 = vld [vmem:[#allocation2 + $0x1a0] sm:$0xff] }
 0x25c   : > { %2715 = vst.msk [vmem:[#allocation2 + $0x1c0] sm:$0xff] %vm2052_vm11, %v2651_v56  ;;  %v4567_v35 = vpack.c.bf16 %v3508_v18, %v3508_v18  ;;  %v3511_v26 = vmax.f32 %v3447_v15, 0.0  ;;  %v3445_v38 = vadd.f32 %v6380_v47, %v3374_v57  ;;  %3314 = vst.msk [vmem:[#allocation2 + $0x188] sm:$0xff] %vm2052_vm11, %v3250_v20  ;;  %v3255_v36 = vadd.f32 %v4876_v25, %v2777_v27  ;;  %v2567_v52 = vpop.f32.mrf.mxu1 }
 0x25d   : > { %3831 = vst.msk [vmem:[%s6193_s8 + $0xb8] sm:$0xf] %vm3784_vm12, %v4569_v9  ;;  %v3379_v14 = vld [vmem:[#allocation2 + $0x190] sm:$0xff]  ;;  %v2652_v8 = vadd.f32 %v2567_v52, %v2174_v0  ;;  %v3154_v46 = vpop.f32.mrf.mxu0  ;;  %v2778_v34 = vld [vmem:[#allocation2 + $0x1b8] sm:$0xff] }
 0x25e   : > { %2718 = vst.msk [vmem:[#allocation2 + $0x1d8] sm:$0xff] %vm2052_vm11, %v2654_v24  ;;  %v4570_v30 = vpack.c.bf16 %v3511_v26, %v3511_v26  ;;  %v3509_v32 = vmax.f32 %v3445_v38, 0.0  ;;  %v3450_v29 = vadd.f32 %v6380_v47, %v3379_v14  ;;  %3319 = vst.msk [vmem:[#allocation2 + $0x1b0] sm:$0xff] %vm2052_vm11, %v3255_v36  ;;  %v3253_v21 = vadd.f32 %v3154_v46, %v2775_v3  ;;  %v4818_v42 = vpop.f32.mrf.mxu1 }
 0x25f   : > { %3829 = vst.msk [vmem:[%s6193_s8 + $0xb0] sm:$0xf] %vm3784_vm12, %v4567_v35  ;;  %v3377_v31 = vld [vmem:[#allocation2 + $0x180] sm:$0xff]  ;;  %v2657_v16 = vadd.f32 %v4818_v42, %v2179_v63  ;;  %v4877_v39 = vpop.f32.mrf.mxu0  ;;  %v2776_v2 = vld [vmem:[#allocation2 + $0x1a8] sm:$0xff] }
 0x260   : > { %2716 = vst.msk [vmem:[#allocation2 + $0x1c8] sm:$0xff] %vm2052_vm11, %v2652_v8  ;;  %v4568_v37 = vpack.c.bf16 %v3509_v32, %v3509_v32  ;;  %v3514_v5 = vmax.f32 %v3450_v29, 0.0  ;;  %v3448_v19 = vadd.f32 %v6380_v47, %v3377_v31  ;;  %3317 = vst.msk [vmem:[#allocation2 + $0x1a0] sm:$0xff] %vm2052_vm11, %v3253_v21  ;;  %v3256_v22 = vadd.f32 %v4877_v39, %v2778_v34  ;;  %v2580_v4 = vpop.f32.mrf.mxu1 }
 0x261   : > { %3832 = vst.msk [vmem:[%s6193_s8 + $0xbc] sm:$0xf] %vm3784_vm12, %v4570_v30  ;;  %v3380_v51 = vld [vmem:[#allocation2 + $0x198] sm:$0xff]  ;;  %v2655_v1 = vadd.f32 %v2580_v4, %v2177_v48  ;;  %v3157_v59 = vpop.f32.mrf.mxu0  ;;  %v2781_v41 = vld [vmem:[#allocation2 + $0x1d0] sm:$0xff] }
 0x262   : > { %2721 = vst.msk [vmem:[#allocation2 + $0x1f0] sm:$0xff] %vm2052_vm11, %v2657_v16  ;;  %v4573_v28 = vpack.c.bf16 %v3514_v5, %v3514_v5  ;;  %v3512_v23 = vmax.f32 %v3448_v19, 0.0  ;;  %v3451_v55 = vadd.f32 %v6380_v47, %v3380_v51  ;;  %3320 = vst.msk [vmem:[#allocation2 + $0x1b8] sm:$0xff] %vm2052_vm11, %v3256_v22  ;;  %v3254_v50 = vadd.f32 %v3157_v59, %v2776_v2  ;;  %v4819_v53 = vpop.f32.mrf.mxu1 }
 0x263   : > { %3830 = vst.msk [vmem:[%s6193_s8 + $0xb4] sm:$0xf] %vm3784_vm12, %v4568_v37  ;;  %v3378_v61 = vld [vmem:[#allocation2 + $0x188] sm:$0xff]  ;;  %v2658_v60 = vadd.f32 %v4819_v53, %v2180_v54  ;;  %v4880_v58 = vpop.f32.mrf.mxu0  ;;  %v2779_v13 = vld [vmem:[#allocation2 + $0x1c0] sm:$0xff] }
 0x264   : > { %2719 = vst.msk [vmem:[#allocation2 + $0x1e0] sm:$0xff] %vm2052_vm11, %v2655_v1  ;;  %v4571_v7 = vpack.c.bf16 %v3512_v23, %v3512_v23  ;;  %v3515_v11 = vmax.f32 %v3451_v55, 0.0  ;;  %v3449_v62 = vadd.f32 %v6380_v47, %v3378_v61  ;;  %3318 = vst.msk [vmem:[#allocation2 + $0x1a8] sm:$0xff] %vm2052_vm11, %v3254_v50  ;;  %v3259_v44 = vadd.f32 %v4880_v58, %v2781_v41  ;;  %v2583_v40 = vpop.f32.mrf.mxu1 }
 0x265   : > { %3835 = vst.msk [vmem:[%s6193_s8 + $0xc8] sm:$0xf] %vm3784_vm12, %v4573_v28  ;;  %v3383_v45 = vld [vmem:[#allocation2 + $0x1b0] sm:$0xff]  ;;  %v2656_v43 = vadd.f32 %v2583_v40, %v2178_v6  ;;  %v3170_v12 = vpop.f32.mrf.mxu0  ;;  %v2782_v15 = vld [vmem:[#allocation2 + $0x1d8] sm:$0xff] }
 0x266   : > { %2722 = vst.msk [vmem:[#allocation2 + $0x1f8] sm:$0xff] %vm2052_vm11, %v2658_v60  ;;  %v4574_v56 = vpack.c.bf16 %v3515_v11, %v3515_v11  ;;  %v3513_v10 = vmax.f32 %v3449_v62, 0.0  ;;  %v3454_v49 = vadd.f32 %v6380_v47, %v3383_v45  ;;  %3323 = vst.msk [vmem:[#allocation2 + $0x1d0] sm:$0xff] %vm2052_vm11, %v3259_v44  ;;  %v3257_v9 = vadd.f32 %v3170_v12, %v2779_v13 }
 0x267   : > { %3833 = vst.msk [vmem:[%s6193_s8 + $0xc0] sm:$0xf] %vm3784_vm12, %v4571_v7  ;;  %v3381_v18 = vld [vmem:[#allocation2 + $0x1a0] sm:$0xff]  ;;  %v4881_v20 = vpop.f32.mrf.mxu0  ;;  %v2780_v25 = vld [vmem:[#allocation2 + $0x1c8] sm:$0xff] }
 0x268   : > { %2720 = vst.msk [vmem:[#allocation2 + $0x1e8] sm:$0xff] %vm2052_vm11, %v2656_v43  ;;  %v4572_v17 = vpack.c.bf16 %v3513_v10, %v3513_v10  ;;  %v3518_v33 = vmax.f32 %v3454_v49, 0.0  ;;  %v3452_v57 = vadd.f32 %v6380_v47, %v3381_v18  ;;  %3321 = vst.msk [vmem:[#allocation2 + $0x1c0] sm:$0xff] %vm2052_vm11, %v3257_v9  ;;  %v3260_v24 = vadd.f32 %v4881_v20, %v2782_v15  ;;  %v3881_v20 = vld [vmem:[%s6193_s8 + $0x8] sm:$0xff] (%p5087_p6)  }
 0x269   : > { %3836 = vst.msk [vmem:[%s6193_s8 + $0xcc] sm:$0xf] %vm3784_vm12, %v4574_v56  ;;  %v3384_v27 = vld [vmem:[#allocation2 + $0x1b8] sm:$0xff]  ;;  %v3173_v35 = vpop.f32.mrf.mxu0  ;;  %v2785_v14 = vld [vmem:[#allocation2 + $0x1f0] sm:$0xff]  ;;  %3882 = vst [vmem:[%s6505_s13 + $0x8] sm:$0xff] (%p5087_p6), %v3881_v20  }
 0x26a   : > { %3834 = vst.msk [vmem:[%s6193_s8 + $0xc4] sm:$0xf] %vm3784_vm12, %v4572_v17  ;;  %v4577_v26 = vpack.c.bf16 %v3518_v33, %v3518_v33  ;;  %v3516_v38 = vmax.f32 %v3452_v57, 0.0  ;;  %v3455_v36 = vadd.f32 %v6380_v47, %v3384_v27  ;;  %v3258_v0 = vadd.f32 %v3173_v35, %v2780_v25  ;;  %v3885_v17 = vld [vmem:[%s6193_s8 + $0x10] sm:$0xff] (%p5087_p6)   ;;  %v3889_v33 = vld [vmem:[%s6193_s8 + $0x18] sm:$0xff] (%p5087_p6)   ;;  %v3893_v57 = vld [vmem:[%s6193_s8 + $0x20] sm:$0xff] (%p5087_p6)  }
 0x26b   : > { %3324 = vst.msk [vmem:[#allocation2 + $0x1d8] sm:$0xff] %vm2052_vm11, %v3260_v24  ;;  %v3382_v52 = vld [vmem:[#allocation2 + $0x1a8] sm:$0xff]  ;;  %v4884_v8 = vpop.f32.mrf.mxu0  ;;  %v2783_v21 = vld [vmem:[#allocation2 + $0x1e0] sm:$0xff]  ;;  %3886 = vst [vmem:[%s6505_s13 + $0x10] sm:$0xff] (%p5087_p6), %v3885_v17  }
 0x26c   : > { %3839 = vst.msk [vmem:[%s6193_s8 + $0xd8] sm:$0xf] %vm3784_vm12, %v4577_v26  ;;  %v4575_v3 = vpack.c.bf16 %v3516_v38, %v3516_v38  ;;  %v3519_v46 = vmax.f32 %v3455_v36, 0.0  ;;  %v3453_v30 = vadd.f32 %v6380_v47, %v3382_v52  ;;  %v3263_v32 = vadd.f32 %v4884_v8, %v2785_v14  ;;  %v3897_v24 = vld [vmem:[%s6193_s8 + $0x28] sm:$0xff] (%p5087_p6)   ;;  %3890 = vst [vmem:[%s6505_s13 + $0x18] sm:$0xff] (%p5087_p6), %v3889_v33   ;;  %v3901_v27 = vld [vmem:[%s6193_s8 + $0x30] sm:$0xff] (%p5087_p6)  }
 0x26d   : > { %3322 = vst.msk [vmem:[#allocation2 + $0x1c8] sm:$0xff] %vm2052_vm11, %v3258_v0  ;;  %v3387_v29 = vld [vmem:[#allocation2 + $0x1d0] sm:$0xff]  ;;  %v3186_v63 = vpop.f32.mrf.mxu0  ;;  %v2786_v37 = vld [vmem:[#allocation2 + $0x1f8] sm:$0xff]  ;;  %3894 = vst [vmem:[%s6505_s13 + $0x20] sm:$0xff] (%p5087_p6), %v3893_v57  }
 0x26e   : > { %3837 = vst.msk [vmem:[%s6193_s8 + $0xd0] sm:$0xf] %vm3784_vm12, %v4575_v3  ;;  %v4578_v42 = vpack.c.bf16 %v3519_v46, %v3519_v46  ;;  %v3517_v31 = vmax.f32 %v3453_v30, 0.0  ;;  %v3458_v16 = vadd.f32 %v6380_v47, %v3387_v29  ;;  %v3261_v34 = vadd.f32 %v3186_v63, %v2783_v21  ;;  %3898 = vst [vmem:[%s6505_s13 + $0x28] sm:$0xff] (%p5087_p6), %v3897_v24   ;;  %v3905_v25 = vld [vmem:[%s6193_s8 + $0x38] sm:$0xff] (%p5087_p6)   ;;  %v3909_v35 = vld [vmem:[%s6193_s8 + $0x40] sm:$0xff] (%p5087_p6)  }
 0x26f   : > { %3327 = vst.msk [vmem:[#allocation2 + $0x1f0] sm:$0xff] %vm2052_vm11, %v3263_v32  ;;  %v3385_v39 = vld [vmem:[#allocation2 + $0x1c0] sm:$0xff]  ;;  %v4885_v5 = vpop.f32.mrf.mxu0  ;;  %v2784_v1 = vld [vmem:[#allocation2 + $0x1e8] sm:$0xff]  ;;  %3902 = vst [vmem:[%s6505_s13 + $0x30] sm:$0xff] (%p5087_p6), %v3901_v27  }
 0x270   : > { %3840 = vst.msk [vmem:[%s6193_s8 + $0xdc] sm:$0xf] %vm3784_vm12, %v4578_v42  ;;  %v4576_v19 = vpack.c.bf16 %v3517_v31, %v3517_v31  ;;  %v3522_v22 = vmax.f32 %v3458_v16, 0.0  ;;  %v3456_v48 = vadd.f32 %v6380_v47, %v3385_v39  ;;  %v3264_v4 = vadd.f32 %v4885_v5, %v2786_v37  ;;  %3906 = vst [vmem:[%s6505_s13 + $0x38] sm:$0xff] (%p5087_p6), %v3905_v25   ;;  %v3913_v26 = vld [vmem:[%s6193_s8 + $0x48] sm:$0xff] (%p5087_p6)   ;;  %v3917_v38 = vld [vmem:[%s6193_s8 + $0x50] sm:$0xff] (%p5087_p6)  }
 0x271   : > { %3325 = vst.msk [vmem:[#allocation2 + $0x1e0] sm:$0xff] %vm2052_vm11, %v3261_v34  ;;  %v3189_v2 = vpop.f32.mrf.mxu0  ;;  %3910 = vst [vmem:[%s6505_s13 + $0x40] sm:$0xff] (%p5087_p6), %v3909_v35   ;;  %v3921_v36 = vld [vmem:[%s6193_s8 + $0x58] sm:$0xff] (%p5087_p6)   ;;  %v3925_v0 = vld [vmem:[%s6193_s8 + $0x60] sm:$0xff] (%p5087_p6)  }
 0x272   : > { %v3388_v51 = vld [vmem:[#allocation2 + $0x1d8] sm:$0xff]  ;;  %3838 = vst.msk [vmem:[%s6193_s8 + $0xd4] sm:$0xf] %vm3784_vm12, %v4576_v19  ;;  %v4581_v59 = vpack.c.bf16 %v3522_v22, %v3522_v22  ;;  %v3520_v28 = vmax.f32 %v3456_v48, 0.0  ;;  %v3262_v55 = vadd.f32 %v3189_v2, %v2784_v1  ;;  %3914 = vst [vmem:[%s6505_s13 + $0x48] sm:$0xff] (%p5087_p6), %v3913_v26   ;;  %v3929_v52 = vld [vmem:[%s6193_s8 + $0x68] sm:$0xff] (%p5087_p6)  }
 0x273   : > { %v3459_v23 = vadd.f32 %v6380_v47, %v3388_v51  ;;  %3328 = vst.msk [vmem:[#allocation2 + $0x1f8] sm:$0xff] %vm2052_vm11, %v3264_v4  ;;  %3918 = vst [vmem:[%s6505_s13 + $0x50] sm:$0xff] (%p5087_p6), %v3917_v38   ;;  %v3933_v14 = vld [vmem:[%s6193_s8 + $0x70] sm:$0xff] (%p5087_p6)   ;;  %v3937_v8 = vld [vmem:[%s6193_s8 + $0x78] sm:$0xff] (%p5087_p6)  }
 0x274   : > { %v3386_v50 = vld [vmem:[#allocation2 + $0x1c8] sm:$0xff]  ;;  %3843 = vst.msk [vmem:[%s6193_s8 + $0xe8] sm:$0xf] %vm3784_vm12, %v4581_v59  ;;  %v4579_v54 = vpack.c.bf16 %v3520_v28, %v3520_v28  ;;  %3922 = vst [vmem:[%s6505_s13 + $0x58] sm:$0xff] (%p5087_p6), %v3921_v36   ;;  %v3941_v3 = vld [vmem:[%s6193_s8 + $0x80] sm:$0xff] (%p5087_p6)  }
 0x275   : > { %v3523_v53 = vmax.f32 %v3459_v23, 0.0  ;;  %v3457_v61 = vadd.f32 %v6380_v47, %v3386_v50  ;;  %3326 = vst.msk [vmem:[#allocation2 + $0x1e8] sm:$0xff] %vm2052_vm11, %v3262_v55  ;;  %3926 = vst [vmem:[%s6505_s13 + $0x60] sm:$0xff] (%p5087_p6), %v3925_v0   ;;  %v3945_v46 = vld [vmem:[%s6193_s8 + $0x88] sm:$0xff] (%p5087_p6)   ;;  %v3949_v30 = vld [vmem:[%s6193_s8 + $0x90] sm:$0xff] (%p5087_p6)  }
 0x276   : > { %v3391_v60 = vld [vmem:[#allocation2 + $0x1f0] sm:$0xff]  ;;  %3841 = vst.msk [vmem:[%s6193_s8 + $0xe0] sm:$0xf] %vm3784_vm12, %v4579_v54  ;;  %3930 = vst [vmem:[%s6505_s13 + $0x68] sm:$0xff] (%p5087_p6), %v3929_v52   ;;  %v3953_v32 = vld [vmem:[%s6193_s8 + $0x98] sm:$0xff] (%p5087_p6)  }
 0x277   : > { %v4582_v41 = vpack.c.bf16 %v3523_v53, %v3523_v53  ;;  %v3521_v58 = vmax.f32 %v3457_v61, 0.0  ;;  %v3462_v7 = vadd.f32 %v6380_v47, %v3391_v60  ;;  %3934 = vst [vmem:[%s6505_s13 + $0x70] sm:$0xff] (%p5087_p6), %v3933_v14   ;;  %3938 = vst [vmem:[%s6505_s13 + $0x78] sm:$0xff] (%p5087_p6), %v3937_v8   ;;  %v3957_v29 = vld [vmem:[%s6193_s8 + $0xa0] sm:$0xff] (%p5087_p6)   ;;  %v3961_v21 = vld [vmem:[%s6193_s8 + $0xa8] sm:$0xff] (%p5087_p6)  }
 0x278   : > { %v3389_v11 = vld [vmem:[#allocation2 + $0x1e0] sm:$0xff]  ;;  %3942 = vst [vmem:[%s6505_s13 + $0x200] sm:$0xff] (%p5087_p6), %v3941_v3   ;;  %3946 = vst [vmem:[%s6505_s13 + $0x208] sm:$0xff] (%p5087_p6), %v3945_v46   ;;  %v3965_v63 = vld [vmem:[%s6193_s8 + $0xb0] sm:$0xff] (%p5087_p6)  }
 0x279   : > { %3844 = vst.msk [vmem:[%s6193_s8 + $0xec] sm:$0xf] %vm3784_vm12, %v4582_v41  ;;  %v4580_v62 = vpack.c.bf16 %v3521_v58, %v3521_v58  ;;  %v3526_v44 = vmax.f32 %v3462_v7, 0.0  ;;  %v3460_v6 = vadd.f32 %v6380_v47, %v3389_v11  ;;  %3950 = vst [vmem:[%s6505_s13 + $0x210] sm:$0xff] (%p5087_p6), %v3949_v30   ;;  %v3969_v42 = vld [vmem:[%s6193_s8 + $0xb8] sm:$0xff] (%p5087_p6)   ;;  %v3973_v31 = vld [vmem:[%s6193_s8 + $0xc0] sm:$0xff] (%p5087_p6)  }
 0x27a   : > { %v3392_v40 = vld [vmem:[#allocation2 + $0x1f8] sm:$0xff]  ;;  %3954 = vst [vmem:[%s6505_s13 + $0x218] sm:$0xff] (%p5087_p6), %v3953_v32   ;;  %3958 = vst [vmem:[%s6505_s13 + $0x220] sm:$0xff] (%p5087_p6), %v3957_v29   ;;  %v3977_v16 = vld [vmem:[%s6193_s8 + $0xc8] sm:$0xff] (%p5087_p6)  }
 0x27b   : > { %3842 = vst.msk [vmem:[%s6193_s8 + $0xe4] sm:$0xf] %vm3784_vm12, %v4580_v62  ;;  %v4585_v45 = vpack.c.bf16 %v3526_v44, %v3526_v44  ;;  %v3524_v43 = vmax.f32 %v3460_v6, 0.0  ;;  %v3463_v13 = vadd.f32 %v6380_v47, %v3392_v40  ;;  %3962 = vst [vmem:[%s6505_s13 + $0x228] sm:$0xff] (%p5087_p6), %v3961_v21   ;;  %v3981_v34 = vld [vmem:[%s6193_s8 + $0xd0] sm:$0xff] (%p5087_p6)   ;;  %v3985_v39 = vld [vmem:[%s6193_s8 + $0xd8] sm:$0xff] (%p5087_p6)  }
 0x27c   : > { %v3390_v12 = vld [vmem:[#allocation2 + $0x1e8] sm:$0xff]  ;;  %3966 = vst [vmem:[%s6505_s13 + $0x230] sm:$0xff] (%p5087_p6), %v3965_v63   ;;  %3970 = vst [vmem:[%s6505_s13 + $0x238] sm:$0xff] (%p5087_p6), %v3969_v42  }
 0x27d   : > { %3847 = vst.msk [vmem:[%s6193_s8 + $0xf8] sm:$0xf] %vm3784_vm12, %v4585_v45  ;;  %v4583_v56 = vpack.c.bf16 %v3524_v43, %v3524_v43  ;;  %v3527_v10 = vmax.f32 %v3463_v13, 0.0  ;;  %v3461_v49 = vadd.f32 %v6380_v47, %v3390_v12  ;;  %v3877_v47 = vld [vmem:[%s6193_s8] sm:$0xff] (%p5087_p6)   ;;  %3974 = vst [vmem:[%s6505_s13 + $0x240] sm:$0xff] (%p5087_p6), %v3973_v31  }
 0x27e   : > { %3878 = vst [vmem:[%s6505_s13] sm:$0xff] (%p5087_p6), %v3877_v47   ;;  %3978 = vst [vmem:[%s6505_s13 + $0x248] sm:$0xff] (%p5087_p6), %v3977_v16  }
 0x27f   : > { %3845 = vst.msk [vmem:[%s6193_s8 + $0xf0] sm:$0xf] %vm3784_vm12, %v4583_v56  ;;  %v4586_v9 = vpack.c.bf16 %v3527_v10, %v3527_v10  ;;  %v3525_v18 = vmax.f32 %v3461_v49, 0.0  ;;  %3855 = sbr.rel (!%p5087_p6) target bundleno = 652 (0x28c), region = 167  ;;  %3982 = vst [vmem:[%s6505_s13 + $0x250] sm:$0xff] (%p5087_p6), %v3981_v34  }
 0x280   : > { %v3993_v5 = vld [vmem:[%s6193_s8 + $0xe8] sm:$0xff] (%p5087_p6)   ;;  %3986 = vst [vmem:[%s6505_s13 + $0x258] sm:$0xff] (%p5087_p6), %v3985_v39  }
 0x281   : > { %3848 = vst.msk [vmem:[%s6193_s8 + $0xfc] sm:$0xf] %vm3784_vm12, %v4586_v9  ;;  %v4584_v15 = vpack.c.bf16 %v3525_v18, %v3525_v18  ;;  %3994 = vst [vmem:[%s6505_s13 + $0x268] sm:$0xff] (%p5087_p6), %v3993_v5  }
 0x282   : > { %v3989_v37 = vld [vmem:[%s6193_s8 + $0xe0] sm:$0xff] (%p5087_p6)  }
 0x283   : > { %3846 = vst.msk [vmem:[%s6193_s8 + $0xf4] sm:$0xf] %vm3784_vm12, %v4584_v15  ;;  %3990 = vst [vmem:[%s6505_s13 + $0x260] sm:$0xff] (%p5087_p6), %v3989_v37  }
 0x288   : > { %v4001_v22 = vld [vmem:[%s6193_s8 + $0xf8] sm:$0xff]  }
 0x289   : > { %4002 = vst [vmem:[%s6505_s13 + $0x278] sm:$0xff] %v4001_v22  }
 0x28a   : > { %v3997_v19 = vld [vmem:[%s6193_s8 + $0xf0] sm:$0xff]  }
 0x28b   : > { %3998 = vst [vmem:[%s6505_s13 + $0x270] sm:$0xff] %v3997_v19  }
 0x28c PF: > { %s15_s22 = sadd.s32 1, %s5013_s22   ;;  %s6601_s18 = smov %s5001_s19 }
 0x28d   : > { %p12_p11 = scmp.ge.s32.totalorder %s15_s22, 6   ;;  %s6602_s19 = smov %s5092_s29 }
 0x28e   : > { %s6603_s20 = smov %s5009_s21  ;;  %s6604_s21 = smov %s6606_s23 }
 0x28f   :  { %14 = sbr.rel (!%p12_p11) target bundleno = 3 (0x3), region = 263 }

</bundles_post_ra>
